<compile_context>
chip_gen: v6e
topology: v6e:2x2x1
jax: 0.10.0
libtpu: 0.0.40
codegen_flags: <defaults>
</compile_context>

<pallas_src>
from typing import NamedTuple

import numpy as np
import jax
import jax.numpy as jnp
from jax.experimental import pallas as pl
from jax.experimental.pallas import tpu as pltpu


# ---------------------------------------------------------------------------
# Globals / helpers
# ---------------------------------------------------------------------------
def _ceil_to(x, m):
    return ((x + m - 1) // m) * m


def _vmem_limit_bytes():
    # v5e/v6e: 128 MiB physical -> ~96 MiB budget; v7x: 64 MiB -> ~48 MiB.
    try:
        cap = int(pltpu.get_tpu_info().vmem_capacity_bytes)
    except Exception:
        cap = 64 * 1024 * 1024
    return int(min(cap * 3 // 4, 100 * 1024 * 1024))


_VMEM_LIMIT = _vmem_limit_bytes()
_LEAD = 8                       # aligned zero lead-in rows of the padded layout
_ACT_DTYPE = jnp.bfloat16       # inter-kernel activation dtype


def _elu(x):
    # ELU(alpha=1); clamp the exp arg so the unselected branch can't overflow.
    return jnp.where(x > 0, x, jnp.exp(jnp.minimum(x, 0.0)) - 1.0)


def _pick_tile(n, unit=128, max_tile=512):
    """Largest divisor of n that is a multiple of `unit` and <= max_tile; else n."""
    best = n
    t = unit
    while t <= min(n, max_tile):
        if n % t == 0:
            best = t
        t += unit
    return best


# ---------------------------------------------------------------------------
# Padded row-flat activation layout (shared by producer and consumer kernels)
# ---------------------------------------------------------------------------
class PadAct(NamedTuple):
    """Activation in the padded row-flattened layout.

    flat[b*Lin + _LEAD + (h+1)*Wp + w, c] = image[b, h, w, c].
    All other rows (top/bottom halo row blocks, pad columns w in [W, Wp),
    lead/tail rows) are exactly zero, so a zero-padded 'same' 3x3 conv tap is
    a static row-offset slice of the per-image block.
    """
    flat: jax.Array
    B: int
    H: int
    W: int
    C: int


def _geom(H, W):
    Wp = _ceil_to(W + 2, 8)             # row stride, sublane aligned
    Lout = H * Wp                       # rows computed per image (multiple of 8)
    Lin = _LEAD + (H + 2) * Wp + 8      # rows stored per image (lead + img + tail)
    return Wp, Lin, Lout


def nhwc_to_pad(x_nhwc, dtype=_ACT_DTYPE):
    B, H, W, C = x_nhwc.shape
    Wp, Lin, _ = _geom(H, W)
    xp = jnp.pad(x_nhwc.astype(dtype), ((0, 0), (1, 1), (0, Wp - W), (0, 0)))
    flat = xp.reshape(B, (H + 2) * Wp, C)
    flat = jnp.pad(flat, ((0, 0), (_LEAD, Lin - _LEAD - (H + 2) * Wp), (0, 0)))
    return PadAct(flat.reshape(B * Lin, C), B, H, W, C)


def pad_to_nhwc(a: PadAct):
    Wp, Lin, _ = _geom(a.H, a.W)
    x = a.flat.reshape(a.B, Lin, a.C)[:, _LEAD:_LEAD + (a.H + 2) * Wp, :]
    x = x.reshape(a.B, a.H + 2, Wp, a.C)
    return x[:, 1:a.H + 1, :a.W, :]


# ---------------------------------------------------------------------------
# Fused 3x3 conv kernel (pre-ELU + bias + 1x1 shortcut + residual add), one
# fat MXU matmul, output written back into the padded layout.
# ---------------------------------------------------------------------------
def _make_conv_kernel(Wp, Lin, Lout, apply_elu, has_bias, has_shortcut, out_dtype):
    offsets = [_LEAD - 1 + dh * Wp + dw for dh in range(3) for dw in range(3)]
    o_start = _LEAD + Wp                 # aligned interior start of the output

    def kernel(*refs):
        it = iter(refs)
        x_ref = next(it)                 # (Lin, Cin)   padded layout, bf16
        w_ref = next(it)                 # (K,  TCO)    bf16, K = 9*Cin [+ Cs]
        m_ref = next(it)                 # (Lout, 1)    f32 interior-column mask
        b_ref = next(it) if has_bias else None        # (1, TCO) f32
        xs_ref = next(it) if has_shortcut else None   # (Lin, Cs) padded layout
        o_ref = next(it)                 # (Lin, TCO)   padded layout out

        x = x_ref[...]
        if apply_elu:
            x = _elu(x.astype(jnp.float32))
        x = x.astype(jnp.bfloat16)       # single cast before the tap slices

        # Tap-concatenated lhs built entirely in VMEM (never touches HBM):
        pieces = [x[off:off + Lout, :] for off in offsets]
        if has_shortcut:                 # 1x1 shortcut = aligned center tap of xs
            pieces.append(xs_ref[o_start:o_start + Lout, :].astype(jnp.bfloat16))
        xcat = jnp.concatenate(pieces, axis=-1)        # (Lout, K)

        acc = jnp.dot(xcat, w_ref[...], preferred_element_type=jnp.float32)
        if has_bias:
            acc = acc + b_ref[...]
        # zero the pad columns (w >= W) so the consumer's taps stay correct
        res = (acc * m_ref[...]).astype(out_dtype)

        n = res.shape[-1]
        zeros = jnp.zeros((o_start, n), out_dtype)     # o_start == Wp + 8
        o_ref[0:o_start, :] = zeros                    # lead + top halo rows
        o_ref[o_start + Lout:Lin, :] = zeros           # bottom halo + tail rows
        o_ref[o_start:o_start + Lout, :] = res         # aligned interior store

    return kernel


def conv3x3(a: PadAct, w, b=None, *, apply_elu=False, shortcut=None,
            out_dtype=_ACT_DTYPE) -> PadAct:
    """'same' 3x3 conv on a PadAct, fused pre-ELU / bias / 1x1 shortcut + add.

    a: PadAct (B,H,W,Cin);  w: (3,3,Cin,Cout);  b: (Cout,) or None;
    shortcut: None | (xs: PadAct with (B,H,W,Cs), ws: (1,1,Cs,Cout)).
    Returns a PadAct holding conv(ELU?(a)) [+ b] [+ conv1x1(xs)].
    """
    B, H, W, Cin = a.B, a.H, a.W, a.C
    Wp, Lin, Lout = _geom(H, W)
    Cout = w.shape[-1]
    has_bias = b is not None
    has_sc = shortcut is not None

    # Pre-concatenated bf16 weight matrix: rows = 9 taps (dh,dw) * Cin [+ Cs].
    wc = w.reshape(9 * Cin, Cout)
    if has_sc:
        xs, ws = shortcut
        Cs = xs.C
        wc = jnp.concatenate([wc, ws.reshape(Cs, Cout)], axis=0)
    wc = wc.astype(jnp.bfloat16)
    K = 9 * Cin + (Cs if has_sc else 0)

    # Interior-column mask (static constant, tiny, resident in VMEM).
    col = np.arange(Lout) % Wp
    mask = (col < W).astype(np.float32).reshape(Lout, 1)

    TCO = _pick_tile(Cout)
    inputs = [a.flat, wc, jnp.asarray(mask)]
    in_specs = [pl.BlockSpec((Lin, Cin), lambda bi, j: (bi, 0)),
                pl.BlockSpec((K, TCO), lambda bi, j: (0, j)),     # resident
                pl.BlockSpec((Lout, 1), lambda bi, j: (0, 0))]    # resident
    if has_bias:
        inputs.append(b.reshape(1, Cout).astype(jnp.float32))
        in_specs.append(pl.BlockSpec((1, TCO), lambda bi, j: (0, j)))
    if has_sc:
        inputs.append(xs.flat)
        in_specs.append(pl.BlockSpec((Lin, Cs), lambda bi, j: (bi, 0)))

    out_flat = pl.pallas_call(
        _make_conv_kernel(Wp, Lin, Lout, apply_elu, has_bias, has_sc, out_dtype),
        out_shape=jax.ShapeDtypeStruct((B * Lin, Cout), out_dtype),
        grid=(B, Cout // TCO),
        in_specs=in_specs,
        out_specs=pl.BlockSpec((Lin, TCO), lambda bi, j: (bi, j)),
        compiler_params=pltpu.CompilerParams(
            dimension_semantics=("parallel", "parallel"),
            vmem_limit_bytes=_VMEM_LIMIT),
    )(*inputs)
    return PadAct(out_flat, B, H, W, Cout)


# ---------------------------------------------------------------------------
# Linear, tiled over the output-feature axis, bf16 NHWC-ordered output
# ---------------------------------------------------------------------------
def pallas_linear(x, w, b, out_dtype=_ACT_DTYPE):
    """x:(B,Fin) @ w:(Fin,Fout) + b:(Fout,), gridded over Fout tiles."""
    B, Fin = x.shape
    Fout = w.shape[1]
    TF = _pick_tile(Fout, max_tile=1024)

    def kernel(x_ref, w_ref, b_ref, o_ref):
        acc = jnp.dot(x_ref[...].astype(jnp.bfloat16), w_ref[...],
                      preferred_element_type=jnp.float32) + b_ref[...]
        o_ref[...] = acc.astype(o_ref.dtype)

    return pl.pallas_call(
        kernel,
        out_shape=jax.ShapeDtypeStruct((B, Fout), out_dtype),
        grid=(Fout // TF,),
        in_specs=[pl.BlockSpec((B, Fin), lambda j: (0, 0)),        # x resident
                  pl.BlockSpec((Fin, TF), lambda j: (0, j)),
                  pl.BlockSpec((1, TF), lambda j: (0, j))],
        out_specs=pl.BlockSpec((B, TF), lambda j: (0, j)),
        compiler_params=pltpu.CompilerParams(
            dimension_semantics=("parallel",),
            vmem_limit_bytes=_VMEM_LIMIT),
    )(x, w.astype(jnp.bfloat16), b.reshape(1, Fout).astype(jnp.float32))


# ---------------------------------------------------------------------------
# Model: residual blocks + forward
# ---------------------------------------------------------------------------
def upsample2x_nhwc(x):
    # nearest-neighbor x2.
    # TODO(synk): fuse the duplication into the producer store / consumer tap
    #   gather to avoid the XLA repeat + re-pad HBM round trip.
    return jnp.repeat(jnp.repeat(x, 2, axis=1), 2, axis=2)


def residual_block(a, p, resample):
    # conv1: ELU -> 3x3 Cin->Cin, no bias                        (pallas_call #1)
    h = conv3x3(a, p["w1"], None, apply_elu=True)
    # fused tail: conv2(ELU(h)) + b2 + conv1x1(a) + bs           (pallas_call #2)
    o = conv3x3(h, p["w2"], p["b2"] + p["bs"], apply_elu=True,
                shortcut=(a, p["ws"]))
    if resample == "up":
        # ConvUpsample = conv-then-nearest-x2, UpsampleConv(1x1) commutes with
        # nearest-x2 -> compute the whole residual sum at low resolution and
        # upsample the sum once.
        o = nhwc_to_pad(upsample2x_nhwc(pad_to_nhwc(o)))
    return o


def residual_net_up(params, x, channels, out_width, resamples):
    """x: (B, in_features) -> (B, out_channels, out_width, out_width) NCHW."""
    B = x.shape[0]
    hw0 = out_width // 8
    ch8 = 8 * channels
    hw = hw0 * hw0

    # Permute Linear columns NCHW->NHWC so the matmul output is directly NHWC
    # rows (PyTorch .view(B, 8c, hw0, hw0) is NCHW); deletes the XLA transpose.
    old = (np.arange(hw)[:, None] + hw * np.arange(ch8)[None, :]).reshape(-1)
    lin_w = params["lin_w"][:, old]
    lin_b = params["lin_b"][old]

    h = pallas_linear(x, lin_w, lin_b)                 # (B, hw*ch8) bf16, NHWC order
    a = nhwc_to_pad(h.reshape(B, hw0, hw0, ch8))

    for p, resample in zip(params["blocks"], resamples):
        a = residual_block(a, p, resample)

    # trailing ELU (fused) + final Conv2dHWInvariant(channels, out_channels, 3)
    y = conv3x3(a, params["final_w"], params["final_b"], apply_elu=True,
                out_dtype=jnp.float32)
    return pad_to_nhwc(y).transpose(0, 3, 1, 2)        # back to NCHW


# ---------------------------------------------------------------------------
# Parameter init
# ---------------------------------------------------------------------------
def _init_conv(key, K, cin, cout, bias=True):
    kw, kb = jax.random.split(key)
    scale = 1.0 / jnp.sqrt(jnp.float32(cin * K * K))
    w = scale * jax.random.normal(kw, (K, K, cin, cout), jnp.float32)
    b = scale * jax.random.normal(kb, (cout,), jnp.float32) if bias else None
    return w, b


def _init_residual_block(key, cin, cout):
    k1, k2, k3 = jax.random.split(key, 3)
    w1, _ = _init_conv(k1, 3, cin, cin, bias=False)    # conv1: bias=False
    w2, b2 = _init_conv(k2, 3, cin, cout, bias=True)   # conv2
    ws, bs = _init_conv(k3, 1, cin, cout, bias=True)   # conv_shortcut (1x1)
    return dict(w1=w1, w2=w2, b2=b2, ws=ws, bs=bs)


def init_residual_net_up(key, in_features, channels, out_channels, out_width, k):
    assert out_width % 8 == 0
    keys = iter(jax.random.split(key, 3 * k + 2))
    hw0 = out_width // 8
    fout = hw0 * hw0 * 8 * channels

    klw, klb = jax.random.split(next(keys))
    lscale = 1.0 / jnp.sqrt(jnp.float32(in_features))
    lin_w = lscale * jax.random.normal(klw, (in_features, fout), jnp.float32)
    lin_b = lscale * jax.random.normal(klb, (fout,), jnp.float32)

    blocks, resamples = [], []
    for i in [4, 2, 1]:
        for _ in range(k - 1):
            blocks.append(_init_residual_block(next(keys), 2 * i * channels,
                                               2 * i * channels))
            resamples.append("none")
        blocks.append(_init_residual_block(next(keys), 2 * i * channels,
                                           i * channels))
        resamples.append("up")

    final_w, final_b = _init_conv(next(keys), 3, channels, out_channels, bias=True)
    params = dict(lin_w=lin_w, lin_b=lin_b, blocks=blocks,
                  final_w=final_w, final_b=final_b)
    return params, resamples


# ---------------------------------------------------------------------------
if __name__ == "__main__":
    key = jax.random.PRNGKey(0)
    pkey, xkey = jax.random.split(key)

    # Small but representative config: k=2 -> both 'none' and 'up' blocks run.
    B, in_features, channels, out_channels, out_width, k = 2, 32, 4, 3, 16, 2

    params, resamples = init_residual_net_up(
        pkey, in_features, channels, out_channels, out_width, k)
    x = jax.random.normal(xkey, (B, in_features), jnp.float32)

    fwd = jax.jit(lambda p, xx: residual_net_up(p, xx, channels, out_width,
                                                resamples))
    out = jax.block_until_ready(fwd(params, x))

    assert out.shape == (B, out_channels, out_width, out_width), out.shape
    assert bool(jnp.all(jnp.isfinite(out)))
    print("KERNEL_OK")
</pallas_src>

<mosaic_0001>
module attributes {stable_mosaic.version = 11 : i64} {
  func.func @kernel(%arg0: i32, %arg1: memref<2x32xf32, #tpu.memory_space<vmem>>, %arg2: memref<32x128xbf16, #tpu.memory_space<vmem>>, %arg3: memref<1x128xf32, #tpu.memory_space<vmem>>, %arg4: memref<2x128xbf16, #tpu.memory_space<vmem>>) attributes {dimension_semantics = [#tpu.dimension_semantics<parallel>], iteration_bounds = array<i64: 1>, scalar_prefetch = 0 : i64, scratch_operands = 0 : i64, tpu.core_type = #tpu.core_type<tc>, window_params = [{pipeline_mode = #tpu.pipeline_mode<synchronous>, transform_indices = @transform_0, window_bounds = array<i64: 2, 32>}, {transform_indices = @transform_1, window_bounds = array<i64: 32, 128>}, {transform_indices = @transform_2, window_bounds = array<i64: 1, 128>}, {transform_indices = @transform_3, window_bounds = array<i64: 2, 128>}]} {
    %c0 = arith.constant 0 : index
    %c0_0 = arith.constant 0 : index
    %0 = vector.load %arg1[%c0, %c0_0] : memref<2x32xf32, #tpu.memory_space<vmem>>, vector<2x32xf32>
    %1 = arith.truncf %0 : vector<2x32xf32> to vector<2x32xbf16>
    %c0_1 = arith.constant 0 : index
    %c0_2 = arith.constant 0 : index
    %2 = vector.load %arg2[%c0_1, %c0_2] : memref<32x128xbf16, #tpu.memory_space<vmem>>, vector<32x128xbf16>
    %cst = arith.constant dense<0.000000e+00> : vector<2x128xf32>
    %3 = tpu.matmul %1, %2, %cst {dimension_numbers = #tpu.dot_dimension_numbers<[1], [0], [0], [1], [0, 0, 1, 1], [], []>} : vector<2x32xbf16>, vector<32x128xbf16>, vector<2x128xf32> -> vector<2x128xf32>
    %c0_3 = arith.constant 0 : index
    %c0_4 = arith.constant 0 : index
    %4 = vector.load %arg3[%c0_3, %c0_4] : memref<1x128xf32, #tpu.memory_space<vmem>>, vector<1x128xf32>
    %5 = vector.broadcast %4 : vector<1x128xf32> to vector<2x128xf32>
    %6 = arith.addf %3, %5 : vector<2x128xf32>
    %7 = arith.truncf %6 : vector<2x128xf32> to vector<2x128xbf16>
    %c0_5 = arith.constant 0 : index
    %c0_6 = arith.constant 0 : index
    %8 = vector.load %arg4[%c0_5, %c0_6] : memref<2x128xbf16, #tpu.memory_space<vmem>>, vector<2x128xbf16>
    tpu.vector_store %arg4[%c0_5, %c0_6], %7 {strides = array<i32>} : memref<2x128xbf16, #tpu.memory_space<vmem>>, vector<2x128xbf16>,
    return
  }
  func.func @transform_0(%arg0: i32) -> (i32, i32) {
    %c0_i32 = arith.constant 0 : i32
    %c0_i32_0 = arith.constant 0 : i32
    %c0_i32_1 = arith.constant 0 : i32
    return %c0_i32, %c0_i32_0 : i32, i32
  }
  func.func @transform_1(%arg0: i32) -> (i32, i32) {
    %c0_i32 = arith.constant 0 : i32
    %c0_i32_0 = arith.constant 0 : i32
    return %c0_i32, %arg0 : i32, i32
  }
  func.func @transform_2(%arg0: i32) -> (i32, i32) {
    %c0_i32 = arith.constant 0 : i32
    %c0_i32_0 = arith.constant 0 : i32
    return %c0_i32, %arg0 : i32, i32
  }
  func.func @transform_3(%arg0: i32) -> (i32, i32) {
    %c0_i32 = arith.constant 0 : i32
    %c0_i32_0 = arith.constant 0 : i32
    return %c0_i32, %arg0 : i32, i32
  }
}

module attributes {stable_mosaic.version = 11 : i64} {
  func.func @kernel(%arg0: i32, %arg1: i32, %arg2: memref<48x32xbf16, #tpu.memory_space<vmem>>, %arg3: memref<288x32xbf16, #tpu.memory_space<vmem>>, %arg4: memref<16x1xf32, #tpu.memory_space<vmem>>, %arg5: memref<48x32xbf16, #tpu.memory_space<vmem>>) attributes {dimension_semantics = [#tpu.dimension_semantics<parallel>, #tpu.dimension_semantics<parallel>], iteration_bounds = array<i64: 2, 1>, scalar_prefetch = 0 : i64, scratch_operands = 0 : i64, tpu.core_type = #tpu.core_type<tc>, window_params = [{transform_indices = @transform_0, window_bounds = array<i64: 48, 32>}, {transform_indices = @transform_1, window_bounds = array<i64: 288, 32>}, {pipeline_mode = #tpu.pipeline_mode<synchronous>, transform_indices = @transform_2, window_bounds = array<i64: 16, 1>}, {transform_indices = @transform_3, window_bounds = array<i64: 48, 32>}]} {
    %c0 = arith.constant 0 : index
    %c0_0 = arith.constant 0 : index
    %0 = vector.load %arg2[%c0, %c0_0] : memref<48x32xbf16, #tpu.memory_space<vmem>>, vector<48x32xbf16>
    %1 = arith.extf %0 : vector<48x32xbf16> to vector<48x32xf32>
    %cst = arith.constant 0.000000e+00 : f32
    %2 = vector.broadcast %cst : f32 to vector<48x32xf32>
    %3 = arith.cmpf ogt, %1, %2 : vector<48x32xf32>
    %cst_1 = arith.constant 0.000000e+00 : f32
    %4 = vector.broadcast %cst_1 : f32 to vector<48x32xf32>
    %5 = arith.minimumf %1, %4 : vector<48x32xf32>
    %6 = math.exp %5 : vector<48x32xf32>
    %cst_2 = arith.constant 1.000000e+00 : f32
    %7 = vector.broadcast %cst_2 : f32 to vector<48x32xf32>
    %8 = arith.subf %6, %7 : vector<48x32xf32>
    %9 = arith.select %3, %1, %8 : vector<48x32xi1>, vector<48x32xf32>
    %10 = arith.truncf %9 : vector<48x32xf32> to vector<48x32xbf16>
    %11 = vector.extract_strided_slice %10 {offsets = [7, 0], sizes = [16, 32], strides = [1, 1]} : vector<48x32xbf16> to vector<16x32xbf16>
    %12 = vector.extract_strided_slice %10 {offsets = [8, 0], sizes = [16, 32], strides = [1, 1]} : vector<48x32xbf16> to vector<16x32xbf16>
    %13 = vector.extract_strided_slice %10 {offsets = [9, 0], sizes = [16, 32], strides = [1, 1]} : vector<48x32xbf16> to vector<16x32xbf16>
    %14 = vector.extract_strided_slice %10 {offsets = [15, 0], sizes = [16, 32], strides = [1, 1]} : vector<48x32xbf16> to vector<16x32xbf16>
    %15 = vector.extract_strided_slice %10 {offsets = [16, 0], sizes = [16, 32], strides = [1, 1]} : vector<48x32xbf16> to vector<16x32xbf16>
    %16 = vector.extract_strided_slice %10 {offsets = [17, 0], sizes = [16, 32], strides = [1, 1]} : vector<48x32xbf16> to vector<16x32xbf16>
    %17 = vector.extract_strided_slice %10 {offsets = [23, 0], sizes = [16, 32], strides = [1, 1]} : vector<48x32xbf16> to vector<16x32xbf16>
    %18 = vector.extract_strided_slice %10 {offsets = [24, 0], sizes = [16, 32], strides = [1, 1]} : vector<48x32xbf16> to vector<16x32xbf16>
    %19 = vector.extract_strided_slice %10 {offsets = [25, 0], sizes = [16, 32], strides = [1, 1]} : vector<48x32xbf16> to vector<16x32xbf16>
    %20 = tpu.concatenate %11, %12, %13, %14, %15, %16, %17, %18, %19 in 1 : vector<16x32xbf16>, vector<16x32xbf16>, vector<16x32xbf16>, vector<16x32xbf16>, vector<16x32xbf16>, vector<16x32xbf16>, vector<16x32xbf16>, vector<16x32xbf16>, vector<16x32xbf16> -> vector<16x288xbf16>
    %c0_3 = arith.constant 0 : index
    %c0_4 = arith.constant 0 : index
    %21 = vector.load %arg3[%c0_3, %c0_4] : memref<288x32xbf16, #tpu.memory_space<vmem>>, vector<288x32xbf16>
    %cst_5 = arith.constant dense<0.000000e+00> : vector<16x32xf32>
    %22 = tpu.matmul %20, %21, %cst_5 {dimension_numbers = #tpu.dot_dimension_numbers<[1], [0], [0], [1], [0, 0, 1, 1], [], []>} : vector<16x288xbf16>, vector<288x32xbf16>, vector<16x32xf32> -> vector<16x32xf32>
    %c0_6 = arith.constant 0 : index
    %c0_7 = arith.constant 0 : index
    %23 = vector.load %arg4[%c0_6, %c0_7] : memref<16x1xf32, #tpu.memory_space<vmem>>, vector<16x1xf32>
    %24 = vector.broadcast %23 : vector<16x1xf32> to vector<16x32xf32>
    %25 = arith.mulf %22, %24 : vector<16x32xf32>
    %26 = arith.truncf %25 : vector<16x32xf32> to vector<16x32xbf16>
    %cst_8 = arith.constant 0.000000e+00 : bf16
    %27 = vector.broadcast %cst_8 : bf16 to vector<16x32xbf16>
    %c0_9 = arith.constant 0 : index
    %c0_10 = arith.constant 0 : index
    %28 = vector.load %arg5[%c0_9, %c0_10] : memref<48x32xbf16, #tpu.memory_space<vmem>>, vector<16x32xbf16>
    tpu.vector_store %arg5[%c0_9, %c0_10], %27 {strides = array<i32>} : memref<48x32xbf16, #tpu.memory_space<vmem>>, vector<16x32xbf16>,
    %c32 = arith.constant 32 : index
    %c0_11 = arith.constant 0 : index
    %29 = vector.load %arg5[%c32, %c0_11] : memref<48x32xbf16, #tpu.memory_space<vmem>>, vector<16x32xbf16>
    tpu.vector_store %arg5[%c32, %c0_11], %27 {strides = array<i32>} : memref<48x32xbf16, #tpu.memory_space<vmem>>, vector<16x32xbf16>,
    %c16 = arith.constant 16 : index
    %c0_12 = arith.constant 0 : index
    %30 = vector.load %arg5[%c16, %c0_12] : memref<48x32xbf16, #tpu.memory_space<vmem>>, vector<16x32xbf16>
    tpu.vector_store %arg5[%c16, %c0_12], %26 {strides = array<i32>} : memref<48x32xbf16, #tpu.memory_space<vmem>>, vector<16x32xbf16>,
    return
  }
  func.func @transform_0(%arg0: i32, %arg1: i32) -> (i32, i32) {
    %c0_i32 = arith.constant 0 : i32
    %c0_i32_0 = arith.constant 0 : i32
    return %arg0, %c0_i32 : i32, i32
  }
  func.func @transform_1(%arg0: i32, %arg1: i32) -> (i32, i32) {
    %c0_i32 = arith.constant 0 : i32
    %c0_i32_0 = arith.constant 0 : i32
    return %c0_i32, %arg1 : i32, i32
  }
  func.func @transform_2(%arg0: i32, %arg1: i32) -> (i32, i32) {
    %c0_i32 = arith.constant 0 : i32
    %c0_i32_0 = arith.constant 0 : i32
    %c0_i32_1 = arith.constant 0 : i32
    return %c0_i32, %c0_i32_0 : i32, i32
  }
  func.func @transform_3(%arg0: i32, %arg1: i32) -> (i32, i32) {
    %c0_i32 = arith.constant 0 : i32
    return %arg0, %arg1 : i32, i32
  }
}

module attributes {stable_mosaic.version = 11 : i64} {
  func.func @kernel(%arg0: i32, %arg1: i32, %arg2: memref<48x32xbf16, #tpu.memory_space<vmem>>, %arg3: memref<320x32xbf16, #tpu.memory_space<vmem>>, %arg4: memref<16x1xf32, #tpu.memory_space<vmem>>, %arg5: memref<1x32xf32, #tpu.memory_space<vmem>>, %arg6: memref<48x32xbf16, #tpu.memory_space<vmem>>, %arg7: memref<48x32xbf16, #tpu.memory_space<vmem>>) attributes {dimension_semantics = [#tpu.dimension_semantics<parallel>, #tpu.dimension_semantics<parallel>], iteration_bounds = array<i64: 2, 1>, scalar_prefetch = 0 : i64, scratch_operands = 0 : i64, tpu.core_type = #tpu.core_type<tc>, window_params = [{transform_indices = @transform_0, window_bounds = array<i64: 48, 32>}, {transform_indices = @transform_1, window_bounds = array<i64: 320, 32>}, {pipeline_mode = #tpu.pipeline_mode<synchronous>, transform_indices = @transform_2, window_bounds = array<i64: 16, 1>}, {transform_indices = @transform_3, window_bounds = array<i64: 1, 32>}, {transform_indices = @transform_4, window_bounds = array<i64: 48, 32>}, {transform_indices = @transform_5, window_bounds = array<i64: 48, 32>}]} {
    %c0 = arith.constant 0 : index
    %c0_0 = arith.constant 0 : index
    %0 = vector.load %arg2[%c0, %c0_0] : memref<48x32xbf16, #tpu.memory_space<vmem>>, vector<48x32xbf16>
    %1 = arith.extf %0 : vector<48x32xbf16> to vector<48x32xf32>
    %cst = arith.constant 0.000000e+00 : f32
    %2 = vector.broadcast %cst : f32 to vector<48x32xf32>
    %3 = arith.cmpf ogt, %1, %2 : vector<48x32xf32>
    %cst_1 = arith.constant 0.000000e+00 : f32
    %4 = vector.broadcast %cst_1 : f32 to vector<48x32xf32>
    %5 = arith.minimumf %1, %4 : vector<48x32xf32>
    %6 = math.exp %5 : vector<48x32xf32>
    %cst_2 = arith.constant 1.000000e+00 : f32
    %7 = vector.broadcast %cst_2 : f32 to vector<48x32xf32>
    %8 = arith.subf %6, %7 : vector<48x32xf32>
    %9 = arith.select %3, %1, %8 : vector<48x32xi1>, vector<48x32xf32>
    %10 = arith.truncf %9 : vector<48x32xf32> to vector<48x32xbf16>
    %11 = vector.extract_strided_slice %10 {offsets = [7, 0], sizes = [16, 32], strides = [1, 1]} : vector<48x32xbf16> to vector<16x32xbf16>
    %12 = vector.extract_strided_slice %10 {offsets = [8, 0], sizes = [16, 32], strides = [1, 1]} : vector<48x32xbf16> to vector<16x32xbf16>
    %13 = vector.extract_strided_slice %10 {offsets = [9, 0], sizes = [16, 32], strides = [1, 1]} : vector<48x32xbf16> to vector<16x32xbf16>
    %14 = vector.extract_strided_slice %10 {offsets = [15, 0], sizes = [16, 32], strides = [1, 1]} : vector<48x32xbf16> to vector<16x32xbf16>
    %15 = vector.extract_strided_slice %10 {offsets = [16, 0], sizes = [16, 32], strides = [1, 1]} : vector<48x32xbf16> to vector<16x32xbf16>
    %16 = vector.extract_strided_slice %10 {offsets = [17, 0], sizes = [16, 32], strides = [1, 1]} : vector<48x32xbf16> to vector<16x32xbf16>
    %17 = vector.extract_strided_slice %10 {offsets = [23, 0], sizes = [16, 32], strides = [1, 1]} : vector<48x32xbf16> to vector<16x32xbf16>
    %18 = vector.extract_strided_slice %10 {offsets = [24, 0], sizes = [16, 32], strides = [1, 1]} : vector<48x32xbf16> to vector<16x32xbf16>
    %19 = vector.extract_strided_slice %10 {offsets = [25, 0], sizes = [16, 32], strides = [1, 1]} : vector<48x32xbf16> to vector<16x32xbf16>
    %c16 = arith.constant 16 : index
    %c0_3 = arith.constant 0 : index
    %20 = vector.load %arg6[%c16, %c0_3] : memref<48x32xbf16, #tpu.memory_space<vmem>>, vector<16x32xbf16>
    %21 = tpu.concatenate %11, %12, %13, %14, %15, %16, %17, %18, %19, %20 in 1 : vector<16x32xbf16>, vector<16x32xbf16>, vector<16x32xbf16>, vector<16x32xbf16>, vector<16x32xbf16>, vector<16x32xbf16>, vector<16x32xbf16>, vector<16x32xbf16>, vector<16x32xbf16>, vector<16x32xbf16> -> vector<16x320xbf16>
    %c0_4 = arith.constant 0 : index
    %c0_5 = arith.constant 0 : index
    %22 = vector.load %arg3[%c0_4, %c0_5] : memref<320x32xbf16, #tpu.memory_space<vmem>>, vector<320x32xbf16>
    %cst_6 = arith.constant dense<0.000000e+00> : vector<16x32xf32>
    %23 = tpu.matmul %21, %22, %cst_6 {dimension_numbers = #tpu.dot_dimension_numbers<[1], [0], [0], [1], [0, 0, 1, 1], [], []>} : vector<16x320xbf16>, vector<320x32xbf16>, vector<16x32xf32> -> vector<16x32xf32>
    %c0_7 = arith.constant 0 : index
    %c0_8 = arith.constant 0 : index
    %24 = vector.load %arg5[%c0_7, %c0_8] : memref<1x32xf32, #tpu.memory_space<vmem>>, vector<1x32xf32>
    %25 = vector.broadcast %24 : vector<1x32xf32> to vector<16x32xf32>
    %26 = arith.addf %23, %25 : vector<16x32xf32>
    %c0_9 = arith.constant 0 : index
    %c0_10 = arith.constant 0 : index
    %27 = vector.load %arg4[%c0_9, %c0_10] : memref<16x1xf32, #tpu.memory_space<vmem>>, vector<16x1xf32>
    %28 = vector.broadcast %27 : vector<16x1xf32> to vector<16x32xf32>
    %29 = arith.mulf %26, %28 : vector<16x32xf32>
    %30 = arith.truncf %29 : vector<16x32xf32> to vector<16x32xbf16>
    %cst_11 = arith.constant 0.000000e+00 : bf16
    %31 = vector.broadcast %cst_11 : bf16 to vector<16x32xbf16>
    %c0_12 = arith.constant 0 : index
    %c0_13 = arith.constant 0 : index
    %32 = vector.load %arg7[%c0_12, %c0_13] : memref<48x32xbf16, #tpu.memory_space<vmem>>, vector<16x32xbf16>
    tpu.vector_store %arg7[%c0_12, %c0_13], %31 {strides = array<i32>} : memref<48x32xbf16, #tpu.memory_space<vmem>>, vector<16x32xbf16>,
    %c32 = arith.constant 32 : index
    %c0_14 = arith.constant 0 : index
    %33 = vector.load %arg7[%c32, %c0_14] : memref<48x32xbf16, #tpu.memory_space<vmem>>, vector<16x32xbf16>
    tpu.vector_store %arg7[%c32, %c0_14], %31 {strides = array<i32>} : memref<48x32xbf16, #tpu.memory_space<vmem>>, vector<16x32xbf16>,
    %c16_15 = arith.constant 16 : index
    %c0_16 = arith.constant 0 : index
    %34 = vector.load %arg7[%c16_15, %c0_16] : memref<48x32xbf16, #tpu.memory_space<vmem>>, vector<16x32xbf16>
    tpu.vector_store %arg7[%c16_15, %c0_16], %30 {strides = array<i32>} : memref<48x32xbf16, #tpu.memory_space<vmem>>, vector<16x32xbf16>,
    return
  }
  func.func @transform_0(%arg0: i32, %arg1: i32) -> (i32, i32) {
    %c0_i32 = arith.constant 0 : i32
    %c0_i32_0 = arith.constant 0 : i32
    return %arg0, %c0_i32 : i32, i32
  }
  func.func @transform_1(%arg0: i32, %arg1: i32) -> (i32, i32) {
    %c0_i32 = arith.constant 0 : i32
    %c0_i32_0 = arith.constant 0 : i32
    return %c0_i32, %arg1 : i32, i32
  }
  func.func @transform_2(%arg0: i32, %arg1: i32) -> (i32, i32) {
    %c0_i32 = arith.constant 0 : i32
    %c0_i32_0 = arith.constant 0 : i32
    %c0_i32_1 = arith.constant 0 : i32
    return %c0_i32, %c0_i32_0 : i32, i32
  }
  func.func @transform_3(%arg0: i32, %arg1: i32) -> (i32, i32) {
    %c0_i32 = arith.constant 0 : i32
    %c0_i32_0 = arith.constant 0 : i32
    return %c0_i32, %arg1 : i32, i32
  }
  func.func @transform_4(%arg0: i32, %arg1: i32) -> (i32, i32) {
    %c0_i32 = arith.constant 0 : i32
    %c0_i32_0 = arith.constant 0 : i32
    return %arg0, %c0_i32 : i32, i32
  }
  func.func @transform_5(%arg0: i32, %arg1: i32) -> (i32, i32) {
    %c0_i32 = arith.constant 0 : i32
    return %arg0, %arg1 : i32, i32
  }
}

module attributes {stable_mosaic.version = 11 : i64} {
  func.func @kernel(%arg0: i32, %arg1: i32, %arg2: memref<48x32xbf16, #tpu.memory_space<vmem>>, %arg3: memref<320x16xbf16, #tpu.memory_space<vmem>>, %arg4: memref<16x1xf32, #tpu.memory_space<vmem>>, %arg5: memref<1x16xf32, #tpu.memory_space<vmem>>, %arg6: memref<48x32xbf16, #tpu.memory_space<vmem>>, %arg7: memref<48x16xbf16, #tpu.memory_space<vmem>>) attributes {dimension_semantics = [#tpu.dimension_semantics<parallel>, #tpu.dimension_semantics<parallel>], iteration_bounds = array<i64: 2, 1>, scalar_prefetch = 0 : i64, scratch_operands = 0 : i64, tpu.core_type = #tpu.core_type<tc>, window_params = [{transform_indices = @transform_0, window_bounds = array<i64: 48, 32>}, {transform_indices = @transform_1, window_bounds = array<i64: 320, 16>}, {pipeline_mode = #tpu.pipeline_mode<synchronous>, transform_indices = @transform_2, window_bounds = array<i64: 16, 1>}, {transform_indices = @transform_3, window_bounds = array<i64: 1, 16>}, {transform_indices = @transform_4, window_bounds = array<i64: 48, 32>}, {transform_indices = @transform_5, window_bounds = array<i64: 48, 16>}]} {
    %c0 = arith.constant 0 : index
    %c0_0 = arith.constant 0 : index
    %0 = vector.load %arg2[%c0, %c0_0] : memref<48x32xbf16, #tpu.memory_space<vmem>>, vector<48x32xbf16>
    %1 = arith.extf %0 : vector<48x32xbf16> to vector<48x32xf32>
    %cst = arith.constant 0.000000e+00 : f32
    %2 = vector.broadcast %cst : f32 to vector<48x32xf32>
    %3 = arith.cmpf ogt, %1, %2 : vector<48x32xf32>
    %cst_1 = arith.constant 0.000000e+00 : f32
    %4 = vector.broadcast %cst_1 : f32 to vector<48x32xf32>
    %5 = arith.minimumf %1, %4 : vector<48x32xf32>
    %6 = math.exp %5 : vector<48x32xf32>
    %cst_2 = arith.constant 1.000000e+00 : f32
    %7 = vector.broadcast %cst_2 : f32 to vector<48x32xf32>
    %8 = arith.subf %6, %7 : vector<48x32xf32>
    %9 = arith.select %3, %1, %8 : vector<48x32xi1>, vector<48x32xf32>
    %10 = arith.truncf %9 : vector<48x32xf32> to vector<48x32xbf16>
    %11 = vector.extract_strided_slice %10 {offsets = [7, 0], sizes = [16, 32], strides = [1, 1]} : vector<48x32xbf16> to vector<16x32xbf16>
    %12 = vector.extract_strided_slice %10 {offsets = [8, 0], sizes = [16, 32], strides = [1, 1]} : vector<48x32xbf16> to vector<16x32xbf16>
    %13 = vector.extract_strided_slice %10 {offsets = [9, 0], sizes = [16, 32], strides = [1, 1]} : vector<48x32xbf16> to vector<16x32xbf16>
    %14 = vector.extract_strided_slice %10 {offsets = [15, 0], sizes = [16, 32], strides = [1, 1]} : vector<48x32xbf16> to vector<16x32xbf16>
    %15 = vector.extract_strided_slice %10 {offsets = [16, 0], sizes = [16, 32], strides = [1, 1]} : vector<48x32xbf16> to vector<16x32xbf16>
    %16 = vector.extract_strided_slice %10 {offsets = [17, 0], sizes = [16, 32], strides = [1, 1]} : vector<48x32xbf16> to vector<16x32xbf16>
    %17 = vector.extract_strided_slice %10 {offsets = [23, 0], sizes = [16, 32], strides = [1, 1]} : vector<48x32xbf16> to vector<16x32xbf16>
    %18 = vector.extract_strided_slice %10 {offsets = [24, 0], sizes = [16, 32], strides = [1, 1]} : vector<48x32xbf16> to vector<16x32xbf16>
    %19 = vector.extract_strided_slice %10 {offsets = [25, 0], sizes = [16, 32], strides = [1, 1]} : vector<48x32xbf16> to vector<16x32xbf16>
    %c16 = arith.constant 16 : index
    %c0_3 = arith.constant 0 : index
    %20 = vector.load %arg6[%c16, %c0_3] : memref<48x32xbf16, #tpu.memory_space<vmem>>, vector<16x32xbf16>
    %21 = tpu.concatenate %11, %12, %13, %14, %15, %16, %17, %18, %19, %20 in 1 : vector<16x32xbf16>, vector<16x32xbf16>, vector<16x32xbf16>, vector<16x32xbf16>, vector<16x32xbf16>, vector<16x32xbf16>, vector<16x32xbf16>, vector<16x32xbf16>, vector<16x32xbf16>, vector<16x32xbf16> -> vector<16x320xbf16>
    %c0_4 = arith.constant 0 : index
    %c0_5 = arith.constant 0 : index
    %22 = vector.load %arg3[%c0_4, %c0_5] : memref<320x16xbf16, #tpu.memory_space<vmem>>, vector<320x16xbf16>
    %cst_6 = arith.constant dense<0.000000e+00> : vector<16x16xf32>
    %23 = tpu.matmul %21, %22, %cst_6 {dimension_numbers = #tpu.dot_dimension_numbers<[1], [0], [0], [1], [0, 0, 1, 1], [], []>} : vector<16x320xbf16>, vector<320x16xbf16>, vector<16x16xf32> -> vector<16x16xf32>
    %c0_7 = arith.constant 0 : index
    %c0_8 = arith.constant 0 : index
    %24 = vector.load %arg5[%c0_7, %c0_8] : memref<1x16xf32, #tpu.memory_space<vmem>>, vector<1x16xf32>
    %25 = vector.broadcast %24 : vector<1x16xf32> to vector<16x16xf32>
    %26 = arith.addf %23, %25 : vector<16x16xf32>
    %c0_9 = arith.constant 0 : index
    %c0_10 = arith.constant 0 : index
    %27 = vector.load %arg4[%c0_9, %c0_10] : memref<16x1xf32, #tpu.memory_space<vmem>>, vector<16x1xf32>
    %28 = vector.broadcast %27 : vector<16x1xf32> to vector<16x16xf32>
    %29 = arith.mulf %26, %28 : vector<16x16xf32>
    %30 = arith.truncf %29 : vector<16x16xf32> to vector<16x16xbf16>
    %cst_11 = arith.constant 0.000000e+00 : bf16
    %31 = vector.broadcast %cst_11 : bf16 to vector<16x16xbf16>
    %c0_12 = arith.constant 0 : index
    %c0_13 = arith.constant 0 : index
    %32 = vector.load %arg7[%c0_12, %c0_13] : memref<48x16xbf16, #tpu.memory_space<vmem>>, vector<16x16xbf16>
    tpu.vector_store %arg7[%c0_12, %c0_13], %31 {strides = array<i32>} : memref<48x16xbf16, #tpu.memory_space<vmem>>, vector<16x16xbf16>,
    %c32 = arith.constant 32 : index
    %c0_14 = arith.constant 0 : index
    %33 = vector.load %arg7[%c32, %c0_14] : memref<48x16xbf16, #tpu.memory_space<vmem>>, vector<16x16xbf16>
    tpu.vector_store %arg7[%c32, %c0_14], %31 {strides = array<i32>} : memref<48x16xbf16, #tpu.memory_space<vmem>>, vector<16x16xbf16>,
    %c16_15 = arith.constant 16 : index
    %c0_16 = arith.constant 0 : index
    %34 = vector.load %arg7[%c16_15, %c0_16] : memref<48x16xbf16, #tpu.memory_space<vmem>>, vector<16x16xbf16>
    tpu.vector_store %arg7[%c16_15, %c0_16], %30 {strides = array<i32>} : memref<48x16xbf16, #tpu.memory_space<vmem>>, vector<16x16xbf16>,
    return
  }
  func.func @transform_0(%arg0: i32, %arg1: i32) -> (i32, i32) {
    %c0_i32 = arith.constant 0 : i32
    %c0_i32_0 = arith.constant 0 : i32
    return %arg0, %c0_i32 : i32, i32
  }
  func.func @transform_1(%arg0: i32, %arg1: i32) -> (i32, i32) {
    %c0_i32 = arith.constant 0 : i32
    %c0_i32_0 = arith.constant 0 : i32
    return %c0_i32, %arg1 : i32, i32
  }
  func.func @transform_2(%arg0: i32, %arg1: i32) -> (i32, i32) {
    %c0_i32 = arith.constant 0 : i32
    %c0_i32_0 = arith.constant 0 : i32
    %c0_i32_1 = arith.constant 0 : i32
    return %c0_i32, %c0_i32_0 : i32, i32
  }
  func.func @transform_3(%arg0: i32, %arg1: i32) -> (i32, i32) {
    %c0_i32 = arith.constant 0 : i32
    %c0_i32_0 = arith.constant 0 : i32
    return %c0_i32, %arg1 : i32, i32
  }
  func.func @transform_4(%arg0: i32, %arg1: i32) -> (i32, i32) {
    %c0_i32 = arith.constant 0 : i32
    %c0_i32_0 = arith.constant 0 : i32
    return %arg0, %c0_i32 : i32, i32
  }
  func.func @transform_5(%arg0: i32, %arg1: i32) -> (i32, i32) {
    %c0_i32 = arith.constant 0 : i32
    return %arg0, %arg1 : i32, i32
  }
}

module attributes {stable_mosaic.version = 11 : i64} {
  func.func @kernel(%arg0: i32, %arg1: i32, %arg2: memref<64x16xbf16, #tpu.memory_space<vmem>>, %arg3: memref<144x16xbf16, #tpu.memory_space<vmem>>, %arg4: memref<32x1xf32, #tpu.memory_space<vmem>>, %arg5: memref<64x16xbf16, #tpu.memory_space<vmem>>) attributes {dimension_semantics = [#tpu.dimension_semantics<parallel>, #tpu.dimension_semantics<parallel>], iteration_bounds = array<i64: 2, 1>, scalar_prefetch = 0 : i64, scratch_operands = 0 : i64, tpu.core_type = #tpu.core_type<tc>, window_params = [{transform_indices = @transform_0, window_bounds = array<i64: 64, 16>}, {transform_indices = @transform_1, window_bounds = array<i64: 144, 16>}, {pipeline_mode = #tpu.pipeline_mode<synchronous>, transform_indices = @transform_2, window_bounds = array<i64: 32, 1>}, {transform_indices = @transform_3, window_bounds = array<i64: 64, 16>}]} {
    %c0 = arith.constant 0 : index
    %c0_0 = arith.constant 0 : index
    %0 = vector.load %arg2[%c0, %c0_0] : memref<64x16xbf16, #tpu.memory_space<vmem>>, vector<64x16xbf16>
    %1 = arith.extf %0 : vector<64x16xbf16> to vector<64x16xf32>
    %cst = arith.constant 0.000000e+00 : f32
    %2 = vector.broadcast %cst : f32 to vector<64x16xf32>
    %3 = arith.cmpf ogt, %1, %2 : vector<64x16xf32>
    %cst_1 = arith.constant 0.000000e+00 : f32
    %4 = vector.broadcast %cst_1 : f32 to vector<64x16xf32>
    %5 = arith.minimumf %1, %4 : vector<64x16xf32>
    %6 = math.exp %5 : vector<64x16xf32>
    %cst_2 = arith.constant 1.000000e+00 : f32
    %7 = vector.broadcast %cst_2 : f32 to vector<64x16xf32>
    %8 = arith.subf %6, %7 : vector<64x16xf32>
    %9 = arith.select %3, %1, %8 : vector<64x16xi1>, vector<64x16xf32>
    %10 = arith.truncf %9 : vector<64x16xf32> to vector<64x16xbf16>
    %11 = vector.extract_strided_slice %10 {offsets = [7, 0], sizes = [32, 16], strides = [1, 1]} : vector<64x16xbf16> to vector<32x16xbf16>
    %12 = vector.extract_strided_slice %10 {offsets = [8, 0], sizes = [32, 16], strides = [1, 1]} : vector<64x16xbf16> to vector<32x16xbf16>
    %13 = vector.extract_strided_slice %10 {offsets = [9, 0], sizes = [32, 16], strides = [1, 1]} : vector<64x16xbf16> to vector<32x16xbf16>
    %14 = vector.extract_strided_slice %10 {offsets = [15, 0], sizes = [32, 16], strides = [1, 1]} : vector<64x16xbf16> to vector<32x16xbf16>
    %15 = vector.extract_strided_slice %10 {offsets = [16, 0], sizes = [32, 16], strides = [1, 1]} : vector<64x16xbf16> to vector<32x16xbf16>
    %16 = vector.extract_strided_slice %10 {offsets = [17, 0], sizes = [32, 16], strides = [1, 1]} : vector<64x16xbf16> to vector<32x16xbf16>
    %17 = vector.extract_strided_slice %10 {offsets = [23, 0], sizes = [32, 16], strides = [1, 1]} : vector<64x16xbf16> to vector<32x16xbf16>
    %18 = vector.extract_strided_slice %10 {offsets = [24, 0], sizes = [32, 16], strides = [1, 1]} : vector<64x16xbf16> to vector<32x16xbf16>
    %19 = vector.extract_strided_slice %10 {offsets = [25, 0], sizes = [32, 16], strides = [1, 1]} : vector<64x16xbf16> to vector<32x16xbf16>
    %20 = tpu.concatenate %11, %12, %13, %14, %15, %16, %17, %18, %19 in 1 : vector<32x16xbf16>, vector<32x16xbf16>, vector<32x16xbf16>, vector<32x16xbf16>, vector<32x16xbf16>, vector<32x16xbf16>, vector<32x16xbf16>, vector<32x16xbf16>, vector<32x16xbf16> -> vector<32x144xbf16>
    %c0_3 = arith.constant 0 : index
    %c0_4 = arith.constant 0 : index
    %21 = vector.load %arg3[%c0_3, %c0_4] : memref<144x16xbf16, #tpu.memory_space<vmem>>, vector<144x16xbf16>
    %cst_5 = arith.constant dense<0.000000e+00> : vector<32x16xf32>
    %22 = tpu.matmul %20, %21, %cst_5 {dimension_numbers = #tpu.dot_dimension_numbers<[1], [0], [0], [1], [0, 0, 1, 1], [], []>} : vector<32x144xbf16>, vector<144x16xbf16>, vector<32x16xf32> -> vector<32x16xf32>
    %c0_6 = arith.constant 0 : index
    %c0_7 = arith.constant 0 : index
    %23 = vector.load %arg4[%c0_6, %c0_7] : memref<32x1xf32, #tpu.memory_space<vmem>>, vector<32x1xf32>
    %24 = vector.broadcast %23 : vector<32x1xf32> to vector<32x16xf32>
    %25 = arith.mulf %22, %24 : vector<32x16xf32>
    %26 = arith.truncf %25 : vector<32x16xf32> to vector<32x16xbf16>
    %cst_8 = arith.constant 0.000000e+00 : bf16
    %27 = vector.broadcast %cst_8 : bf16 to vector<16x16xbf16>
    %c0_9 = arith.constant 0 : index
    %c0_10 = arith.constant 0 : index
    %28 = vector.load %arg5[%c0_9, %c0_10] : memref<64x16xbf16, #tpu.memory_space<vmem>>, vector<16x16xbf16>
    tpu.vector_store %arg5[%c0_9, %c0_10], %27 {strides = array<i32>} : memref<64x16xbf16, #tpu.memory_space<vmem>>, vector<16x16xbf16>,
    %c48 = arith.constant 48 : index
    %c0_11 = arith.constant 0 : index
    %29 = vector.load %arg5[%c48, %c0_11] : memref<64x16xbf16, #tpu.memory_space<vmem>>, vector<16x16xbf16>
    tpu.vector_store %arg5[%c48, %c0_11], %27 {strides = array<i32>} : memref<64x16xbf16, #tpu.memory_space<vmem>>, vector<16x16xbf16>,
    %c16 = arith.constant 16 : index
    %c0_12 = arith.constant 0 : index
    %30 = vector.load %arg5[%c16, %c0_12] : memref<64x16xbf16, #tpu.memory_space<vmem>>, vector<32x16xbf16>
    tpu.vector_store %arg5[%c16, %c0_12], %26 {strides = array<i32>} : memref<64x16xbf16, #tpu.memory_space<vmem>>, vector<32x16xbf16>,
    return
  }
  func.func @transform_0(%arg0: i32, %arg1: i32) -> (i32, i32) {
    %c0_i32 = arith.constant 0 : i32
    %c0_i32_0 = arith.constant 0 : i32
    return %arg0, %c0_i32 : i32, i32
  }
  func.func @transform_1(%arg0: i32, %arg1: i32) -> (i32, i32) {
    %c0_i32 = arith.constant 0 : i32
    %c0_i32_0 = arith.constant 0 : i32
    return %c0_i32, %arg1 : i32, i32
  }
  func.func @transform_2(%arg0: i32, %arg1: i32) -> (i32, i32) {
    %c0_i32 = arith.constant 0 : i32
    %c0_i32_0 = arith.constant 0 : i32
    %c0_i32_1 = arith.constant 0 : i32
    return %c0_i32, %c0_i32_0 : i32, i32
  }
  func.func @transform_3(%arg0: i32, %arg1: i32) -> (i32, i32) {
    %c0_i32 = arith.constant 0 : i32
    return %arg0, %arg1 : i32, i32
  }
}

module attributes {stable_mosaic.version = 11 : i64} {
  func.func @kernel(%arg0: i32, %arg1: i32, %arg2: memref<64x16xbf16, #tpu.memory_space<vmem>>, %arg3: memref<160x16xbf16, #tpu.memory_space<vmem>>, %arg4: memref<32x1xf32, #tpu.memory_space<vmem>>, %arg5: memref<1x16xf32, #tpu.memory_space<vmem>>, %arg6: memref<64x16xbf16, #tpu.memory_space<vmem>>, %arg7: memref<64x16xbf16, #tpu.memory_space<vmem>>) attributes {dimension_semantics = [#tpu.dimension_semantics<parallel>, #tpu.dimension_semantics<parallel>], iteration_bounds = array<i64: 2, 1>, scalar_prefetch = 0 : i64, scratch_operands = 0 : i64, tpu.core_type = #tpu.core_type<tc>, window_params = [{transform_indices = @transform_0, window_bounds = array<i64: 64, 16>}, {transform_indices = @transform_1, window_bounds = array<i64: 160, 16>}, {pipeline_mode = #tpu.pipeline_mode<synchronous>, transform_indices = @transform_2, window_bounds = array<i64: 32, 1>}, {transform_indices = @transform_3, window_bounds = array<i64: 1, 16>}, {transform_indices = @transform_4, window_bounds = array<i64: 64, 16>}, {transform_indices = @transform_5, window_bounds = array<i64: 64, 16>}]} {
    %c0 = arith.constant 0 : index
    %c0_0 = arith.constant 0 : index
    %0 = vector.load %arg2[%c0, %c0_0] : memref<64x16xbf16, #tpu.memory_space<vmem>>, vector<64x16xbf16>
    %1 = arith.extf %0 : vector<64x16xbf16> to vector<64x16xf32>
    %cst = arith.constant 0.000000e+00 : f32
    %2 = vector.broadcast %cst : f32 to vector<64x16xf32>
    %3 = arith.cmpf ogt, %1, %2 : vector<64x16xf32>
    %cst_1 = arith.constant 0.000000e+00 : f32
    %4 = vector.broadcast %cst_1 : f32 to vector<64x16xf32>
    %5 = arith.minimumf %1, %4 : vector<64x16xf32>
    %6 = math.exp %5 : vector<64x16xf32>
    %cst_2 = arith.constant 1.000000e+00 : f32
    %7 = vector.broadcast %cst_2 : f32 to vector<64x16xf32>
    %8 = arith.subf %6, %7 : vector<64x16xf32>
    %9 = arith.select %3, %1, %8 : vector<64x16xi1>, vector<64x16xf32>
    %10 = arith.truncf %9 : vector<64x16xf32> to vector<64x16xbf16>
    %11 = vector.extract_strided_slice %10 {offsets = [7, 0], sizes = [32, 16], strides = [1, 1]} : vector<64x16xbf16> to vector<32x16xbf16>
    %12 = vector.extract_strided_slice %10 {offsets = [8, 0], sizes = [32, 16], strides = [1, 1]} : vector<64x16xbf16> to vector<32x16xbf16>
    %13 = vector.extract_strided_slice %10 {offsets = [9, 0], sizes = [32, 16], strides = [1, 1]} : vector<64x16xbf16> to vector<32x16xbf16>
    %14 = vector.extract_strided_slice %10 {offsets = [15, 0], sizes = [32, 16], strides = [1, 1]} : vector<64x16xbf16> to vector<32x16xbf16>
    %15 = vector.extract_strided_slice %10 {offsets = [16, 0], sizes = [32, 16], strides = [1, 1]} : vector<64x16xbf16> to vector<32x16xbf16>
    %16 = vector.extract_strided_slice %10 {offsets = [17, 0], sizes = [32, 16], strides = [1, 1]} : vector<64x16xbf16> to vector<32x16xbf16>
    %17 = vector.extract_strided_slice %10 {offsets = [23, 0], sizes = [32, 16], strides = [1, 1]} : vector<64x16xbf16> to vector<32x16xbf16>
    %18 = vector.extract_strided_slice %10 {offsets = [24, 0], sizes = [32, 16], strides = [1, 1]} : vector<64x16xbf16> to vector<32x16xbf16>
    %19 = vector.extract_strided_slice %10 {offsets = [25, 0], sizes = [32, 16], strides = [1, 1]} : vector<64x16xbf16> to vector<32x16xbf16>
    %c16 = arith.constant 16 : index
    %c0_3 = arith.constant 0 : index
    %20 = vector.load %arg6[%c16, %c0_3] : memref<64x16xbf16, #tpu.memory_space<vmem>>, vector<32x16xbf16>
    %21 = tpu.concatenate %11, %12, %13, %14, %15, %16, %17, %18, %19, %20 in 1 : vector<32x16xbf16>, vector<32x16xbf16>, vector<32x16xbf16>, vector<32x16xbf16>, vector<32x16xbf16>, vector<32x16xbf16>, vector<32x16xbf16>, vector<32x16xbf16>, vector<32x16xbf16>, vector<32x16xbf16> -> vector<32x160xbf16>
    %c0_4 = arith.constant 0 : index
    %c0_5 = arith.constant 0 : index
    %22 = vector.load %arg3[%c0_4, %c0_5] : memref<160x16xbf16, #tpu.memory_space<vmem>>, vector<160x16xbf16>
    %cst_6 = arith.constant dense<0.000000e+00> : vector<32x16xf32>
    %23 = tpu.matmul %21, %22, %cst_6 {dimension_numbers = #tpu.dot_dimension_numbers<[1], [0], [0], [1], [0, 0, 1, 1], [], []>} : vector<32x160xbf16>, vector<160x16xbf16>, vector<32x16xf32> -> vector<32x16xf32>
    %c0_7 = arith.constant 0 : index
    %c0_8 = arith.constant 0 : index
    %24 = vector.load %arg5[%c0_7, %c0_8] : memref<1x16xf32, #tpu.memory_space<vmem>>, vector<1x16xf32>
    %25 = vector.broadcast %24 : vector<1x16xf32> to vector<32x16xf32>
    %26 = arith.addf %23, %25 : vector<32x16xf32>
    %c0_9 = arith.constant 0 : index
    %c0_10 = arith.constant 0 : index
    %27 = vector.load %arg4[%c0_9, %c0_10] : memref<32x1xf32, #tpu.memory_space<vmem>>, vector<32x1xf32>
    %28 = vector.broadcast %27 : vector<32x1xf32> to vector<32x16xf32>
    %29 = arith.mulf %26, %28 : vector<32x16xf32>
    %30 = arith.truncf %29 : vector<32x16xf32> to vector<32x16xbf16>
    %cst_11 = arith.constant 0.000000e+00 : bf16
    %31 = vector.broadcast %cst_11 : bf16 to vector<16x16xbf16>
    %c0_12 = arith.constant 0 : index
    %c0_13 = arith.constant 0 : index
    %32 = vector.load %arg7[%c0_12, %c0_13] : memref<64x16xbf16, #tpu.memory_space<vmem>>, vector<16x16xbf16>
    tpu.vector_store %arg7[%c0_12, %c0_13], %31 {strides = array<i32>} : memref<64x16xbf16, #tpu.memory_space<vmem>>, vector<16x16xbf16>,
    %c48 = arith.constant 48 : index
    %c0_14 = arith.constant 0 : index
    %33 = vector.load %arg7[%c48, %c0_14] : memref<64x16xbf16, #tpu.memory_space<vmem>>, vector<16x16xbf16>
    tpu.vector_store %arg7[%c48, %c0_14], %31 {strides = array<i32>} : memref<64x16xbf16, #tpu.memory_space<vmem>>, vector<16x16xbf16>,
    %c16_15 = arith.constant 16 : index
    %c0_16 = arith.constant 0 : index
    %34 = vector.load %arg7[%c16_15, %c0_16] : memref<64x16xbf16, #tpu.memory_space<vmem>>, vector<32x16xbf16>
    tpu.vector_store %arg7[%c16_15, %c0_16], %30 {strides = array<i32>} : memref<64x16xbf16, #tpu.memory_space<vmem>>, vector<32x16xbf16>,
    return
  }
  func.func @transform_0(%arg0: i32, %arg1: i32) -> (i32, i32) {
    %c0_i32 = arith.constant 0 : i32
    %c0_i32_0 = arith.constant 0 : i32
    return %arg0, %c0_i32 : i32, i32
  }
  func.func @transform_1(%arg0: i32, %arg1: i32) -> (i32, i32) {
    %c0_i32 = arith.constant 0 : i32
    %c0_i32_0 = arith.constant 0 : i32
    return %c0_i32, %arg1 : i32, i32
  }
  func.func @transform_2(%arg0: i32, %arg1: i32) -> (i32, i32) {
    %c0_i32 = arith.constant 0 : i32
    %c0_i32_0 = arith.constant 0 : i32
    %c0_i32_1 = arith.constant 0 : i32
    return %c0_i32, %c0_i32_0 : i32, i32
  }
  func.func @transform_3(%arg0: i32, %arg1: i32) -> (i32, i32) {
    %c0_i32 = arith.constant 0 : i32
    %c0_i32_0 = arith.constant 0 : i32
    return %c0_i32, %arg1 : i32, i32
  }
  func.func @transform_4(%arg0: i32, %arg1: i32) -> (i32, i32) {
    %c0_i32 = arith.constant 0 : i32
    %c0_i32_0 = arith.constant 0 : i32
    return %arg0, %c0_i32 : i32, i32
  }
  func.func @transform_5(%arg0: i32, %arg1: i32) -> (i32, i32) {
    %c0_i32 = arith.constant 0 : i32
    return %arg0, %arg1 : i32, i32
  }
}

module attributes {stable_mosaic.version = 11 : i64} {
  func.func @kernel(%arg0: i32, %arg1: i32, %arg2: memref<64x16xbf16, #tpu.memory_space<vmem>>, %arg3: memref<160x8xbf16, #tpu.memory_space<vmem>>, %arg4: memref<32x1xf32, #tpu.memory_space<vmem>>, %arg5: memref<1x8xf32, #tpu.memory_space<vmem>>, %arg6: memref<64x16xbf16, #tpu.memory_space<vmem>>, %arg7: memref<64x8xbf16, #tpu.memory_space<vmem>>) attributes {dimension_semantics = [#tpu.dimension_semantics<parallel>, #tpu.dimension_semantics<parallel>], iteration_bounds = array<i64: 2, 1>, scalar_prefetch = 0 : i64, scratch_operands = 0 : i64, tpu.core_type = #tpu.core_type<tc>, window_params = [{transform_indices = @transform_0, window_bounds = array<i64: 64, 16>}, {transform_indices = @transform_1, window_bounds = array<i64: 160, 8>}, {pipeline_mode = #tpu.pipeline_mode<synchronous>, transform_indices = @transform_2, window_bounds = array<i64: 32, 1>}, {transform_indices = @transform_3, window_bounds = array<i64: 1, 8>}, {transform_indices = @transform_4, window_bounds = array<i64: 64, 16>}, {transform_indices = @transform_5, window_bounds = array<i64: 64, 8>}]} {
    %c0 = arith.constant 0 : index
    %c0_0 = arith.constant 0 : index
    %0 = vector.load %arg2[%c0, %c0_0] : memref<64x16xbf16, #tpu.memory_space<vmem>>, vector<64x16xbf16>
    %1 = arith.extf %0 : vector<64x16xbf16> to vector<64x16xf32>
    %cst = arith.constant 0.000000e+00 : f32
    %2 = vector.broadcast %cst : f32 to vector<64x16xf32>
    %3 = arith.cmpf ogt, %1, %2 : vector<64x16xf32>
    %cst_1 = arith.constant 0.000000e+00 : f32
    %4 = vector.broadcast %cst_1 : f32 to vector<64x16xf32>
    %5 = arith.minimumf %1, %4 : vector<64x16xf32>
    %6 = math.exp %5 : vector<64x16xf32>
    %cst_2 = arith.constant 1.000000e+00 : f32
    %7 = vector.broadcast %cst_2 : f32 to vector<64x16xf32>
    %8 = arith.subf %6, %7 : vector<64x16xf32>
    %9 = arith.select %3, %1, %8 : vector<64x16xi1>, vector<64x16xf32>
    %10 = arith.truncf %9 : vector<64x16xf32> to vector<64x16xbf16>
    %11 = vector.extract_strided_slice %10 {offsets = [7, 0], sizes = [32, 16], strides = [1, 1]} : vector<64x16xbf16> to vector<32x16xbf16>
    %12 = vector.extract_strided_slice %10 {offsets = [8, 0], sizes = [32, 16], strides = [1, 1]} : vector<64x16xbf16> to vector<32x16xbf16>
    %13 = vector.extract_strided_slice %10 {offsets = [9, 0], sizes = [32, 16], strides = [1, 1]} : vector<64x16xbf16> to vector<32x16xbf16>
    %14 = vector.extract_strided_slice %10 {offsets = [15, 0], sizes = [32, 16], strides = [1, 1]} : vector<64x16xbf16> to vector<32x16xbf16>
    %15 = vector.extract_strided_slice %10 {offsets = [16, 0], sizes = [32, 16], strides = [1, 1]} : vector<64x16xbf16> to vector<32x16xbf16>
    %16 = vector.extract_strided_slice %10 {offsets = [17, 0], sizes = [32, 16], strides = [1, 1]} : vector<64x16xbf16> to vector<32x16xbf16>
    %17 = vector.extract_strided_slice %10 {offsets = [23, 0], sizes = [32, 16], strides = [1, 1]} : vector<64x16xbf16> to vector<32x16xbf16>
    %18 = vector.extract_strided_slice %10 {offsets = [24, 0], sizes = [32, 16], strides = [1, 1]} : vector<64x16xbf16> to vector<32x16xbf16>
    %19 = vector.extract_strided_slice %10 {offsets = [25, 0], sizes = [32, 16], strides = [1, 1]} : vector<64x16xbf16> to vector<32x16xbf16>
    %c16 = arith.constant 16 : index
    %c0_3 = arith.constant 0 : index
    %20 = vector.load %arg6[%c16, %c0_3] : memref<64x16xbf16, #tpu.memory_space<vmem>>, vector<32x16xbf16>
    %21 = tpu.concatenate %11, %12, %13, %14, %15, %16, %17, %18, %19, %20 in 1 : vector<32x16xbf16>, vector<32x16xbf16>, vector<32x16xbf16>, vector<32x16xbf16>, vector<32x16xbf16>, vector<32x16xbf16>, vector<32x16xbf16>, vector<32x16xbf16>, vector<32x16xbf16>, vector<32x16xbf16> -> vector<32x160xbf16>
    %c0_4 = arith.constant 0 : index
    %c0_5 = arith.constant 0 : index
    %22 = vector.load %arg3[%c0_4, %c0_5] : memref<160x8xbf16, #tpu.memory_space<vmem>>, vector<160x8xbf16>
    %cst_6 = arith.constant dense<0.000000e+00> : vector<32x8xf32>
    %23 = tpu.matmul %21, %22, %cst_6 {dimension_numbers = #tpu.dot_dimension_numbers<[1], [0], [0], [1], [0, 0, 1, 1], [], []>} : vector<32x160xbf16>, vector<160x8xbf16>, vector<32x8xf32> -> vector<32x8xf32>
    %c0_7 = arith.constant 0 : index
    %c0_8 = arith.constant 0 : index
    %24 = vector.load %arg5[%c0_7, %c0_8] : memref<1x8xf32, #tpu.memory_space<vmem>>, vector<1x8xf32>
    %25 = vector.broadcast %24 : vector<1x8xf32> to vector<32x8xf32>
    %26 = arith.addf %23, %25 : vector<32x8xf32>
    %c0_9 = arith.constant 0 : index
    %c0_10 = arith.constant 0 : index
    %27 = vector.load %arg4[%c0_9, %c0_10] : memref<32x1xf32, #tpu.memory_space<vmem>>, vector<32x1xf32>
    %28 = vector.broadcast %27 : vector<32x1xf32> to vector<32x8xf32>
    %29 = arith.mulf %26, %28 : vector<32x8xf32>
    %30 = arith.truncf %29 : vector<32x8xf32> to vector<32x8xbf16>
    %cst_11 = arith.constant 0.000000e+00 : bf16
    %31 = vector.broadcast %cst_11 : bf16 to vector<16x8xbf16>
    %c0_12 = arith.constant 0 : index
    %c0_13 = arith.constant 0 : index
    %32 = vector.load %arg7[%c0_12, %c0_13] : memref<64x8xbf16, #tpu.memory_space<vmem>>, vector<16x8xbf16>
    tpu.vector_store %arg7[%c0_12, %c0_13], %31 {strides = array<i32>} : memref<64x8xbf16, #tpu.memory_space<vmem>>, vector<16x8xbf16>,
    %c48 = arith.constant 48 : index
    %c0_14 = arith.constant 0 : index
    %33 = vector.load %arg7[%c48, %c0_14] : memref<64x8xbf16, #tpu.memory_space<vmem>>, vector<16x8xbf16>
    tpu.vector_store %arg7[%c48, %c0_14], %31 {strides = array<i32>} : memref<64x8xbf16, #tpu.memory_space<vmem>>, vector<16x8xbf16>,
    %c16_15 = arith.constant 16 : index
    %c0_16 = arith.constant 0 : index
    %34 = vector.load %arg7[%c16_15, %c0_16] : memref<64x8xbf16, #tpu.memory_space<vmem>>, vector<32x8xbf16>
    tpu.vector_store %arg7[%c16_15, %c0_16], %30 {strides = array<i32>} : memref<64x8xbf16, #tpu.memory_space<vmem>>, vector<32x8xbf16>,
    return
  }
  func.func @transform_0(%arg0: i32, %arg1: i32) -> (i32, i32) {
    %c0_i32 = arith.constant 0 : i32
    %c0_i32_0 = arith.constant 0 : i32
    return %arg0, %c0_i32 : i32, i32
  }
  func.func @transform_1(%arg0: i32, %arg1: i32) -> (i32, i32) {
    %c0_i32 = arith.constant 0 : i32
    %c0_i32_0 = arith.constant 0 : i32
    return %c0_i32, %arg1 : i32, i32
  }
  func.func @transform_2(%arg0: i32, %arg1: i32) -> (i32, i32) {
    %c0_i32 = arith.constant 0 : i32
    %c0_i32_0 = arith.constant 0 : i32
    %c0_i32_1 = arith.constant 0 : i32
    return %c0_i32, %c0_i32_0 : i32, i32
  }
  func.func @transform_3(%arg0: i32, %arg1: i32) -> (i32, i32) {
    %c0_i32 = arith.constant 0 : i32
    %c0_i32_0 = arith.constant 0 : i32
    return %c0_i32, %arg1 : i32, i32
  }
  func.func @transform_4(%arg0: i32, %arg1: i32) -> (i32, i32) {
    %c0_i32 = arith.constant 0 : i32
    %c0_i32_0 = arith.constant 0 : i32
    return %arg0, %c0_i32 : i32, i32
  }
  func.func @transform_5(%arg0: i32, %arg1: i32) -> (i32, i32) {
    %c0_i32 = arith.constant 0 : i32
    return %arg0, %arg1 : i32, i32
  }
}

module attributes {stable_mosaic.version = 11 : i64} {
  func.func @kernel(%arg0: i32, %arg1: i32, %arg2: memref<176x8xbf16, #tpu.memory_space<vmem>>, %arg3: memref<72x8xbf16, #tpu.memory_space<vmem>>, %arg4: memref<128x1xf32, #tpu.memory_space<vmem>>, %arg5: memref<176x8xbf16, #tpu.memory_space<vmem>>) attributes {dimension_semantics = [#tpu.dimension_semantics<parallel>, #tpu.dimension_semantics<parallel>], iteration_bounds = array<i64: 2, 1>, scalar_prefetch = 0 : i64, scratch_operands = 0 : i64, tpu.core_type = #tpu.core_type<tc>, window_params = [{transform_indices = @transform_0, window_bounds = array<i64: 176, 8>}, {transform_indices = @transform_1, window_bounds = array<i64: 72, 8>}, {pipeline_mode = #tpu.pipeline_mode<synchronous>, transform_indices = @transform_2, window_bounds = array<i64: 128, 1>}, {transform_indices = @transform_3, window_bounds = array<i64: 176, 8>}]} {
    %c0 = arith.constant 0 : index
    %c0_0 = arith.constant 0 : index
    %0 = vector.load %arg2[%c0, %c0_0] : memref<176x8xbf16, #tpu.memory_space<vmem>>, vector<176x8xbf16>
    %1 = arith.extf %0 : vector<176x8xbf16> to vector<176x8xf32>
    %cst = arith.constant 0.000000e+00 : f32
    %2 = vector.broadcast %cst : f32 to vector<176x8xf32>
    %3 = arith.cmpf ogt, %1, %2 : vector<176x8xf32>
    %cst_1 = arith.constant 0.000000e+00 : f32
    %4 = vector.broadcast %cst_1 : f32 to vector<176x8xf32>
    %5 = arith.minimumf %1, %4 : vector<176x8xf32>
    %6 = math.exp %5 : vector<176x8xf32>
    %cst_2 = arith.constant 1.000000e+00 : f32
    %7 = vector.broadcast %cst_2 : f32 to vector<176x8xf32>
    %8 = arith.subf %6, %7 : vector<176x8xf32>
    %9 = arith.select %3, %1, %8 : vector<176x8xi1>, vector<176x8xf32>
    %10 = arith.truncf %9 : vector<176x8xf32> to vector<176x8xbf16>
    %11 = vector.extract_strided_slice %10 {offsets = [7, 0], sizes = [128, 8], strides = [1, 1]} : vector<176x8xbf16> to vector<128x8xbf16>
    %12 = vector.extract_strided_slice %10 {offsets = [8, 0], sizes = [128, 8], strides = [1, 1]} : vector<176x8xbf16> to vector<128x8xbf16>
    %13 = vector.extract_strided_slice %10 {offsets = [9, 0], sizes = [128, 8], strides = [1, 1]} : vector<176x8xbf16> to vector<128x8xbf16>
    %14 = vector.extract_strided_slice %10 {offsets = [23, 0], sizes = [128, 8], strides = [1, 1]} : vector<176x8xbf16> to vector<128x8xbf16>
    %15 = vector.extract_strided_slice %10 {offsets = [24, 0], sizes = [128, 8], strides = [1, 1]} : vector<176x8xbf16> to vector<128x8xbf16>
    %16 = vector.extract_strided_slice %10 {offsets = [25, 0], sizes = [128, 8], strides = [1, 1]} : vector<176x8xbf16> to vector<128x8xbf16>
    %17 = vector.extract_strided_slice %10 {offsets = [39, 0], sizes = [128, 8], strides = [1, 1]} : vector<176x8xbf16> to vector<128x8xbf16>
    %18 = vector.extract_strided_slice %10 {offsets = [40, 0], sizes = [128, 8], strides = [1, 1]} : vector<176x8xbf16> to vector<128x8xbf16>
    %19 = vector.extract_strided_slice %10 {offsets = [41, 0], sizes = [128, 8], strides = [1, 1]} : vector<176x8xbf16> to vector<128x8xbf16>
    %20 = tpu.concatenate %11, %12, %13, %14, %15, %16, %17, %18, %19 in 1 : vector<128x8xbf16>, vector<128x8xbf16>, vector<128x8xbf16>, vector<128x8xbf16>, vector<128x8xbf16>, vector<128x8xbf16>, vector<128x8xbf16>, vector<128x8xbf16>, vector<128x8xbf16> -> vector<128x72xbf16>
    %c0_3 = arith.constant 0 : index
    %c0_4 = arith.constant 0 : index
    %21 = vector.load %arg3[%c0_3, %c0_4] : memref<72x8xbf16, #tpu.memory_space<vmem>>, vector<72x8xbf16>
    %cst_5 = arith.constant dense<0.000000e+00> : vector<128x8xf32>
    %22 = tpu.matmul %20, %21, %cst_5 {dimension_numbers = #tpu.dot_dimension_numbers<[1], [0], [0], [1], [0, 0, 1, 1], [], []>} : vector<128x72xbf16>, vector<72x8xbf16>, vector<128x8xf32> -> vector<128x8xf32>
    %c0_6 = arith.constant 0 : index
    %c0_7 = arith.constant 0 : index
    %23 = vector.load %arg4[%c0_6, %c0_7] : memref<128x1xf32, #tpu.memory_space<vmem>>, vector<128x1xf32>
    %24 = vector.broadcast %23 : vector<128x1xf32> to vector<128x8xf32>
    %25 = arith.mulf %22, %24 : vector<128x8xf32>
    %26 = arith.truncf %25 : vector<128x8xf32> to vector<128x8xbf16>
    %cst_8 = arith.constant 0.000000e+00 : bf16
    %27 = vector.broadcast %cst_8 : bf16 to vector<24x8xbf16>
    %c0_9 = arith.constant 0 : index
    %c0_10 = arith.constant 0 : index
    %28 = vector.load %arg5[%c0_9, %c0_10] : memref<176x8xbf16, #tpu.memory_space<vmem>>, vector<24x8xbf16>
    tpu.vector_store %arg5[%c0_9, %c0_10], %27 {strides = array<i32>} : memref<176x8xbf16, #tpu.memory_space<vmem>>, vector<24x8xbf16>,
    %c152 = arith.constant 152 : index
    %c0_11 = arith.constant 0 : index
    %29 = vector.load %arg5[%c152, %c0_11] : memref<176x8xbf16, #tpu.memory_space<vmem>>, vector<24x8xbf16>
    tpu.vector_store %arg5[%c152, %c0_11], %27 {strides = array<i32>} : memref<176x8xbf16, #tpu.memory_space<vmem>>, vector<24x8xbf16>,
    %c24 = arith.constant 24 : index
    %c0_12 = arith.constant 0 : index
    %30 = vector.load %arg5[%c24, %c0_12] : memref<176x8xbf16, #tpu.memory_space<vmem>>, vector<128x8xbf16>
    tpu.vector_store %arg5[%c24, %c0_12], %26 {strides = array<i32>} : memref<176x8xbf16, #tpu.memory_space<vmem>>, vector<128x8xbf16>,
    return
  }
  func.func @transform_0(%arg0: i32, %arg1: i32) -> (i32, i32) {
    %c0_i32 = arith.constant 0 : i32
    %c0_i32_0 = arith.constant 0 : i32
    return %arg0, %c0_i32 : i32, i32
  }
  func.func @transform_1(%arg0: i32, %arg1: i32) -> (i32, i32) {
    %c0_i32 = arith.constant 0 : i32
    %c0_i32_0 = arith.constant 0 : i32
    return %c0_i32, %arg1 : i32, i32
  }
  func.func @transform_2(%arg0: i32, %arg1: i32) -> (i32, i32) {
    %c0_i32 = arith.constant 0 : i32
    %c0_i32_0 = arith.constant 0 : i32
    %c0_i32_1 = arith.constant 0 : i32
    return %c0_i32, %c0_i32_0 : i32, i32
  }
  func.func @transform_3(%arg0: i32, %arg1: i32) -> (i32, i32) {
    %c0_i32 = arith.constant 0 : i32
    return %arg0, %arg1 : i32, i32
  }
}

module attributes {stable_mosaic.version = 11 : i64} {
  func.func @kernel(%arg0: i32, %arg1: i32, %arg2: memref<176x8xbf16, #tpu.memory_space<vmem>>, %arg3: memref<80x8xbf16, #tpu.memory_space<vmem>>, %arg4: memref<128x1xf32, #tpu.memory_space<vmem>>, %arg5: memref<1x8xf32, #tpu.memory_space<vmem>>, %arg6: memref<176x8xbf16, #tpu.memory_space<vmem>>, %arg7: memref<176x8xbf16, #tpu.memory_space<vmem>>) attributes {dimension_semantics = [#tpu.dimension_semantics<parallel>, #tpu.dimension_semantics<parallel>], iteration_bounds = array<i64: 2, 1>, scalar_prefetch = 0 : i64, scratch_operands = 0 : i64, tpu.core_type = #tpu.core_type<tc>, window_params = [{transform_indices = @transform_0, window_bounds = array<i64: 176, 8>}, {transform_indices = @transform_1, window_bounds = array<i64: 80, 8>}, {pipeline_mode = #tpu.pipeline_mode<synchronous>, transform_indices = @transform_2, window_bounds = array<i64: 128, 1>}, {transform_indices = @transform_3, window_bounds = array<i64: 1, 8>}, {transform_indices = @transform_4, window_bounds = array<i64: 176, 8>}, {transform_indices = @transform_5, window_bounds = array<i64: 176, 8>}]} {
    %c0 = arith.constant 0 : index
    %c0_0 = arith.constant 0 : index
    %0 = vector.load %arg2[%c0, %c0_0] : memref<176x8xbf16, #tpu.memory_space<vmem>>, vector<176x8xbf16>
    %1 = arith.extf %0 : vector<176x8xbf16> to vector<176x8xf32>
    %cst = arith.constant 0.000000e+00 : f32
    %2 = vector.broadcast %cst : f32 to vector<176x8xf32>
    %3 = arith.cmpf ogt, %1, %2 : vector<176x8xf32>
    %cst_1 = arith.constant 0.000000e+00 : f32
    %4 = vector.broadcast %cst_1 : f32 to vector<176x8xf32>
    %5 = arith.minimumf %1, %4 : vector<176x8xf32>
    %6 = math.exp %5 : vector<176x8xf32>
    %cst_2 = arith.constant 1.000000e+00 : f32
    %7 = vector.broadcast %cst_2 : f32 to vector<176x8xf32>
    %8 = arith.subf %6, %7 : vector<176x8xf32>
    %9 = arith.select %3, %1, %8 : vector<176x8xi1>, vector<176x8xf32>
    %10 = arith.truncf %9 : vector<176x8xf32> to vector<176x8xbf16>
    %11 = vector.extract_strided_slice %10 {offsets = [7, 0], sizes = [128, 8], strides = [1, 1]} : vector<176x8xbf16> to vector<128x8xbf16>
    %12 = vector.extract_strided_slice %10 {offsets = [8, 0], sizes = [128, 8], strides = [1, 1]} : vector<176x8xbf16> to vector<128x8xbf16>
    %13 = vector.extract_strided_slice %10 {offsets = [9, 0], sizes = [128, 8], strides = [1, 1]} : vector<176x8xbf16> to vector<128x8xbf16>
    %14 = vector.extract_strided_slice %10 {offsets = [23, 0], sizes = [128, 8], strides = [1, 1]} : vector<176x8xbf16> to vector<128x8xbf16>
    %15 = vector.extract_strided_slice %10 {offsets = [24, 0], sizes = [128, 8], strides = [1, 1]} : vector<176x8xbf16> to vector<128x8xbf16>
    %16 = vector.extract_strided_slice %10 {offsets = [25, 0], sizes = [128, 8], strides = [1, 1]} : vector<176x8xbf16> to vector<128x8xbf16>
    %17 = vector.extract_strided_slice %10 {offsets = [39, 0], sizes = [128, 8], strides = [1, 1]} : vector<176x8xbf16> to vector<128x8xbf16>
    %18 = vector.extract_strided_slice %10 {offsets = [40, 0], sizes = [128, 8], strides = [1, 1]} : vector<176x8xbf16> to vector<128x8xbf16>
    %19 = vector.extract_strided_slice %10 {offsets = [41, 0], sizes = [128, 8], strides = [1, 1]} : vector<176x8xbf16> to vector<128x8xbf16>
    %c24 = arith.constant 24 : index
    %c0_3 = arith.constant 0 : index
    %20 = vector.load %arg6[%c24, %c0_3] : memref<176x8xbf16, #tpu.memory_space<vmem>>, vector<128x8xbf16>
    %21 = tpu.concatenate %11, %12, %13, %14, %15, %16, %17, %18, %19, %20 in 1 : vector<128x8xbf16>, vector<128x8xbf16>, vector<128x8xbf16>, vector<128x8xbf16>, vector<128x8xbf16>, vector<128x8xbf16>, vector<128x8xbf16>, vector<128x8xbf16>, vector<128x8xbf16>, vector<128x8xbf16> -> vector<128x80xbf16>
    %c0_4 = arith.constant 0 : index
    %c0_5 = arith.constant 0 : index
    %22 = vector.load %arg3[%c0_4, %c0_5] : memref<80x8xbf16, #tpu.memory_space<vmem>>, vector<80x8xbf16>
    %cst_6 = arith.constant dense<0.000000e+00> : vector<128x8xf32>
    %23 = tpu.matmul %21, %22, %cst_6 {dimension_numbers = #tpu.dot_dimension_numbers<[1], [0], [0], [1], [0, 0, 1, 1], [], []>} : vector<128x80xbf16>, vector<80x8xbf16>, vector<128x8xf32> -> vector<128x8xf32>
    %c0_7 = arith.constant 0 : index
    %c0_8 = arith.constant 0 : index
    %24 = vector.load %arg5[%c0_7, %c0_8] : memref<1x8xf32, #tpu.memory_space<vmem>>, vector<1x8xf32>
    %25 = vector.broadcast %24 : vector<1x8xf32> to vector<128x8xf32>
    %26 = arith.addf %23, %25 : vector<128x8xf32>
    %c0_9 = arith.constant 0 : index
    %c0_10 = arith.constant 0 : index
    %27 = vector.load %arg4[%c0_9, %c0_10] : memref<128x1xf32, #tpu.memory_space<vmem>>, vector<128x1xf32>
    %28 = vector.broadcast %27 : vector<128x1xf32> to vector<128x8xf32>
    %29 = arith.mulf %26, %28 : vector<128x8xf32>
    %30 = arith.truncf %29 : vector<128x8xf32> to vector<128x8xbf16>
    %cst_11 = arith.constant 0.000000e+00 : bf16
    %31 = vector.broadcast %cst_11 : bf16 to vector<24x8xbf16>
    %c0_12 = arith.constant 0 : index
    %c0_13 = arith.constant 0 : index
    %32 = vector.load %arg7[%c0_12, %c0_13] : memref<176x8xbf16, #tpu.memory_space<vmem>>, vector<24x8xbf16>
    tpu.vector_store %arg7[%c0_12, %c0_13], %31 {strides = array<i32>} : memref<176x8xbf16, #tpu.memory_space<vmem>>, vector<24x8xbf16>,
    %c152 = arith.constant 152 : index
    %c0_14 = arith.constant 0 : index
    %33 = vector.load %arg7[%c152, %c0_14] : memref<176x8xbf16, #tpu.memory_space<vmem>>, vector<24x8xbf16>
    tpu.vector_store %arg7[%c152, %c0_14], %31 {strides = array<i32>} : memref<176x8xbf16, #tpu.memory_space<vmem>>, vector<24x8xbf16>,
    %c24_15 = arith.constant 24 : index
    %c0_16 = arith.constant 0 : index
    %34 = vector.load %arg7[%c24_15, %c0_16] : memref<176x8xbf16, #tpu.memory_space<vmem>>, vector<128x8xbf16>
    tpu.vector_store %arg7[%c24_15, %c0_16], %30 {strides = array<i32>} : memref<176x8xbf16, #tpu.memory_space<vmem>>, vector<128x8xbf16>,
    return
  }
  func.func @transform_0(%arg0: i32, %arg1: i32) -> (i32, i32) {
    %c0_i32 = arith.constant 0 : i32
    %c0_i32_0 = arith.constant 0 : i32
    return %arg0, %c0_i32 : i32, i32
  }
  func.func @transform_1(%arg0: i32, %arg1: i32) -> (i32, i32) {
    %c0_i32 = arith.constant 0 : i32
    %c0_i32_0 = arith.constant 0 : i32
    return %c0_i32, %arg1 : i32, i32
  }
  func.func @transform_2(%arg0: i32, %arg1: i32) -> (i32, i32) {
    %c0_i32 = arith.constant 0 : i32
    %c0_i32_0 = arith.constant 0 : i32
    %c0_i32_1 = arith.constant 0 : i32
    return %c0_i32, %c0_i32_0 : i32, i32
  }
  func.func @transform_3(%arg0: i32, %arg1: i32) -> (i32, i32) {
    %c0_i32 = arith.constant 0 : i32
    %c0_i32_0 = arith.constant 0 : i32
    return %c0_i32, %arg1 : i32, i32
  }
  func.func @transform_4(%arg0: i32, %arg1: i32) -> (i32, i32) {
    %c0_i32 = arith.constant 0 : i32
    %c0_i32_0 = arith.constant 0 : i32
    return %arg0, %c0_i32 : i32, i32
  }
  func.func @transform_5(%arg0: i32, %arg1: i32) -> (i32, i32) {
    %c0_i32 = arith.constant 0 : i32
    return %arg0, %arg1 : i32, i32
  }
}

module attributes {stable_mosaic.version = 11 : i64} {
  func.func @kernel(%arg0: i32, %arg1: i32, %arg2: memref<176x8xbf16, #tpu.memory_space<vmem>>, %arg3: memref<80x4xbf16, #tpu.memory_space<vmem>>, %arg4: memref<128x1xf32, #tpu.memory_space<vmem>>, %arg5: memref<1x4xf32, #tpu.memory_space<vmem>>, %arg6: memref<176x8xbf16, #tpu.memory_space<vmem>>, %arg7: memref<176x4xbf16, #tpu.memory_space<vmem>>) attributes {dimension_semantics = [#tpu.dimension_semantics<parallel>, #tpu.dimension_semantics<parallel>], iteration_bounds = array<i64: 2, 1>, scalar_prefetch = 0 : i64, scratch_operands = 0 : i64, tpu.core_type = #tpu.core_type<tc>, window_params = [{transform_indices = @transform_0, window_bounds = array<i64: 176, 8>}, {transform_indices = @transform_1, window_bounds = array<i64: 80, 4>}, {pipeline_mode = #tpu.pipeline_mode<synchronous>, transform_indices = @transform_2, window_bounds = array<i64: 128, 1>}, {transform_indices = @transform_3, window_bounds = array<i64: 1, 4>}, {transform_indices = @transform_4, window_bounds = array<i64: 176, 8>}, {transform_indices = @transform_5, window_bounds = array<i64: 176, 4>}]} {
    %c0 = arith.constant 0 : index
    %c0_0 = arith.constant 0 : index
    %0 = vector.load %arg2[%c0, %c0_0] : memref<176x8xbf16, #tpu.memory_space<vmem>>, vector<176x8xbf16>
    %1 = arith.extf %0 : vector<176x8xbf16> to vector<176x8xf32>
    %cst = arith.constant 0.000000e+00 : f32
    %2 = vector.broadcast %cst : f32 to vector<176x8xf32>
    %3 = arith.cmpf ogt, %1, %2 : vector<176x8xf32>
    %cst_1 = arith.constant 0.000000e+00 : f32
    %4 = vector.broadcast %cst_1 : f32 to vector<176x8xf32>
    %5 = arith.minimumf %1, %4 : vector<176x8xf32>
    %6 = math.exp %5 : vector<176x8xf32>
    %cst_2 = arith.constant 1.000000e+00 : f32
    %7 = vector.broadcast %cst_2 : f32 to vector<176x8xf32>
    %8 = arith.subf %6, %7 : vector<176x8xf32>
    %9 = arith.select %3, %1, %8 : vector<176x8xi1>, vector<176x8xf32>
    %10 = arith.truncf %9 : vector<176x8xf32> to vector<176x8xbf16>
    %11 = vector.extract_strided_slice %10 {offsets = [7, 0], sizes = [128, 8], strides = [1, 1]} : vector<176x8xbf16> to vector<128x8xbf16>
    %12 = vector.extract_strided_slice %10 {offsets = [8, 0], sizes = [128, 8], strides = [1, 1]} : vector<176x8xbf16> to vector<128x8xbf16>
    %13 = vector.extract_strided_slice %10 {offsets = [9, 0], sizes = [128, 8], strides = [1, 1]} : vector<176x8xbf16> to vector<128x8xbf16>
    %14 = vector.extract_strided_slice %10 {offsets = [23, 0], sizes = [128, 8], strides = [1, 1]} : vector<176x8xbf16> to vector<128x8xbf16>
    %15 = vector.extract_strided_slice %10 {offsets = [24, 0], sizes = [128, 8], strides = [1, 1]} : vector<176x8xbf16> to vector<128x8xbf16>
    %16 = vector.extract_strided_slice %10 {offsets = [25, 0], sizes = [128, 8], strides = [1, 1]} : vector<176x8xbf16> to vector<128x8xbf16>
    %17 = vector.extract_strided_slice %10 {offsets = [39, 0], sizes = [128, 8], strides = [1, 1]} : vector<176x8xbf16> to vector<128x8xbf16>
    %18 = vector.extract_strided_slice %10 {offsets = [40, 0], sizes = [128, 8], strides = [1, 1]} : vector<176x8xbf16> to vector<128x8xbf16>
    %19 = vector.extract_strided_slice %10 {offsets = [41, 0], sizes = [128, 8], strides = [1, 1]} : vector<176x8xbf16> to vector<128x8xbf16>
    %c24 = arith.constant 24 : index
    %c0_3 = arith.constant 0 : index
    %20 = vector.load %arg6[%c24, %c0_3] : memref<176x8xbf16, #tpu.memory_space<vmem>>, vector<128x8xbf16>
    %21 = tpu.concatenate %11, %12, %13, %14, %15, %16, %17, %18, %19, %20 in 1 : vector<128x8xbf16>, vector<128x8xbf16>, vector<128x8xbf16>, vector<128x8xbf16>, vector<128x8xbf16>, vector<128x8xbf16>, vector<128x8xbf16>, vector<128x8xbf16>, vector<128x8xbf16>, vector<128x8xbf16> -> vector<128x80xbf16>
    %c0_4 = arith.constant 0 : index
    %c0_5 = arith.constant 0 : index
    %22 = vector.load %arg3[%c0_4, %c0_5] : memref<80x4xbf16, #tpu.memory_space<vmem>>, vector<80x4xbf16>
    %cst_6 = arith.constant dense<0.000000e+00> : vector<128x4xf32>
    %23 = tpu.matmul %21, %22, %cst_6 {dimension_numbers = #tpu.dot_dimension_numbers<[1], [0], [0], [1], [0, 0, 1, 1], [], []>} : vector<128x80xbf16>, vector<80x4xbf16>, vector<128x4xf32> -> vector<128x4xf32>
    %c0_7 = arith.constant 0 : index
    %c0_8 = arith.constant 0 : index
    %24 = vector.load %arg5[%c0_7, %c0_8] : memref<1x4xf32, #tpu.memory_space<vmem>>, vector<1x4xf32>
    %25 = vector.broadcast %24 : vector<1x4xf32> to vector<128x4xf32>
    %26 = arith.addf %23, %25 : vector<128x4xf32>
    %c0_9 = arith.constant 0 : index
    %c0_10 = arith.constant 0 : index
    %27 = vector.load %arg4[%c0_9, %c0_10] : memref<128x1xf32, #tpu.memory_space<vmem>>, vector<128x1xf32>
    %28 = vector.broadcast %27 : vector<128x1xf32> to vector<128x4xf32>
    %29 = arith.mulf %26, %28 : vector<128x4xf32>
    %30 = arith.truncf %29 : vector<128x4xf32> to vector<128x4xbf16>
    %cst_11 = arith.constant 0.000000e+00 : bf16
    %31 = vector.broadcast %cst_11 : bf16 to vector<24x4xbf16>
    %c0_12 = arith.constant 0 : index
    %c0_13 = arith.constant 0 : index
    %32 = vector.load %arg7[%c0_12, %c0_13] : memref<176x4xbf16, #tpu.memory_space<vmem>>, vector<24x4xbf16>
    tpu.vector_store %arg7[%c0_12, %c0_13], %31 {strides = array<i32>} : memref<176x4xbf16, #tpu.memory_space<vmem>>, vector<24x4xbf16>,
    %c152 = arith.constant 152 : index
    %c0_14 = arith.constant 0 : index
    %33 = vector.load %arg7[%c152, %c0_14] : memref<176x4xbf16, #tpu.memory_space<vmem>>, vector<24x4xbf16>
    tpu.vector_store %arg7[%c152, %c0_14], %31 {strides = array<i32>} : memref<176x4xbf16, #tpu.memory_space<vmem>>, vector<24x4xbf16>,
    %c24_15 = arith.constant 24 : index
    %c0_16 = arith.constant 0 : index
    %34 = vector.load %arg7[%c24_15, %c0_16] : memref<176x4xbf16, #tpu.memory_space<vmem>>, vector<128x4xbf16>
    tpu.vector_store %arg7[%c24_15, %c0_16], %30 {strides = array<i32>} : memref<176x4xbf16, #tpu.memory_space<vmem>>, vector<128x4xbf16>,
    return
  }
  func.func @transform_0(%arg0: i32, %arg1: i32) -> (i32, i32) {
    %c0_i32 = arith.constant 0 : i32
    %c0_i32_0 = arith.constant 0 : i32
    return %arg0, %c0_i32 : i32, i32
  }
  func.func @transform_1(%arg0: i32, %arg1: i32) -> (i32, i32) {
    %c0_i32 = arith.constant 0 : i32
    %c0_i32_0 = arith.constant 0 : i32
    return %c0_i32, %arg1 : i32, i32
  }
  func.func @transform_2(%arg0: i32, %arg1: i32) -> (i32, i32) {
    %c0_i32 = arith.constant 0 : i32
    %c0_i32_0 = arith.constant 0 : i32
    %c0_i32_1 = arith.constant 0 : i32
    return %c0_i32, %c0_i32_0 : i32, i32
  }
  func.func @transform_3(%arg0: i32, %arg1: i32) -> (i32, i32) {
    %c0_i32 = arith.constant 0 : i32
    %c0_i32_0 = arith.constant 0 : i32
    return %c0_i32, %arg1 : i32, i32
  }
  func.func @transform_4(%arg0: i32, %arg1: i32) -> (i32, i32) {
    %c0_i32 = arith.constant 0 : i32
    %c0_i32_0 = arith.constant 0 : i32
    return %arg0, %c0_i32 : i32, i32
  }
  func.func @transform_5(%arg0: i32, %arg1: i32) -> (i32, i32) {
    %c0_i32 = arith.constant 0 : i32
    return %arg0, %arg1 : i32, i32
  }
}

module attributes {stable_mosaic.version = 11 : i64} {
  func.func @kernel(%arg0: i32, %arg1: i32, %arg2: memref<448x4xbf16, #tpu.memory_space<vmem>>, %arg3: memref<36x3xbf16, #tpu.memory_space<vmem>>, %arg4: memref<384x1xf32, #tpu.memory_space<vmem>>, %arg5: memref<1x3xf32, #tpu.memory_space<vmem>>, %arg6: memref<448x3xf32, #tpu.memory_space<vmem>>) attributes {dimension_semantics = [#tpu.dimension_semantics<parallel>, #tpu.dimension_semantics<parallel>], iteration_bounds = array<i64: 2, 1>, scalar_prefetch = 0 : i64, scratch_operands = 0 : i64, tpu.core_type = #tpu.core_type<tc>, window_params = [{transform_indices = @transform_0, window_bounds = array<i64: 448, 4>}, {transform_indices = @transform_1, window_bounds = array<i64: 36, 3>}, {pipeline_mode = #tpu.pipeline_mode<synchronous>, transform_indices = @transform_2, window_bounds = array<i64: 384, 1>}, {transform_indices = @transform_3, window_bounds = array<i64: 1, 3>}, {transform_indices = @transform_4, window_bounds = array<i64: 448, 3>}]} {
    %c0 = arith.constant 0 : index
    %c0_0 = arith.constant 0 : index
    %0 = vector.load %arg2[%c0, %c0_0] : memref<448x4xbf16, #tpu.memory_space<vmem>>, vector<448x4xbf16>
    %1 = arith.extf %0 : vector<448x4xbf16> to vector<448x4xf32>
    %cst = arith.constant 0.000000e+00 : f32
    %2 = vector.broadcast %cst : f32 to vector<448x4xf32>
    %3 = arith.cmpf ogt, %1, %2 : vector<448x4xf32>
    %cst_1 = arith.constant 0.000000e+00 : f32
    %4 = vector.broadcast %cst_1 : f32 to vector<448x4xf32>
    %5 = arith.minimumf %1, %4 : vector<448x4xf32>
    %6 = math.exp %5 : vector<448x4xf32>
    %cst_2 = arith.constant 1.000000e+00 : f32
    %7 = vector.broadcast %cst_2 : f32 to vector<448x4xf32>
    %8 = arith.subf %6, %7 : vector<448x4xf32>
    %9 = arith.select %3, %1, %8 : vector<448x4xi1>, vector<448x4xf32>
    %10 = arith.truncf %9 : vector<448x4xf32> to vector<448x4xbf16>
    %11 = vector.extract_strided_slice %10 {offsets = [7, 0], sizes = [384, 4], strides = [1, 1]} : vector<448x4xbf16> to vector<384x4xbf16>
    %12 = vector.extract_strided_slice %10 {offsets = [8, 0], sizes = [384, 4], strides = [1, 1]} : vector<448x4xbf16> to vector<384x4xbf16>
    %13 = vector.extract_strided_slice %10 {offsets = [9, 0], sizes = [384, 4], strides = [1, 1]} : vector<448x4xbf16> to vector<384x4xbf16>
    %14 = vector.extract_strided_slice %10 {offsets = [31, 0], sizes = [384, 4], strides = [1, 1]} : vector<448x4xbf16> to vector<384x4xbf16>
    %15 = vector.extract_strided_slice %10 {offsets = [32, 0], sizes = [384, 4], strides = [1, 1]} : vector<448x4xbf16> to vector<384x4xbf16>
    %16 = vector.extract_strided_slice %10 {offsets = [33, 0], sizes = [384, 4], strides = [1, 1]} : vector<448x4xbf16> to vector<384x4xbf16>
    %17 = vector.extract_strided_slice %10 {offsets = [55, 0], sizes = [384, 4], strides = [1, 1]} : vector<448x4xbf16> to vector<384x4xbf16>
    %18 = vector.extract_strided_slice %10 {offsets = [56, 0], sizes = [384, 4], strides = [1, 1]} : vector<448x4xbf16> to vector<384x4xbf16>
    %19 = vector.extract_strided_slice %10 {offsets = [57, 0], sizes = [384, 4], strides = [1, 1]} : vector<448x4xbf16> to vector<384x4xbf16>
    %20 = tpu.concatenate %11, %12, %13, %14, %15, %16, %17, %18, %19 in 1 : vector<384x4xbf16>, vector<384x4xbf16>, vector<384x4xbf16>, vector<384x4xbf16>, vector<384x4xbf16>, vector<384x4xbf16>, vector<384x4xbf16>, vector<384x4xbf16>, vector<384x4xbf16> -> vector<384x36xbf16>
    %c0_3 = arith.constant 0 : index
    %c0_4 = arith.constant 0 : index
    %21 = vector.load %arg3[%c0_3, %c0_4] : memref<36x3xbf16, #tpu.memory_space<vmem>>, vector<36x3xbf16>
    %cst_5 = arith.constant dense<0.000000e+00> : vector<384x3xf32>
    %22 = tpu.matmul %20, %21, %cst_5 {dimension_numbers = #tpu.dot_dimension_numbers<[1], [0], [0], [1], [0, 0, 1, 1], [], []>} : vector<384x36xbf16>, vector<36x3xbf16>, vector<384x3xf32> -> vector<384x3xf32>
    %c0_6 = arith.constant 0 : index
    %c0_7 = arith.constant 0 : index
    %23 = vector.load %arg5[%c0_6, %c0_7] : memref<1x3xf32, #tpu.memory_space<vmem>>, vector<1x3xf32>
    %24 = vector.broadcast %23 : vector<1x3xf32> to vector<384x3xf32>
    %25 = arith.addf %22, %24 : vector<384x3xf32>
    %c0_8 = arith.constant 0 : index
    %c0_9 = arith.constant 0 : index
    %26 = vector.load %arg4[%c0_8, %c0_9] : memref<384x1xf32, #tpu.memory_space<vmem>>, vector<384x1xf32>
    %27 = vector.broadcast %26 : vector<384x1xf32> to vector<384x3xf32>
    %28 = arith.mulf %25, %27 : vector<384x3xf32>
    %cst_10 = arith.constant 0.000000e+00 : f32
    %29 = vector.broadcast %cst_10 : f32 to vector<32x3xf32>
    %c0_11 = arith.constant 0 : index
    %c0_12 = arith.constant 0 : index
    %30 = vector.load %arg6[%c0_11, %c0_12] : memref<448x3xf32, #tpu.memory_space<vmem>>, vector<32x3xf32>
    tpu.vector_store %arg6[%c0_11, %c0_12], %29 {strides = array<i32>} : memref<448x3xf32, #tpu.memory_space<vmem>>, vector<32x3xf32>,
    %c416 = arith.constant 416 : index
    %c0_13 = arith.constant 0 : index
    %31 = vector.load %arg6[%c416, %c0_13] : memref<448x3xf32, #tpu.memory_space<vmem>>, vector<32x3xf32>
    tpu.vector_store %arg6[%c416, %c0_13], %29 {strides = array<i32>} : memref<448x3xf32, #tpu.memory_space<vmem>>, vector<32x3xf32>,
    %c32 = arith.constant 32 : index
    %c0_14 = arith.constant 0 : index
    %32 = vector.load %arg6[%c32, %c0_14] : memref<448x3xf32, #tpu.memory_space<vmem>>, vector<384x3xf32>
    tpu.vector_store %arg6[%c32, %c0_14], %28 {strides = array<i32>} : memref<448x3xf32, #tpu.memory_space<vmem>>, vector<384x3xf32>,
    return
  }
  func.func @transform_0(%arg0: i32, %arg1: i32) -> (i32, i32) {
    %c0_i32 = arith.constant 0 : i32
    %c0_i32_0 = arith.constant 0 : i32
    return %arg0, %c0_i32 : i32, i32
  }
  func.func @transform_1(%arg0: i32, %arg1: i32) -> (i32, i32) {
    %c0_i32 = arith.constant 0 : i32
    %c0_i32_0 = arith.constant 0 : i32
    return %c0_i32, %arg1 : i32, i32
  }
  func.func @transform_2(%arg0: i32, %arg1: i32) -> (i32, i32) {
    %c0_i32 = arith.constant 0 : i32
    %c0_i32_0 = arith.constant 0 : i32
    %c0_i32_1 = arith.constant 0 : i32
    return %c0_i32, %c0_i32_0 : i32, i32
  }
  func.func @transform_3(%arg0: i32, %arg1: i32) -> (i32, i32) {
    %c0_i32 = arith.constant 0 : i32
    %c0_i32_0 = arith.constant 0 : i32
    return %c0_i32, %arg1 : i32, i32
  }
  func.func @transform_4(%arg0: i32, %arg1: i32) -> (i32, i32) {
    %c0_i32 = arith.constant 0 : i32
    return %arg0, %arg1 : i32, i32
  }
}

</mosaic_0001>

<bundles_post_ra>
// kernel: _lambda_.14
= control target key start
LH: loop header
LB: loop body
LE: loop exit
PB: predicated region body
PF: predicated region fallthrough
CT: control target
= control target key end

     0   :  { %v109_v0 = vmov 0.0   ;;  %vm110_vm0 = vmmov 0   ;;  %vm40_vm1 = vcmask 261120   ;;  %s146_s1 = inlined_call_operand.vmem [shape: bf16[32,128], index: 1, kind: input, shape index: {}]   ;;  %s147_s0 = inlined_call_operand.vmem [shape: f32[2,32], index: 0, kind: input, shape index: {}]   ;;  %s148_s2 = inlined_call_operand.vmem [shape: f32[1,128], index: 2, kind: input, shape index: {}]   ;;  %s149_s3 = inlined_call_operand.vmem [shape: bf16[2,128], index: 3, kind: output, shape index: {}]  }
   0x1   :  { %97 = vmatprep.subr.bf16.mxu0 %v109_v0  ;;  %v107_v1 = vld [vmem:[%s146_s1 + $0x8] sm:$0xff]   ;;  %101 = vmatprep.mubr.msk.bf16.mxu0 %vm110_vm0, %v109_v0  ;;  %v108_v2 = vld [vmem:[%s146_s1] sm:$0xff]  }
   0x2   :  { %98 = vmatpush3.bf16.msra.mxu0 %v107_v1  ;;  %v15_v3 = vld [vmem:[%s147_s0] sm:$0x3] }
   0x3   :  { %99 = vmatprep.subr.bf16.mxu0 %v109_v0  ;;  %v16_v4 = vpack.c.bf16 %v15_v3, %v15_v3  ;;  %v90_v5 = vld [vmem:[%s148_s2] ss:$0 sm:$0xff] }
   0x6   :  { %100 = vmatpush3.bf16.msra.mxu0 %v108_v2 }
   0x9   :  { %102 = vmatmul.mubr.msk.bf16.vlgmr.msra.gmra.mxu0 %vm40_vm1, %v16_v4 }
  0xc9   :  { %v78_v6 = vpop.f32.mrf.mxu0 }
  0xca   :  { %v79_v7 = vadd.f32 %v90_v5, %v78_v6 }
  0xcb   :  { %v103_v8 = vpop.f32.mrf.mxu0 }
  0xcc   :  { %v84_v9 = vpack.c.bf16 %v79_v7, %v79_v7 }
  0xcd   :  { %v81_v10 = vpop.f32.mrf.mxu0 }
  0xce   :  { %85 = vst [vmem:[%s149_s3] sm:$0x1] %v84_v9 }
  0xcf   :  { %v104_v11 = vpop.f32.mrf.mxu0 }

// kernel: _lambda_.15
= control target key start
LH: loop header
LB: loop body
LE: loop exit
PB: predicated region body
PF: predicated region fallthrough
CT: control target
= control target key end

     0   :  { %s955_s12 = smov 0   ;;  %s957_s13 = smov 0   ;;  %s1128_s0 = inlined_call_operand.vmem [shape: bf16[96,32], index: 0, kind: input, shape index: {}]   ;;  %s1129_s1 = inlined_call_operand.vmem [shape: bf16[288,32], index: 1, kind: input, shape index: {}]   ;;  %s1130_s2 = inlined_call_operand.vmem [shape: f32[16,1], index: 2, kind: input, shape index: {}]   ;;  %s1131_s3 = inlined_call_operand.vmem [shape: bf16[96,32], index: 3, kind: output, shape index: {}]  }
   0x1   :  { %s959_s14 = smov 0  }
   0x2 LB: > { %s25_s15 = sadd.s32 1, %s923_s13  ;;  %p762_p0 = scmp.ge.s32.totalorder %s927_s14, 1  ;;  %s927_s14 = sphi %s959_s14, %s13_s14   ;;  %s923_s13 = sphi %s957_s13, %s1133_s13   ;;  %s919_s12 = sphi %s955_s12, %s1132_s12  }
   0x3   : > { %p27_p1 = scmp.ge.s32.totalorder %s25_s15, 2  ;;  %p161_p2 = scmp.lt.s32.totalorder %s927_s14, 3 }
   0x5   : > { %s1135_s15 = smov (%p27_p1, %s25_s15), 0  ;;  %p162_p3 = pnand %p762_p0, %p161_p2 }
   0x6   : > { %s192_s16 = smul.u32 (!%p162_p3), 6, %s919_s12  ;;  %s929_s12 = smov (!%p162_p3), 64  }
   0x7   : > { %165 = sbr.rel (%p162_p3) target bundleno = 395 (0x18b), region = 32  ;;  %s932_s8 = smov (!%p162_p3), 96  }
   0x8   : > { %p193_p4 = scmp.lt.s32.totalorder (!%p162_p3), %s192_s16, 11 }
   0xc   : > { %v875_v0 = vld [vmem:[%s1129_s1 + $0x78] sm:$0xff]   ;;  %s1137_s16 = smov (!%p193_p4, %s192_s16), 11  ;;  %v877_v23 = vld [vmem:[%s1129_s1 + $0x70] sm:$0xff]   ;;  %v879_v25 = vld [vmem:[%s1129_s1 + $0x68] sm:$0xff]   ;;  %vm305_vm6 = vcmask 1042432   ;;  %vm285_vm7 = vcmask 1046528  }
   0xd   : > { %v876_v1 = vld [vmem:[%s1129_s1 + $0x38] sm:$0xff]   ;;  %810 = vmatprep.subr.bf16.mxu0 %v875_v0  ;;  %s763_s21 = sshll.u32 %s1137_s16, 2  ;;  %v878_v24 = vld [vmem:[%s1129_s1 + $0x30] sm:$0xff]   ;;  %v880_v26 = vld [vmem:[%s1129_s1 + $0x28] sm:$0xff]   ;;  %vm263_vm8 = vsmask.f32 7424 }
   0xe   : > { %811 = vmatpush3.bf16.msra.mxu0 %v876_v1  ;;  %s196_s24 = scalar_lea.vmem %s1128_s0, %s763_s21  ;;  %v881_v32 = vld [vmem:[%s1129_s1 + $0x60] sm:$0xff]   ;;  %v883_v46 = vld [vmem:[%s1129_s1 + $0x58] sm:$0xff]   ;;  %v885_v59 = vld [vmem:[%s1129_s1 + $0x50] sm:$0xff]   ;;  %vm395_vm9 = vsmask.f32 4352  ;;  %vm933_vm10 = vmmov 0   ;;  %s209_s22 = scalar_lea.vmem %s1131_s3, %s763_s21 }
   0xf   : > { %v809_v2 = vld [vmem:[%s196_s24 + $0x10] sm:$0xff]   ;;  %v797_v3 = vld [vmem:[%s196_s24] sm:$0xff]   ;;  %v808_v4 = vld [vmem:[%s196_s24 + $0x8] sm:$0xff]   ;;  %812 = vmatprep.subr.bf16.mxu0 %v877_v23  ;;  %s930_s24 = smov 32   ;;  %vm293_vm11 = vcmask 1043456   ;;  %vm331_vm12 = vcmask 261120  }
  0x10   : > { %v806_v5 = vunpack.c.l.bf16 %v809_v2  ;;  %v807_v6 = vunpack.c.h.bf16 %v809_v2  ;;  %v987_v7 = vunpack.c.l.bf16 %v797_v3  ;;  %v989_v8 = vunpack.c.h.bf16 %v797_v3  ;;  %v882_v36 = vld [vmem:[%s1129_s1 + $0x20] sm:$0xff]   ;;  %v884_v49 = vld [vmem:[%s1129_s1 + $0x18] sm:$0xff]   ;;  %v886_v0 = vld [vmem:[%s1129_s1 + $0x10] sm:$0xff]  }
  0x11   : > { %v802_v9 = vunpack.c.l.bf16 %v808_v4  ;;  %v803_v10 = vunpack.c.h.bf16 %v808_v4  ;;  %vm341_vm13 = vcmask 785408   ;;  %vm336_vm14 = vcmask 523264  }
  0x12   : > { %v234_v11 = vmin.f32 %v806_v5, 0.0  ;;  %v235_v12 = vmin.f32 %v807_v6, 0.0  ;;  %v230_v13 = vmin.f32 %v987_v7, 0.0  ;;  %v231_v14 = vmin.f32 %v989_v8, 0.0  ;;  %813 = vmatpush3.bf16.msra.mxu0 %v878_v24  ;;  %v891_v24 = vld [vmem:[%s1129_s1 + $0x40] sm:$0xff]  }
  0x13   : > { %v232_v15 = vmin.f32 %v802_v9, 0.0  ;;  %v233_v16 = vmin.f32 %v803_v10, 0.0  ;;  %vm228_vm0 = vcmp.gt.f32.partialorder %v806_v5, 0.0  ;;  %814 = vmatprep.subr.bf16.mxu0 %v879_v25  ;;  %vm229_vm1 = vcmp.gt.f32.partialorder %v807_v6, 0.0 }
  0x14   : > { %v244_v17 = vmul.f32 1.442695, %v234_v11  ;;  %v246_v18 = vmul.f32 1.442695, %v235_v12  ;;  %v236_v21 = vmul.f32 1.442695, %v230_v13 }
  0x15   : > { %v240_v19 = vmul.f32 1.442695, %v232_v15  ;;  %v242_v20 = vmul.f32 1.442695, %v233_v16  ;;  %v238_v22 = vmul.f32 1.442695, %v231_v14 }
  0x16   : > { %893 = vpow2.f32 %v244_v17  ;;  %815 = vmatpush3.bf16.msra.mxu0 %v880_v26  ;;  %vm226_vm2 = vcmp.gt.f32.partialorder %v802_v9, 0.0  ;;  %vm227_vm3 = vcmp.gt.f32.partialorder %v803_v10, 0.0  ;;  %vm224_vm4 = vcmp.gt.f32.partialorder %v987_v7, 0.0  ;;  %v888_v11 = vld [vmem:[%s1129_s1 + $0x48] sm:$0xff]  }
  0x17   : > { %895 = vpow2.f32 %v246_v18  ;;  %816 = vmatprep.subr.bf16.mxu0 %v881_v32  ;;  %vm225_vm5 = vcmp.gt.f32.partialorder %v989_v8, 0.0  ;;  %v889_v15 = vld [vmem:[%s1129_s1 + $0x8] sm:$0xff]   ;;  %v931_v18 = vmov 0.0   ;;  %vm653_vm15 = vcmask 257024  }
  0x18   : > { %897 = vpow2.f32 %v240_v19  ;;  %835 = vmatprep.subr.bf16.mxu1 %v931_v18  ;;  %839 = vmatprep.mubr.msk.bf16.mxu1 %vm933_vm10, %v931_v18 }
  0x19   : > { %899 = vpow2.f32 %v242_v20 }
  0x1a   : > { %901 = vpow2.f32 %v236_v21  ;;  %817 = vmatpush3.bf16.msra.mxu0 %v882_v36 }
  0x1b   : > { %903 = vpow2.f32 %v238_v22  ;;  %818 = vmatprep.subr.bf16.mxu0 %v883_v46  ;;  %v890_v22 = vld [vmem:[%s1129_s1 + $0x80] sm:$0xff]  }
  0x1e   : > { %819 = vmatpush3.bf16.msra.mxu0 %v884_v49 }
  0x1f   : > { %820 = vmatprep.subr.bf16.mxu0 %v885_v59 }
  0x22   : > { %821 = vmatpush3.bf16.msra.mxu0 %v886_v0 }
  0x23   : > { %v894_v27 = vpop.eup %893  ;;  %822 = vmatprep.subr.bf16.mxu0 %v888_v11 }
  0x24   : > { %v896_v28 = vpop.eup %895  ;;  %v769_v29 = vadd.f32 -1.0, %v894_v27 }
  0x25   : > { %v898_v30 = vpop.eup %897  ;;  %v770_v31 = vadd.f32 -1.0, %v896_v28  ;;  %v892_v28 = vld [vmem:[%s1129_s1] sm:$0xff]  }
  0x26   : > { %v900_v33 = vpop.eup %899  ;;  %v258_v34 = vsel %vm228_vm0, %v806_v5, %v769_v29  ;;  %v767_v35 = vadd.f32 -1.0, %v898_v30  ;;  %823 = vmatpush3.bf16.msra.mxu0 %v889_v15 }
  0x27   : > { %v902_v37 = vpop.eup %901  ;;  %v259_v38 = vsel %vm229_vm1, %v807_v6, %v770_v31  ;;  %v768_v39 = vadd.f32 -1.0, %v900_v33  ;;  %824 = vmatprep.subr.bf16.mxu0 %v891_v24 }
  0x28   : > { %v904_v40 = vpop.eup %903  ;;  %v262_v41 = vpack.c.bf16 %v259_v38, %v258_v34  ;;  %v256_v42 = vsel %vm226_vm2, %v802_v9, %v767_v35  ;;  %v765_v43 = vadd.f32 -1.0, %v902_v37  ;;  %v934_v35 = vmov 0   ;;  %v639_v37 = vld [vmem:[%s1130_s2 + $0x8] sm:$0xff]  ;;  %v638_v38 = vld [vmem:[%s1130_s2] sm:$0xff] }
  0x29   : > { %v257_v44 = vsel %vm227_vm3, %v803_v10, %v768_v39  ;;  %v766_v45 = vadd.f32 -1.0, %v904_v40  ;;  %874 = vset.pattern.permute.xlu1 %v934_v35  ;;  %873 = vset.pattern.permute.xlu0 %v934_v35  ;;  %654 = vst.msk [vmem:[%s209_s22] sm:$0xf] %vm653_vm15, %v934_v35  ;;  %655 = vst.msk [vmem:[%s209_s22 + $0x4] sm:$0xf] %vm653_vm15, %v934_v35 }
  0x2a   : > { %315 = vrot.lane.b32.xlu1 %v262_v41, %s929_s12  ;;  %v1017_v47 = vpack.c.bf16 %v257_v44, %v256_v42  ;;  %v318_v48 = vshll.u32 %v262_v41, 16  ;;  %v254_v50 = vsel %vm224_vm4, %v987_v7, %v765_v43  ;;  %v329_v52 = vrot.slane %v262_v41, 1  ;;  %v887_v7 = vld [vmem:[%s1129_s1 + $0x88] sm:$0xff]   ;;  %825 = vmatpush3.bf16.msra.mxu0 %v892_v28  ;;  %656 = vst.msk [vmem:[%s209_s22 + $0x10] sm:$0xf] %vm653_vm15, %v934_v35 }
  0x2b   : > { %v255_v51 = vsel %vm225_vm5, %v989_v8, %v766_v45  ;;  %v307_v57 = vrot.slane %v262_v41, 5  ;;  %v322_v62 = vshrl.u32 %v262_v41, 16  ;;  %836 = vmatpush3.bf16.msra.mxu1 %v887_v7  ;;  %657 = vst.msk [vmem:[%s209_s22 + $0x14] sm:$0xf] %vm653_vm15, %v934_v35 }
  0x2c   : > { %313 = vrot.lane.b32.xlu0 %v1017_v47, %s929_s12  ;;  %v306_v53 = vrot.slane %v1017_v47, 5  ;;  %v287_v54 = vrot.slane %v1017_v47, 1  ;;  %v272_v55 = vshll.u32 %v1017_v47, 16  ;;  %v276_v56 = vshrl.u32 %v1017_v47, 16  ;;  %837 = vmatprep.subr.bf16.mxu1 %v931_v18 }
  0x2d   : > { %v1032_v58 = vpack.c.bf16 %v255_v51, %v254_v50  ;;  %v320_v61 = vrot.slane %v318_v48, 1  ;;  %v435_v19 = vshrl.u32 %v329_v52, 16  ;;  %v438_v20 = vshll.u32 %v329_v52, 16 }
  0x2e   : > { %291 = vrot.lane.b32.xlu1 %v287_v54, %s929_s12  ;;  %v274_v60 = vrot.slane %v272_v55, 1  ;;  %v330_v63 = vsel %vm285_vm7, %v287_v54, %v329_v52  ;;  %v301_v1 = vrot.slane %v276_v56, 4  ;;  %v308_v8 = vsel %vm305_vm6, %v306_v53, %v307_v57 }
  0x2f   : > { %v427_v2 = vshrl.u32 %v330_v63, 16  ;;  %v430_v3 = vshll.u32 %v330_v63, 16  ;;  %v265_v5 = vshrl.u32 %v1032_v58, 16  ;;  %v267_v6 = vshll.u32 %v1032_v58, 16  ;;  %838 = vmatpush3.bf16.msra.mxu1 %v890_v22 }
  0x30   : > { %309 = vrot.lane.b32.xlu0 %v306_v53, %s930_s24  ;;  %v278_v4 = vor.u32 %v276_v56, %v274_v60  ;;  %v286_v9 = vrot.slane %v1032_v58, 1  ;;  %v302_v10 = vrot.slane %v272_v55, 5  ;;  %v324_v12 = vor.u32 %v322_v62, %v320_v61 }
  0x31   : > { %v429_v13 = vrot.slane %v427_v2, 3  ;;  %v269_v14 = vrot.slane %v267_v6, 1  ;;  %v432_v16 = vrot.slane %v430_v3, 4  ;;  %v437_v25 = vrot.slane %v435_v19, 3 }
  0x32   : > { %281 = vrot.lane.b32.xlu1 %v278_v4, %s930_s24  ;;  %v1057_v17 = vor.u32 %v302_v10, %v301_v1  ;;  %v288_v23 = vsel %vm285_vm7, %v286_v9, %v287_v54  ;;  %v440_v26 = vrot.slane %v438_v20, 4  ;;  %v321_v31 = vsel %vm263_vm8, %v278_v4, %v320_v61 }
  0x33   : > { %v270_v21 = vor.u32 %v269_v14, %v265_v5  ;;  %v433_v29 = vor.u32 %v432_v16, %v429_v13  ;;  %v294_v32 = vrot.slane %v1032_v58, 4  ;;  %v295_v33 = vrot.slane %v1017_v47, 4 }
  0x34   : > { %311 = vrot.lane.b32.xlu0 %v308_v8, %s930_s24  ;;  %v441_v30 = vor.u32 %v440_v26, %v437_v25 }
  0x35   : > { %v275_v27 = vsel %vm263_vm8, %v270_v21, %v274_v60  ;;  %v296_v36 = vsel %vm293_vm11, %v294_v32, %v295_v33 }
  0x36   : > { %327 = vrot.lane.b32.xlu1 %v324_v12, %s932_s8  ;;  %v442_v34 = vsel %vm395_vm9, %v433_v29, %v441_v30 }
  0x37   : > { %840 = vmatmul.mubr.msk.bf16.vlgmr.msra.gmra.mxu1 %vm331_vm12, %v442_v34 }
  0x38   : > { %289 = vrot.lane.b32.xlu0 %v288_v23, %s929_s12 }
  0x3a   : > { %279 = vrot.lane.b32.xlu1 %v275_v27, %s930_s24 }
  0x3c   : > { %325 = vrot.lane.b32.xlu0 %v321_v31, %s932_s8 }
  0x3e   : > { %299 = vrot.lane.b32.xlu1 %v295_v33, %s932_s8 }
  0x40   : > { %297 = vrot.lane.b32.xlu0 %v296_v36, %s932_s8 }
  0x42   : > { %647 = vperm.xlu1 %874, %v639_v37  }
  0x44   : > { %642 = vperm.xlu0 %873, %v638_v38  }
  0x9c   : > { %v316_v39 = vpop.permute.xlu1 %315 }
  0x9e   : > { %v314_v40 = vpop.permute.xlu0 %313 }
  0xa0   : > { %v292_v41 = vpop.permute.xlu1 %291 }
  0xa2   : > { %v310_v42 = vpop.permute.xlu0 %309 }
  0xa3   : > { %v348_v51 = vsel %vm331_vm12, %v1057_v17, %v310_v42 }
  0xa4   : > { %v282_v43 = vpop.permute.xlu1 %281  ;;  %v352_v56 = vsel %vm336_vm14, %v348_v51, %v314_v40 }
  0xa5   : > { %v335_v53 = vsel %vm331_vm12, %v1017_v47, %v282_v43 }
  0xa6   : > { %v312_v44 = vpop.permute.xlu0 %311  ;;  %v340_v63 = vsel %vm336_vm14, %v335_v53, %v292_v41 }
  0xa7   : > { %v350_v45 = vsel %vm331_vm12, %v1057_v17, %v312_v44 }
  0xa8   : > { %v328_v46 = vpop.permute.xlu1 %327  ;;  %v354_v48 = vsel %vm336_vm14, %v350_v45, %v316_v39 }
  0xa9   : > { %v358_v49 = vsel %vm341_vm13, %v354_v48, %v328_v46 }
  0xaa   : > { %v290_v50 = vpop.permute.xlu0 %289  ;;  %v418_v54 = vshrl.u32 %v358_v49, 16  ;;  %v421_v55 = vshll.u32 %v358_v49, 16 }
  0xac   : > { %v280_v52 = vpop.permute.xlu1 %279  ;;  %v420_v1 = vrot.slane %v418_v54, 3  ;;  %v423_v2 = vrot.slane %v421_v55, 4 }
  0xad   : > { %v333_v59 = vsel %vm331_vm12, %v1032_v58, %v280_v52 }
  0xae   : > { %v326_v57 = vpop.permute.xlu0 %325  ;;  %v338_v3 = vsel %vm336_vm14, %v333_v59, %v290_v50  ;;  %v424_v14 = vor.u32 %v423_v2, %v420_v1 }
  0xaf   : > { %v356_v60 = vsel %vm341_vm13, %v352_v56, %v326_v57 }
  0xb0   : > { %v411_v61 = vshrl.u32 %v356_v60, 16  ;;  %v414_v62 = vshll.u32 %v356_v60, 16  ;;  %v300_v0 = vpop.permute.xlu1 %299 }
  0xb1   : > { %v345_v47 = vsel %vm341_vm13, %v340_v63, %v300_v0 }
  0xb2   : > { %v413_v4 = vrot.slane %v411_v61, 3  ;;  %v416_v5 = vrot.slane %v414_v62, 4  ;;  %v298_v6 = vpop.permute.xlu0 %297  ;;  %v403_v7 = vshrl.u32 %v345_v47, 16  ;;  %v406_v8 = vshll.u32 %v345_v47, 16 }
  0xb3   : > { %v343_v58 = vsel %vm341_vm13, %v338_v3, %v298_v6 }
  0xb4   : > { %v396_v9 = vshrl.u32 %v343_v58, 16  ;;  %v399_v10 = vshll.u32 %v343_v58, 16  ;;  %v405_v11 = vrot.slane %v403_v7, 3  ;;  %v408_v12 = vrot.slane %v406_v8, 4 }
  0xb5   : > { %v417_v13 = vor.u32 %v416_v5, %v413_v4 }
  0xb6   : > { %v398_v15 = vrot.slane %v396_v9, 3  ;;  %v401_v16 = vrot.slane %v399_v10, 4  ;;  %v409_v17 = vor.u32 %v408_v12, %v405_v11 }
  0xb7   : > { %v425_v18 = vsel %vm395_vm9, %v417_v13, %v424_v14 }
  0xb8   : > { %v402_v19 = vor.u32 %v401_v16, %v398_v15  ;;  %588 = vmatprep.mubr.bf16.mxu0 %v425_v18 }
  0xba   : > { %v410_v20 = vsel %vm395_vm9, %v402_v19, %v409_v17 }
  0xbb   : > { %589 = vmatmul.mubr.bf16.vlgmr.msra.gmra.mxu0 %v410_v20 }
  0xbd   : > { %v648_v34 = vpop.permute.xlu1 %647 }
  0xbf   : > { %v643_v29 = vpop.permute.xlu0 %642 }
  0xf7   : > { %v631_v21 = vpop.f32.mrf.mxu1 }
  0xf9   : > { %v841_v22 = vpop.f32.mrf.mxu1 }
  0xfb   : > { %v634_v23 = vpop.f32.mrf.mxu1 }
  0xfd   : > { %v842_v24 = vpop.f32.mrf.mxu1 }
 0x17b   : > { %v826_v25 = vpop.f32.mrf.mxu0 }
 0x17d   : > { %v827_v26 = vpop.f32.mrf.mxu0 }
 0x17e   : > { %v828_v27 = vadd.f32 %v827_v26, %v826_v25 }
 0x17f   : > { %v829_v28 = vpop.f32.mrf.mxu0 }
 0x180   : > { %v632_v30 = vadd.f32 %v828_v27, %v631_v21 }
 0x181   : > { %v830_v31 = vpop.f32.mrf.mxu0 }
 0x182   : > { %v650_v32 = vmul.f32 %v643_v29, %v632_v30  ;;  %v831_v33 = vadd.f32 %v830_v31, %v829_v28 }
 0x184   : > { %v794_v36 = vpack.c.bf16 %v650_v32, %v650_v32  ;;  %v635_v37 = vadd.f32 %v831_v33, %v634_v23 }
 0x186   : > { %665 = vst.msk [vmem:[%s209_s22 + $0x8] sm:$0xf] %vm653_vm15, %v794_v36  ;;  %v651_v38 = vmul.f32 %v648_v34, %v635_v37 }
 0x188   : > { %v795_v39 = vpack.c.bf16 %v651_v38, %v651_v38 }
 0x18a   : > { %666 = vst.msk [vmem:[%s209_s22 + $0xc] sm:$0xf] %vm653_vm15, %v795_v39 }
 0x18b PF: > { %s13_s14 = sadd.s32 1, %s927_s14   ;;  %s1132_s12 = smov %s923_s13 }
 0x18c   : > { %p10_p5 = scmp.ge.s32.totalorder %s13_s14, 4   ;;  %s1133_s13 = smov %s1135_s15 }
 0x18e   :  { %12 = sbr.rel (!%p10_p5) target bundleno = 2 (0x2), region = 65 }

// kernel: _lambda_.16
= control target key start
LH: loop header
LB: loop body
LE: loop exit
PB: predicated region body
PF: predicated region fallthrough
CT: control target
= control target key end

     0   :  { %s1137_s18 = smov 0   ;;  %s1139_s19 = smov 0   ;;  %s1342_s0 = inlined_call_operand.vmem [shape: bf16[96,32], index: 0, kind: input, shape index: {}]   ;;  %s1343_s1 = inlined_call_operand.vmem [shape: bf16[320,32], index: 1, kind: input, shape index: {}]   ;;  %s1344_s2 = inlined_call_operand.vmem [shape: f32[16,1], index: 2, kind: input, shape index: {}]   ;;  %s1345_s3 = inlined_call_operand.vmem [shape: f32[1,32], index: 3, kind: input, shape index: {}]   ;;  %s1346_s4 = inlined_call_operand.vmem [shape: bf16[96,32], index: 4, kind: input, shape index: {}]   ;;  %s1347_s5 = inlined_call_operand.vmem [shape: bf16[96,32], index: 5, kind: output, shape index: {}]  }
   0x1   :  { %s1141_s20 = smov 0  }
   0x2 LB: > { %s27_s21 = sadd.s32 1, %s1095_s19  ;;  %p920_p0 = scmp.ge.s32.totalorder %s1099_s20, 1  ;;  %s1099_s20 = sphi %s1141_s20, %s15_s20   ;;  %s1095_s19 = sphi %s1139_s19, %s1349_s19   ;;  %s1091_s18 = sphi %s1137_s18, %s1348_s18  }
   0x3   : > { %p29_p1 = scmp.ge.s32.totalorder %s27_s21, 2  ;;  %p230_p2 = scmp.lt.s32.totalorder %s1099_s20, 3 }
   0x5   : > { %s1351_s21 = smov (%p29_p1, %s27_s21), 0  ;;  %p231_p3 = pnand %p920_p0, %p230_p2 }
   0x6   : > { %s273_s22 = smul.u32 (!%p231_p3), 6, %s1091_s18  ;;  %s1101_s26 = smov (!%p231_p3), 64  }
   0x7   : > { %234 = sbr.rel (%p231_p3) target bundleno = 397 (0x18d), region = 40  ;;  %s1102_s12 = smov (!%p231_p3), 32  }
   0x8   : > { %p274_p4 = scmp.lt.s32.totalorder (!%p231_p3), %s273_s22, 11  ;;  %s1104_s24 = smov (!%p231_p3), 96  }
   0xc   : > { %v1045_v0 = vld [vmem:[%s1343_s1 + $0x78] sm:$0xff]   ;;  %s1353_s22 = smov (!%p274_p4, %s273_s22), 11  ;;  %v1047_v23 = vld [vmem:[%s1343_s1 + $0x70] sm:$0xff]   ;;  %v1049_v25 = vld [vmem:[%s1343_s1 + $0x68] sm:$0xff]   ;;  %vm397_vm6 = vcmask 1042432   ;;  %vm377_vm7 = vcmask 1046528  }
   0xd   : > { %v1046_v1 = vld [vmem:[%s1343_s1 + $0x38] sm:$0xff]   ;;  %973 = vmatprep.subr.bf16.mxu0 %v1045_v0  ;;  %s1161_s27 = sshll.u32 %s1353_s22, 2  ;;  %v1048_v24 = vld [vmem:[%s1343_s1 + $0x30] sm:$0xff]   ;;  %v1050_v26 = vld [vmem:[%s1343_s1 + $0x28] sm:$0xff]   ;;  %vm355_vm8 = vsmask.f32 7424 }
   0xe   : > { %974 = vmatpush3.bf16.msra.mxu0 %v1046_v1  ;;  %s277_s30 = scalar_lea.vmem %s1342_s0, %s1161_s27  ;;  %s290_s8 = scalar_lea.vmem %s1346_s4, %s1161_s27  ;;  %v1051_v32 = vld [vmem:[%s1343_s1 + $0x60] sm:$0xff]   ;;  %v1053_v46 = vld [vmem:[%s1343_s1 + $0x58] sm:$0xff]   ;;  %v1055_v59 = vld [vmem:[%s1343_s1 + $0x50] sm:$0xff]   ;;  %vm385_vm9 = vcmask 1043456   ;;  %vm1105_vm10 = vmmov 0   ;;  %vm438_vm11 = vcmask 261120  }
   0xf   : > { %v972_v2 = vld [vmem:[%s277_s30 + $0x10] sm:$0xff]   ;;  %v960_v3 = vld [vmem:[%s277_s30] sm:$0xff]   ;;  %v971_v4 = vld [vmem:[%s277_s30 + $0x8] sm:$0xff]   ;;  %975 = vmatprep.subr.bf16.mxu0 %v1047_v23  ;;  %vm448_vm12 = vcmask 785408   ;;  %vm443_vm13 = vcmask 523264   ;;  %s299_s15 = scalar_lea.vmem %s1347_s5, %s1161_s27  ;;  %vm786_vm15 = vcmask 257024  }
  0x10   : > { %v969_v5 = vunpack.c.l.bf16 %v972_v2  ;;  %v970_v6 = vunpack.c.h.bf16 %v972_v2  ;;  %v1171_v7 = vunpack.c.l.bf16 %v960_v3  ;;  %v1173_v8 = vunpack.c.h.bf16 %v960_v3  ;;  %v1052_v36 = vld [vmem:[%s1343_s1 + $0x20] sm:$0xff]   ;;  %v1054_v49 = vld [vmem:[%s1343_s1 + $0x18] sm:$0xff]   ;;  %v1056_v0 = vld [vmem:[%s1343_s1 + $0x10] sm:$0xff]  }
  0x11   : > { %v965_v9 = vunpack.c.l.bf16 %v971_v4  ;;  %v966_v10 = vunpack.c.h.bf16 %v971_v4  ;;  %v1057_v1 = vld [vmem:[%s1343_s1 + $0x98] sm:$0xff]   ;;  %vm518_vm14 = vsmask.f32 4352 }
  0x12   : > { %v324_v11 = vmin.f32 %v969_v5, 0.0  ;;  %v325_v12 = vmin.f32 %v970_v6, 0.0  ;;  %v320_v13 = vmin.f32 %v1171_v7, 0.0  ;;  %v321_v14 = vmin.f32 %v1173_v8, 0.0  ;;  %976 = vmatpush3.bf16.msra.mxu0 %v1048_v24 }
  0x13   : > { %v322_v15 = vmin.f32 %v965_v9, 0.0  ;;  %v323_v16 = vmin.f32 %v966_v10, 0.0  ;;  %vm318_vm0 = vcmp.gt.f32.partialorder %v969_v5, 0.0  ;;  %977 = vmatprep.subr.bf16.mxu0 %v1049_v25  ;;  %vm319_vm1 = vcmp.gt.f32.partialorder %v970_v6, 0.0 }
  0x14   : > { %v334_v17 = vmul.f32 1.442695, %v324_v11  ;;  %v336_v18 = vmul.f32 1.442695, %v325_v12  ;;  %v326_v21 = vmul.f32 1.442695, %v320_v13 }
  0x15   : > { %v330_v19 = vmul.f32 1.442695, %v322_v15  ;;  %v332_v20 = vmul.f32 1.442695, %v323_v16  ;;  %v328_v22 = vmul.f32 1.442695, %v321_v14 }
  0x16   : > { %1065 = vpow2.f32 %v334_v17  ;;  %978 = vmatpush3.bf16.msra.mxu0 %v1050_v26  ;;  %vm316_vm2 = vcmp.gt.f32.partialorder %v965_v9, 0.0  ;;  %vm317_vm3 = vcmp.gt.f32.partialorder %v966_v10, 0.0  ;;  %vm314_vm4 = vcmp.gt.f32.partialorder %v1171_v7, 0.0  ;;  %v1059_v12 = vld [vmem:[%s1343_s1 + $0x8] sm:$0xff]   ;;  %v1060_v13 = vld [vmem:[%s1343_s1 + $0x90] sm:$0xff]  }
  0x17   : > { %1067 = vpow2.f32 %v336_v18  ;;  %979 = vmatprep.subr.bf16.mxu0 %v1051_v32  ;;  %vm315_vm5 = vcmp.gt.f32.partialorder %v1173_v8, 0.0  ;;  %v1044_v15 = vld [vmem:[%s290_s8 + $0x8] sm:$0xff]  }
  0x18   : > { %1069 = vpow2.f32 %v330_v19  ;;  %v1061_v19 = vld [vmem:[%s1343_s1 + $0x40] sm:$0xff]   ;;  %v429_v23 = vshrl.u32 %v1044_v15, 16  ;;  %v432_v24 = vshll.u32 %v1044_v15, 16 }
  0x19   : > { %1071 = vpow2.f32 %v332_v20 }
  0x1a   : > { %1073 = vpow2.f32 %v326_v21  ;;  %980 = vmatpush3.bf16.msra.mxu0 %v1052_v36  ;;  %v1062_v21 = vld [vmem:[%s1343_s1] sm:$0xff]  }
  0x1b   : > { %1075 = vpow2.f32 %v328_v22  ;;  %981 = vmatprep.subr.bf16.mxu0 %v1053_v46  ;;  %v1063_v22 = vld [vmem:[%s1343_s1 + $0x88] sm:$0xff]  }
  0x1e   : > { %982 = vmatpush3.bf16.msra.mxu0 %v1054_v49 }
  0x1f   : > { %983 = vmatprep.subr.bf16.mxu0 %v1055_v59 }
  0x22   : > { %984 = vmatpush3.bf16.msra.mxu0 %v1056_v0 }
  0x23   : > { %v1066_v27 = vpop.eup %1065 }
  0x24   : > { %v1068_v28 = vpop.eup %1067  ;;  %v928_v29 = vadd.f32 -1.0, %v1066_v27 }
  0x25   : > { %v1070_v30 = vpop.eup %1069  ;;  %v929_v31 = vadd.f32 -1.0, %v1068_v28  ;;  %v1064_v28 = vld [vmem:[%s1343_s1 + $0x80] sm:$0xff]  }
  0x26   : > { %v1072_v33 = vpop.eup %1071  ;;  %v348_v34 = vsel %vm318_vm0, %v969_v5, %v928_v29  ;;  %v926_v35 = vadd.f32 -1.0, %v1070_v30  ;;  %v431_v29 = vrot.slane %v429_v23, 4  ;;  %v434_v30 = vrot.slane %v432_v24, 5 }
  0x27   : > { %v1074_v37 = vpop.eup %1073  ;;  %v349_v38 = vsel %vm319_vm1, %v970_v6, %v929_v31  ;;  %v927_v39 = vadd.f32 -1.0, %v1072_v33  ;;  %v771_v33 = vld [vmem:[%s1344_s2] sm:$0xff] }
  0x28   : > { %v1076_v40 = vpop.eup %1075  ;;  %v1196_v41 = vpack.c.bf16 %v349_v38, %v348_v34  ;;  %v346_v42 = vsel %vm316_vm2, %v965_v9, %v926_v35  ;;  %v924_v43 = vadd.f32 -1.0, %v1074_v37  ;;  %v1103_v9 = vmov 0.0   ;;  %v772_v35 = vld [vmem:[%s1344_s2 + $0x8] sm:$0xff] }
  0x29   : > { %v347_v44 = vsel %vm317_vm3, %v966_v10, %v927_v39  ;;  %v925_v45 = vadd.f32 -1.0, %v1076_v40  ;;  %1000 = vmatprep.subr.bf16.mxu1 %v1103_v9  ;;  %v1058_v10 = vld [vmem:[%s1343_s1 + $0x48] sm:$0xff]   ;;  %1008 = vmatprep.mubr.msk.bf16.mxu1 %vm1105_vm10, %v1103_v9  ;;  %v435_v32 = vor.u32 %v434_v30, %v431_v29  ;;  %v1106_v34 = vmov 0  }
  0x2a   : > { %407 = vrot.lane.b32.xlu1 %v1196_v41, %s1101_s26  ;;  %v1204_v47 = vpack.c.bf16 %v347_v44, %v346_v42  ;;  %v410_v48 = vshll.u32 %v1196_v41, 16  ;;  %v344_v50 = vsel %vm314_vm4, %v1171_v7, %v924_v43  ;;  %v399_v56 = vrot.slane %v1196_v41, 5  ;;  %1001 = vmatpush3.bf16.msra.mxu1 %v1057_v1  ;;  %787 = vst.msk [vmem:[%s299_s15] sm:$0xf] %vm786_vm15, %v1106_v34 }
  0x2b   : > { %v345_v51 = vsel %vm315_vm5, %v1173_v8, %v925_v45  ;;  %v414_v57 = vshrl.u32 %v1196_v41, 16  ;;  %985 = vmatprep.subr.bf16.mxu0 %v1058_v10  ;;  %1002 = vmatprep.subr.bf16.mxu1 %v1103_v9  ;;  %v421_v16 = vrot.slane %v1196_v41, 1  ;;  %788 = vst.msk [vmem:[%s299_s15 + $0x4] sm:$0xf] %vm786_vm15, %v1106_v34  ;;  %789 = vst.msk [vmem:[%s299_s15 + $0x10] sm:$0xf] %vm786_vm15, %v1106_v34 }
  0x2c   : > { %405 = vrot.lane.b32.xlu0 %v1204_v47, %s1101_s26  ;;  %v398_v52 = vrot.slane %v1204_v47, 5  ;;  %v379_v53 = vrot.slane %v1204_v47, 1  ;;  %v364_v54 = vshll.u32 %v1204_v47, 16  ;;  %v368_v55 = vshrl.u32 %v1204_v47, 16  ;;  %986 = vmatpush3.bf16.msra.mxu0 %v1059_v12  ;;  %790 = vst.msk [vmem:[%s299_s15 + $0x14] sm:$0xf] %vm786_vm15, %v1106_v34 }
  0x2d   : > { %v1222_v58 = vpack.c.bf16 %v345_v51, %v344_v50  ;;  %v412_v62 = vrot.slane %v410_v48, 1  ;;  %987 = vmatprep.subr.bf16.mxu0 %v1061_v19  ;;  %v387_v27 = vrot.slane %v1204_v47, 4  ;;  %1042 = vset.pattern.permute.xlu1 %v1106_v34 }
  0x2e   : > { %383 = vrot.lane.b32.xlu1 %v379_v53, %s1101_s26  ;;  %v366_v60 = vrot.slane %v364_v54, 1  ;;  %v393_v61 = vrot.slane %v368_v55, 4  ;;  %v394_v63 = vrot.slane %v364_v54, 5  ;;  %v400_v6 = vsel %vm397_vm6, %v398_v52, %v399_v56  ;;  %1003 = vmatpush3.bf16.msra.mxu1 %v1060_v13 }
  0x2f   : > { %v357_v2 = vshrl.u32 %v1222_v58, 16  ;;  %v359_v3 = vshll.u32 %v1222_v58, 16  ;;  %v378_v7 = vrot.slane %v1222_v58, 1  ;;  %v416_v11 = vor.u32 %v414_v57, %v412_v62  ;;  %1004 = vmatprep.subr.bf16.mxu1 %v1103_v9  ;;  %1043 = vset.pattern.permute.xlu0 %v1106_v34 }
  0x30   : > { %401 = vrot.lane.b32.xlu0 %v398_v52, %s1102_s12  ;;  %v370_v4 = vor.u32 %v368_v55, %v366_v60  ;;  %v1237_v5 = vor.u32 %v394_v63, %v393_v61  ;;  %v1262_v18 = vsel %vm377_vm7, %v379_v53, %v421_v16  ;;  %v386_v26 = vrot.slane %v1222_v58, 4  ;;  %988 = vmatpush3.bf16.msra.mxu0 %v1062_v21 }
  0x31   : > { %v361_v8 = vrot.slane %v359_v3, 1  ;;  %v380_v17 = vsel %vm377_vm7, %v378_v7, %v379_v53 }
  0x32   : > { %373 = vrot.lane.b32.xlu1 %v370_v4, %s1102_s12  ;;  %v413_v25 = vsel %vm355_vm8, %v370_v4, %v412_v62  ;;  %1005 = vmatpush3.bf16.msra.mxu1 %v1063_v22  ;;  %v388_v31 = vsel %vm385_vm9, %v386_v26, %v387_v27 }
  0x33   : > { %v362_v14 = vor.u32 %v361_v8, %v357_v2  ;;  %1006 = vmatprep.subr.bf16.mxu1 %v1103_v9 }
  0x34   : > { %403 = vrot.lane.b32.xlu0 %v400_v6, %s1102_s12 }
  0x35   : > { %v367_v20 = vsel %vm355_vm8, %v362_v14, %v366_v60 }
  0x36   : > { %419 = vrot.lane.b32.xlu1 %v416_v11, %s1104_s24  ;;  %1007 = vmatpush3.bf16.msra.mxu1 %v1064_v28 }
  0x38   : > { %381 = vrot.lane.b32.xlu0 %v380_v17, %s1101_s26 }
  0x3a   : > { %371 = vrot.lane.b32.xlu1 %v367_v20, %s1102_s12 }
  0x3c   : > { %417 = vrot.lane.b32.xlu0 %v413_v25, %s1104_s24 }
  0x3e   : > { %391 = vrot.lane.b32.xlu1 %v387_v27, %s1104_s24 }
  0x40   : > { %389 = vrot.lane.b32.xlu0 %v388_v31, %s1104_s24 }
  0x42   : > { %775 = vperm.xlu1 %1042, %v771_v33  }
  0x44   : > { %436 = vrot.lane.b32.xlu0 %v435_v32, %s1102_s12 }
  0x48   : > { %780 = vperm.xlu0 %1043, %v772_v35   ;;  %v931_v35 = vld [vmem:[%s1345_s3] ss:$0 sm:$0xff] }
  0x9c   : > { %v408_v36 = vpop.permute.xlu1 %407 }
  0x9e   : > { %v406_v37 = vpop.permute.xlu0 %405 }
  0xa0   : > { %v384_v38 = vpop.permute.xlu1 %383 }
  0xa2   : > { %v402_v39 = vpop.permute.xlu0 %401 }
  0xa3   : > { %v455_v49 = vsel %vm438_vm11, %v1237_v5, %v402_v39 }
  0xa4   : > { %v374_v40 = vpop.permute.xlu1 %373  ;;  %v459_v54 = vsel %vm443_vm13, %v455_v49, %v406_v37 }
  0xa5   : > { %v442_v51 = vsel %vm438_vm11, %v1204_v47, %v374_v40 }
  0xa6   : > { %v404_v42 = vpop.permute.xlu0 %403  ;;  %v447_v61 = vsel %vm443_vm13, %v442_v51, %v384_v38 }
  0xa7   : > { %v457_v43 = vsel %vm438_vm11, %v1237_v5, %v404_v42 }
  0xa8   : > { %v420_v44 = vpop.permute.xlu1 %419  ;;  %v461_v45 = vsel %vm443_vm13, %v457_v43, %v408_v36 }
  0xa9   : > { %v465_v46 = vsel %vm448_vm12, %v461_v45, %v420_v44 }
  0xaa   : > { %v382_v48 = vpop.permute.xlu0 %381  ;;  %v541_v52 = vshrl.u32 %v465_v46, 16  ;;  %v544_v53 = vshll.u32 %v465_v46, 16 }
  0xac   : > { %v372_v50 = vpop.permute.xlu1 %371  ;;  %v543_v63 = vrot.slane %v541_v52, 3  ;;  %v546_v0 = vrot.slane %v544_v53, 4 }
  0xad   : > { %v440_v56 = vsel %vm438_vm11, %v1222_v58, %v372_v50 }
  0xae   : > { %v418_v55 = vpop.permute.xlu0 %417  ;;  %v445_v1 = vsel %vm443_vm13, %v440_v56, %v382_v48  ;;  %v547_v12 = vor.u32 %v546_v0, %v543_v63 }
  0xaf   : > { %v463_v57 = vsel %vm448_vm12, %v459_v54, %v418_v55 }
  0xb0   : > { %v534_v59 = vshrl.u32 %v463_v57, 16  ;;  %v537_v60 = vshll.u32 %v463_v57, 16  ;;  %v392_v62 = vpop.permute.xlu1 %391 }
  0xb1   : > { %v452_v47 = vsel %vm448_vm12, %v447_v61, %v392_v62 }
  0xb2   : > { %v536_v2 = vrot.slane %v534_v59, 3  ;;  %v539_v3 = vrot.slane %v537_v60, 4  ;;  %v390_v4 = vpop.permute.xlu0 %389  ;;  %v526_v5 = vshrl.u32 %v452_v47, 16  ;;  %v529_v6 = vshll.u32 %v452_v47, 16 }
  0xb3   : > { %v450_v58 = vsel %vm448_vm12, %v445_v1, %v390_v4 }
  0xb4   : > { %v519_v7 = vshrl.u32 %v450_v58, 16  ;;  %v522_v8 = vshll.u32 %v450_v58, 16  ;;  %v528_v9 = vrot.slane %v526_v5, 3  ;;  %v531_v10 = vrot.slane %v529_v6, 4 }
  0xb5   : > { %v540_v11 = vor.u32 %v539_v3, %v536_v2 }
  0xb6   : > { %v521_v13 = vrot.slane %v519_v7, 3  ;;  %v524_v14 = vrot.slane %v522_v8, 4  ;;  %v532_v15 = vor.u32 %v531_v10, %v528_v9  ;;  %v437_v17 = vpop.permute.xlu0 %436 }
  0xb7   : > { %v468_v19 = vsel %vm438_vm11, %v1262_v18, %v437_v17  ;;  %v470_v20 = vsel %vm438_vm11, %v421_v16, %v437_v17  ;;  %v548_v21 = vsel %vm518_vm14, %v540_v11, %v547_v12 }
  0xb8   : > { %v525_v22 = vor.u32 %v524_v14, %v521_v13  ;;  %v549_v23 = vshrl.u32 %v468_v19, 16  ;;  %v552_v24 = vshll.u32 %v468_v19, 16  ;;  %v556_v25 = vshrl.u32 %v470_v20, 16  ;;  %721 = vmatprep.mubr.bf16.mxu0 %v548_v21 }
  0xb9   : > { %v559_v26 = vshll.u32 %v470_v20, 16 }
  0xba   : > { %v551_v27 = vrot.slane %v549_v23, 3  ;;  %v554_v28 = vrot.slane %v552_v24, 4  ;;  %v558_v29 = vrot.slane %v556_v25, 3  ;;  %v533_v30 = vsel %vm518_vm14, %v525_v22, %v532_v15 }
  0xbb   : > { %v561_v31 = vrot.slane %v559_v26, 4  ;;  %722 = vmatmul.mubr.bf16.vlgmr.msra.gmra.mxu0 %v533_v30 }
  0xbc   : > { %v555_v18 = vor.u32 %v554_v28, %v551_v27 }
  0xbd   : > { %v562_v41 = vor.u32 %v561_v31, %v558_v29  ;;  %v776_v42 = vpop.permute.xlu1 %775 }
  0xbf   : > { %v563_v16 = vsel %vm518_vm14, %v555_v18, %v562_v41 }
  0xc0   : > { %1009 = vmatmul.mubr.msk.bf16.vlgmr.msra.gmra.mxu1 %vm443_vm13, %v563_v16 }
  0xc3   : > { %v781_v50 = vpop.permute.xlu0 %780 }
 0x17b   : > { %v989_v32 = vpop.f32.mrf.mxu0 }
 0x17d   : > { %v990_v33 = vpop.f32.mrf.mxu0 }
 0x17e   : > { %v991_v36 = vadd.f32 %v990_v33, %v989_v32 }
 0x17f   : > { %v992_v37 = vpop.f32.mrf.mxu0 }
 0x180   : > { %v724_v38 = vadd.f32 %v991_v36, %v931_v35  ;;  %v764_v39 = vpop.f32.mrf.mxu1 }
 0x181   : > { %v993_v40 = vpop.f32.mrf.mxu0 }
 0x182   : > { %v765_v43 = vadd.f32 %v764_v39, %v724_v38  ;;  %v994_v44 = vadd.f32 %v993_v40, %v992_v37  ;;  %v1010_v45 = vpop.f32.mrf.mxu1 }
 0x184   : > { %v727_v46 = vadd.f32 %v994_v44, %v931_v35  ;;  %v767_v48 = vpop.f32.mrf.mxu1  ;;  %v783_v49 = vmul.f32 %v776_v42, %v765_v43 }
 0x186   : > { %v768_v34 = vadd.f32 %v767_v48, %v727_v46  ;;  %v957_v51 = vpack.c.bf16 %v783_v49, %v783_v49  ;;  %v1011_v52 = vpop.f32.mrf.mxu1 }
 0x188   : > { %798 = vst.msk [vmem:[%s299_s15 + $0x8] sm:$0xf] %vm786_vm15, %v957_v51  ;;  %v784_v53 = vmul.f32 %v781_v50, %v768_v34 }
 0x18a   : > { %v958_v54 = vpack.c.bf16 %v784_v53, %v784_v53 }
 0x18c   : > { %799 = vst.msk [vmem:[%s299_s15 + $0xc] sm:$0xf] %vm786_vm15, %v958_v54 }
 0x18d PF: > { %s15_s20 = sadd.s32 1, %s1099_s20   ;;  %s1348_s18 = smov %s1095_s19 }
 0x18e   : > { %p12_p5 = scmp.ge.s32.totalorder %s15_s20, 4   ;;  %s1349_s19 = smov %s1351_s21 }
 0x190   :  { %14 = sbr.rel (!%p12_p5) target bundleno = 2 (0x2), region = 79 }

// kernel: _lambda_.18
= control target key start
LH: loop header
LB: loop body
LE: loop exit
PB: predicated region body
PF: predicated region fallthrough
CT: control target
= control target key end

     0   :  { %s1137_s18 = smov 0   ;;  %s1139_s19 = smov 0   ;;  %s1342_s0 = inlined_call_operand.vmem [shape: bf16[96,32], index: 0, kind: input, shape index: {}]   ;;  %s1343_s1 = inlined_call_operand.vmem [shape: bf16[320,16], index: 1, kind: input, shape index: {}]   ;;  %s1344_s2 = inlined_call_operand.vmem [shape: f32[16,1], index: 2, kind: input, shape index: {}]   ;;  %s1345_s3 = inlined_call_operand.vmem [shape: f32[1,16], index: 3, kind: input, shape index: {}]   ;;  %s1346_s4 = inlined_call_operand.vmem [shape: bf16[96,32], index: 4, kind: input, shape index: {}]   ;;  %s1347_s5 = inlined_call_operand.vmem [shape: bf16[96,16], index: 5, kind: output, shape index: {}]  }
   0x1   :  { %s1141_s20 = smov 0  }
   0x2 LB: > { %s27_s21 = sadd.s32 1, %s1095_s19  ;;  %p920_p0 = scmp.ge.s32.totalorder %s1099_s20, 1  ;;  %s1099_s20 = sphi %s1141_s20, %s15_s20   ;;  %s1095_s19 = sphi %s1139_s19, %s1349_s19   ;;  %s1091_s18 = sphi %s1137_s18, %s1348_s18  }
   0x3   : > { %p29_p1 = scmp.ge.s32.totalorder %s27_s21, 2  ;;  %p230_p2 = scmp.lt.s32.totalorder %s1099_s20, 3 }
   0x5   : > { %s1351_s21 = smov (%p29_p1, %s27_s21), 0  ;;  %p231_p3 = pnand %p920_p0, %p230_p2 }
   0x6   : > { %s273_s22 = smul.u32 (!%p231_p3), 6, %s1091_s18  ;;  %s1101_s26 = smov (!%p231_p3), 64  }
   0x7   : > { %234 = sbr.rel (%p231_p3) target bundleno = 397 (0x18d), region = 40  ;;  %s1102_s12 = smov (!%p231_p3), 32  }
   0x8   : > { %p274_p4 = scmp.lt.s32.totalorder (!%p231_p3), %s273_s22, 11  ;;  %s1104_s24 = smov (!%p231_p3), 96  }
   0xc   : > { %v1045_v0 = vld [vmem:[%s1343_s1 + $0x78] sm:$0xff]   ;;  %s1353_s22 = smov (!%p274_p4, %s273_s22), 11  ;;  %v1047_v23 = vld [vmem:[%s1343_s1 + $0x70] sm:$0xff]   ;;  %v1049_v25 = vld [vmem:[%s1343_s1 + $0x68] sm:$0xff]   ;;  %vm397_vm6 = vcmask 1042432   ;;  %vm377_vm7 = vcmask 1046528  }
   0xd   : > { %v1046_v1 = vld [vmem:[%s1343_s1 + $0x38] sm:$0xff]   ;;  %973 = vmatprep.subr.bf16.mxu0 %v1045_v0  ;;  %s1161_s27 = sshll.u32 %s1353_s22, 2  ;;  %v1048_v24 = vld [vmem:[%s1343_s1 + $0x30] sm:$0xff]   ;;  %v1050_v26 = vld [vmem:[%s1343_s1 + $0x28] sm:$0xff]   ;;  %vm355_vm8 = vsmask.f32 7424 }
   0xe   : > { %974 = vmatpush3.bf16.msra.mxu0 %v1046_v1  ;;  %s277_s30 = scalar_lea.vmem %s1342_s0, %s1161_s27  ;;  %s290_s8 = scalar_lea.vmem %s1346_s4, %s1161_s27  ;;  %v1051_v32 = vld [vmem:[%s1343_s1 + $0x60] sm:$0xff]   ;;  %v1053_v46 = vld [vmem:[%s1343_s1 + $0x58] sm:$0xff]   ;;  %v1055_v59 = vld [vmem:[%s1343_s1 + $0x50] sm:$0xff]   ;;  %vm385_vm9 = vcmask 1043456   ;;  %vm1105_vm10 = vmmov 0   ;;  %vm438_vm11 = vcmask 261120  }
   0xf   : > { %v972_v2 = vld [vmem:[%s277_s30 + $0x10] sm:$0xff]   ;;  %v960_v3 = vld [vmem:[%s277_s30] sm:$0xff]   ;;  %v971_v4 = vld [vmem:[%s277_s30 + $0x8] sm:$0xff]   ;;  %975 = vmatprep.subr.bf16.mxu0 %v1047_v23  ;;  %vm448_vm12 = vcmask 785408   ;;  %vm443_vm13 = vcmask 523264   ;;  %s299_s15 = scalar_lea.vmem %s1347_s5, %s1161_s27  ;;  %vm786_vm15 = vcmask 125952  }
  0x10   : > { %v969_v5 = vunpack.c.l.bf16 %v972_v2  ;;  %v970_v6 = vunpack.c.h.bf16 %v972_v2  ;;  %v1171_v7 = vunpack.c.l.bf16 %v960_v3  ;;  %v1173_v8 = vunpack.c.h.bf16 %v960_v3  ;;  %v1052_v36 = vld [vmem:[%s1343_s1 + $0x20] sm:$0xff]   ;;  %v1054_v49 = vld [vmem:[%s1343_s1 + $0x18] sm:$0xff]   ;;  %v1056_v0 = vld [vmem:[%s1343_s1 + $0x10] sm:$0xff]  }
  0x11   : > { %v965_v9 = vunpack.c.l.bf16 %v971_v4  ;;  %v966_v10 = vunpack.c.h.bf16 %v971_v4  ;;  %v1057_v1 = vld [vmem:[%s1343_s1 + $0x98] sm:$0xff]   ;;  %vm518_vm14 = vsmask.f32 4352 }
  0x12   : > { %v324_v11 = vmin.f32 %v969_v5, 0.0  ;;  %v325_v12 = vmin.f32 %v970_v6, 0.0  ;;  %v320_v13 = vmin.f32 %v1171_v7, 0.0  ;;  %v321_v14 = vmin.f32 %v1173_v8, 0.0  ;;  %976 = vmatpush3.bf16.msra.mxu0 %v1048_v24 }
  0x13   : > { %v322_v15 = vmin.f32 %v965_v9, 0.0  ;;  %v323_v16 = vmin.f32 %v966_v10, 0.0  ;;  %vm318_vm0 = vcmp.gt.f32.partialorder %v969_v5, 0.0  ;;  %977 = vmatprep.subr.bf16.mxu0 %v1049_v25  ;;  %vm319_vm1 = vcmp.gt.f32.partialorder %v970_v6, 0.0 }
  0x14   : > { %v334_v17 = vmul.f32 1.442695, %v324_v11  ;;  %v336_v18 = vmul.f32 1.442695, %v325_v12  ;;  %v326_v21 = vmul.f32 1.442695, %v320_v13 }
  0x15   : > { %v330_v19 = vmul.f32 1.442695, %v322_v15  ;;  %v332_v20 = vmul.f32 1.442695, %v323_v16  ;;  %v328_v22 = vmul.f32 1.442695, %v321_v14 }
  0x16   : > { %1065 = vpow2.f32 %v334_v17  ;;  %978 = vmatpush3.bf16.msra.mxu0 %v1050_v26  ;;  %vm316_vm2 = vcmp.gt.f32.partialorder %v965_v9, 0.0  ;;  %vm317_vm3 = vcmp.gt.f32.partialorder %v966_v10, 0.0  ;;  %vm314_vm4 = vcmp.gt.f32.partialorder %v1171_v7, 0.0  ;;  %v1059_v12 = vld [vmem:[%s1343_s1 + $0x8] sm:$0xff]   ;;  %v1060_v13 = vld [vmem:[%s1343_s1 + $0x90] sm:$0xff]  }
  0x17   : > { %1067 = vpow2.f32 %v336_v18  ;;  %979 = vmatprep.subr.bf16.mxu0 %v1051_v32  ;;  %vm315_vm5 = vcmp.gt.f32.partialorder %v1173_v8, 0.0  ;;  %v1044_v15 = vld [vmem:[%s290_s8 + $0x8] sm:$0xff]  }
  0x18   : > { %1069 = vpow2.f32 %v330_v19  ;;  %v1061_v19 = vld [vmem:[%s1343_s1 + $0x40] sm:$0xff]   ;;  %v429_v23 = vshrl.u32 %v1044_v15, 16  ;;  %v432_v24 = vshll.u32 %v1044_v15, 16 }
  0x19   : > { %1071 = vpow2.f32 %v332_v20 }
  0x1a   : > { %1073 = vpow2.f32 %v326_v21  ;;  %980 = vmatpush3.bf16.msra.mxu0 %v1052_v36  ;;  %v1062_v21 = vld [vmem:[%s1343_s1] sm:$0xff]  }
  0x1b   : > { %1075 = vpow2.f32 %v328_v22  ;;  %981 = vmatprep.subr.bf16.mxu0 %v1053_v46  ;;  %v1063_v22 = vld [vmem:[%s1343_s1 + $0x88] sm:$0xff]  }
  0x1e   : > { %982 = vmatpush3.bf16.msra.mxu0 %v1054_v49 }
  0x1f   : > { %983 = vmatprep.subr.bf16.mxu0 %v1055_v59 }
  0x22   : > { %984 = vmatpush3.bf16.msra.mxu0 %v1056_v0 }
  0x23   : > { %v1066_v27 = vpop.eup %1065 }
  0x24   : > { %v1068_v28 = vpop.eup %1067  ;;  %v928_v29 = vadd.f32 -1.0, %v1066_v27 }
  0x25   : > { %v1070_v30 = vpop.eup %1069  ;;  %v929_v31 = vadd.f32 -1.0, %v1068_v28  ;;  %v1064_v28 = vld [vmem:[%s1343_s1 + $0x80] sm:$0xff]  }
  0x26   : > { %v1072_v33 = vpop.eup %1071  ;;  %v348_v34 = vsel %vm318_vm0, %v969_v5, %v928_v29  ;;  %v926_v35 = vadd.f32 -1.0, %v1070_v30  ;;  %v431_v29 = vrot.slane %v429_v23, 4  ;;  %v434_v30 = vrot.slane %v432_v24, 5 }
  0x27   : > { %v1074_v37 = vpop.eup %1073  ;;  %v349_v38 = vsel %vm319_vm1, %v970_v6, %v929_v31  ;;  %v927_v39 = vadd.f32 -1.0, %v1072_v33  ;;  %v771_v33 = vld [vmem:[%s1344_s2] sm:$0xff] }
  0x28   : > { %v1076_v40 = vpop.eup %1075  ;;  %v1196_v41 = vpack.c.bf16 %v349_v38, %v348_v34  ;;  %v346_v42 = vsel %vm316_vm2, %v965_v9, %v926_v35  ;;  %v924_v43 = vadd.f32 -1.0, %v1074_v37  ;;  %v1103_v9 = vmov 0.0   ;;  %v772_v35 = vld [vmem:[%s1344_s2 + $0x8] sm:$0xff] }
  0x29   : > { %v347_v44 = vsel %vm317_vm3, %v966_v10, %v927_v39  ;;  %v925_v45 = vadd.f32 -1.0, %v1076_v40  ;;  %1000 = vmatprep.subr.bf16.mxu1 %v1103_v9  ;;  %v1058_v10 = vld [vmem:[%s1343_s1 + $0x48] sm:$0xff]   ;;  %1008 = vmatprep.mubr.msk.bf16.mxu1 %vm1105_vm10, %v1103_v9  ;;  %v435_v32 = vor.u32 %v434_v30, %v431_v29  ;;  %v1106_v34 = vmov 0  }
  0x2a   : > { %407 = vrot.lane.b32.xlu1 %v1196_v41, %s1101_s26  ;;  %v1204_v47 = vpack.c.bf16 %v347_v44, %v346_v42  ;;  %v410_v48 = vshll.u32 %v1196_v41, 16  ;;  %v344_v50 = vsel %vm314_vm4, %v1171_v7, %v924_v43  ;;  %v399_v56 = vrot.slane %v1196_v41, 5  ;;  %1001 = vmatpush3.bf16.msra.mxu1 %v1057_v1  ;;  %787 = vst.msk [vmem:[%s299_s15] sm:$0xf] %vm786_vm15, %v1106_v34 }
  0x2b   : > { %v345_v51 = vsel %vm315_vm5, %v1173_v8, %v925_v45  ;;  %v414_v57 = vshrl.u32 %v1196_v41, 16  ;;  %985 = vmatprep.subr.bf16.mxu0 %v1058_v10  ;;  %1002 = vmatprep.subr.bf16.mxu1 %v1103_v9  ;;  %v421_v16 = vrot.slane %v1196_v41, 1  ;;  %788 = vst.msk [vmem:[%s299_s15 + $0x4] sm:$0xf] %vm786_vm15, %v1106_v34  ;;  %789 = vst.msk [vmem:[%s299_s15 + $0x10] sm:$0xf] %vm786_vm15, %v1106_v34 }
  0x2c   : > { %405 = vrot.lane.b32.xlu0 %v1204_v47, %s1101_s26  ;;  %v398_v52 = vrot.slane %v1204_v47, 5  ;;  %v379_v53 = vrot.slane %v1204_v47, 1  ;;  %v364_v54 = vshll.u32 %v1204_v47, 16  ;;  %v368_v55 = vshrl.u32 %v1204_v47, 16  ;;  %986 = vmatpush3.bf16.msra.mxu0 %v1059_v12  ;;  %790 = vst.msk [vmem:[%s299_s15 + $0x14] sm:$0xf] %vm786_vm15, %v1106_v34 }
  0x2d   : > { %v1222_v58 = vpack.c.bf16 %v345_v51, %v344_v50  ;;  %v412_v62 = vrot.slane %v410_v48, 1  ;;  %987 = vmatprep.subr.bf16.mxu0 %v1061_v19  ;;  %v387_v27 = vrot.slane %v1204_v47, 4  ;;  %1042 = vset.pattern.permute.xlu1 %v1106_v34 }
  0x2e   : > { %383 = vrot.lane.b32.xlu1 %v379_v53, %s1101_s26  ;;  %v366_v60 = vrot.slane %v364_v54, 1  ;;  %v393_v61 = vrot.slane %v368_v55, 4  ;;  %v394_v63 = vrot.slane %v364_v54, 5  ;;  %v400_v6 = vsel %vm397_vm6, %v398_v52, %v399_v56  ;;  %1003 = vmatpush3.bf16.msra.mxu1 %v1060_v13 }
  0x2f   : > { %v357_v2 = vshrl.u32 %v1222_v58, 16  ;;  %v359_v3 = vshll.u32 %v1222_v58, 16  ;;  %v378_v7 = vrot.slane %v1222_v58, 1  ;;  %v416_v11 = vor.u32 %v414_v57, %v412_v62  ;;  %1004 = vmatprep.subr.bf16.mxu1 %v1103_v9  ;;  %1043 = vset.pattern.permute.xlu0 %v1106_v34 }
  0x30   : > { %401 = vrot.lane.b32.xlu0 %v398_v52, %s1102_s12  ;;  %v370_v4 = vor.u32 %v368_v55, %v366_v60  ;;  %v1237_v5 = vor.u32 %v394_v63, %v393_v61  ;;  %v1262_v18 = vsel %vm377_vm7, %v379_v53, %v421_v16  ;;  %v386_v26 = vrot.slane %v1222_v58, 4  ;;  %988 = vmatpush3.bf16.msra.mxu0 %v1062_v21 }
  0x31   : > { %v361_v8 = vrot.slane %v359_v3, 1  ;;  %v380_v17 = vsel %vm377_vm7, %v378_v7, %v379_v53 }
  0x32   : > { %373 = vrot.lane.b32.xlu1 %v370_v4, %s1102_s12  ;;  %v413_v25 = vsel %vm355_vm8, %v370_v4, %v412_v62  ;;  %1005 = vmatpush3.bf16.msra.mxu1 %v1063_v22  ;;  %v388_v31 = vsel %vm385_vm9, %v386_v26, %v387_v27 }
  0x33   : > { %v362_v14 = vor.u32 %v361_v8, %v357_v2  ;;  %1006 = vmatprep.subr.bf16.mxu1 %v1103_v9 }
  0x34   : > { %403 = vrot.lane.b32.xlu0 %v400_v6, %s1102_s12 }
  0x35   : > { %v367_v20 = vsel %vm355_vm8, %v362_v14, %v366_v60 }
  0x36   : > { %419 = vrot.lane.b32.xlu1 %v416_v11, %s1104_s24  ;;  %1007 = vmatpush3.bf16.msra.mxu1 %v1064_v28 }
  0x38   : > { %381 = vrot.lane.b32.xlu0 %v380_v17, %s1101_s26 }
  0x3a   : > { %371 = vrot.lane.b32.xlu1 %v367_v20, %s1102_s12 }
  0x3c   : > { %417 = vrot.lane.b32.xlu0 %v413_v25, %s1104_s24 }
  0x3e   : > { %391 = vrot.lane.b32.xlu1 %v387_v27, %s1104_s24 }
  0x40   : > { %389 = vrot.lane.b32.xlu0 %v388_v31, %s1104_s24 }
  0x42   : > { %775 = vperm.xlu1 %1042, %v771_v33  }
  0x44   : > { %436 = vrot.lane.b32.xlu0 %v435_v32, %s1102_s12 }
  0x48   : > { %780 = vperm.xlu0 %1043, %v772_v35   ;;  %v931_v35 = vld [vmem:[%s1345_s3] ss:$0 sm:$0xff] }
  0x9c   : > { %v408_v36 = vpop.permute.xlu1 %407 }
  0x9e   : > { %v406_v37 = vpop.permute.xlu0 %405 }
  0xa0   : > { %v384_v38 = vpop.permute.xlu1 %383 }
  0xa2   : > { %v402_v39 = vpop.permute.xlu0 %401 }
  0xa3   : > { %v455_v49 = vsel %vm438_vm11, %v1237_v5, %v402_v39 }
  0xa4   : > { %v374_v40 = vpop.permute.xlu1 %373  ;;  %v459_v54 = vsel %vm443_vm13, %v455_v49, %v406_v37 }
  0xa5   : > { %v442_v51 = vsel %vm438_vm11, %v1204_v47, %v374_v40 }
  0xa6   : > { %v404_v42 = vpop.permute.xlu0 %403  ;;  %v447_v61 = vsel %vm443_vm13, %v442_v51, %v384_v38 }
  0xa7   : > { %v457_v43 = vsel %vm438_vm11, %v1237_v5, %v404_v42 }
  0xa8   : > { %v420_v44 = vpop.permute.xlu1 %419  ;;  %v461_v45 = vsel %vm443_vm13, %v457_v43, %v408_v36 }
  0xa9   : > { %v465_v46 = vsel %vm448_vm12, %v461_v45, %v420_v44 }
  0xaa   : > { %v382_v48 = vpop.permute.xlu0 %381  ;;  %v541_v52 = vshrl.u32 %v465_v46, 16  ;;  %v544_v53 = vshll.u32 %v465_v46, 16 }
  0xac   : > { %v372_v50 = vpop.permute.xlu1 %371  ;;  %v543_v63 = vrot.slane %v541_v52, 3  ;;  %v546_v0 = vrot.slane %v544_v53, 4 }
  0xad   : > { %v440_v56 = vsel %vm438_vm11, %v1222_v58, %v372_v50 }
  0xae   : > { %v418_v55 = vpop.permute.xlu0 %417  ;;  %v445_v1 = vsel %vm443_vm13, %v440_v56, %v382_v48  ;;  %v547_v12 = vor.u32 %v546_v0, %v543_v63 }
  0xaf   : > { %v463_v57 = vsel %vm448_vm12, %v459_v54, %v418_v55 }
  0xb0   : > { %v534_v59 = vshrl.u32 %v463_v57, 16  ;;  %v537_v60 = vshll.u32 %v463_v57, 16  ;;  %v392_v62 = vpop.permute.xlu1 %391 }
  0xb1   : > { %v452_v47 = vsel %vm448_vm12, %v447_v61, %v392_v62 }
  0xb2   : > { %v536_v2 = vrot.slane %v534_v59, 3  ;;  %v539_v3 = vrot.slane %v537_v60, 4  ;;  %v390_v4 = vpop.permute.xlu0 %389  ;;  %v526_v5 = vshrl.u32 %v452_v47, 16  ;;  %v529_v6 = vshll.u32 %v452_v47, 16 }
  0xb3   : > { %v450_v58 = vsel %vm448_vm12, %v445_v1, %v390_v4 }
  0xb4   : > { %v519_v7 = vshrl.u32 %v450_v58, 16  ;;  %v522_v8 = vshll.u32 %v450_v58, 16  ;;  %v528_v9 = vrot.slane %v526_v5, 3  ;;  %v531_v10 = vrot.slane %v529_v6, 4 }
  0xb5   : > { %v540_v11 = vor.u32 %v539_v3, %v536_v2 }
  0xb6   : > { %v521_v13 = vrot.slane %v519_v7, 3  ;;  %v524_v14 = vrot.slane %v522_v8, 4  ;;  %v532_v15 = vor.u32 %v531_v10, %v528_v9  ;;  %v437_v17 = vpop.permute.xlu0 %436 }
  0xb7   : > { %v468_v19 = vsel %vm438_vm11, %v1262_v18, %v437_v17  ;;  %v470_v20 = vsel %vm438_vm11, %v421_v16, %v437_v17  ;;  %v548_v21 = vsel %vm518_vm14, %v540_v11, %v547_v12 }
  0xb8   : > { %v525_v22 = vor.u32 %v524_v14, %v521_v13  ;;  %v549_v23 = vshrl.u32 %v468_v19, 16  ;;  %v552_v24 = vshll.u32 %v468_v19, 16  ;;  %v556_v25 = vshrl.u32 %v470_v20, 16  ;;  %721 = vmatprep.mubr.bf16.mxu0 %v548_v21 }
  0xb9   : > { %v559_v26 = vshll.u32 %v470_v20, 16 }
  0xba   : > { %v551_v27 = vrot.slane %v549_v23, 3  ;;  %v554_v28 = vrot.slane %v552_v24, 4  ;;  %v558_v29 = vrot.slane %v556_v25, 3  ;;  %v533_v30 = vsel %vm518_vm14, %v525_v22, %v532_v15 }
  0xbb   : > { %v561_v31 = vrot.slane %v559_v26, 4  ;;  %722 = vmatmul.mubr.bf16.vlgmr.msra.gmra.mxu0 %v533_v30 }
  0xbc   : > { %v555_v18 = vor.u32 %v554_v28, %v551_v27 }
  0xbd   : > { %v562_v41 = vor.u32 %v561_v31, %v558_v29  ;;  %v776_v42 = vpop.permute.xlu1 %775 }
  0xbf   : > { %v563_v16 = vsel %vm518_vm14, %v555_v18, %v562_v41 }
  0xc0   : > { %1009 = vmatmul.mubr.msk.bf16.vlgmr.msra.gmra.mxu1 %vm443_vm13, %v563_v16 }
  0xc3   : > { %v781_v50 = vpop.permute.xlu0 %780 }
 0x17b   : > { %v989_v32 = vpop.f32.mrf.mxu0 }
 0x17d   : > { %v990_v33 = vpop.f32.mrf.mxu0 }
 0x17e   : > { %v991_v36 = vadd.f32 %v990_v33, %v989_v32 }
 0x17f   : > { %v992_v37 = vpop.f32.mrf.mxu0 }
 0x180   : > { %v724_v38 = vadd.f32 %v991_v36, %v931_v35  ;;  %v764_v39 = vpop.f32.mrf.mxu1 }
 0x181   : > { %v993_v40 = vpop.f32.mrf.mxu0 }
 0x182   : > { %v765_v43 = vadd.f32 %v764_v39, %v724_v38  ;;  %v994_v44 = vadd.f32 %v993_v40, %v992_v37  ;;  %v1010_v45 = vpop.f32.mrf.mxu1 }
 0x184   : > { %v727_v46 = vadd.f32 %v994_v44, %v931_v35  ;;  %v767_v48 = vpop.f32.mrf.mxu1  ;;  %v783_v49 = vmul.f32 %v776_v42, %v765_v43 }
 0x186   : > { %v768_v34 = vadd.f32 %v767_v48, %v727_v46  ;;  %v957_v51 = vpack.c.bf16 %v783_v49, %v783_v49  ;;  %v1011_v52 = vpop.f32.mrf.mxu1 }
 0x188   : > { %798 = vst.msk [vmem:[%s299_s15 + $0x8] sm:$0xf] %vm786_vm15, %v957_v51  ;;  %v784_v53 = vmul.f32 %v781_v50, %v768_v34 }
 0x18a   : > { %v958_v54 = vpack.c.bf16 %v784_v53, %v784_v53 }
 0x18c   : > { %799 = vst.msk [vmem:[%s299_s15 + $0xc] sm:$0xf] %vm786_vm15, %v958_v54 }
 0x18d PF: > { %s15_s20 = sadd.s32 1, %s1099_s20   ;;  %s1348_s18 = smov %s1095_s19 }
 0x18e   : > { %p12_p5 = scmp.ge.s32.totalorder %s15_s20, 4   ;;  %s1349_s19 = smov %s1351_s21 }
 0x190   :  { %14 = sbr.rel (!%p12_p5) target bundleno = 2 (0x2), region = 79 }

// kernel: _lambda_.19
= control target key start
LH: loop header
LB: loop body
LE: loop exit
PB: predicated region body
PF: predicated region fallthrough
CT: control target
= control target key end

     0   :  { %s944_s12 = smov 0   ;;  %s946_s13 = smov 0   ;;  %s1158_s0 = inlined_call_operand.vmem [shape: bf16[128,16], index: 0, kind: input, shape index: {}]   ;;  %s1159_s1 = inlined_call_operand.vmem [shape: bf16[144,16], index: 1, kind: input, shape index: {}]   ;;  %s1160_s2 = inlined_call_operand.vmem [shape: f32[32,1], index: 2, kind: input, shape index: {}]   ;;  %s1161_s3 = inlined_call_operand.vmem [shape: bf16[128,16], index: 3, kind: output, shape index: {}]  }
   0x1   :  { %s948_s14 = smov 0  }
   0x2 LB: > { %s25_s15 = sadd.s32 1, %s910_s13  ;;  %p762_p0 = scmp.ge.s32.totalorder %s914_s14, 1  ;;  %s914_s14 = sphi %s948_s14, %s13_s14   ;;  %s910_s13 = sphi %s946_s13, %s1163_s13   ;;  %s906_s12 = sphi %s944_s12, %s1162_s12  }
   0x3   : > { %p27_p1 = scmp.ge.s32.totalorder %s25_s15, 2  ;;  %p161_p2 = scmp.lt.s32.totalorder %s914_s14, 3 }
   0x5   : > { %s1165_s15 = smov (%p27_p1, %s25_s15), 0  ;;  %p162_p3 = pnand %p762_p0, %p161_p2 }
   0x6   : > { %s763_s16 = sshll.u32 (!%p162_p3), %s906_s12, 3  ;;  %s917_s23 = smov (!%p162_p3), 96  }
   0x7   : > { %165 = sbr.rel (%p162_p3) target bundleno = 408 (0x198), region = 32  ;;  %p193_p4 = scmp.lt.s32.totalorder (!%p162_p3), %s763_s16, 15 }
   0x8   : > { %s918_s26 = smov (!%p162_p3), 48   ;;  %s919_s29 = smov (!%p162_p3), 80  }
   0x9   : > { %s920_s5 = smov (!%p162_p3), 32   ;;  %s921_s12 = smov (!%p162_p3), 16  }
   0xa   : > { %s922_s22 = smov (!%p162_p3), 64  }
   0xc   : > { %s1167_s16 = smov (!%p193_p4, %s763_s16), 15  ;;  %v867_v36 = vld [vmem:[%s1159_s1 + $0x38] sm:$0xff]   ;;  %v916_v40 = vmov 0   ;;  %v868_v52 = vld [vmem:[%s1159_s1 + $0x30] sm:$0xff]   ;;  %v869_v61 = vld [vmem:[%s1159_s1 + $0x28] sm:$0xff]   ;;  %vm313_vm8 = vcmask 1046528  }
   0xd   : > { %s764_s17 = sshll.u32 %s1167_s16, 2  ;;  %565 = vmatprep.subr.bf16.mxu0 %v916_v40  ;;  %815 = vmatprep.subr.bf16.mxu1 %v916_v40  ;;  %vm325_vm9 = vcmask 1043456   ;;  %vm352_vm10 = vcmask 1042432   ;;  %vm280_vm11 = vsmask.f32 7424  ;;  %vm386_vm14 = vcmask 130048  }
   0xe   : > { %s196_s20 = scalar_lea.vmem %s1158_s0, %s764_s17  ;;  %566 = vmatpush1.bf16.msra.mxu0 %v867_v36  ;;  %824 = vmatpush1.bf16.msra.mxu1 %v867_v36  ;;  %vm337_vm12 = vsmask.f32 3328  ;;  %vm453_vm13 = vsmask.f32 4352  ;;  %vm393_vm15 = vcmask 261120   ;;  %s209_s7 = scalar_lea.vmem %s1161_s3, %s764_s17 }
   0xf   : > { %v813_v0 = vld [vmem:[%s196_s20 + $0x10] sm:$0xff]   ;;  %v812_v1 = vld [vmem:[%s196_s20 + $0x8] sm:$0xff]   ;;  %v814_v2 = vld [vmem:[%s196_s20 + $0x18] sm:$0xff]   ;;  %567 = vmatprep.subr.bf16.mxu0 %v916_v40  ;;  %816 = vmatprep.subr.bf16.mxu1 %v916_v40 }
  0x10   : > { %v806_v3 = vunpack.c.l.bf16 %v813_v0  ;;  %v807_v4 = vunpack.c.h.bf16 %v813_v0  ;;  %v802_v5 = vunpack.c.l.bf16 %v812_v1  ;;  %v803_v6 = vunpack.c.h.bf16 %v812_v1  ;;  %v797_v7 = vld [vmem:[%s196_s20] sm:$0xff]   ;;  %865 = vset.pattern.permute.xlu1 %v916_v40  ;;  %866 = vset.pattern.permute.xlu0 %v916_v40 }
  0x11   : > { %v970_v8 = vunpack.c.l.bf16 %v814_v2  ;;  %v972_v9 = vunpack.c.h.bf16 %v814_v2  ;;  %v974_v12 = vunpack.c.l.bf16 %v797_v7  ;;  %v976_v15 = vunpack.c.h.bf16 %v797_v7  ;;  %v870_v1 = vld [vmem:[%s1159_s1 + $0x20] sm:$0xff]  }
  0x12   : > { %v240_v10 = vmin.f32 %v806_v3, 0.0  ;;  %v241_v11 = vmin.f32 %v807_v4, 0.0  ;;  %v238_v13 = vmin.f32 %v802_v5, 0.0  ;;  %v239_v14 = vmin.f32 %v803_v6, 0.0  ;;  %568 = vmatpush1.bf16.msra.mxu0 %v868_v52  ;;  %825 = vmatpush1.bf16.msra.mxu1 %v868_v52 }
  0x13   : > { %v242_v20 = vmin.f32 %v970_v8, 0.0  ;;  %v243_v21 = vmin.f32 %v972_v9, 0.0  ;;  %v236_v22 = vmin.f32 %v974_v12, 0.0  ;;  %v237_v25 = vmin.f32 %v976_v15, 0.0  ;;  %569 = vmatprep.subr.bf16.mxu0 %v916_v40  ;;  %817 = vmatprep.subr.bf16.mxu1 %v916_v40 }
  0x14   : > { %v252_v16 = vmul.f32 1.442695, %v240_v10  ;;  %v254_v17 = vmul.f32 1.442695, %v241_v11  ;;  %v248_v18 = vmul.f32 1.442695, %v238_v13 }
  0x15   : > { %v250_v19 = vmul.f32 1.442695, %v239_v14  ;;  %v256_v23 = vmul.f32 1.442695, %v242_v20  ;;  %v258_v24 = vmul.f32 1.442695, %v243_v21 }
  0x16   : > { %876 = vpow2.f32 %v252_v16  ;;  %v244_v26 = vmul.f32 1.442695, %v236_v22  ;;  %v246_v27 = vmul.f32 1.442695, %v237_v25  ;;  %vm232_vm0 = vcmp.gt.f32.partialorder %v806_v3, 0.0  ;;  %570 = vmatpush1.bf16.msra.mxu0 %v869_v61  ;;  %826 = vmatpush1.bf16.msra.mxu1 %v869_v61 }
  0x17   : > { %878 = vpow2.f32 %v254_v17  ;;  %vm233_vm1 = vcmp.gt.f32.partialorder %v807_v4, 0.0  ;;  %vm230_vm2 = vcmp.gt.f32.partialorder %v802_v5, 0.0  ;;  %vm231_vm3 = vcmp.gt.f32.partialorder %v803_v6, 0.0  ;;  %571 = vmatprep.subr.bf16.mxu0 %v916_v40  ;;  %818 = vmatprep.subr.bf16.mxu1 %v916_v40  ;;  %v872_v17 = vld [vmem:[%s1159_s1 + $0x10] sm:$0xff]  }
  0x18   : > { %880 = vpow2.f32 %v248_v18  ;;  %vm234_vm4 = vcmp.gt.f32.partialorder %v970_v8, 0.0  ;;  %vm235_vm5 = vcmp.gt.f32.partialorder %v972_v9, 0.0  ;;  %vm228_vm6 = vcmp.gt.f32.partialorder %v974_v12, 0.0 }
  0x19   : > { %882 = vpow2.f32 %v250_v19  ;;  %vm229_vm7 = vcmp.gt.f32.partialorder %v976_v15, 0.0 }
  0x1a   : > { %884 = vpow2.f32 %v256_v23  ;;  %572 = vmatpush1.bf16.msra.mxu0 %v870_v1  ;;  %827 = vmatpush1.bf16.msra.mxu1 %v870_v1 }
  0x1b   : > { %886 = vpow2.f32 %v258_v24  ;;  %573 = vmatprep.subr.bf16.mxu0 %v916_v40  ;;  %819 = vmatprep.subr.bf16.mxu1 %v916_v40 }
  0x1c   : > { %888 = vpow2.f32 %v244_v26 }
  0x1d   : > { %890 = vpow2.f32 %v246_v27 }
  0x23   : > { %v877_v28 = vpop.eup %876 }
  0x24   : > { %v879_v29 = vpop.eup %878  ;;  %v771_v30 = vadd.f32 -1.0, %v877_v28  ;;  %v873_v28 = vld [vmem:[%s1159_s1 + $0x8] sm:$0xff]  }
  0x25   : > { %v881_v31 = vpop.eup %880  ;;  %v772_v32 = vadd.f32 -1.0, %v879_v29 }
  0x26   : > { %v883_v33 = vpop.eup %882  ;;  %v272_v34 = vsel %vm232_vm0, %v806_v3, %v771_v30  ;;  %v769_v35 = vadd.f32 -1.0, %v881_v31  ;;  %vm400_vm0 = vcmask 392192  }
  0x27   : > { %v885_v37 = vpop.eup %884  ;;  %v273_v38 = vsel %vm233_vm1, %v807_v4, %v772_v32  ;;  %v770_v39 = vadd.f32 -1.0, %v883_v33  ;;  %vm407_vm1 = vcmask 523264  }
  0x28   : > { %v887_v41 = vpop.eup %886  ;;  %v988_v42 = vpack.c.bf16 %v273_v38, %v272_v34  ;;  %v270_v43 = vsel %vm230_vm2, %v802_v5, %v769_v35  ;;  %v773_v44 = vadd.f32 -1.0, %v885_v37  ;;  %vm414_vm2 = vcmask 654336  }
  0x29   : > { %v889_v45 = vpop.eup %888  ;;  %v271_v46 = vsel %vm231_vm3, %v803_v6, %v770_v39  ;;  %v774_v47 = vadd.f32 -1.0, %v887_v41  ;;  %v874_v39 = vld [vmem:[%s1159_s1] sm:$0xff]   ;;  %vm421_vm3 = vcmask 785408  }
  0x2a   : > { %v891_v48 = vpop.eup %890  ;;  %366 = vrot.lane.b32.xlu0 %v988_v42, %s917_s23  ;;  %v996_v49 = vpack.c.bf16 %v271_v46, %v270_v43  ;;  %v329_v50 = vrot.slane %v988_v42, 4  ;;  %v274_v51 = vsel %vm234_vm4, %v970_v8, %v773_v44  ;;  %v767_v54 = vadd.f32 -1.0, %v889_v45 }
  0x2b   : > { %v275_v53 = vsel %vm235_vm5, %v972_v9, %v774_v47  ;;  %v768_v55 = vadd.f32 -1.0, %v891_v48  ;;  %v317_v63 = vrot.slane %v988_v42, 1  ;;  %v354_v7 = vrot.slane %v988_v42, 5  ;;  %v871_v9 = vld [vmem:[%s1159_s1 + $0x18] sm:$0xff]  }
  0x2c   : > { %364 = vrot.lane.b32.xlu1 %v996_v49, %s917_s23  ;;  %v1012_v56 = vpack.c.bf16 %v275_v53, %v274_v51  ;;  %v268_v57 = vsel %vm228_vm6, %v974_v12, %v767_v54  ;;  %v353_v59 = vrot.slane %v996_v49, 5  ;;  %v315_v62 = vrot.slane %v996_v49, 1  ;;  %574 = vmatpush1.bf16.msra.mxu0 %v871_v9  ;;  %v875_v51 = vld [vmem:[%s1159_s1 + $0x40] sm:$0xff]  }
  0x2d   : > { %v269_v58 = vsel %vm229_vm7, %v976_v15, %v768_v55  ;;  %v327_v4 = vrot.slane %v996_v49, 4  ;;  %v289_v13 = vshll.u32 %v996_v49, 16  ;;  %v297_v14 = vshll.u32 %v988_v42, 16  ;;  %575 = vmatprep.subr.bf16.mxu0 %v916_v40  ;;  %828 = vmatpush1.bf16.msra.mxu1 %v871_v9 }
  0x2e   : > { %335 = vrot.lane.b32.xlu0 %v329_v50, %s918_s26  ;;  %v1021_v60 = vpack.c.bf16 %v269_v58, %v268_v57  ;;  %v1037_v2 = vsel %vm313_vm8, %v315_v62, %v317_v63  ;;  %v356_v8 = vrot.slane %v1012_v56, 5  ;;  %v1059_v16 = vrot.slane %v1012_v56, 1  ;;  %820 = vmatprep.subr.bf16.mxu1 %v916_v40 }
  0x2f   : > { %v330_v15 = vsel %vm325_vm9, %v327_v4, %v329_v50  ;;  %v291_v20 = vrot.slane %v289_v13, 1  ;;  %v293_v21 = vshrl.u32 %v996_v49, 16  ;;  %v299_v22 = vrot.slane %v297_v14, 1 }
  0x30   : > { %368 = vrot.lane.b32.xlu1 %v1012_v56, %s917_s23  ;;  %v314_v0 = vrot.slane %v1021_v60, 1  ;;  %v326_v3 = vrot.slane %v1021_v60, 4  ;;  %v284_v5 = vshll.u32 %v1021_v60, 16  ;;  %v282_v11 = vshrl.u32 %v1021_v60, 16  ;;  %576 = vmatpush1.bf16.msra.mxu0 %v872_v17  ;;  %s923_s23 = smov 112  }
  0x31   : > { %v357_v18 = vsel %vm352_vm10, %v354_v7, %v356_v8  ;;  %v301_v23 = vshrl.u32 %v988_v42, 16  ;;  %v355_v24 = vsel %vm352_vm10, %v353_v59, %v354_v7  ;;  %577 = vmatprep.subr.bf16.mxu0 %v916_v40  ;;  %829 = vmatpush1.bf16.msra.mxu1 %v872_v17  ;;  %v385_v25 = vsel %vm313_vm8, %v317_v63, %v1059_v16 }
  0x32   : > { %358 = vrot.lane.b32.xlu0 %v353_v59, %s919_s29  ;;  %v316_v6 = vsel %vm313_vm8, %v314_v0, %v315_v62  ;;  %v328_v10 = vsel %vm325_vm9, %v326_v3, %v327_v4  ;;  %v286_v12 = vrot.slane %v284_v5, 1  ;;  %v342_v27 = vrot.slane %v297_v14, 5  ;;  %821 = vmatprep.subr.bf16.mxu1 %v916_v40  ;;  %v614_v3 = vld [vmem:[%s1160_s2] sm:$0xff]  ;;  %v616_v4 = vld [vmem:[%s1160_s2 + $0x10] sm:$0xff]  ;;  %v617_v5 = vld [vmem:[%s1160_s2 + $0x18] sm:$0xff] }
  0x33   : > { %v341_v26 = vrot.slane %v301_v23, 4  ;;  %v470_v29 = vshrl.u32 %v1037_v2, 16  ;;  %v473_v30 = vshll.u32 %v1037_v2, 16  ;;  %v295_v32 = vor.u32 %v293_v21, %v291_v20 }
  0x34   : > { %323 = vrot.lane.b32.xlu1 %v317_v63, %s920_s5  ;;  %v287_v19 = vor.u32 %v286_v12, %v282_v11  ;;  %v303_v33 = vor.u32 %v301_v23, %v299_v22  ;;  %v338_v34 = vrot.slane %v293_v21, 4  ;;  %v339_v35 = vrot.slane %v289_v13, 5  ;;  %578 = vmatpush1.bf16.msra.mxu0 %v873_v28 }
  0x35   : > { %v478_v36 = vshrl.u32 %v385_v25, 16  ;;  %v481_v37 = vshll.u32 %v385_v25, 16  ;;  %579 = vmatprep.subr.bf16.mxu0 %v916_v40  ;;  %830 = vmatpush1.bf16.msra.mxu1 %v873_v28  ;;  %v343_v38 = vor.u32 %v342_v27, %v341_v26  ;;  %v472_v41 = vrot.slane %v470_v29, 3 }
  0x36   : > { %321 = vrot.lane.b32.xlu0 %v1037_v2, %s920_s5  ;;  %v292_v31 = vsel %vm280_vm11, %v287_v19, %v291_v20  ;;  %822 = vmatprep.subr.bf16.mxu1 %v916_v40  ;;  %v475_v43 = vrot.slane %v473_v30, 4  ;;  %v300_v44 = vsel %vm280_vm11, %v295_v32, %v299_v22  ;;  %v340_v45 = vor.u32 %v339_v35, %v338_v34 }
  0x37   : > { %v371_v46 = vshll.u32 %v1012_v56, 16  ;;  %v480_v47 = vrot.slane %v478_v36, 3  ;;  %v483_v48 = vrot.slane %v481_v37, 4  ;;  %v495_v54 = vshrl.u32 %v1059_v16, 16 }
  0x38   : > { %319 = vrot.lane.b32.xlu1 %v316_v6, %s920_s5  ;;  %580 = vmatpush1.bf16.msra.mxu0 %v874_v39  ;;  %v344_v50 = vsel %vm337_vm12, %v340_v45, %v343_v38  ;;  %v476_v52 = vor.u32 %v475_v43, %v472_v41  ;;  %v498_v55 = vshll.u32 %v1059_v16, 16  ;;  %v375_v62 = vshrl.u32 %v1012_v56, 16  ;;  %v615_v56 = vld [vmem:[%s1160_s2 + $0x8] sm:$0xff] }
  0x39   : > { %595 = vmatprep.subr.bf16.mxu0 %v916_v40  ;;  %831 = vmatpush1.bf16.msra.mxu1 %v874_v39  ;;  %v484_v53 = vor.u32 %v483_v48, %v480_v47  ;;  %v373_v57 = vrot.slane %v371_v46, 1  ;;  %v497_v59 = vrot.slane %v495_v54, 3  ;;  %vm428_vm4 = vcmask 916480  }
  0x3a   : > { %331 = vrot.lane.b32.xlu0 %v328_v10, %s918_s26  ;;  %823 = vmatprep.subr.bf16.mxu1 %v916_v40  ;;  %v500_v61 = vrot.slane %v498_v55, 4  ;;  %vm644_vm5 = vcmask 125952  }
  0x3b   : > { %v485_v58 = vsel %vm453_vm13, %v476_v52, %v484_v53  ;;  %v374_v0 = vsel %vm280_vm11, %v303_v33, %v373_v57  ;;  %v377_v2 = vor.u32 %v375_v62, %v373_v57  ;;  %645 = vst.msk [vmem:[%s209_s7] sm:$0xf] %vm644_vm5, %v916_v40  ;;  %646 = vst.msk [vmem:[%s209_s7 + $0x4] sm:$0xf] %vm644_vm5, %v916_v40 }
  0x3c   : > { %333 = vrot.lane.b32.xlu1 %v330_v15, %s918_s26  ;;  %596 = vmatpush2.bf16.msra.mxu0 %v875_v51  ;;  %v501_v63 = vor.u32 %v500_v61, %v497_v59  ;;  %647 = vst.msk [vmem:[%s209_s7 + $0x18] sm:$0xf] %vm644_vm5, %v916_v40  ;;  %648 = vst.msk [vmem:[%s209_s7 + $0x1c] sm:$0xf] %vm644_vm5, %v916_v40 }
  0x3d   : > { %832 = vmatpush2.bf16.msra.mxu1 %v875_v51  ;;  %784 = vmatprep.mubr.msk.bf16.mxu0 %vm386_vm14, %v485_v58 }
  0x3e   : > { %362 = vrot.lane.b32.xlu0 %v357_v18, %s919_s29  ;;  %v502_v1 = vsel %vm453_vm13, %v484_v53, %v501_v63 }
  0x3f   : > { %785 = vmatprep.mubr.msk.bf16.mxu1 %vm386_vm14, %v502_v1 }
  0x40   : > { %360 = vrot.lane.b32.xlu1 %v355_v24, %s919_s29 }
  0x42   : > { %304 = vrot.lane.b32.xlu0 %v292_v31, %s921_s12 }
  0x44   : > { %308 = vrot.lane.b32.xlu1 %v303_v33, %s921_s12 }
  0x46   : > { %306 = vrot.lane.b32.xlu0 %v300_v44, %s921_s12 }
  0x48   : > { %345 = vrot.lane.b32.xlu1 %v340_v45, %s922_s22 }
  0x4a   : > { %347 = vrot.lane.b32.xlu0 %v344_v50, %s922_s22 }
  0x4c   : > { %349 = vrot.lane.b32.xlu1 %v343_v38, %s922_s22 }
  0x4e   : > { %378 = vrot.lane.b32.xlu0 %v300_v44, %s923_s23 }
  0x50   : > { %380 = vrot.lane.b32.xlu1 %v374_v0, %s923_s23 }
  0x52   : > { %382 = vrot.lane.b32.xlu0 %v377_v2, %s923_s23 }
  0x54   : > { %620 = vperm.xlu1 %865, %v614_v3  }
  0x56   : > { %625 = vperm.xlu0 %866, %v615_v56  }
  0x58   : > { %630 = vperm.xlu1 %865, %v616_v4  }
  0x5c   : > { %635 = vperm.xlu1 %865, %v617_v5  }
  0x9c   : > { %v367_v6 = vpop.permute.xlu0 %366 }
  0x9e   : > { %v365_v7 = vpop.permute.xlu1 %364 }
  0xa0   : > { %v336_v8 = vpop.permute.xlu0 %335 }
  0xa2   : > { %v369_v9 = vpop.permute.xlu1 %368 }
  0xa4   : > { %v359_v10 = vpop.permute.xlu0 %358 }
  0xa6   : > { %v324_v11 = vpop.permute.xlu1 %323 }
  0xa8   : > { %v322_v12 = vpop.permute.xlu0 %321 }
  0xaa   : > { %v320_v13 = vpop.permute.xlu1 %319 }
  0xac   : > { %v332_v14 = vpop.permute.xlu0 %331 }
  0xae   : > { %v334_v15 = vpop.permute.xlu1 %333 }
  0xb0   : > { %v363_v16 = vpop.permute.xlu0 %362 }
  0xb2   : > { %v361_v17 = vpop.permute.xlu1 %360 }
  0xb4   : > { %v305_v18 = vpop.permute.xlu0 %304 }
  0xb5   : > { %v388_v19 = vsel %vm386_vm14, %v1021_v60, %v305_v18 }
  0xb6   : > { %v309_v20 = vpop.permute.xlu1 %308  ;;  %v395_v21 = vsel %vm393_vm15, %v388_v19, %v320_v13 }
  0xb7   : > { %v392_v22 = vsel %vm386_vm14, %v988_v42, %v309_v20  ;;  %v402_v23 = vsel %vm400_vm0, %v395_v21, %v332_v14 }
  0xb8   : > { %v307_v24 = vpop.permute.xlu0 %306  ;;  %v399_v28 = vsel %vm393_vm15, %v392_v22, %v324_v11 }
  0xb9   : > { %v390_v25 = vsel %vm386_vm14, %v996_v49, %v307_v24  ;;  %v406_v42 = vsel %vm400_vm0, %v399_v28, %v336_v8 }
  0xba   : > { %v346_v26 = vpop.permute.xlu1 %345  ;;  %v397_v27 = vsel %vm393_vm15, %v390_v25, %v322_v12 }
  0xbb   : > { %v409_v29 = vsel %vm407_vm1, %v402_v23, %v346_v26  ;;  %v404_v60 = vsel %vm400_vm0, %v397_v27, %v334_v15 }
  0xbc   : > { %v348_v30 = vpop.permute.xlu0 %347  ;;  %v416_v31 = vsel %vm414_vm2, %v409_v29, %v359_v10 }
  0xbd   : > { %v411_v32 = vsel %vm407_vm1, %v404_v60, %v348_v30  ;;  %v423_v37 = vsel %vm421_vm3, %v416_v31, %v365_v7 }
  0xbe   : > { %v350_v33 = vpop.permute.xlu1 %349  ;;  %v418_v34 = vsel %vm414_vm2, %v411_v32, %v361_v17 }
  0xbf   : > { %v413_v49 = vsel %vm407_vm1, %v406_v42, %v350_v33  ;;  %v425_v36 = vsel %vm421_vm3, %v418_v34, %v367_v6 }
  0xc0   : > { %v420_v35 = vsel %vm414_vm2, %v413_v49, %v363_v16  ;;  %v379_v38 = vpop.permute.xlu0 %378 }
  0xc1   : > { %v430_v39 = vsel %vm428_vm4, %v423_v37, %v379_v38  ;;  %v427_v46 = vsel %vm421_vm3, %v420_v35, %v369_v9 }
  0xc2   : > { %v381_v41 = vpop.permute.xlu1 %380  ;;  %v454_v43 = vshrl.u32 %v430_v39, 16  ;;  %v457_v44 = vshll.u32 %v430_v39, 16 }
  0xc3   : > { %v432_v45 = vsel %vm428_vm4, %v425_v36, %v381_v41 }
  0xc4   : > { %v461_v47 = vshrl.u32 %v432_v45, 16  ;;  %v464_v48 = vshll.u32 %v432_v45, 16  ;;  %v456_v50 = vrot.slane %v454_v43, 3  ;;  %v459_v51 = vrot.slane %v457_v44, 4  ;;  %v383_v52 = vpop.permute.xlu0 %382 }
  0xc5   : > { %v434_v53 = vsel %vm428_vm4, %v427_v46, %v383_v52 }
  0xc6   : > { %v463_v54 = vrot.slane %v461_v47, 3  ;;  %v466_v55 = vrot.slane %v464_v48, 4  ;;  %v460_v57 = vor.u32 %v459_v51, %v456_v50  ;;  %v486_v58 = vshrl.u32 %v434_v53, 16 }
  0xc7   : > { %v489_v59 = vshll.u32 %v434_v53, 16 }
  0xc8   : > { %v467_v61 = vor.u32 %v466_v55, %v463_v54  ;;  %v488_v62 = vrot.slane %v486_v58, 3 }
  0xc9   : > { %v491_v63 = vrot.slane %v489_v59, 4 }
  0xca   : > { %v468_v0 = vsel %vm453_vm13, %v460_v57, %v467_v61 }
  0xcb   : > { %v492_v1 = vor.u32 %v491_v63, %v488_v62  ;;  %598 = vmatmul.mubr.bf16.vlgmr.msra.gmra.mxu0 %v468_v0 }
  0xcd   : > { %v493_v2 = vsel %vm453_vm13, %v467_v61, %v492_v1 }
  0xce   : > { %606 = vmatmul.mubr.bf16.vlgmr.msra.gmra.mxu1 %v493_v2 }
  0xcf   : > { %v621_v3 = vpop.permute.xlu1 %620 }
  0xd1   : > { %v626_v7 = vpop.permute.xlu0 %625 }
  0xd3   : > { %v631_v4 = vpop.permute.xlu1 %630 }
  0xd7   : > { %v636_v16 = vpop.permute.xlu1 %635 }
 0x18b   : > { %v599_v56 = vpop.f32.mrf.mxu0 }
 0x18c   : > { %v638_v5 = vmul.f32 %v621_v3, %v599_v56 }
 0x18d   : > { %v601_v6 = vpop.f32.mrf.mxu0 }
 0x18e   : > { %v792_v8 = vpack.c.bf16 %v638_v5, %v638_v5  ;;  %v607_v9 = vpop.f32.mrf.mxu1 }
 0x18f   : > { %v602_v10 = vpop.f32.mrf.mxu0  ;;  %v640_v11 = vmul.f32 %v631_v4, %v607_v9 }
 0x190   : > { %663 = vst.msk [vmem:[%s209_s7 + $0x8] sm:$0xf] %vm644_vm5, %v792_v8  ;;  %v639_v12 = vmul.f32 %v626_v7, %v602_v10  ;;  %v609_v13 = vpop.f32.mrf.mxu1 }
 0x191   : > { %v794_v14 = vpack.c.bf16 %v640_v11, %v640_v11  ;;  %v604_v15 = vpop.f32.mrf.mxu0 }
 0x192   : > { %v793_v17 = vpack.c.bf16 %v639_v12, %v639_v12  ;;  %v610_v18 = vpop.f32.mrf.mxu1 }
 0x193   : > { %665 = vst.msk [vmem:[%s209_s7 + $0x10] sm:$0xf] %vm644_vm5, %v794_v14  ;;  %v641_v40 = vmul.f32 %v636_v16, %v610_v18 }
 0x194   : > { %664 = vst.msk [vmem:[%s209_s7 + $0xc] sm:$0xf] %vm644_vm5, %v793_v17  ;;  %v612_v19 = vpop.f32.mrf.mxu1 }
 0x195   : > { %v795_v20 = vpack.c.bf16 %v641_v40, %v641_v40 }
 0x197   : > { %666 = vst.msk [vmem:[%s209_s7 + $0x14] sm:$0xf] %vm644_vm5, %v795_v20 }
 0x198 PF: > { %s13_s14 = sadd.s32 1, %s914_s14   ;;  %s1162_s12 = smov %s910_s13 }
 0x199   : > { %p10_p5 = scmp.ge.s32.totalorder %s13_s14, 4   ;;  %s1163_s13 = smov %s1165_s15 }
 0x19b   :  { %12 = sbr.rel (!%p10_p5) target bundleno = 2 (0x2), region = 65 }

// kernel: _lambda_.20
= control target key start
LH: loop header
LB: loop body
LE: loop exit
PB: predicated region body
PF: predicated region fallthrough
CT: control target
= control target key end

     0   :  { %s1138_s18 = smov 0   ;;  %s1140_s19 = smov 0   ;;  %s1415_s0 = inlined_call_operand.vmem [shape: bf16[128,16], index: 0, kind: input, shape index: {}]   ;;  %s1416_s1 = inlined_call_operand.vmem [shape: bf16[160,16], index: 1, kind: input, shape index: {}]   ;;  %s1417_s2 = inlined_call_operand.vmem [shape: f32[32,1], index: 2, kind: input, shape index: {}]   ;;  %s1418_s3 = inlined_call_operand.vmem [shape: f32[1,16], index: 3, kind: input, shape index: {}]   ;;  %s1419_s4 = inlined_call_operand.vmem [shape: bf16[128,16], index: 4, kind: input, shape index: {}]   ;;  %s1420_s5 = inlined_call_operand.vmem [shape: bf16[128,16], index: 5, kind: output, shape index: {}]  }
   0x1   :  { %s1142_s20 = smov 0  }
   0x2 LB: > { %s27_s21 = sadd.s32 1, %s1094_s19  ;;  %p935_p0 = scmp.ge.s32.totalorder %s1098_s20, 1  ;;  %s1098_s20 = sphi %s1142_s20, %s15_s20   ;;  %s1094_s19 = sphi %s1140_s19, %s1422_s19   ;;  %s1090_s18 = sphi %s1138_s18, %s1421_s18  }
   0x3   : > { %p29_p1 = scmp.ge.s32.totalorder %s27_s21, 2  ;;  %p230_p2 = scmp.lt.s32.totalorder %s1098_s20, 3 }
   0x5   : > { %s1424_s21 = smov (%p29_p1, %s27_s21), 0  ;;  %p231_p3 = pnand %p935_p0, %p230_p2 }
   0x6   : > { %s936_s22 = sshll.u32 (!%p231_p3), %s1090_s18, 3  ;;  %s1100_s30 = smov (!%p231_p3), 16  }
   0x7   : > { %234 = sbr.rel (%p231_p3) target bundleno = 412 (0x19c), region = 40  ;;  %p274_p4 = scmp.lt.s32.totalorder (!%p231_p3), %s936_s22, 15 }
   0x8   : > { %s1102_s10 = smov (!%p231_p3), 96   ;;  %s1103_s15 = smov (!%p231_p3), 48  }
   0x9   : > { %s1104_s16 = smov (!%p231_p3), 32   ;;  %s1106_s8 = smov (!%p231_p3), 64  }
   0xa   : > { %s1107_s11 = smov (!%p231_p3), 112  }
   0xc   : > { %s1426_s22 = smov (!%p274_p4, %s936_s22), 15  ;;  %vm431_vm0 = vsmask.f32 3328  ;;  %v1050_v43 = vld [vmem:[%s1416_s1 + $0x38] sm:$0xff]   ;;  %v1101_v46 = vmov 0   ;;  %v1051_v55 = vld [vmem:[%s1416_s1 + $0x30] sm:$0xff]  }
   0xd   : > { %s1156_s23 = sshll.u32 %s1426_s22, 2  ;;  %713 = vmatprep.subr.bf16.mxu0 %v1101_v46  ;;  %994 = vmatprep.subr.bf16.mxu1 %v1101_v46  ;;  %vm407_vm9 = vcmask 1046528   ;;  %s1105_s22 = smov 80   ;;  %vm419_vm10 = vcmask 1043456   ;;  %vm446_vm11 = vcmask 1042432   ;;  %vm513_vm13 = vcmask 130048  }
   0xe   : > { %s290_s26 = scalar_lea.vmem %s1419_s4, %s1156_s23  ;;  %s277_s29 = scalar_lea.vmem %s1415_s0, %s1156_s23  ;;  %714 = vmatpush1.bf16.msra.mxu0 %v1050_v43  ;;  %1004 = vmatpush1.bf16.msra.mxu1 %v1050_v43  ;;  %vm374_vm12 = vsmask.f32 7424  ;;  %v1057_v43 = vld [vmem:[%s1416_s1] sm:$0xff]   ;;  %vm598_vm14 = vsmask.f32 4352  ;;  %vm520_vm15 = vcmask 261120  }
   0xf   : > { %v1048_v0 = vld [vmem:[%s290_s26 + $0x8] sm:$0xff]   ;;  %v976_v1 = vld [vmem:[%s277_s29] sm:$0xff]   ;;  %v992_v3 = vld [vmem:[%s277_s29 + $0x10] sm:$0xff]   ;;  %715 = vmatprep.subr.bf16.mxu0 %v1101_v46  ;;  %995 = vmatprep.subr.bf16.mxu1 %v1101_v46  ;;  %s1381_s25 = scalar_lea.vmem %s1420_s5, %s1156_s23 }
  0x10   : > { %v991_v2 = vld [vmem:[%s277_s29 + $0x8] sm:$0xff]   ;;  %v491_v4 = vshrl.u32 %v1048_v0, 16  ;;  %v494_v5 = vshll.u32 %v1048_v0, 16  ;;  %v1166_v6 = vunpack.c.l.bf16 %v976_v1  ;;  %v1168_v7 = vunpack.c.h.bf16 %v976_v1  ;;  %v1049_v12 = vld [vmem:[%s290_s26 + $0x10] sm:$0xff]   ;;  %v993_v17 = vld [vmem:[%s277_s29 + $0x18] sm:$0xff]   ;;  %1047 = vset.pattern.permute.xlu1 %v1101_v46  ;;  %1046 = vset.pattern.permute.xlu0 %v1101_v46 }
  0x11   : > { %v1170_v8 = vunpack.c.l.bf16 %v991_v2  ;;  %v1172_v9 = vunpack.c.h.bf16 %v991_v2  ;;  %v1174_v10 = vunpack.c.l.bf16 %v992_v3  ;;  %v1176_v11 = vunpack.c.h.bf16 %v992_v3 }
  0x12   : > { %v493_v13 = vrot.slane %v491_v4, 4  ;;  %v496_v14 = vrot.slane %v494_v5, 5  ;;  %v326_v15 = vmin.f32 %v1166_v6, 0.0  ;;  %v327_v16 = vmin.f32 %v1168_v7, 0.0  ;;  %716 = vmatpush1.bf16.msra.mxu0 %v1051_v55  ;;  %1005 = vmatpush1.bf16.msra.mxu1 %v1051_v55  ;;  %v1052_v5 = vld [vmem:[%s1416_s1 + $0x28] sm:$0xff]  }
  0x13   : > { %v328_v19 = vmin.f32 %v1170_v8, 0.0  ;;  %v329_v20 = vmin.f32 %v1172_v9, 0.0  ;;  %v330_v21 = vmin.f32 %v1174_v10, 0.0  ;;  %v331_v22 = vmin.f32 %v1176_v11, 0.0  ;;  %717 = vmatprep.subr.bf16.mxu0 %v1101_v46  ;;  %996 = vmatprep.subr.bf16.mxu1 %v1101_v46 }
  0x14   : > { %v497_v18 = vor.u32 %v496_v14, %v493_v13  ;;  %v334_v23 = vmul.f32 1.442695, %v326_v15  ;;  %v336_v24 = vmul.f32 1.442695, %v327_v16  ;;  %v499_v25 = vshrl.u32 %v1049_v12, 16  ;;  %v1054_v16 = vld [vmem:[%s1416_s1 + $0x18] sm:$0xff]  }
  0x15   : > { %v338_v26 = vmul.f32 1.442695, %v328_v19  ;;  %v340_v27 = vmul.f32 1.442695, %v329_v20  ;;  %v342_v28 = vmul.f32 1.442695, %v330_v21  ;;  %v1185_v29 = vunpack.c.l.bf16 %v993_v17 }
  0x16   : > { %507 = vrot.lane.b32.xlu0 %v497_v18, %s1100_s30  ;;  %1060 = vpow2.f32 %v334_v23  ;;  %v344_v30 = vmul.f32 1.442695, %v331_v22  ;;  %v501_v31 = vrot.slane %v499_v25, 4  ;;  %v502_v32 = vshll.u32 %v1049_v12, 16  ;;  %718 = vmatpush1.bf16.msra.mxu0 %v1052_v5 }
  0x17   : > { %1062 = vpow2.f32 %v336_v24  ;;  %v1187_v33 = vunpack.c.h.bf16 %v993_v17  ;;  %v332_v34 = vmin.f32 %v1185_v29, 0.0  ;;  %vm320_vm1 = vcmp.gt.f32.partialorder %v1170_v8, 0.0  ;;  %719 = vmatprep.subr.bf16.mxu0 %v1101_v46  ;;  %1006 = vmatpush1.bf16.msra.mxu1 %v1052_v5  ;;  %v1055_v24 = vld [vmem:[%s1416_s1 + $0x10] sm:$0xff]  }
  0x18   : > { %1064 = vpow2.f32 %v338_v26  ;;  %v504_v35 = vrot.slane %v502_v32, 5  ;;  %vm321_vm2 = vcmp.gt.f32.partialorder %v1172_v9, 0.0  ;;  %vm318_vm3 = vcmp.gt.f32.partialorder %v1166_v6, 0.0  ;;  %997 = vmatprep.subr.bf16.mxu1 %v1101_v46 }
  0x19   : > { %1066 = vpow2.f32 %v340_v27  ;;  %v333_v36 = vmin.f32 %v1187_v33, 0.0  ;;  %v346_v37 = vmul.f32 1.442695, %v332_v34  ;;  %vm322_vm4 = vcmp.gt.f32.partialorder %v1174_v10, 0.0 }
  0x1a   : > { %1068 = vpow2.f32 %v342_v28  ;;  %v505_v38 = vor.u32 %v504_v35, %v501_v31  ;;  %vm319_vm5 = vcmp.gt.f32.partialorder %v1168_v7, 0.0  ;;  %vm323_vm6 = vcmp.gt.f32.partialorder %v1176_v11, 0.0  ;;  %v1056_v35 = vld [vmem:[%s1416_s1 + $0x8] sm:$0xff]  }
  0x1b   : > { %1070 = vpow2.f32 %v344_v30  ;;  %v348_v39 = vmul.f32 1.442695, %v333_v36  ;;  %vm324_vm7 = vcmp.gt.f32.partialorder %v1185_v29, 0.0  ;;  %vm325_vm8 = vcmp.gt.f32.partialorder %v1187_v33, 0.0 }
  0x1c   : > { %511 = vrot.lane.b32.xlu0 %v505_v38, %s1100_s30  ;;  %v506_v40 = vsel %vm431_vm0, %v497_v18, %v505_v38  ;;  %1072 = vpow2.f32 %v346_v37 }
  0x1d   : > { %509 = vrot.lane.b32.xlu1 %v506_v40, %s1100_s30  ;;  %1074 = vpow2.f32 %v348_v39 }
  0x23   : > { %v1061_v41 = vpop.eup %1060 }
  0x24   : > { %v1063_v42 = vpop.eup %1062  ;;  %v942_v45 = vadd.f32 -1.0, %v1061_v41 }
  0x25   : > { %v1065_v44 = vpop.eup %1064  ;;  %v943_v49 = vadd.f32 -1.0, %v1063_v42 }
  0x26   : > { %v1067_v47 = vpop.eup %1066  ;;  %v944_v48 = vadd.f32 -1.0, %v1065_v44  ;;  %v358_v59 = vsel %vm318_vm3, %v1166_v6, %v942_v45  ;;  %vm548_vm3 = vcmask 785408  }
  0x27   : > { %v1069_v50 = vpop.eup %1068  ;;  %v945_v51 = vadd.f32 -1.0, %v1067_v47  ;;  %v359_v0 = vsel %vm319_vm5, %v1168_v7, %v943_v49  ;;  %vm792_vm5 = vcmask 125952  }
  0x28   : > { %v1071_v52 = vpop.eup %1070  ;;  %v946_v53 = vadd.f32 -1.0, %v1069_v50  ;;  %v360_v54 = vsel %vm320_vm1, %v1170_v8, %v944_v48  ;;  %v1248_v7 = vpack.c.bf16 %v359_v0, %v358_v59  ;;  %v1058_v50 = vld [vmem:[%s1416_s1 + $0x48] sm:$0xff]   ;;  %v764_v0 = vld [vmem:[%s1417_s2 + $0x10] sm:$0xff]  ;;  %vm534_vm1 = vcmask 523264   ;;  %793 = vst.msk [vmem:[%s1381_s25] sm:$0xf] %vm792_vm5, %v1101_v46 }
  0x29   : > { %v1073_v56 = vpop.eup %1072  ;;  %v947_v57 = vadd.f32 -1.0, %v1071_v52  ;;  %v361_v58 = vsel %vm321_vm2, %v1172_v9, %v945_v51  ;;  %vm541_vm2 = vcmask 654336   ;;  %794 = vst.msk [vmem:[%s1381_s25 + $0x4] sm:$0xf] %vm792_vm5, %v1101_v46  ;;  %795 = vst.msk [vmem:[%s1381_s25 + $0x18] sm:$0xf] %vm792_vm5, %v1101_v46 }
  0x2a   : > { %v1075_v60 = vpop.eup %1074  ;;  %v362_v61 = vsel %vm322_vm4, %v1174_v10, %v946_v53  ;;  %v1226_v62 = vpack.c.bf16 %v361_v58, %v360_v54  ;;  %v948_v63 = vadd.f32 -1.0, %v1073_v56  ;;  %v408_v13 = vrot.slane %v1248_v7, 1  ;;  %v1059_v54 = vld [vmem:[%s1416_s1 + $0x40] sm:$0xff]   ;;  %796 = vst.msk [vmem:[%s1381_s25 + $0x1c] sm:$0xf] %vm792_vm5, %v1101_v46 }
  0x2b   : > { %v363_v1 = vsel %vm323_vm6, %v1176_v11, %v947_v57  ;;  %v949_v2 = vadd.f32 -1.0, %v1075_v60  ;;  %v1053_v11 = vld [vmem:[%s1416_s1 + $0x20] sm:$0xff]   ;;  %v420_v21 = vrot.slane %v1248_v7, 4  ;;  %v378_v22 = vshll.u32 %v1248_v7, 16 }
  0x2c   : > { %v1236_v3 = vpack.c.bf16 %v363_v1, %v362_v61  ;;  %458 = vrot.lane.b32.xlu1 %v1226_v62, %s1102_s10  ;;  %v364_v4 = vsel %vm324_vm7, %v1185_v29, %v948_v63  ;;  %v409_v12 = vrot.slane %v1226_v62, 1  ;;  %v447_v14 = vrot.slane %v1226_v62, 5  ;;  %720 = vmatpush1.bf16.msra.mxu0 %v1053_v11  ;;  %v762_v60 = vld [vmem:[%s1417_s2] sm:$0xff]  ;;  %v763_v61 = vld [vmem:[%s1417_s2 + $0x8] sm:$0xff]  ;;  %v765_v63 = vld [vmem:[%s1417_s2 + $0x18] sm:$0xff] }
  0x2d   : > { %v365_v6 = vsel %vm325_vm8, %v1187_v33, %v949_v2  ;;  %721 = vmatprep.subr.bf16.mxu0 %v1101_v46  ;;  %1007 = vmatpush1.bf16.msra.mxu1 %v1053_v11  ;;  %v421_v18 = vrot.slane %v1226_v62, 4  ;;  %v376_v27 = vshrl.u32 %v1248_v7, 16  ;;  %v380_v30 = vrot.slane %v378_v22, 1 }
  0x2e   : > { %460 = vrot.lane.b32.xlu0 %v1236_v3, %s1102_s10  ;;  %v423_v8 = vrot.slane %v1236_v3, 4  ;;  %v1252_v9 = vpack.c.bf16 %v365_v6, %v364_v4  ;;  %v411_v10 = vrot.slane %v1236_v3, 1  ;;  %998 = vmatprep.subr.bf16.mxu1 %v1101_v46  ;;  %v410_v17 = vsel %vm407_vm9, %v408_v13, %v409_v12 }
  0x2f   : > { %v391_v23 = vshll.u32 %v1236_v3, 16  ;;  %v448_v26 = vrot.slane %v1236_v3, 5  ;;  %v422_v28 = vsel %vm419_vm10, %v420_v21, %v421_v18  ;;  %v383_v31 = vshll.u32 %v1226_v62, 16 }
  0x30   : > { %462 = vrot.lane.b32.xlu1 %v1252_v9, %s1102_s10  ;;  %v478_v15 = vrot.slane %v1252_v9, 1  ;;  %722 = vmatpush1.bf16.msra.mxu0 %v1054_v16  ;;  %v1280_v20 = vsel %vm407_vm9, %v409_v12, %v411_v10  ;;  %v424_v25 = vsel %vm419_vm10, %v421_v18, %v423_v8  ;;  %v450_v29 = vrot.slane %v1252_v9, 5 }
  0x31   : > { %723 = vmatprep.subr.bf16.mxu0 %v1101_v46  ;;  %1008 = vmatpush1.bf16.msra.mxu1 %v1054_v16  ;;  %v393_v32 = vrot.slane %v391_v23, 1  ;;  %v395_v33 = vshrl.u32 %v1236_v3, 16  ;;  %v387_v34 = vshrl.u32 %v1226_v62, 16  ;;  %v449_v36 = vsel %vm446_vm11, %v447_v14, %v448_v26 }
  0x32   : > { %429 = vrot.lane.b32.xlu0 %v423_v8, %s1103_s15  ;;  %v1277_v19 = vsel %vm407_vm9, %v411_v10, %v478_v15  ;;  %999 = vmatprep.subr.bf16.mxu1 %v1101_v46  ;;  %v451_v37 = vsel %vm446_vm11, %v448_v26, %v450_v29  ;;  %v381_v38 = vor.u32 %v380_v30, %v376_v27  ;;  %v385_v39 = vrot.slane %v383_v31, 1 }
  0x33   : > { %v397_v40 = vor.u32 %v395_v33, %v393_v32  ;;  %v432_v41 = vrot.slane %v387_v34, 4  ;;  %v433_v42 = vrot.slane %v383_v31, 5  ;;  %v435_v47 = vrot.slane %v395_v33, 4 }
  0x34   : > { %417 = vrot.lane.b32.xlu1 %v411_v10, %s1104_s16  ;;  %724 = vmatpush1.bf16.msra.mxu0 %v1055_v24  ;;  %v386_v44 = vsel %vm374_vm12, %v381_v38, %v385_v39  ;;  %v389_v45 = vor.u32 %v387_v34, %v385_v39  ;;  %v436_v48 = vrot.slane %v391_v23, 5  ;;  %v465_v53 = vshll.u32 %v1252_v9, 16 }
  0x35   : > { %725 = vmatprep.subr.bf16.mxu0 %v1101_v46  ;;  %1009 = vmatpush1.bf16.msra.mxu1 %v1055_v24  ;;  %v434_v49 = vor.u32 %v433_v42, %v432_v41  ;;  %v469_v57 = vshrl.u32 %v1252_v9, 16  ;;  %vm555_vm4 = vcmask 916480  }
  0x36   : > { %452 = vrot.lane.b32.xlu0 %v447_v14, %s1105_s22  ;;  %1000 = vmatprep.subr.bf16.mxu1 %v1101_v46  ;;  %v394_v51 = vsel %vm374_vm12, %v389_v45, %v393_v32  ;;  %v437_v52 = vor.u32 %v436_v48, %v435_v47  ;;  %v467_v56 = vrot.slane %v465_v53, 1 }
  0x38   : > { %413 = vrot.lane.b32.xlu1 %v410_v17, %s1104_s16  ;;  %726 = vmatpush1.bf16.msra.mxu0 %v1056_v35  ;;  %v438_v55 = vsel %vm431_vm0, %v434_v49, %v437_v52  ;;  %v468_v58 = vsel %vm374_vm12, %v397_v40, %v467_v56  ;;  %v471_v59 = vor.u32 %v469_v57, %v467_v56  ;;  %vm527_vm0 = vcmask 392192  }
  0x39   : > { %727 = vmatprep.subr.bf16.mxu0 %v1101_v46  ;;  %1010 = vmatpush1.bf16.msra.mxu1 %v1056_v35 }
  0x3a   : > { %415 = vrot.lane.b32.xlu0 %v1280_v20, %s1104_s16  ;;  %1001 = vmatprep.subr.bf16.mxu1 %v1101_v46 }
  0x3c   : > { %427 = vrot.lane.b32.xlu1 %v424_v25, %s1103_s15  ;;  %728 = vmatpush1.bf16.msra.mxu0 %v1057_v43 }
  0x3d   : > { %741 = vmatprep.subr.bf16.mxu0 %v1101_v46  ;;  %1011 = vmatpush1.bf16.msra.mxu1 %v1057_v43 }
  0x3e   : > { %425 = vrot.lane.b32.xlu0 %v422_v28, %s1103_s15  ;;  %1002 = vmatprep.subr.bf16.mxu1 %v1101_v46 }
  0x40   : > { %454 = vrot.lane.b32.xlu1 %v449_v36, %s1105_s22  ;;  %742 = vmatpush2.bf16.msra.mxu0 %v1058_v50 }
  0x41   : > { %743 = vmatprep.subr.bf16.mxu0 %v1101_v46  ;;  %1012 = vmatpush2.bf16.msra.mxu1 %v1058_v50 }
  0x42   : > { %456 = vrot.lane.b32.xlu0 %v451_v37, %s1105_s22  ;;  %1003 = vmatprep.subr.bf16.mxu1 %v1101_v46 }
  0x44   : > { %402 = vrot.lane.b32.xlu1 %v397_v40, %s1100_s30  ;;  %744 = vmatpush2.bf16.msra.mxu0 %v1059_v54 }
  0x45   : > { %1013 = vmatpush2.bf16.msra.mxu1 %v1059_v54 }
  0x46   : > { %398 = vrot.lane.b32.xlu0 %v386_v44, %s1100_s30 }
  0x48   : > { %439 = vrot.lane.b32.xlu1 %v434_v49, %s1106_s8 }
  0x4a   : > { %400 = vrot.lane.b32.xlu0 %v394_v51, %s1100_s30 }
  0x4c   : > { %443 = vrot.lane.b32.xlu1 %v437_v52, %s1106_s8 }
  0x4e   : > { %441 = vrot.lane.b32.xlu0 %v438_v55, %s1106_s8 }
  0x50   : > { %472 = vrot.lane.b32.xlu1 %v394_v51, %s1107_s11 }
  0x52   : > { %474 = vrot.lane.b32.xlu0 %v468_v58, %s1107_s11 }
  0x54   : > { %476 = vrot.lane.b32.xlu1 %v471_v59, %s1107_s11 }
  0x56   : > { %768 = vperm.xlu0 %1046, %v762_v60  }
  0x58   : > { %773 = vperm.xlu1 %1047, %v763_v61  }
  0x5a   : > { %783 = vperm.xlu0 %1046, %v765_v63  }
  0x5c   : > { %778 = vperm.xlu1 %1047, %v764_v0  }
  0x88   : > { %v508_v1 = vpop.permute.xlu0 %507 }
  0x89   : > { %v564_v2 = vsel %vm513_vm13, %v1280_v20, %v508_v1 }
  0x8a   : > { %v614_v4 = vshrl.u32 %v564_v2, 16  ;;  %v617_v5 = vshll.u32 %v564_v2, 16 }
  0x8c   : > { %v616_v8 = vrot.slane %v614_v4, 3  ;;  %v619_v10 = vrot.slane %v617_v5, 4 }
  0x8e   : > { %v512_v6 = vpop.permute.xlu0 %511  ;;  %v620_v24 = vor.u32 %v619_v10, %v616_v8 }
  0x8f   : > { %v570_v11 = vsel %vm513_vm13, %v478_v15, %v512_v6  ;;  %v510_v12 = vpop.permute.xlu1 %509 }
  0x90   : > { %v637_v13 = vshrl.u32 %v570_v11, 16  ;;  %v640_v14 = vshll.u32 %v570_v11, 16  ;;  %v567_v16 = vsel %vm513_vm13, %v1277_v19, %v510_v12 }
  0x91   : > { %v621_v17 = vshrl.u32 %v567_v16, 16  ;;  %v624_v18 = vshll.u32 %v567_v16, 16 }
  0x92   : > { %v639_v21 = vrot.slane %v637_v13, 3  ;;  %v642_v22 = vrot.slane %v640_v14, 4 }
  0x93   : > { %v623_v20 = vrot.slane %v621_v17, 3  ;;  %v626_v23 = vrot.slane %v624_v18, 4 }
  0x94   : > { %v643_v25 = vor.u32 %v642_v22, %v639_v21 }
  0x95   : > { %v627_v26 = vor.u32 %v626_v23, %v623_v20 }
  0x97   : > { %v628_v9 = vsel %vm598_vm14, %v620_v24, %v627_v26  ;;  %v644_v15 = vsel %vm598_vm14, %v627_v26, %v643_v25  ;;  %v952_v26 = vld [vmem:[%s1418_s3] ss:$0 sm:$0xff] }
  0x98   : > { %963 = vmatprep.mubr.msk.bf16.mxu0 %vm520_vm15, %v628_v9  ;;  %964 = vmatprep.mubr.msk.bf16.mxu1 %vm520_vm15, %v644_v15 }
  0x9e   : > { %v459_v19 = vpop.permute.xlu1 %458 }
  0xa0   : > { %v461_v27 = vpop.permute.xlu0 %460 }
  0xa2   : > { %v463_v28 = vpop.permute.xlu1 %462 }
  0xa4   : > { %v430_v29 = vpop.permute.xlu0 %429 }
  0xa6   : > { %v418_v30 = vpop.permute.xlu1 %417 }
  0xa8   : > { %v453_v31 = vpop.permute.xlu0 %452 }
  0xaa   : > { %v414_v32 = vpop.permute.xlu1 %413 }
  0xac   : > { %v416_v33 = vpop.permute.xlu0 %415 }
  0xae   : > { %v428_v34 = vpop.permute.xlu1 %427 }
  0xb0   : > { %v426_v35 = vpop.permute.xlu0 %425 }
  0xb2   : > { %v455_v36 = vpop.permute.xlu1 %454 }
  0xb4   : > { %v457_v37 = vpop.permute.xlu0 %456 }
  0xb6   : > { %v403_v38 = vpop.permute.xlu1 %402 }
  0xb7   : > { %v519_v39 = vsel %vm513_vm13, %v1236_v3, %v403_v38 }
  0xb8   : > { %v399_v40 = vpop.permute.xlu0 %398  ;;  %v526_v44 = vsel %vm520_vm15, %v519_v39, %v418_v30 }
  0xb9   : > { %v515_v41 = vsel %vm513_vm13, %v1248_v7, %v399_v40  ;;  %v533_v50 = vsel %vm527_vm0, %v526_v44, %v430_v29 }
  0xba   : > { %v522_v42 = vsel %vm520_vm15, %v515_v41, %v414_v32  ;;  %v440_v43 = vpop.permute.xlu1 %439 }
  0xbb   : > { %v529_v45 = vsel %vm527_vm0, %v522_v42, %v426_v35 }
  0xbc   : > { %v536_v47 = vsel %vm534_vm1, %v529_v45, %v440_v43  ;;  %v401_v48 = vpop.permute.xlu0 %400 }
  0xbd   : > { %v517_v3 = vsel %vm513_vm13, %v1226_v62, %v401_v48  ;;  %v543_v51 = vsel %vm541_vm2, %v536_v47, %v453_v31 }
  0xbe   : > { %v524_v49 = vsel %vm520_vm15, %v517_v3, %v416_v33  ;;  %v444_v7 = vpop.permute.xlu1 %443  ;;  %v550_v59 = vsel %vm548_vm3, %v543_v51, %v459_v19 }
  0xbf   : > { %v540_v52 = vsel %vm534_vm1, %v533_v50, %v444_v7  ;;  %v531_v53 = vsel %vm527_vm0, %v524_v49, %v428_v34 }
  0xc0   : > { %v442_v54 = vpop.permute.xlu0 %441  ;;  %v547_v56 = vsel %vm541_vm2, %v540_v52, %v457_v37 }
  0xc1   : > { %v538_v55 = vsel %vm534_vm1, %v531_v53, %v442_v54  ;;  %v554_v2 = vsel %vm548_vm3, %v547_v56, %v463_v28 }
  0xc2   : > { %v545_v57 = vsel %vm541_vm2, %v538_v55, %v455_v36  ;;  %v473_v58 = vpop.permute.xlu1 %472 }
  0xc3   : > { %v557_v62 = vsel %vm555_vm4, %v550_v59, %v473_v58  ;;  %v552_v60 = vsel %vm548_vm3, %v545_v57, %v461_v27 }
  0xc4   : > { %v599_v61 = vshrl.u32 %v557_v62, 16  ;;  %v602_v63 = vshll.u32 %v557_v62, 16  ;;  %v475_v0 = vpop.permute.xlu0 %474 }
  0xc5   : > { %v559_v1 = vsel %vm555_vm4, %v552_v60, %v475_v0 }
  0xc6   : > { %v601_v4 = vrot.slane %v599_v61, 3  ;;  %v604_v5 = vrot.slane %v602_v63, 4  ;;  %v606_v6 = vshrl.u32 %v559_v1, 16  ;;  %v609_v8 = vshll.u32 %v559_v1, 16  ;;  %v477_v10 = vpop.permute.xlu1 %476 }
  0xc7   : > { %v561_v11 = vsel %vm555_vm4, %v554_v2, %v477_v10 }
  0xc8   : > { %v605_v12 = vor.u32 %v604_v5, %v601_v4  ;;  %v608_v13 = vrot.slane %v606_v6, 3  ;;  %v611_v14 = vrot.slane %v609_v8, 4  ;;  %v629_v16 = vshrl.u32 %v561_v11, 16 }
  0xc9   : > { %v632_v17 = vshll.u32 %v561_v11, 16 }
  0xca   : > { %v612_v18 = vor.u32 %v611_v14, %v608_v13  ;;  %v631_v21 = vrot.slane %v629_v16, 3 }
  0xcb   : > { %v634_v22 = vrot.slane %v632_v17, 4 }
  0xcc   : > { %v613_v20 = vsel %vm598_vm14, %v605_v12, %v612_v18 }
  0xcd   : > { %v635_v23 = vor.u32 %v634_v22, %v631_v21  ;;  %746 = vmatmul.mubr.bf16.vlgmr.msra.gmra.mxu0 %v613_v20 }
  0xcf   : > { %v636_v24 = vsel %vm598_vm14, %v612_v18, %v635_v23 }
  0xd0   : > { %754 = vmatmul.mubr.bf16.vlgmr.msra.gmra.mxu1 %v636_v24 }
  0xd1   : > { %v769_v15 = vpop.permute.xlu0 %768 }
  0xd3   : > { %v774_v25 = vpop.permute.xlu1 %773 }
  0xd5   : > { %v784_v42 = vpop.permute.xlu0 %783 }
  0xd7   : > { %v779_v30 = vpop.permute.xlu1 %778 }
 0x18d   : > { %v747_v9 = vpop.f32.mrf.mxu0 }
 0x18e   : > { %v748_v19 = vadd.f32 %v952_v26, %v747_v9 }
 0x18f   : > { %v749_v27 = vpop.f32.mrf.mxu0 }
 0x190   : > { %v786_v28 = vmul.f32 %v769_v15, %v748_v19  ;;  %v755_v29 = vpop.f32.mrf.mxu1 }
 0x191   : > { %v750_v31 = vpop.f32.mrf.mxu0  ;;  %v756_v32 = vadd.f32 %v952_v26, %v755_v29 }
 0x192   : > { %v971_v33 = vpack.c.bf16 %v786_v28, %v786_v28  ;;  %v751_v34 = vadd.f32 %v952_v26, %v750_v31  ;;  %v757_v46 = vpop.f32.mrf.mxu1 }
 0x193   : > { %v788_v35 = vmul.f32 %v779_v30, %v756_v32  ;;  %v752_v36 = vpop.f32.mrf.mxu0 }
 0x194   : > { %811 = vst.msk [vmem:[%s1381_s25 + $0x8] sm:$0xf] %vm792_vm5, %v971_v33  ;;  %v787_v37 = vmul.f32 %v774_v25, %v751_v34  ;;  %v758_v38 = vpop.f32.mrf.mxu1 }
 0x195   : > { %v973_v39 = vpack.c.bf16 %v788_v35, %v788_v35  ;;  %v759_v40 = vadd.f32 %v952_v26, %v758_v38 }
 0x196   : > { %v972_v41 = vpack.c.bf16 %v787_v37, %v787_v37  ;;  %v760_v43 = vpop.f32.mrf.mxu1 }
 0x197   : > { %813 = vst.msk [vmem:[%s1381_s25 + $0x10] sm:$0xf] %vm792_vm5, %v973_v39  ;;  %v789_v44 = vmul.f32 %v784_v42, %v759_v40 }
 0x198   : > { %812 = vst.msk [vmem:[%s1381_s25 + $0xc] sm:$0xf] %vm792_vm5, %v972_v41 }
 0x199   : > { %v974_v45 = vpack.c.bf16 %v789_v44, %v789_v44 }
 0x19b   : > { %814 = vst.msk [vmem:[%s1381_s25 + $0x14] sm:$0xf] %vm792_vm5, %v974_v45 }
 0x19c PF: > { %s15_s20 = sadd.s32 1, %s1098_s20   ;;  %s1421_s18 = smov %s1094_s19 }
 0x19d   : > { %p12_p5 = scmp.ge.s32.totalorder %s15_s20, 4   ;;  %s1422_s19 = smov %s1424_s21 }
 0x19f   :  { %14 = sbr.rel (!%p12_p5) target bundleno = 2 (0x2), region = 79 }

// kernel: _lambda_.22
= control target key start
LH: loop header
LB: loop body
LE: loop exit
PB: predicated region body
PF: predicated region fallthrough
CT: control target
= control target key end

     0   :  { %s1138_s18 = smov 0   ;;  %s1140_s19 = smov 0   ;;  %s1415_s0 = inlined_call_operand.vmem [shape: bf16[128,16], index: 0, kind: input, shape index: {}]   ;;  %s1416_s1 = inlined_call_operand.vmem [shape: bf16[160,8], index: 1, kind: input, shape index: {}]   ;;  %s1417_s2 = inlined_call_operand.vmem [shape: f32[32,1], index: 2, kind: input, shape index: {}]   ;;  %s1418_s3 = inlined_call_operand.vmem [shape: f32[1,8], index: 3, kind: input, shape index: {}]   ;;  %s1419_s4 = inlined_call_operand.vmem [shape: bf16[128,16], index: 4, kind: input, shape index: {}]   ;;  %s1420_s5 = inlined_call_operand.vmem [shape: bf16[128,8], index: 5, kind: output, shape index: {}]  }
   0x1   :  { %s1142_s20 = smov 0  }
   0x2 LB: > { %s27_s21 = sadd.s32 1, %s1094_s19  ;;  %p935_p0 = scmp.ge.s32.totalorder %s1098_s20, 1  ;;  %s1098_s20 = sphi %s1142_s20, %s15_s20   ;;  %s1094_s19 = sphi %s1140_s19, %s1422_s19   ;;  %s1090_s18 = sphi %s1138_s18, %s1421_s18  }
   0x3   : > { %p29_p1 = scmp.ge.s32.totalorder %s27_s21, 2  ;;  %p230_p2 = scmp.lt.s32.totalorder %s1098_s20, 3 }
   0x5   : > { %s1424_s21 = smov (%p29_p1, %s27_s21), 0  ;;  %p231_p3 = pnand %p935_p0, %p230_p2 }
   0x6   : > { %s936_s22 = sshll.u32 (!%p231_p3), %s1090_s18, 3  ;;  %s1100_s30 = smov (!%p231_p3), 16  }
   0x7   : > { %234 = sbr.rel (%p231_p3) target bundleno = 412 (0x19c), region = 40  ;;  %p274_p4 = scmp.lt.s32.totalorder (!%p231_p3), %s936_s22, 15 }
   0x8   : > { %s1102_s10 = smov (!%p231_p3), 96   ;;  %s1103_s15 = smov (!%p231_p3), 48  }
   0x9   : > { %s1104_s16 = smov (!%p231_p3), 32   ;;  %s1106_s8 = smov (!%p231_p3), 64  }
   0xa   : > { %s1107_s11 = smov (!%p231_p3), 112  }
   0xc   : > { %s1426_s22 = smov (!%p274_p4, %s936_s22), 15  ;;  %vm431_vm0 = vsmask.f32 3328  ;;  %v1050_v43 = vld [vmem:[%s1416_s1 + $0x38] sm:$0xff]   ;;  %v1101_v46 = vmov 0   ;;  %v1051_v55 = vld [vmem:[%s1416_s1 + $0x30] sm:$0xff]  }
   0xd   : > { %s1156_s23 = sshll.u32 %s1426_s22, 2  ;;  %713 = vmatprep.subr.bf16.mxu0 %v1101_v46  ;;  %994 = vmatprep.subr.bf16.mxu1 %v1101_v46  ;;  %vm407_vm9 = vcmask 1046528   ;;  %s1105_s22 = smov 80   ;;  %vm419_vm10 = vcmask 1043456   ;;  %vm446_vm11 = vcmask 1042432   ;;  %vm513_vm13 = vcmask 130048  }
   0xe   : > { %s290_s26 = scalar_lea.vmem %s1419_s4, %s1156_s23  ;;  %s277_s29 = scalar_lea.vmem %s1415_s0, %s1156_s23  ;;  %714 = vmatpush1.bf16.msra.mxu0 %v1050_v43  ;;  %1004 = vmatpush1.bf16.msra.mxu1 %v1050_v43  ;;  %vm374_vm12 = vsmask.f32 7424  ;;  %v1057_v43 = vld [vmem:[%s1416_s1] sm:$0xff]   ;;  %vm598_vm14 = vsmask.f32 4352  ;;  %vm520_vm15 = vcmask 261120  }
   0xf   : > { %v1048_v0 = vld [vmem:[%s290_s26 + $0x8] sm:$0xff]   ;;  %v976_v1 = vld [vmem:[%s277_s29] sm:$0xff]   ;;  %v992_v3 = vld [vmem:[%s277_s29 + $0x10] sm:$0xff]   ;;  %715 = vmatprep.subr.bf16.mxu0 %v1101_v46  ;;  %995 = vmatprep.subr.bf16.mxu1 %v1101_v46  ;;  %s1381_s25 = scalar_lea.vmem %s1420_s5, %s1156_s23 }
  0x10   : > { %v991_v2 = vld [vmem:[%s277_s29 + $0x8] sm:$0xff]   ;;  %v491_v4 = vshrl.u32 %v1048_v0, 16  ;;  %v494_v5 = vshll.u32 %v1048_v0, 16  ;;  %v1166_v6 = vunpack.c.l.bf16 %v976_v1  ;;  %v1168_v7 = vunpack.c.h.bf16 %v976_v1  ;;  %v1049_v12 = vld [vmem:[%s290_s26 + $0x10] sm:$0xff]   ;;  %v993_v17 = vld [vmem:[%s277_s29 + $0x18] sm:$0xff]   ;;  %1047 = vset.pattern.permute.xlu1 %v1101_v46  ;;  %1046 = vset.pattern.permute.xlu0 %v1101_v46 }
  0x11   : > { %v1170_v8 = vunpack.c.l.bf16 %v991_v2  ;;  %v1172_v9 = vunpack.c.h.bf16 %v991_v2  ;;  %v1174_v10 = vunpack.c.l.bf16 %v992_v3  ;;  %v1176_v11 = vunpack.c.h.bf16 %v992_v3 }
  0x12   : > { %v493_v13 = vrot.slane %v491_v4, 4  ;;  %v496_v14 = vrot.slane %v494_v5, 5  ;;  %v326_v15 = vmin.f32 %v1166_v6, 0.0  ;;  %v327_v16 = vmin.f32 %v1168_v7, 0.0  ;;  %716 = vmatpush1.bf16.msra.mxu0 %v1051_v55  ;;  %1005 = vmatpush1.bf16.msra.mxu1 %v1051_v55  ;;  %v1052_v5 = vld [vmem:[%s1416_s1 + $0x28] sm:$0xff]  }
  0x13   : > { %v328_v19 = vmin.f32 %v1170_v8, 0.0  ;;  %v329_v20 = vmin.f32 %v1172_v9, 0.0  ;;  %v330_v21 = vmin.f32 %v1174_v10, 0.0  ;;  %v331_v22 = vmin.f32 %v1176_v11, 0.0  ;;  %717 = vmatprep.subr.bf16.mxu0 %v1101_v46  ;;  %996 = vmatprep.subr.bf16.mxu1 %v1101_v46 }
  0x14   : > { %v497_v18 = vor.u32 %v496_v14, %v493_v13  ;;  %v334_v23 = vmul.f32 1.442695, %v326_v15  ;;  %v336_v24 = vmul.f32 1.442695, %v327_v16  ;;  %v499_v25 = vshrl.u32 %v1049_v12, 16  ;;  %v1054_v16 = vld [vmem:[%s1416_s1 + $0x18] sm:$0xff]  }
  0x15   : > { %v338_v26 = vmul.f32 1.442695, %v328_v19  ;;  %v340_v27 = vmul.f32 1.442695, %v329_v20  ;;  %v342_v28 = vmul.f32 1.442695, %v330_v21  ;;  %v1185_v29 = vunpack.c.l.bf16 %v993_v17 }
  0x16   : > { %507 = vrot.lane.b32.xlu0 %v497_v18, %s1100_s30  ;;  %1060 = vpow2.f32 %v334_v23  ;;  %v344_v30 = vmul.f32 1.442695, %v331_v22  ;;  %v501_v31 = vrot.slane %v499_v25, 4  ;;  %v502_v32 = vshll.u32 %v1049_v12, 16  ;;  %718 = vmatpush1.bf16.msra.mxu0 %v1052_v5 }
  0x17   : > { %1062 = vpow2.f32 %v336_v24  ;;  %v1187_v33 = vunpack.c.h.bf16 %v993_v17  ;;  %v332_v34 = vmin.f32 %v1185_v29, 0.0  ;;  %vm320_vm1 = vcmp.gt.f32.partialorder %v1170_v8, 0.0  ;;  %719 = vmatprep.subr.bf16.mxu0 %v1101_v46  ;;  %1006 = vmatpush1.bf16.msra.mxu1 %v1052_v5  ;;  %v1055_v24 = vld [vmem:[%s1416_s1 + $0x10] sm:$0xff]  }
  0x18   : > { %1064 = vpow2.f32 %v338_v26  ;;  %v504_v35 = vrot.slane %v502_v32, 5  ;;  %vm321_vm2 = vcmp.gt.f32.partialorder %v1172_v9, 0.0  ;;  %vm318_vm3 = vcmp.gt.f32.partialorder %v1166_v6, 0.0  ;;  %997 = vmatprep.subr.bf16.mxu1 %v1101_v46 }
  0x19   : > { %1066 = vpow2.f32 %v340_v27  ;;  %v333_v36 = vmin.f32 %v1187_v33, 0.0  ;;  %v346_v37 = vmul.f32 1.442695, %v332_v34  ;;  %vm322_vm4 = vcmp.gt.f32.partialorder %v1174_v10, 0.0 }
  0x1a   : > { %1068 = vpow2.f32 %v342_v28  ;;  %v505_v38 = vor.u32 %v504_v35, %v501_v31  ;;  %vm319_vm5 = vcmp.gt.f32.partialorder %v1168_v7, 0.0  ;;  %vm323_vm6 = vcmp.gt.f32.partialorder %v1176_v11, 0.0  ;;  %v1056_v35 = vld [vmem:[%s1416_s1 + $0x8] sm:$0xff]  }
  0x1b   : > { %1070 = vpow2.f32 %v344_v30  ;;  %v348_v39 = vmul.f32 1.442695, %v333_v36  ;;  %vm324_vm7 = vcmp.gt.f32.partialorder %v1185_v29, 0.0  ;;  %vm325_vm8 = vcmp.gt.f32.partialorder %v1187_v33, 0.0 }
  0x1c   : > { %511 = vrot.lane.b32.xlu0 %v505_v38, %s1100_s30  ;;  %v506_v40 = vsel %vm431_vm0, %v497_v18, %v505_v38  ;;  %1072 = vpow2.f32 %v346_v37 }
  0x1d   : > { %509 = vrot.lane.b32.xlu1 %v506_v40, %s1100_s30  ;;  %1074 = vpow2.f32 %v348_v39 }
  0x23   : > { %v1061_v41 = vpop.eup %1060 }
  0x24   : > { %v1063_v42 = vpop.eup %1062  ;;  %v942_v45 = vadd.f32 -1.0, %v1061_v41 }
  0x25   : > { %v1065_v44 = vpop.eup %1064  ;;  %v943_v49 = vadd.f32 -1.0, %v1063_v42 }
  0x26   : > { %v1067_v47 = vpop.eup %1066  ;;  %v944_v48 = vadd.f32 -1.0, %v1065_v44  ;;  %v358_v59 = vsel %vm318_vm3, %v1166_v6, %v942_v45  ;;  %vm548_vm3 = vcmask 785408  }
  0x27   : > { %v1069_v50 = vpop.eup %1068  ;;  %v945_v51 = vadd.f32 -1.0, %v1067_v47  ;;  %v359_v0 = vsel %vm319_vm5, %v1168_v7, %v943_v49  ;;  %vm792_vm5 = vcmask 60416  }
  0x28   : > { %v1071_v52 = vpop.eup %1070  ;;  %v946_v53 = vadd.f32 -1.0, %v1069_v50  ;;  %v360_v54 = vsel %vm320_vm1, %v1170_v8, %v944_v48  ;;  %v1248_v7 = vpack.c.bf16 %v359_v0, %v358_v59  ;;  %v1058_v50 = vld [vmem:[%s1416_s1 + $0x48] sm:$0xff]   ;;  %v764_v0 = vld [vmem:[%s1417_s2 + $0x10] sm:$0xff]  ;;  %vm534_vm1 = vcmask 523264   ;;  %793 = vst.msk [vmem:[%s1381_s25] sm:$0xf] %vm792_vm5, %v1101_v46 }
  0x29   : > { %v1073_v56 = vpop.eup %1072  ;;  %v947_v57 = vadd.f32 -1.0, %v1071_v52  ;;  %v361_v58 = vsel %vm321_vm2, %v1172_v9, %v945_v51  ;;  %vm541_vm2 = vcmask 654336   ;;  %794 = vst.msk [vmem:[%s1381_s25 + $0x4] sm:$0xf] %vm792_vm5, %v1101_v46  ;;  %795 = vst.msk [vmem:[%s1381_s25 + $0x18] sm:$0xf] %vm792_vm5, %v1101_v46 }
  0x2a   : > { %v1075_v60 = vpop.eup %1074  ;;  %v362_v61 = vsel %vm322_vm4, %v1174_v10, %v946_v53  ;;  %v1226_v62 = vpack.c.bf16 %v361_v58, %v360_v54  ;;  %v948_v63 = vadd.f32 -1.0, %v1073_v56  ;;  %v408_v13 = vrot.slane %v1248_v7, 1  ;;  %v1059_v54 = vld [vmem:[%s1416_s1 + $0x40] sm:$0xff]   ;;  %796 = vst.msk [vmem:[%s1381_s25 + $0x1c] sm:$0xf] %vm792_vm5, %v1101_v46 }
  0x2b   : > { %v363_v1 = vsel %vm323_vm6, %v1176_v11, %v947_v57  ;;  %v949_v2 = vadd.f32 -1.0, %v1075_v60  ;;  %v1053_v11 = vld [vmem:[%s1416_s1 + $0x20] sm:$0xff]   ;;  %v420_v21 = vrot.slane %v1248_v7, 4  ;;  %v378_v22 = vshll.u32 %v1248_v7, 16 }
  0x2c   : > { %v1236_v3 = vpack.c.bf16 %v363_v1, %v362_v61  ;;  %458 = vrot.lane.b32.xlu1 %v1226_v62, %s1102_s10  ;;  %v364_v4 = vsel %vm324_vm7, %v1185_v29, %v948_v63  ;;  %v409_v12 = vrot.slane %v1226_v62, 1  ;;  %v447_v14 = vrot.slane %v1226_v62, 5  ;;  %720 = vmatpush1.bf16.msra.mxu0 %v1053_v11  ;;  %v762_v60 = vld [vmem:[%s1417_s2] sm:$0xff]  ;;  %v763_v61 = vld [vmem:[%s1417_s2 + $0x8] sm:$0xff]  ;;  %v765_v63 = vld [vmem:[%s1417_s2 + $0x18] sm:$0xff] }
  0x2d   : > { %v365_v6 = vsel %vm325_vm8, %v1187_v33, %v949_v2  ;;  %721 = vmatprep.subr.bf16.mxu0 %v1101_v46  ;;  %1007 = vmatpush1.bf16.msra.mxu1 %v1053_v11  ;;  %v421_v18 = vrot.slane %v1226_v62, 4  ;;  %v376_v27 = vshrl.u32 %v1248_v7, 16  ;;  %v380_v30 = vrot.slane %v378_v22, 1 }
  0x2e   : > { %460 = vrot.lane.b32.xlu0 %v1236_v3, %s1102_s10  ;;  %v423_v8 = vrot.slane %v1236_v3, 4  ;;  %v1252_v9 = vpack.c.bf16 %v365_v6, %v364_v4  ;;  %v411_v10 = vrot.slane %v1236_v3, 1  ;;  %998 = vmatprep.subr.bf16.mxu1 %v1101_v46  ;;  %v410_v17 = vsel %vm407_vm9, %v408_v13, %v409_v12 }
  0x2f   : > { %v391_v23 = vshll.u32 %v1236_v3, 16  ;;  %v448_v26 = vrot.slane %v1236_v3, 5  ;;  %v422_v28 = vsel %vm419_vm10, %v420_v21, %v421_v18  ;;  %v383_v31 = vshll.u32 %v1226_v62, 16 }
  0x30   : > { %462 = vrot.lane.b32.xlu1 %v1252_v9, %s1102_s10  ;;  %v478_v15 = vrot.slane %v1252_v9, 1  ;;  %722 = vmatpush1.bf16.msra.mxu0 %v1054_v16  ;;  %v1280_v20 = vsel %vm407_vm9, %v409_v12, %v411_v10  ;;  %v424_v25 = vsel %vm419_vm10, %v421_v18, %v423_v8  ;;  %v450_v29 = vrot.slane %v1252_v9, 5 }
  0x31   : > { %723 = vmatprep.subr.bf16.mxu0 %v1101_v46  ;;  %1008 = vmatpush1.bf16.msra.mxu1 %v1054_v16  ;;  %v393_v32 = vrot.slane %v391_v23, 1  ;;  %v395_v33 = vshrl.u32 %v1236_v3, 16  ;;  %v387_v34 = vshrl.u32 %v1226_v62, 16  ;;  %v449_v36 = vsel %vm446_vm11, %v447_v14, %v448_v26 }
  0x32   : > { %429 = vrot.lane.b32.xlu0 %v423_v8, %s1103_s15  ;;  %v1277_v19 = vsel %vm407_vm9, %v411_v10, %v478_v15  ;;  %999 = vmatprep.subr.bf16.mxu1 %v1101_v46  ;;  %v451_v37 = vsel %vm446_vm11, %v448_v26, %v450_v29  ;;  %v381_v38 = vor.u32 %v380_v30, %v376_v27  ;;  %v385_v39 = vrot.slane %v383_v31, 1 }
  0x33   : > { %v397_v40 = vor.u32 %v395_v33, %v393_v32  ;;  %v432_v41 = vrot.slane %v387_v34, 4  ;;  %v433_v42 = vrot.slane %v383_v31, 5  ;;  %v435_v47 = vrot.slane %v395_v33, 4 }
  0x34   : > { %417 = vrot.lane.b32.xlu1 %v411_v10, %s1104_s16  ;;  %724 = vmatpush1.bf16.msra.mxu0 %v1055_v24  ;;  %v386_v44 = vsel %vm374_vm12, %v381_v38, %v385_v39  ;;  %v389_v45 = vor.u32 %v387_v34, %v385_v39  ;;  %v436_v48 = vrot.slane %v391_v23, 5  ;;  %v465_v53 = vshll.u32 %v1252_v9, 16 }
  0x35   : > { %725 = vmatprep.subr.bf16.mxu0 %v1101_v46  ;;  %1009 = vmatpush1.bf16.msra.mxu1 %v1055_v24  ;;  %v434_v49 = vor.u32 %v433_v42, %v432_v41  ;;  %v469_v57 = vshrl.u32 %v1252_v9, 16  ;;  %vm555_vm4 = vcmask 916480  }
  0x36   : > { %452 = vrot.lane.b32.xlu0 %v447_v14, %s1105_s22  ;;  %1000 = vmatprep.subr.bf16.mxu1 %v1101_v46  ;;  %v394_v51 = vsel %vm374_vm12, %v389_v45, %v393_v32  ;;  %v437_v52 = vor.u32 %v436_v48, %v435_v47  ;;  %v467_v56 = vrot.slane %v465_v53, 1 }
  0x38   : > { %413 = vrot.lane.b32.xlu1 %v410_v17, %s1104_s16  ;;  %726 = vmatpush1.bf16.msra.mxu0 %v1056_v35  ;;  %v438_v55 = vsel %vm431_vm0, %v434_v49, %v437_v52  ;;  %v468_v58 = vsel %vm374_vm12, %v397_v40, %v467_v56  ;;  %v471_v59 = vor.u32 %v469_v57, %v467_v56  ;;  %vm527_vm0 = vcmask 392192  }
  0x39   : > { %727 = vmatprep.subr.bf16.mxu0 %v1101_v46  ;;  %1010 = vmatpush1.bf16.msra.mxu1 %v1056_v35 }
  0x3a   : > { %415 = vrot.lane.b32.xlu0 %v1280_v20, %s1104_s16  ;;  %1001 = vmatprep.subr.bf16.mxu1 %v1101_v46 }
  0x3c   : > { %427 = vrot.lane.b32.xlu1 %v424_v25, %s1103_s15  ;;  %728 = vmatpush1.bf16.msra.mxu0 %v1057_v43 }
  0x3d   : > { %741 = vmatprep.subr.bf16.mxu0 %v1101_v46  ;;  %1011 = vmatpush1.bf16.msra.mxu1 %v1057_v43 }
  0x3e   : > { %425 = vrot.lane.b32.xlu0 %v422_v28, %s1103_s15  ;;  %1002 = vmatprep.subr.bf16.mxu1 %v1101_v46 }
  0x40   : > { %454 = vrot.lane.b32.xlu1 %v449_v36, %s1105_s22  ;;  %742 = vmatpush2.bf16.msra.mxu0 %v1058_v50 }
  0x41   : > { %743 = vmatprep.subr.bf16.mxu0 %v1101_v46  ;;  %1012 = vmatpush2.bf16.msra.mxu1 %v1058_v50 }
  0x42   : > { %456 = vrot.lane.b32.xlu0 %v451_v37, %s1105_s22  ;;  %1003 = vmatprep.subr.bf16.mxu1 %v1101_v46 }
  0x44   : > { %402 = vrot.lane.b32.xlu1 %v397_v40, %s1100_s30  ;;  %744 = vmatpush2.bf16.msra.mxu0 %v1059_v54 }
  0x45   : > { %1013 = vmatpush2.bf16.msra.mxu1 %v1059_v54 }
  0x46   : > { %398 = vrot.lane.b32.xlu0 %v386_v44, %s1100_s30 }
  0x48   : > { %439 = vrot.lane.b32.xlu1 %v434_v49, %s1106_s8 }
  0x4a   : > { %400 = vrot.lane.b32.xlu0 %v394_v51, %s1100_s30 }
  0x4c   : > { %443 = vrot.lane.b32.xlu1 %v437_v52, %s1106_s8 }
  0x4e   : > { %441 = vrot.lane.b32.xlu0 %v438_v55, %s1106_s8 }
  0x50   : > { %472 = vrot.lane.b32.xlu1 %v394_v51, %s1107_s11 }
  0x52   : > { %474 = vrot.lane.b32.xlu0 %v468_v58, %s1107_s11 }
  0x54   : > { %476 = vrot.lane.b32.xlu1 %v471_v59, %s1107_s11 }
  0x56   : > { %768 = vperm.xlu0 %1046, %v762_v60  }
  0x58   : > { %773 = vperm.xlu1 %1047, %v763_v61  }
  0x5a   : > { %783 = vperm.xlu0 %1046, %v765_v63  }
  0x5c   : > { %778 = vperm.xlu1 %1047, %v764_v0  }
  0x88   : > { %v508_v1 = vpop.permute.xlu0 %507 }
  0x89   : > { %v564_v2 = vsel %vm513_vm13, %v1280_v20, %v508_v1 }
  0x8a   : > { %v614_v4 = vshrl.u32 %v564_v2, 16  ;;  %v617_v5 = vshll.u32 %v564_v2, 16 }
  0x8c   : > { %v616_v8 = vrot.slane %v614_v4, 3  ;;  %v619_v10 = vrot.slane %v617_v5, 4 }
  0x8e   : > { %v512_v6 = vpop.permute.xlu0 %511  ;;  %v620_v24 = vor.u32 %v619_v10, %v616_v8 }
  0x8f   : > { %v570_v11 = vsel %vm513_vm13, %v478_v15, %v512_v6  ;;  %v510_v12 = vpop.permute.xlu1 %509 }
  0x90   : > { %v637_v13 = vshrl.u32 %v570_v11, 16  ;;  %v640_v14 = vshll.u32 %v570_v11, 16  ;;  %v567_v16 = vsel %vm513_vm13, %v1277_v19, %v510_v12 }
  0x91   : > { %v621_v17 = vshrl.u32 %v567_v16, 16  ;;  %v624_v18 = vshll.u32 %v567_v16, 16 }
  0x92   : > { %v639_v21 = vrot.slane %v637_v13, 3  ;;  %v642_v22 = vrot.slane %v640_v14, 4 }
  0x93   : > { %v623_v20 = vrot.slane %v621_v17, 3  ;;  %v626_v23 = vrot.slane %v624_v18, 4 }
  0x94   : > { %v643_v25 = vor.u32 %v642_v22, %v639_v21 }
  0x95   : > { %v627_v26 = vor.u32 %v626_v23, %v623_v20 }
  0x97   : > { %v628_v9 = vsel %vm598_vm14, %v620_v24, %v627_v26  ;;  %v644_v15 = vsel %vm598_vm14, %v627_v26, %v643_v25  ;;  %v952_v26 = vld [vmem:[%s1418_s3] ss:$0 sm:$0xff] }
  0x98   : > { %963 = vmatprep.mubr.msk.bf16.mxu0 %vm520_vm15, %v628_v9  ;;  %964 = vmatprep.mubr.msk.bf16.mxu1 %vm520_vm15, %v644_v15 }
  0x9e   : > { %v459_v19 = vpop.permute.xlu1 %458 }
  0xa0   : > { %v461_v27 = vpop.permute.xlu0 %460 }
  0xa2   : > { %v463_v28 = vpop.permute.xlu1 %462 }
  0xa4   : > { %v430_v29 = vpop.permute.xlu0 %429 }
  0xa6   : > { %v418_v30 = vpop.permute.xlu1 %417 }
  0xa8   : > { %v453_v31 = vpop.permute.xlu0 %452 }
  0xaa   : > { %v414_v32 = vpop.permute.xlu1 %413 }
  0xac   : > { %v416_v33 = vpop.permute.xlu0 %415 }
  0xae   : > { %v428_v34 = vpop.permute.xlu1 %427 }
  0xb0   : > { %v426_v35 = vpop.permute.xlu0 %425 }
  0xb2   : > { %v455_v36 = vpop.permute.xlu1 %454 }
  0xb4   : > { %v457_v37 = vpop.permute.xlu0 %456 }
  0xb6   : > { %v403_v38 = vpop.permute.xlu1 %402 }
  0xb7   : > { %v519_v39 = vsel %vm513_vm13, %v1236_v3, %v403_v38 }
  0xb8   : > { %v399_v40 = vpop.permute.xlu0 %398  ;;  %v526_v44 = vsel %vm520_vm15, %v519_v39, %v418_v30 }
  0xb9   : > { %v515_v41 = vsel %vm513_vm13, %v1248_v7, %v399_v40  ;;  %v533_v50 = vsel %vm527_vm0, %v526_v44, %v430_v29 }
  0xba   : > { %v522_v42 = vsel %vm520_vm15, %v515_v41, %v414_v32  ;;  %v440_v43 = vpop.permute.xlu1 %439 }
  0xbb   : > { %v529_v45 = vsel %vm527_vm0, %v522_v42, %v426_v35 }
  0xbc   : > { %v536_v47 = vsel %vm534_vm1, %v529_v45, %v440_v43  ;;  %v401_v48 = vpop.permute.xlu0 %400 }
  0xbd   : > { %v517_v3 = vsel %vm513_vm13, %v1226_v62, %v401_v48  ;;  %v543_v51 = vsel %vm541_vm2, %v536_v47, %v453_v31 }
  0xbe   : > { %v524_v49 = vsel %vm520_vm15, %v517_v3, %v416_v33  ;;  %v444_v7 = vpop.permute.xlu1 %443  ;;  %v550_v59 = vsel %vm548_vm3, %v543_v51, %v459_v19 }
  0xbf   : > { %v540_v52 = vsel %vm534_vm1, %v533_v50, %v444_v7  ;;  %v531_v53 = vsel %vm527_vm0, %v524_v49, %v428_v34 }
  0xc0   : > { %v442_v54 = vpop.permute.xlu0 %441  ;;  %v547_v56 = vsel %vm541_vm2, %v540_v52, %v457_v37 }
  0xc1   : > { %v538_v55 = vsel %vm534_vm1, %v531_v53, %v442_v54  ;;  %v554_v2 = vsel %vm548_vm3, %v547_v56, %v463_v28 }
  0xc2   : > { %v545_v57 = vsel %vm541_vm2, %v538_v55, %v455_v36  ;;  %v473_v58 = vpop.permute.xlu1 %472 }
  0xc3   : > { %v557_v62 = vsel %vm555_vm4, %v550_v59, %v473_v58  ;;  %v552_v60 = vsel %vm548_vm3, %v545_v57, %v461_v27 }
  0xc4   : > { %v599_v61 = vshrl.u32 %v557_v62, 16  ;;  %v602_v63 = vshll.u32 %v557_v62, 16  ;;  %v475_v0 = vpop.permute.xlu0 %474 }
  0xc5   : > { %v559_v1 = vsel %vm555_vm4, %v552_v60, %v475_v0 }
  0xc6   : > { %v601_v4 = vrot.slane %v599_v61, 3  ;;  %v604_v5 = vrot.slane %v602_v63, 4  ;;  %v606_v6 = vshrl.u32 %v559_v1, 16  ;;  %v609_v8 = vshll.u32 %v559_v1, 16  ;;  %v477_v10 = vpop.permute.xlu1 %476 }
  0xc7   : > { %v561_v11 = vsel %vm555_vm4, %v554_v2, %v477_v10 }
  0xc8   : > { %v605_v12 = vor.u32 %v604_v5, %v601_v4  ;;  %v608_v13 = vrot.slane %v606_v6, 3  ;;  %v611_v14 = vrot.slane %v609_v8, 4  ;;  %v629_v16 = vshrl.u32 %v561_v11, 16 }
  0xc9   : > { %v632_v17 = vshll.u32 %v561_v11, 16 }
  0xca   : > { %v612_v18 = vor.u32 %v611_v14, %v608_v13  ;;  %v631_v21 = vrot.slane %v629_v16, 3 }
  0xcb   : > { %v634_v22 = vrot.slane %v632_v17, 4 }
  0xcc   : > { %v613_v20 = vsel %vm598_vm14, %v605_v12, %v612_v18 }
  0xcd   : > { %v635_v23 = vor.u32 %v634_v22, %v631_v21  ;;  %746 = vmatmul.mubr.bf16.vlgmr.msra.gmra.mxu0 %v613_v20 }
  0xcf   : > { %v636_v24 = vsel %vm598_vm14, %v612_v18, %v635_v23 }
  0xd0   : > { %754 = vmatmul.mubr.bf16.vlgmr.msra.gmra.mxu1 %v636_v24 }
  0xd1   : > { %v769_v15 = vpop.permute.xlu0 %768 }
  0xd3   : > { %v774_v25 = vpop.permute.xlu1 %773 }
  0xd5   : > { %v784_v42 = vpop.permute.xlu0 %783 }
  0xd7   : > { %v779_v30 = vpop.permute.xlu1 %778 }
 0x18d   : > { %v747_v9 = vpop.f32.mrf.mxu0 }
 0x18e   : > { %v748_v19 = vadd.f32 %v952_v26, %v747_v9 }
 0x18f   : > { %v749_v27 = vpop.f32.mrf.mxu0 }
 0x190   : > { %v786_v28 = vmul.f32 %v769_v15, %v748_v19  ;;  %v755_v29 = vpop.f32.mrf.mxu1 }
 0x191   : > { %v750_v31 = vpop.f32.mrf.mxu0  ;;  %v756_v32 = vadd.f32 %v952_v26, %v755_v29 }
 0x192   : > { %v971_v33 = vpack.c.bf16 %v786_v28, %v786_v28  ;;  %v751_v34 = vadd.f32 %v952_v26, %v750_v31  ;;  %v757_v46 = vpop.f32.mrf.mxu1 }
 0x193   : > { %v788_v35 = vmul.f32 %v779_v30, %v756_v32  ;;  %v752_v36 = vpop.f32.mrf.mxu0 }
 0x194   : > { %811 = vst.msk [vmem:[%s1381_s25 + $0x8] sm:$0xf] %vm792_vm5, %v971_v33  ;;  %v787_v37 = vmul.f32 %v774_v25, %v751_v34  ;;  %v758_v38 = vpop.f32.mrf.mxu1 }
 0x195   : > { %v973_v39 = vpack.c.bf16 %v788_v35, %v788_v35  ;;  %v759_v40 = vadd.f32 %v952_v26, %v758_v38 }
 0x196   : > { %v972_v41 = vpack.c.bf16 %v787_v37, %v787_v37  ;;  %v760_v43 = vpop.f32.mrf.mxu1 }
 0x197   : > { %813 = vst.msk [vmem:[%s1381_s25 + $0x10] sm:$0xf] %vm792_vm5, %v973_v39  ;;  %v789_v44 = vmul.f32 %v784_v42, %v759_v40 }
 0x198   : > { %812 = vst.msk [vmem:[%s1381_s25 + $0xc] sm:$0xf] %vm792_vm5, %v972_v41 }
 0x199   : > { %v974_v45 = vpack.c.bf16 %v789_v44, %v789_v44 }
 0x19b   : > { %814 = vst.msk [vmem:[%s1381_s25 + $0x14] sm:$0xf] %vm792_vm5, %v974_v45 }
 0x19c PF: > { %s15_s20 = sadd.s32 1, %s1098_s20   ;;  %s1421_s18 = smov %s1094_s19 }
 0x19d   : > { %p12_p5 = scmp.ge.s32.totalorder %s15_s20, 4   ;;  %s1422_s19 = smov %s1424_s21 }
 0x19f   :  { %14 = sbr.rel (!%p12_p5) target bundleno = 2 (0x2), region = 79 }

// kernel: _lambda_.23
= control target key start
LH: loop header
LB: loop body
LE: loop exit
PB: predicated region body
PF: predicated region fallthrough
CT: control target
= control target key end

     0   :  { %s1658_s12 = smov 0   ;;  %s1660_s13 = smov 0   ;;  %s2367_s0 = inlined_call_operand.vmem [shape: bf16[352,8], index: 0, kind: input, shape index: {}]   ;;  %s2368_s1 = inlined_call_operand.vmem [shape: bf16[72,8], index: 1, kind: input, shape index: {}]   ;;  %s2369_s2 = inlined_call_operand.vmem [shape: f32[128,1], index: 2, kind: input, shape index: {}]   ;;  %s2370_s3 = inlined_call_operand.vmem [shape: bf16[352,8], index: 3, kind: output, shape index: {}]  }
   0x1   :  { %s1662_s14 = smov 0  }
   0x2 LB: > { %s25_s15 = sadd.s32 1, %s1623_s13  ;;  %p1344_p0 = scmp.ge.s32.totalorder %s1627_s14, 1  ;;  %s1627_s14 = sphi %s1662_s14, %s13_s14   ;;  %s1623_s13 = sphi %s1660_s13, %s2372_s13   ;;  %s1619_s12 = sphi %s1658_s12, %s2371_s12  }
   0x3   : > { %p27_p1 = scmp.ge.s32.totalorder %s25_s15, 2  ;;  %p161_p2 = scmp.lt.s32.totalorder %s1627_s14, 3 }
   0x5   : > { %s2374_s15 = smov (%p27_p1, %s25_s15), 0  ;;  %p162_p3 = pnand %p1344_p0, %p161_p2 }
   0x6   : > { %s192_s16 = smul.u32 (!%p162_p3), 22, %s1619_s12  ;;  %s1629_s21 = smov (!%p162_p3), 24  }
   0x7   : > { %165 = sbr.rel (%p162_p3) target bundleno = 513 (0x201), region = 32  ;;  %s1630_s22 = smov (!%p162_p3), 16  }
   0x8   : > { %p193_p4 = scmp.lt.s32.totalorder (!%p162_p3), %s192_s16, 43  ;;  %s1631_s23 = smov (!%p162_p3), 8  }
   0x9   : > { %s1632_s24 = smov (!%p162_p3), 32   ;;  %s1633_s25 = smov (!%p162_p3), 40  }
   0xa   : > { %s1634_s26 = smov (!%p162_p3), 48   ;;  %s1635_s27 = smov (!%p162_p3), 56  }
   0xb   : > { %s1636_s7 = smov (!%p162_p3), 64  }
   0xc   : > { %s2376_s16 = smov (!%p193_p4, %s192_s16), 43  ;;  %vm498_vm12 = vcmask 1046528  }
   0xd   : > { %s1345_s17 = sshll.u32 %s2376_s16, 2 }
   0xe   : > { %s1684_s20 = scalar_lea.vmem %s2367_s0, %s1345_s17  ;;  %s2123_s19 = scalar_lea.vmem %s2370_s3, %s1345_s17 }
   0xf   : > { %v1461_v0 = vld [vmem:[%s1684_s20 + $0x10] sm:$0xff]   ;;  %v1460_v1 = vld [vmem:[%s1684_s20 + $0x8] sm:$0xff]   ;;  %v1466_v18 = vld [vmem:[%s1684_s20 + $0x38] sm:$0xff]  }
  0x10   : > { %v1465_v2 = vld [vmem:[%s1684_s20 + $0x30] sm:$0xff]   ;;  %v1689_v3 = vunpack.c.l.bf16 %v1461_v0  ;;  %v1691_v4 = vunpack.c.h.bf16 %v1461_v0  ;;  %v1693_v5 = vunpack.c.l.bf16 %v1460_v1  ;;  %v1695_v6 = vunpack.c.h.bf16 %v1460_v1  ;;  %v1464_v7 = vld [vmem:[%s1684_s20 + $0x28] sm:$0xff]   ;;  %v1462_v24 = vld [vmem:[%s1684_s20 + $0x18] sm:$0xff]  }
  0x11   : > { %v1698_v8 = vunpack.c.l.bf16 %v1465_v2  ;;  %v1700_v9 = vunpack.c.h.bf16 %v1465_v2  ;;  %v1704_v12 = vunpack.c.l.bf16 %v1464_v7  ;;  %v1708_v15 = vunpack.c.h.bf16 %v1464_v7  ;;  %v1417_v35 = vld [vmem:[%s1684_s20] sm:$0xff]  }
  0x12   : > { %v282_v10 = vmin.f32 %v1689_v3, 0.0  ;;  %v283_v11 = vmin.f32 %v1691_v4, 0.0  ;;  %v280_v13 = vmin.f32 %v1693_v5, 0.0  ;;  %v281_v14 = vmin.f32 %v1695_v6, 0.0  ;;  %v1463_v37 = vld [vmem:[%s1684_s20 + $0x20] sm:$0xff]  }
  0x13   : > { %v290_v21 = vmin.f32 %v1698_v8, 0.0  ;;  %v291_v22 = vmin.f32 %v1700_v9, 0.0  ;;  %v288_v23 = vmin.f32 %v1704_v12, 0.0  ;;  %v289_v27 = vmin.f32 %v1708_v15, 0.0  ;;  %v1467_v50 = vld [vmem:[%s1684_s20 + $0x40] sm:$0xff]  }
  0x14   : > { %v308_v16 = vmul.f32 1.442695, %v282_v10  ;;  %v310_v17 = vmul.f32 1.442695, %v283_v11  ;;  %v304_v19 = vmul.f32 1.442695, %v280_v13  ;;  %v1716_v29 = vunpack.c.l.bf16 %v1466_v18 }
  0x15   : > { %v306_v20 = vmul.f32 1.442695, %v281_v14  ;;  %v324_v25 = vmul.f32 1.442695, %v290_v21  ;;  %v326_v26 = vmul.f32 1.442695, %v291_v22  ;;  %v1718_v30 = vunpack.c.h.bf16 %v1466_v18 }
  0x16   : > { %1561 = vpow2.f32 %v308_v16  ;;  %v320_v28 = vmul.f32 1.442695, %v288_v23  ;;  %v322_v31 = vmul.f32 1.442695, %v289_v27  ;;  %v1720_v32 = vunpack.c.l.bf16 %v1462_v24 }
  0x17   : > { %1563 = vpow2.f32 %v310_v17  ;;  %v1722_v33 = vunpack.c.h.bf16 %v1462_v24  ;;  %v292_v34 = vmin.f32 %v1716_v29, 0.0  ;;  %v293_v36 = vmin.f32 %v1718_v30, 0.0 }
  0x18   : > { %1565 = vpow2.f32 %v304_v19  ;;  %v284_v39 = vmin.f32 %v1720_v32, 0.0  ;;  %v1730_v42 = vunpack.c.l.bf16 %v1417_v35  ;;  %v1732_v43 = vunpack.c.h.bf16 %v1417_v35 }
  0x19   : > { %1567 = vpow2.f32 %v306_v20  ;;  %v328_v38 = vmul.f32 1.442695, %v292_v34  ;;  %v285_v40 = vmin.f32 %v1722_v33, 0.0  ;;  %v330_v41 = vmul.f32 1.442695, %v293_v36 }
  0x1a   : > { %1569 = vpow2.f32 %v324_v25  ;;  %v312_v44 = vmul.f32 1.442695, %v284_v39  ;;  %v1734_v46 = vunpack.c.l.bf16 %v1463_v37  ;;  %v278_v47 = vmin.f32 %v1730_v42, 0.0 }
  0x1b   : > { %1571 = vpow2.f32 %v326_v26  ;;  %v314_v45 = vmul.f32 1.442695, %v285_v40  ;;  %v279_v48 = vmin.f32 %v1732_v43, 0.0  ;;  %v1738_v49 = vunpack.c.h.bf16 %v1463_v37 }
  0x1c   : > { %1573 = vpow2.f32 %v320_v28  ;;  %v300_v51 = vmul.f32 1.442695, %v278_v47  ;;  %v286_v52 = vmin.f32 %v1734_v46, 0.0  ;;  %vm260_vm0 = vcmp.gt.f32.partialorder %v1689_v3, 0.0 }
  0x1d   : > { %1575 = vpow2.f32 %v322_v31  ;;  %vm261_vm1 = vcmp.gt.f32.partialorder %v1691_v4, 0.0  ;;  %v302_v53 = vmul.f32 1.442695, %v279_v48  ;;  %v287_v54 = vmin.f32 %v1738_v49, 0.0 }
  0x1e   : > { %1577 = vpow2.f32 %v328_v38  ;;  %vm258_vm2 = vcmp.gt.f32.partialorder %v1693_v5, 0.0  ;;  %v316_v56 = vmul.f32 1.442695, %v286_v52  ;;  %v1746_v57 = vunpack.c.l.bf16 %v1467_v50 }
  0x1f   : > { %1579 = vpow2.f32 %v330_v41  ;;  %v318_v60 = vmul.f32 1.442695, %v287_v54  ;;  %v1748_v61 = vunpack.c.h.bf16 %v1467_v50  ;;  %vm259_vm3 = vcmp.gt.f32.partialorder %v1695_v6, 0.0 }
  0x20   : > { %1581 = vpow2.f32 %v312_v44  ;;  %vm268_vm4 = vcmp.gt.f32.partialorder %v1698_v8, 0.0  ;;  %vm269_vm5 = vcmp.gt.f32.partialorder %v1700_v9, 0.0  ;;  %vm266_vm6 = vcmp.gt.f32.partialorder %v1704_v12, 0.0 }
  0x21   : > { %1583 = vpow2.f32 %v314_v45  ;;  %v294_v13 = vmin.f32 %v1746_v57, 0.0  ;;  %v295_v18 = vmin.f32 %v1748_v61, 0.0  ;;  %vm267_vm7 = vcmp.gt.f32.partialorder %v1708_v15, 0.0 }
  0x22   : > { %1585 = vpow2.f32 %v300_v51  ;;  %vm270_vm8 = vcmp.gt.f32.partialorder %v1716_v29, 0.0  ;;  %vm271_vm9 = vcmp.gt.f32.partialorder %v1718_v30, 0.0  ;;  %vm262_vm10 = vcmp.gt.f32.partialorder %v1720_v32, 0.0 }
  0x23   : > { %v1562_v55 = vpop.eup %1561  ;;  %1587 = vpow2.f32 %v302_v53  ;;  %v332_v26 = vmul.f32 1.442695, %v294_v13  ;;  %v334_v34 = vmul.f32 1.442695, %v295_v18  ;;  %vm263_vm11 = vcmp.gt.f32.partialorder %v1722_v33, 0.0  ;;  %v1468_v18 = vld [vmem:[%s1684_s20 + $0x48] sm:$0xff]  }
  0x24   : > { %v1564_v58 = vpop.eup %1563  ;;  %v1351_v59 = vadd.f32 -1.0, %v1562_v55  ;;  %1589 = vpow2.f32 %v316_v56  ;;  %vm256_vm13 = vcmp.gt.f32.partialorder %v1730_v42, 0.0  ;;  %vm257_vm14 = vcmp.gt.f32.partialorder %v1732_v43, 0.0 }
  0x25   : > { %v1566_v62 = vpop.eup %1565  ;;  %v1352_v63 = vadd.f32 -1.0, %v1564_v58  ;;  %1591 = vpow2.f32 %v318_v60  ;;  %vm264_vm15 = vcmp.gt.f32.partialorder %v1734_v46, 0.0 }
  0x26   : > { %v1568_v0 = vpop.eup %1567  ;;  %v370_v1 = vsel %vm260_vm0, %v1689_v3, %v1351_v59  ;;  %v1349_v2 = vadd.f32 -1.0, %v1566_v62  ;;  %1593 = vpow2.f32 %v332_v26  ;;  %vm265_vm0 = vcmp.gt.f32.partialorder %v1738_v49, 0.0 }
  0x27   : > { %v1570_v7 = vpop.eup %1569  ;;  %v371_v10 = vsel %vm261_vm1, %v1691_v4, %v1352_v63  ;;  %v1350_v11 = vadd.f32 -1.0, %v1568_v0  ;;  %1595 = vpow2.f32 %v334_v34  ;;  %vm399_vm1 = vsmask.f32 7424 }
  0x28   : > { %v1572_v14 = vpop.eup %1571  ;;  %v1761_v16 = vpack.c.bf16 %v371_v10, %v370_v1  ;;  %v368_v3 = vsel %vm258_vm2, %v1693_v5, %v1349_v2  ;;  %v1359_v17 = vadd.f32 -1.0, %v1570_v7  ;;  %vm272_vm2 = vcmp.gt.f32.partialorder %v1746_v57, 0.0 }
  0x29   : > { %v1574_v19 = vpop.eup %1573  ;;  %v369_v4 = vsel %vm259_vm3, %v1695_v6, %v1350_v11  ;;  %v1360_v20 = vadd.f32 -1.0, %v1572_v14  ;;  %vm273_vm3 = vcmp.gt.f32.partialorder %v1748_v61, 0.0 }
  0x2a   : > { %v1576_v21 = vpop.eup %1575  ;;  %537 = vrot.lane.b32.xlu1 %v1761_v16, %s1629_s21  ;;  %v1774_v22 = vpack.c.bf16 %v369_v4, %v368_v3  ;;  %v378_v5 = vsel %vm268_vm4, %v1698_v8, %v1359_v17  ;;  %v1357_v23 = vadd.f32 -1.0, %v1574_v19  ;;  %v502_v37 = vrot.slane %v1761_v16, 1 }
  0x2b   : > { %v1578_v6 = vpop.eup %1577  ;;  %v379_v24 = vsel %vm269_vm5, %v1700_v9, %v1360_v20  ;;  %v1358_v25 = vadd.f32 -1.0, %v1576_v21  ;;  %v416_v26 = vshll.u32 %v1761_v16, 16 }
  0x2c   : > { %v1580_v27 = vpop.eup %1579  ;;  %535 = vrot.lane.b32.xlu0 %v1774_v22, %s1629_s21  ;;  %v1786_v28 = vpack.c.bf16 %v379_v24, %v378_v5  ;;  %v376_v8 = vsel %vm266_vm6, %v1704_v12, %v1357_v23  ;;  %v1361_v31 = vadd.f32 -1.0, %v1578_v6  ;;  %v500_v41 = vrot.slane %v1774_v22, 1 }
  0x2d   : > { %v1582_v35 = vpop.eup %1581  ;;  %v377_v9 = vsel %vm267_vm7, %v1708_v15, %v1358_v25  ;;  %v1362_v36 = vadd.f32 -1.0, %v1580_v27  ;;  %v408_v10 = vshll.u32 %v1774_v22, 16  ;;  %v412_v21 = vshrl.u32 %v1774_v22, 16 }
  0x2e   : > { %v1584_v38 = vpop.eup %1583  ;;  %545 = vrot.lane.b32.xlu1 %v1786_v28, %s1629_s21  ;;  %v1798_v39 = vpack.c.bf16 %v377_v9, %v376_v8  ;;  %v380_v12 = vsel %vm270_vm8, %v1716_v29, %v1361_v31  ;;  %v1353_v40 = vadd.f32 -1.0, %v1582_v35  ;;  %v510_v56 = vrot.slane %v1786_v28, 1 }
  0x2f   : > { %v381_v15 = vsel %vm271_vm9, %v1718_v30, %v1362_v36  ;;  %v1354_v44 = vadd.f32 -1.0, %v1584_v38  ;;  %v1586_v45 = vpop.eup %1585  ;;  %v1881_v27 = vunpack.c.l.bf16 %v1468_v18  ;;  %v1883_v8 = vunpack.c.h.bf16 %v1468_v18 }
  0x30   : > { %543 = vrot.lane.b32.xlu0 %v1798_v39, %s1629_s21  ;;  %v1809_v47 = vpack.c.bf16 %v381_v15, %v380_v12  ;;  %v372_v29 = vsel %vm262_vm10, %v1720_v32, %v1353_v40  ;;  %v1588_v48 = vpop.eup %1587  ;;  %v1347_v50 = vadd.f32 -1.0, %v1586_v45  ;;  %v1827_v32 = vsel %vm498_vm12, %v500_v41, %v502_v37 }
  0x31   : > { %v373_v30 = vsel %vm263_vm11, %v1722_v33, %v1354_v44  ;;  %v1590_v51 = vpop.eup %1589  ;;  %v1348_v53 = vadd.f32 -1.0, %v1588_v48  ;;  %v508_v55 = vrot.slane %v1798_v39, 1  ;;  %v440_v1 = vshll.u32 %v1798_v39, 16 }
  0x32   : > { %547 = vrot.lane.b32.xlu1 %v1809_v47, %s1629_s21  ;;  %v1822_v52 = vpack.c.bf16 %v373_v30, %v372_v29  ;;  %v1592_v33 = vpop.eup %1591  ;;  %v366_v54 = vsel %vm256_vm13, %v1730_v42, %v1347_v50  ;;  %v1355_v58 = vadd.f32 -1.0, %v1590_v51  ;;  %v512_v0 = vrot.slane %v1809_v47, 1 }
  0x33   : > { %v367_v59 = vsel %vm257_vm14, %v1732_v43, %v1348_v53  ;;  %v1356_v60 = vadd.f32 -1.0, %v1592_v33  ;;  %v1848_v2 = vsel %vm498_vm12, %v508_v55, %v510_v56  ;;  %v444_v11 = vshrl.u32 %v1798_v39, 16  ;;  %v1594_v25 = vpop.eup %1593 }
  0x34   : > { %539 = vrot.lane.b32.xlu0 %v1822_v52, %s1629_s21  ;;  %v1836_v62 = vpack.c.bf16 %v367_v59, %v366_v54  ;;  %v374_v63 = vsel %vm264_vm15, %v1734_v46, %v1355_v58  ;;  %v1867_v19 = vsel %vm498_vm12, %v510_v56, %v512_v0  ;;  %v504_v4 = vrot.slane %v1822_v52, 1  ;;  %v1596_v31 = vpop.eup %1595 }
  0x35   : > { %v375_v42 = vsel %vm265_vm0, %v1738_v49, %v1356_v60  ;;  %v448_v49 = vshll.u32 %v1786_v28, 16  ;;  %v442_v20 = vrot.slane %v440_v1, 1  ;;  %v410_v35 = vrot.slane %v408_v10, 1 }
  0x36   : > { %518 = vrot.lane.b32.xlu1 %v1827_v32, %s1630_s22  ;;  %v499_v43 = vrot.slane %v1836_v62, 1  ;;  %v1850_v7 = vpack.c.bf16 %v375_v42, %v374_v63  ;;  %v403_v46 = vshll.u32 %v1836_v62, 16  ;;  %v401_v6 = vshrl.u32 %v1836_v62, 16 }
  0x37   : > { %v446_v9 = vor.u32 %v444_v11, %v442_v20  ;;  %v450_v36 = vrot.slane %v448_v49, 1  ;;  %v452_v38 = vshrl.u32 %v1786_v28, 16  ;;  %v456_v12 = vshll.u32 %v1809_v47, 16 }
  0x38   : > { %v501_v13 = vsel %vm498_vm12, %v499_v43, %v500_v41  ;;  %v506_v14 = vrot.slane %v1850_v7, 1  ;;  %v432_v3 = vshll.u32 %v1850_v7, 16  ;;  %v436_v17 = vshrl.u32 %v1850_v7, 16  ;;  %v1469_v41 = vld [vmem:[%s1684_s20 + $0x50] sm:$0xff]  }
  0x39   : > { %516 = vrot.lane.b32.xlu0 %v501_v13, %s1630_s22  ;;  %v405_v24 = vrot.slane %v403_v46, 1  ;;  %v420_v40 = vshrl.u32 %v1761_v16, 16  ;;  %v1900_v15 = vsel %vm498_vm12, %v502_v37, %v504_v4  ;;  %v414_v29 = vor.u32 %v412_v21, %v410_v35 }
  0x3a   : > { %526 = vrot.lane.b32.xlu1 %v1848_v2, %s1630_s22  ;;  %v1874_v5 = vsel %vm498_vm12, %v506_v14, %v508_v55  ;;  %v1876_v23 = vrot.slane %v432_v3, 1  ;;  %v1363_v48 = vadd.f32 -1.0, %v1594_v25  ;;  %v1364_v30 = vadd.f32 -1.0, %v1596_v31 }
  0x3b   : > { %v406_v45 = vor.u32 %v405_v24, %v401_v6  ;;  %v296_v50 = vmin.f32 %v1881_v27, 0.0  ;;  %v297_v51 = vmin.f32 %v1883_v8, 0.0  ;;  %v1908_v53 = vsel %vm399_vm1, %v446_v9, %v450_v36 }
  0x3c   : > { %v438_v34 = vor.u32 %v436_v17, %v1876_v23  ;;  %v418_v33 = vrot.slane %v416_v26, 1  ;;  %v1458_v54 = vunpack.c.l.bf16 %v1469_v41  ;;  %v1910_v55 = vunpack.c.h.bf16 %v1469_v41 }
  0x3d   : > { %524 = vrot.lane.b32.xlu0 %v1874_v5, %s1630_s22  ;;  %v454_v37 = vor.u32 %v452_v38, %v450_v36  ;;  %v458_v56 = vrot.slane %v456_v12, 1  ;;  %v336_v58 = vmul.f32 1.442695, %v296_v50  ;;  %v338_v59 = vmul.f32 1.442695, %v297_v51 }
  0x3e   : > { %528 = vrot.lane.b32.xlu1 %v1867_v19, %s1630_s22  ;;  %v1903_v44 = vsel %vm399_vm1, %v438_v34, %v442_v20  ;;  %v411_v60 = vsel %vm399_vm1, %v406_v45, %v410_v35  ;;  %v424_v63 = vshll.u32 %v1822_v52, 16  ;;  %v298_v42 = vmin.f32 %v1458_v54, 0.0 }
  0x3f   : > { %v299_v1 = vmin.f32 %v1910_v55, 0.0  ;;  %v382_v43 = vsel %vm272_vm2, %v1746_v57, %v1363_v48  ;;  %v383_v46 = vsel %vm273_vm3, %v1748_v61, %v1364_v30  ;;  %1597 = vpow2.f32 %v336_v58 }
  0x40   : > { %1599 = vpow2.f32 %v338_v59  ;;  %v340_v10 = vmul.f32 1.442695, %v298_v42  ;;  %v419_v49 = vsel %vm399_vm1, %v414_v29, %v418_v33  ;;  %v422_v13 = vor.u32 %v420_v40, %v418_v33 }
  0x41   : > { %520 = vrot.lane.b32.xlu0 %v1900_v15, %s1630_s22  ;;  %v342_v11 = vmul.f32 1.442695, %v299_v1  ;;  %v1930_v3 = vsel %vm399_vm1, %v454_v37, %v458_v56  ;;  %v426_v57 = vrot.slane %v424_v63, 1  ;;  %v1932_v17 = vpack.c.bf16 %v383_v46, %v382_v43  ;;  %v1557_v46 = vld [vmem:[%s2368_s1 + $0x18] sm:$0xff]  }
  0x42   : > { %479 = vrot.lane.b32.xlu1 %v1903_v44, %s1631_s23  ;;  %1601 = vpow2.f32 %v340_v10  ;;  %v460_v18 = vshrl.u32 %v1809_v47, 16  ;;  %v428_v24 = vshrl.u32 %v1822_v52, 16  ;;  %vm274_vm4 = vcmp.gt.f32.partialorder %v1881_v27, 0.0  ;;  %v1558_v10 = vld [vmem:[%s2368_s1 + $0x10] sm:$0xff]  }
  0x43   : > { %1603 = vpow2.f32 %v342_v11  ;;  %v1938_v61 = vsel %vm399_vm1, %v422_v13, %v426_v57  ;;  %v464_v20 = vshll.u32 %v1932_v17, 16  ;;  %vm275_vm5 = vcmp.gt.f32.partialorder %v1883_v8, 0.0  ;;  %v1559_v11 = vld [vmem:[%s2368_s1 + $0x8] sm:$0xff]  }
  0x44   : > { %v462_v21 = vor.u32 %v460_v18, %v458_v56  ;;  %v430_v35 = vor.u32 %v428_v24, %v426_v57  ;;  %vm276_vm6 = vcmp.gt.f32.partialorder %v1458_v54, 0.0  ;;  %vm277_vm7 = vcmp.gt.f32.partialorder %v1910_v55, 0.0 }
  0x45   : > { %471 = vrot.lane.b32.xlu0 %v411_v60, %s1631_s23  ;;  %v466_v6 = vrot.slane %v464_v20, 1  ;;  %v1969_v30 = vrot.slane %v1932_v17, 1  ;;  %vm949_vm8 = vcmask 1043456   ;;  %vm664_vm9 = vcmask 64512  }
  0x46   : > { %481 = vrot.lane.b32.xlu1 %v1908_v53, %s1631_s23  ;;  %v1966_v48 = vsel %vm399_vm1, %v430_v35, %v1876_v23  ;;  %vm683_vm10 = vcmask 130048   ;;  %vm702_vm11 = vcmask 195584   ;;  %vm721_vm13 = vcmask 261120  }
  0x47   : > { %v1953_v34 = vsel %vm399_vm1, %v462_v21, %v466_v6  ;;  %v515_v63 = vsel %vm498_vm12, %v512_v0, %v1969_v30  ;;  %v468_v0 = vshrl.u32 %v1932_v17, 16  ;;  %vm740_vm14 = vcmask 326656  }
  0x48   : > { %vm759_vm15 = vcmask 392192   ;;  %vm778_vm0 = vcmask 457728   ;;  %vm825_vm2 = vsmask.f32 4352  ;;  %vm924_vm3 = vcmask 588800  }
  0x49   : > { %473 = vrot.lane.b32.xlu0 %v419_v49, %s1631_s23 }
  0x4a   : > { %483 = vrot.lane.b32.xlu1 %v1930_v3, %s1631_s23 }
  0x4c   : > { %v1598_v25 = vpop.eup %1597 }
  0x4d   : > { %475 = vrot.lane.b32.xlu0 %v1938_v61, %s1631_s23  ;;  %v1600_v26 = vpop.eup %1599  ;;  %v1365_v31 = vadd.f32 -1.0, %v1598_v25 }
  0x4e   : > { %563 = vrot.lane.b32.xlu1 %v1938_v61, %s1632_s24  ;;  %v1366_v9 = vadd.f32 -1.0, %v1600_v26 }
  0x4f   : > { %v1602_v36 = vpop.eup %1601  ;;  %v384_v38 = vsel %vm274_vm4, %v1881_v27, %v1365_v31 }
  0x50   : > { %v1604_v12 = vpop.eup %1603  ;;  %v385_v40 = vsel %vm275_vm5, %v1883_v8, %v1366_v9  ;;  %v1367_v41 = vadd.f32 -1.0, %v1602_v36 }
  0x51   : > { %561 = vrot.lane.b32.xlu0 %v419_v49, %s1632_s24  ;;  %v1962_v45 = vpack.c.bf16 %v385_v40, %v384_v38  ;;  %v1368_v29 = vadd.f32 -1.0, %v1604_v12  ;;  %v1560_v49 = vld [vmem:[%s2368_s1] sm:$0xff]  }
  0x52   : > { %571 = vrot.lane.b32.xlu1 %v1930_v3, %s1632_s24  ;;  %v386_v27 = vsel %vm276_vm6, %v1458_v54, %v1367_v41 }
  0x53   : > { %v554_v8 = vshll.u32 %v1962_v45, 16  ;;  %v1973_v50 = vrot.slane %v1962_v45, 1  ;;  %v387_v51 = vsel %vm277_vm7, %v1910_v55, %v1368_v29  ;;  %v558_v33 = vshrl.u32 %v1962_v45, 16 }
  0x54   : > { %v1977_v37 = vpack.c.bf16 %v387_v51, %v386_v27 }
  0x55   : > { %569 = vrot.lane.b32.xlu0 %v1908_v53, %s1632_s24  ;;  %v1986_v23 = vsel %vm498_vm12, %v1969_v30, %v1973_v50  ;;  %v556_v54 = vrot.slane %v554_v8, 1 }
  0x56   : > { %573 = vrot.lane.b32.xlu1 %v1953_v34, %s1632_s24  ;;  %v619_v56 = vshll.u32 %v1977_v37, 16  ;;  %v644_v55 = vrot.slane %v1977_v37, 1 }
  0x57   : > { %v1990_v58 = vor.u32 %v558_v33, %v556_v54 }
  0x58   : > { %v1992_v59 = vrot.slane %v619_v56, 1  ;;  %v1998_v60 = vsel %vm498_vm12, %v1973_v50, %v644_v55 }
  0x59   : > { %565 = vrot.lane.b32.xlu0 %v1966_v48, %s1632_s24 }
  0x5a   : > { %583 = vrot.lane.b32.xlu1 %v1900_v15, %s1633_s25  ;;  %v2011_v42 = vsel %vm399_vm1, %v1990_v58, %v1992_v59 }
  0x5d   : > { %581 = vrot.lane.b32.xlu0 %v1827_v32, %s1633_s25  ;;  %v507_v32 = vsel %vm498_vm12, %v504_v4, %v506_v14  ;;  %v470_v14 = vor.u32 %v468_v0, %v466_v6  ;;  %v1556_v4 = vld [vmem:[%s2368_s1 + $0x20] ss:$0 sps:$4 sm:$0xff]   ;;  %vm1170_vm12 = vcmask 60416  }
  0x5e   : > { %591 = vrot.lane.b32.xlu1 %v1867_v19, %s1633_s25  ;;  %1519 = vmatprep.subr.msk.bf16.mxu0 %vm949_vm8, %v1556_v4  ;;  %v951_v1 = vsel %vm949_vm8, %v1556_v4, 0 }
  0x5f   : > { %1520 = vmatprep.subr.msk.bf16.mxu1 %vm949_vm8, %v1556_v4  ;;  %v557_v43 = vsel %vm399_vm1, %v470_v14, %v556_v54  ;;  %1484 = vmatpush3.bf16.msra.mxu0 %v951_v1  ;;  %v1059_v4 = vld [vmem:[%s2369_s2 + $0x48] sm:$0xff]  ;;  %vm797_vm1 = vcmask 523264  }
  0x60   : > { %1514 = vmatpush3.bf16.msra.mxu1 %v951_v1  ;;  %1485 = vmatprep.subr.bf16.mxu0 %v1557_v46 }
  0x61   : > { %589 = vrot.lane.b32.xlu0 %v1848_v2, %s1633_s25  ;;  %1510 = vmatprep.subr.bf16.mxu1 %v1557_v46 }
  0x62   : > { %593 = vrot.lane.b32.xlu1 %v515_v63, %s1633_s25 }
  0x63   : > { %1486 = vmatpush3.bf16.msra.mxu0 %v1557_v46 }
  0x64   : > { %1515 = vmatpush3.bf16.msra.mxu1 %v1557_v46  ;;  %1487 = vmatprep.subr.bf16.mxu0 %v1558_v10  ;;  %v1061_v46 = vld [vmem:[%s2369_s2 + $0x58] sm:$0xff] }
  0x65   : > { %585 = vrot.lane.b32.xlu0 %v507_v32, %s1633_s25  ;;  %1511 = vmatprep.subr.bf16.mxu1 %v1558_v10 }
  0x66   : > { %602 = vrot.lane.b32.xlu1 %v1822_v52, %s1634_s26 }
  0x67   : > { %1488 = vmatpush3.bf16.msra.mxu0 %v1558_v10 }
  0x68   : > { %1516 = vmatpush3.bf16.msra.mxu1 %v1558_v10  ;;  %1489 = vmatprep.subr.bf16.mxu0 %v1559_v11  ;;  %v1062_v10 = vld [vmem:[%s2369_s2 + $0x60] sm:$0xff] }
  0x69   : > { %600 = vrot.lane.b32.xlu0 %v1761_v16, %s1634_s26  ;;  %1512 = vmatprep.subr.bf16.mxu1 %v1559_v11 }
  0x6a   : > { %610 = vrot.lane.b32.xlu1 %v1809_v47, %s1634_s26 }
  0x6b   : > { %1490 = vmatpush3.bf16.msra.mxu0 %v1559_v11 }
  0x6c   : > { %1517 = vmatpush3.bf16.msra.mxu1 %v1559_v11  ;;  %1491 = vmatprep.subr.bf16.mxu0 %v1560_v49 }
  0x6d   : > { %608 = vrot.lane.b32.xlu0 %v1786_v28, %s1634_s26  ;;  %1513 = vmatprep.subr.bf16.mxu1 %v1560_v49 }
  0x6e   : > { %612 = vrot.lane.b32.xlu1 %v1932_v17, %s1634_s26 }
  0x6f   : > { %1492 = vmatpush3.bf16.msra.mxu0 %v1560_v49 }
  0x70   : > { %1518 = vmatpush3.bf16.msra.mxu1 %v1560_v49 }
  0x71   : > { %604 = vrot.lane.b32.xlu0 %v1850_v7, %s1634_s26 }
  0x72   : > { %628 = vrot.lane.b32.xlu1 %v1966_v48, %s1635_s27 }
  0x75   : > { %626 = vrot.lane.b32.xlu0 %v1938_v61, %s1635_s27 }
  0x76   : > { %636 = vrot.lane.b32.xlu1 %v1953_v34, %s1635_s27 }
  0x79   : > { %634 = vrot.lane.b32.xlu0 %v1930_v3, %s1635_s27 }
  0x7a   : > { %638 = vrot.lane.b32.xlu1 %v557_v43, %s1635_s27 }
  0x7d   : > { %630 = vrot.lane.b32.xlu0 %v1903_v44, %s1635_s27 }
  0x7e   : > { %648 = vrot.lane.b32.xlu1 %v507_v32, %s1636_s7 }
  0x81   : > { %646 = vrot.lane.b32.xlu0 %v1900_v15, %s1636_s7 }
  0x82   : > { %656 = vrot.lane.b32.xlu1 %v515_v63, %s1636_s7 }
  0x85   : > { %654 = vrot.lane.b32.xlu0 %v1867_v19, %s1636_s7 }
  0x86   : > { %485 = vrot.lane.b32.xlu1 %v1953_v34, %s1631_s23  ;;  %v1051_v34 = vld [vmem:[%s2369_s2 + $0x8] sm:$0xff] }
  0x89   : > { %477 = vrot.lane.b32.xlu0 %v1966_v48, %s1631_s23 }
  0x8a   : > { %658 = vrot.lane.b32.xlu1 %v1986_v23, %s1636_s7 }
  0x8d   : > { %650 = vrot.lane.b32.xlu0 %v1874_v5, %s1636_s7 }
  0x8e   : > { %522 = vrot.lane.b32.xlu1 %v507_v32, %s1630_s22 }
  0x91   : > { %487 = vrot.lane.b32.xlu0 %v470_v14, %s1631_s23  ;;  %v1060_v14 = vld [vmem:[%s2369_s2 + $0x50] sm:$0xff] }
  0x92   : > { %532 = vrot.lane.b32.xlu1 %v1969_v30, %s1630_s22 }
  0x95   : > { %530 = vrot.lane.b32.xlu0 %v515_v63, %s1630_s22 }
  0x96   : > { %549 = vrot.lane.b32.xlu1 %v1932_v17, %s1629_s21 }
  0x99   : > { %541 = vrot.lane.b32.xlu0 %v1850_v7, %s1629_s21 }
  0x9a   : > { %567 = vrot.lane.b32.xlu1 %v1903_v44, %s1632_s24 }
  0x9c   : > { %v2087_v19 = vpop.permute.xlu1 %537 }
  0x9d   : > { %551 = vrot.lane.b32.xlu0 %v1962_v45, %s1629_s21 }
  0x9e   : > { %v536_v15 = vpop.permute.xlu0 %535  ;;  %577 = vrot.lane.b32.xlu1 %v1990_v58, %s1632_s24  ;;  %v1056_v58 = vld [vmem:[%s2369_s2 + $0x30] sm:$0xff] }
  0xa0   : > { %v546_v13 = vpop.permute.xlu1 %545 }
  0xa1   : > { %575 = vrot.lane.b32.xlu0 %v557_v43, %s1632_s24 }
  0xa2   : > { %v544_v3 = vpop.permute.xlu0 %543  ;;  %595 = vrot.lane.b32.xlu1 %v1986_v23, %s1633_s25 }
  0xa4   : > { %v548_v57 = vpop.permute.xlu1 %547 }
  0xa5   : > { %587 = vrot.lane.b32.xlu0 %v1874_v5, %s1633_s25  ;;  %v623_v5 = vshrl.u32 %v1977_v37, 16 }
  0xa6   : > { %v2098_v44 = vpop.permute.xlu0 %539  ;;  %606 = vrot.lane.b32.xlu1 %v1798_v39, %s1634_s26 }
  0xa7   : > { %v625_v24 = vor.u32 %v623_v5, %v1992_v59  ;;  %v1055_v59 = vld [vmem:[%s2369_s2 + $0x28] sm:$0xff] }
  0xa8   : > { %v519_v61 = vpop.permute.xlu1 %518 }
  0xa9   : > { %597 = vrot.lane.b32.xlu0 %v1973_v50, %s1633_s25 }
  0xaa   : > { %616 = vrot.lane.b32.xlu1 %v1977_v37, %s1634_s26  ;;  %v1054_v37 = vld [vmem:[%s2369_s2 + $0x20] sm:$0xff] }
  0xab   : > { %v517_v18 = vpop.permute.xlu0 %516 }
  0xac   : > { %v527_v20 = vpop.permute.xlu1 %526 }
  0xad   : > { %614 = vrot.lane.b32.xlu0 %v1962_v45, %s1634_s26 }
  0xae   : > { %640 = vrot.lane.b32.xlu1 %v2011_v42, %s1635_s27  ;;  %v1057_v42 = vld [vmem:[%s2369_s2 + $0x38] sm:$0xff] }
  0xaf   : > { %v525_v21 = vpop.permute.xlu0 %524 }
  0xb0   : > { %v529_v6 = vpop.permute.xlu1 %528 }
  0xb1   : > { %632 = vrot.lane.b32.xlu0 %v1908_v53, %s1635_s27  ;;  %v1637_v53 = vmov 0  }
  0xb2   : > { %652 = vrot.lane.b32.xlu1 %v1848_v2, %s1636_s7  ;;  %1171 = vst.msk [vmem:[%s2123_s19] sm:$0xf] %vm1170_vm12, %v1637_v53  ;;  %1172 = vst.msk [vmem:[%s2123_s19 + $0x4] sm:$0xf] %vm1170_vm12, %v1637_v53  ;;  %1554 = vset.pattern.permute.xlu0 %v1637_v53 }
  0xb3   : > { %v521_v25 = vpop.permute.xlu0 %520  ;;  %1555 = vset.pattern.permute.xlu1 %v1637_v53  ;;  %1173 = vst.msk [vmem:[%s2123_s19 + $0x8] sm:$0xf] %vm1170_vm12, %v1637_v53  ;;  %1174 = vst.msk [vmem:[%s2123_s19 + $0x4c] sm:$0xf] %vm1170_vm12, %v1637_v53 }
  0xb4   : > { %v480_v26 = vpop.permute.xlu1 %479  ;;  %1175 = vst.msk [vmem:[%s2123_s19 + $0x50] sm:$0xf] %vm1170_vm12, %v1637_v53  ;;  %1176 = vst.msk [vmem:[%s2123_s19 + $0x54] sm:$0xf] %vm1170_vm12, %v1637_v53 }
  0xb5   : > { %v674_v31 = vsel %vm664_vm9, %v1850_v7, %v480_v26  ;;  %642 = vrot.lane.b32.xlu0 %v625_v24, %s1635_s27 }
  0xb6   : > { %v693_v2 = vsel %vm683_vm10, %v674_v31, %v525_v21  ;;  %662 = vrot.lane.b32.xlu1 %v644_v55, %s1636_s7 }
  0xb7   : > { %v2131_v7 = vsel %vm702_vm11, %v693_v2, %v544_v3  ;;  %v472_v35 = vpop.permute.xlu0 %471 }
  0xb8   : > { %v482_v9 = vpop.permute.xlu1 %481  ;;  %v666_v36 = vsel %vm664_vm9, %v1836_v62, %v472_v35  ;;  %v1052_v62 = vld [vmem:[%s2369_s2 + $0x10] sm:$0xff] }
  0xb9   : > { %v676_v38 = vsel %vm664_vm9, %v1798_v39, %v482_v9  ;;  %v685_v12 = vsel %vm683_vm10, %v666_v36, %v517_v18  ;;  %660 = vrot.lane.b32.xlu0 %v1998_v60, %s1636_s7  ;;  %v1050_v39 = vld [vmem:[%s2369_s2] sm:$0xff] }
  0xba   : > { %v695_v40 = vsel %vm683_vm10, %v676_v38, %v527_v20  ;;  %1073 = vperm.xlu1 %1555, %v1051_v34   ;;  %v2157_v41 = vsel %vm702_vm11, %v685_v12, %v536_v15  ;;  %v1064_v15 = vld [vmem:[%s2369_s2 + $0x70] sm:$0xff] }
  0xbb   : > { %v2160_v45 = vsel %vm702_vm11, %v695_v40, %v546_v13  ;;  %v474_v29 = vpop.permute.xlu0 %473 }
  0xbc   : > { %v484_v48 = vpop.permute.xlu1 %483  ;;  %v668_v27 = vsel %vm664_vm9, %v1774_v22, %v474_v29  ;;  %v1053_v22 = vld [vmem:[%s2369_s2 + $0x18] sm:$0xff] }
  0xbd   : > { %v678_v30 = vsel %vm664_vm9, %v1786_v28, %v484_v48  ;;  %v687_v8 = vsel %vm683_vm10, %v668_v27, %v519_v61  ;;  %1068 = vperm.xlu0 %1554, %v1050_v39  }
  0xbe   : > { %v697_v50 = vsel %vm683_vm10, %v678_v30, %v529_v6  ;;  %1078 = vperm.xlu1 %1555, %v1052_v62   ;;  %v706_v51 = vsel %vm702_vm11, %v687_v8, %v2087_v19  ;;  %v1063_v19 = vld [vmem:[%s2369_s2 + $0x68] sm:$0xff] }
  0xbf   : > { %v2177_v33 = vsel %vm702_vm11, %v697_v50, %v548_v57  ;;  %v476_v28 = vpop.permute.xlu0 %475  ;;  %v1065_v57 = vld [vmem:[%s2369_s2 + $0x78] sm:$0xff] }
  0xc0   : > { %v564_v23 = vpop.permute.xlu1 %563  ;;  %v670_v54 = vsel %vm664_vm9, %v1761_v16, %v476_v28  ;;  %v1058_v16 = vld [vmem:[%s2369_s2 + $0x40] sm:$0xff] }
  0xc1   : > { %v689_v56 = vsel %vm683_vm10, %v670_v54, %v521_v25  ;;  %1083 = vperm.xlu0 %1554, %v1053_v22   ;;  %v725_v53 = vsel %vm721_vm13, %v706_v51, %v564_v23 }
  0xc2   : > { %1088 = vperm.xlu1 %1555, %v1054_v37   ;;  %v2190_v55 = vsel %vm702_vm11, %v689_v56, %v2098_v44 }
  0xc3   : > { %v562_v60 = vpop.permute.xlu0 %561 }
  0xc4   : > { %v572_v63 = vpop.permute.xlu1 %571  ;;  %v723_v12 = vsel %vm721_vm13, %v2157_v41, %v562_v60 }
  0xc5   : > { %1093 = vperm.xlu0 %1554, %v1055_v59   ;;  %v733_v40 = vsel %vm721_vm13, %v2160_v45, %v572_v63 }
  0xc6   : > { %1098 = vperm.xlu1 %1555, %v1056_v58  }
  0xc7   : > { %v570_v32 = vpop.permute.xlu0 %569 }
  0xc8   : > { %v2204_v0 = vpop.permute.xlu1 %573  ;;  %v731_v62 = vsel %vm721_vm13, %v2131_v7, %v570_v32 }
  0xc9   : > { %1103 = vperm.xlu0 %1554, %v1057_v42  }
  0xca   : > { %1108 = vperm.xlu1 %1555, %v1058_v16   ;;  %v735_v16 = vsel %vm721_vm13, %v2177_v33, %v2204_v0 }
  0xcb   : > { %v2212_v1 = vpop.permute.xlu0 %565 }
  0xcc   : > { %v584_v43 = vpop.permute.xlu1 %583 }
  0xcd   : > { %1113 = vperm.xlu0 %1554, %v1059_v4   ;;  %v744_v34 = vsel %vm740_vm14, %v725_v53, %v584_v43 }
  0xce   : > { %1118 = vperm.xlu1 %1555, %v1060_v14  }
  0xcf   : > { %v582_v11 = vpop.permute.xlu0 %581 }
  0xd0   : > { %v592_v49 = vpop.permute.xlu1 %591  ;;  %v742_v29 = vsel %vm740_vm14, %v723_v12, %v582_v11 }
  0xd1   : > { %1123 = vperm.xlu0 %1554, %v1061_v46   ;;  %v752_v48 = vsel %vm740_vm14, %v733_v40, %v592_v49 }
  0xd2   : > { %1128 = vperm.xlu1 %1555, %v1062_v10  }
  0xd3   : > { %v590_v13 = vpop.permute.xlu0 %589 }
  0xd4   : > { %v594_v3 = vpop.permute.xlu1 %593  ;;  %v750_v8 = vsel %vm740_vm14, %v731_v62, %v590_v13 }
  0xd5   : > { %1133 = vperm.xlu0 %1554, %v1063_v19   ;;  %v754_v49 = vsel %vm740_vm14, %v735_v16, %v594_v3  ;;  %v727_v3 = vsel %vm721_vm13, %v2190_v55, %v2212_v1 }
  0xd6   : > { %1138 = vperm.xlu1 %1555, %v1064_v15  }
  0xd7   : > { %v2229_v44 = vpop.permute.xlu0 %585 }
  0xd8   : > { %v603_v61 = vpop.permute.xlu1 %602 }
  0xd9   : > { %1143 = vperm.xlu0 %1554, %v1065_v57   ;;  %v763_v35 = vsel %vm759_vm15, %v744_v34, %v603_v61 }
  0xdb   : > { %v601_v18 = vpop.permute.xlu0 %600 }
  0xdc   : > { %v611_v20 = vpop.permute.xlu1 %610  ;;  %v761_v50 = vsel %vm759_vm15, %v742_v29, %v601_v18 }
  0xdd   : > { %v771_v41 = vsel %vm759_vm15, %v752_v48, %v611_v20 }
  0xdf   : > { %v609_v5 = vpop.permute.xlu0 %608 }
  0xe0   : > { %v613_v21 = vpop.permute.xlu1 %612  ;;  %v769_v23 = vsel %vm759_vm15, %v750_v8, %v609_v5 }
  0xe1   : > { %v773_v15 = vsel %vm759_vm15, %v754_v49, %v613_v21 }
  0xe3   : > { %v2231_v6 = vpop.permute.xlu0 %604 }
  0xe4   : > { %v629_v24 = vpop.permute.xlu1 %628 }
  0xe5   : > { %v782_v9 = vsel %vm778_vm0, %v763_v35, %v629_v24 }
  0xe7   : > { %v627_v25 = vpop.permute.xlu0 %626 }
  0xe8   : > { %v637_v26 = vpop.permute.xlu1 %636  ;;  %v780_v51 = vsel %vm778_vm0, %v761_v50, %v627_v25 }
  0xe9   : > { %v790_v45 = vsel %vm778_vm0, %v771_v41, %v637_v26  ;;  %v746_v26 = vsel %vm740_vm14, %v727_v3, %v2229_v44 }
  0xea   : > { %v765_v34 = vsel %vm759_vm15, %v746_v26, %v2231_v6 }
  0xeb   : > { %v635_v31 = vpop.permute.xlu0 %634 }
  0xec   : > { %v639_v2 = vpop.permute.xlu1 %638  ;;  %v788_v42 = vsel %vm778_vm0, %v769_v23, %v635_v31 }
  0xed   : > { %v792_v57 = vsel %vm778_vm0, %v773_v15, %v639_v2 }
  0xef   : > { %v631_v36 = vpop.permute.xlu0 %630 }
  0xf0   : > { %v649_v38 = vpop.permute.xlu1 %648  ;;  %v784_v35 = vsel %vm778_vm0, %v765_v34, %v631_v36 }
  0xf1   : > { %v801_v39 = vsel %vm797_vm1, %v782_v9, %v649_v38 }
  0xf2   : > { %v833_v27 = vshrl.u32 %v801_v39, 16  ;;  %v836_v30 = vshll.u32 %v801_v39, 16 }
  0xf3   : > { %v647_v22 = vpop.permute.xlu0 %646 }
  0xf4   : > { %v835_v37 = vrot.slane %v833_v27, 3  ;;  %v838_v7 = vrot.slane %v836_v30, 4  ;;  %v657_v28 = vpop.permute.xlu1 %656  ;;  %v799_v54 = vsel %vm797_vm1, %v780_v51, %v647_v22 }
  0xf5   : > { %v809_v56 = vsel %vm797_vm1, %v790_v45, %v657_v28  ;;  %v826_v58 = vshrl.u32 %v799_v54, 16  ;;  %v829_v59 = vshll.u32 %v799_v54, 16 }
  0xf6   : > { %v865_v60 = vshrl.u32 %v809_v56, 16  ;;  %v868_v63 = vshll.u32 %v809_v56, 16  ;;  %v839_v32 = vor.u32 %v838_v7, %v835_v37 }
  0xf7   : > { %v828_v14 = vrot.slane %v826_v58, 3  ;;  %v831_v4 = vrot.slane %v829_v59, 4  ;;  %v655_v10 = vpop.permute.xlu0 %654 }
  0xf8   : > { %v867_v43 = vrot.slane %v865_v60, 3  ;;  %v870_v46 = vrot.slane %v868_v63, 4  ;;  %v2258_v11 = vpop.permute.xlu1 %485  ;;  %v807_v19 = vsel %vm797_vm1, %v788_v42, %v655_v10 }
  0xf9   : > { %v857_v13 = vshrl.u32 %v807_v19, 16  ;;  %v860_v33 = vshll.u32 %v807_v19, 16  ;;  %v832_v0 = vor.u32 %v831_v4, %v828_v14  ;;  %v680_v15 = vsel %vm664_vm9, %v1809_v47, %v2258_v11 }
  0xfa   : > { %v871_v25 = vor.u32 %v870_v46, %v867_v43 }
  0xfb   : > { %v859_v61 = vrot.slane %v857_v13, 3  ;;  %v862_v18 = vrot.slane %v860_v33, 4  ;;  %v478_v20 = vpop.permute.xlu0 %477  ;;  %v840_v5 = vsel %vm825_vm2, %v832_v0, %v839_v32 }
  0xfc   : > { %v659_v24 = vpop.permute.xlu1 %658  ;;  %1493 = vmatprep.mubr.msk.bf16.mxu0 %vm924_vm3, %v840_v5  ;;  %v672_v59 = vsel %vm664_vm9, %v1822_v52, %v478_v20 }
  0xfd   : > { %v811_v21 = vsel %vm797_vm1, %v792_v57, %v659_v24  ;;  %v2272_v53 = vor.u32 %v862_v18, %v859_v61 }
  0xfe   : > { %v873_v31 = vshrl.u32 %v811_v21, 16  ;;  %v876_v2 = vshll.u32 %v811_v21, 16 }
  0xff   : > { %v651_v12 = vpop.permute.xlu0 %650  ;;  %v872_v55 = vsel %vm825_vm2, %v2272_v53, %v871_v25 }
 0x100   : > { %v875_v9 = vrot.slane %v873_v31, 3  ;;  %v878_v38 = vrot.slane %v876_v2, 4  ;;  %v523_v1 = vpop.permute.xlu1 %522  ;;  %v803_v40 = vsel %vm797_vm1, %v784_v35, %v651_v12  ;;  %1501 = vmatprep.mubr.msk.bf16.mxu1 %vm924_vm3, %v872_v55 }
 0x101   : > { %v841_v62 = vshrl.u32 %v803_v40, 16  ;;  %v844_v39 = vshll.u32 %v803_v40, 16  ;;  %v691_v60 = vsel %vm683_vm10, %v672_v59, %v523_v1 }
 0x102   : > { %v2281_v44 = vor.u32 %v878_v38, %v875_v9 }
 0x103   : > { %v843_v29 = vrot.slane %v841_v62, 3  ;;  %v846_v48 = vrot.slane %v844_v39, 4  ;;  %v488_v6 = vpop.permute.xlu0 %487 }
 0x104   : > { %v533_v27 = vpop.permute.xlu1 %532  ;;  %v880_v36 = vsel %vm825_vm2, %v871_v25, %v2281_v44  ;;  %v682_v14 = vsel %vm664_vm9, %v1932_v17, %v488_v6 }
 0x105   : > { %1502 = vmatmul.mubr.msk.bf16.vlgmr.msra.gmra.mxu1 %vm924_vm3, %v880_v36  ;;  %v847_v30 = vor.u32 %v846_v48, %v843_v29  ;;  %v701_v43 = vsel %vm683_vm10, %v682_v14, %v533_v27 }
 0x107   : > { %v531_v8 = vpop.permute.xlu0 %530  ;;  %v848_v50 = vsel %vm825_vm2, %v839_v32, %v847_v30 }
 0x108   : > { %v550_v41 = vpop.permute.xlu1 %549  ;;  %1494 = vmatmul.mubr.msk.bf16.vlgmr.msra.gmra.mxu0 %vm924_vm3, %v848_v50  ;;  %v699_v33 = vsel %vm683_vm10, %v680_v15, %v531_v8 }
 0x109   : > { %v718_v18 = vsel %vm702_vm11, %v699_v33, %v550_v41 }
 0x10b   : > { %v542_v51 = vpop.permute.xlu0 %541 }
 0x10c   : > { %v568_v45 = vpop.permute.xlu1 %567  ;;  %v710_v42 = vsel %vm702_vm11, %v691_v60, %v542_v51 }
 0x10d   : > { %v729_v32 = vsel %vm721_vm13, %v710_v42, %v568_v45 }
 0x10f   : > { %v552_v37 = vpop.permute.xlu0 %551 }
 0x110   : > { %v578_v7 = vpop.permute.xlu1 %577  ;;  %v720_v52 = vsel %vm702_vm11, %v701_v43, %v552_v37 }
 0x111   : > { %v739_v13 = vsel %vm721_vm13, %v720_v52, %v578_v7 }
 0x113   : > { %v576_v22 = vpop.permute.xlu0 %575 }
 0x114   : > { %v596_v28 = vpop.permute.xlu1 %595  ;;  %v737_v25 = vsel %vm721_vm13, %v718_v18, %v576_v22 }
 0x115   : > { %v756_v21 = vsel %vm740_vm14, %v737_v25, %v596_v28 }
 0x117   : > { %v588_v23 = vpop.permute.xlu0 %587 }
 0x118   : > { %v607_v54 = vpop.permute.xlu1 %606  ;;  %v748_v4 = vsel %vm740_vm14, %v729_v32, %v588_v23 }
 0x119   : > { %v767_v46 = vsel %vm759_vm15, %v748_v4, %v607_v54 }
 0x11b   : > { %v598_v56 = vpop.permute.xlu0 %597 }
 0x11c   : > { %v617_v58 = vpop.permute.xlu1 %616  ;;  %v758_v0 = vsel %vm740_vm14, %v739_v13, %v598_v56 }
 0x11d   : > { %v777_v20 = vsel %vm759_vm15, %v758_v0, %v617_v58 }
 0x11f   : > { %v615_v63 = vpop.permute.xlu0 %614 }
 0x120   : > { %v641_v16 = vpop.permute.xlu1 %640  ;;  %v775_v31 = vsel %vm759_vm15, %v756_v21, %v615_v63 }
 0x121   : > { %v794_v9 = vsel %vm778_vm0, %v775_v31, %v641_v16 }
 0x123   : > { %v633_v10 = vpop.permute.xlu0 %632 }
 0x124   : > { %v653_v49 = vpop.permute.xlu1 %652  ;;  %v786_v19 = vsel %vm778_vm0, %v767_v46, %v633_v10 }
 0x125   : > { %v805_v17 = vsel %vm797_vm1, %v786_v19, %v653_v49 }
 0x126   : > { %v849_v57 = vshrl.u32 %v805_v17, 16  ;;  %v852_v61 = vshll.u32 %v805_v17, 16 }
 0x127   : > { %v643_v5 = vpop.permute.xlu0 %642 }
 0x128   : > { %v663_v24 = vpop.permute.xlu1 %662  ;;  %v851_v3 = vrot.slane %v849_v57, 3  ;;  %v854_v47 = vrot.slane %v852_v61, 4  ;;  %v796_v11 = vsel %vm778_vm0, %v777_v20, %v643_v5 }
 0x129   : > { %v815_v26 = vsel %vm797_vm1, %v796_v11, %v663_v24 }
 0x12a   : > { %v855_v2 = vor.u32 %v854_v47, %v851_v3  ;;  %v889_v34 = vshrl.u32 %v815_v26, 16  ;;  %v892_v35 = vshll.u32 %v815_v26, 16 }
 0x12b   : > { %v661_v38 = vpop.permute.xlu0 %660 }
 0x12c   : > { %v891_v12 = vrot.slane %v889_v34, 3  ;;  %v894_v55 = vrot.slane %v892_v35, 4  ;;  %v813_v1 = vsel %vm797_vm1, %v794_v9, %v661_v38  ;;  %v856_v40 = vsel %vm825_vm2, %v847_v30, %v855_v2 }
 0x12d   : > { %v881_v62 = vshrl.u32 %v813_v1, 16  ;;  %v884_v39 = vshll.u32 %v813_v1, 16  ;;  %1497 = vmatprep.mubr.msk.bf16.mxu0 %vm924_vm3, %v856_v40  ;;  %v864_v29 = vsel %vm825_vm2, %v855_v2, %v2272_v53 }
 0x12e   : > { %1498 = vmatmul.mubr.msk.bf16.gmra.mxu0 %vm924_vm3, %v864_v29  ;;  %v895_v48 = vor.u32 %v894_v55, %v891_v12 }
 0x12f   : > { %v883_v6 = vrot.slane %v881_v62, 3  ;;  %v886_v27 = vrot.slane %v884_v39, 4 }
 0x131   : > { %v887_v36 = vor.u32 %v886_v27, %v883_v6 }
 0x133   : > { %v888_v8 = vsel %vm825_vm2, %v2281_v44, %v887_v36  ;;  %v896_v50 = vsel %vm825_vm2, %v887_v36, %v895_v48 }
 0x134   : > { %1505 = vmatprep.mubr.msk.bf16.mxu1 %vm924_vm3, %v888_v8 }
 0x135   : > { %1506 = vmatmul.mubr.msk.bf16.gmra.mxu1 %vm924_vm3, %v896_v50  ;;  %v1074_v30 = vpop.permute.xlu1 %1073 }
 0x138   : > { %v1069_v41 = vpop.permute.xlu0 %1068 }
 0x139   : > { %v1079_v51 = vpop.permute.xlu1 %1078 }
 0x13c   : > { %v1084_v45 = vpop.permute.xlu0 %1083 }
 0x13d   : > { %v1089_v53 = vpop.permute.xlu1 %1088 }
 0x140   : > { %v1094_v37 = vpop.permute.xlu0 %1093 }
 0x141   : > { %v1099_v7 = vpop.permute.xlu1 %1098 }
 0x144   : > { %v1104_v22 = vpop.permute.xlu0 %1103 }
 0x145   : > { %v1109_v28 = vpop.permute.xlu1 %1108 }
 0x148   : > { %v1114_v23 = vpop.permute.xlu0 %1113 }
 0x149   : > { %v1119_v54 = vpop.permute.xlu1 %1118 }
 0x14c   : > { %v1124_v59 = vpop.permute.xlu0 %1123 }
 0x14d   : > { %v1129_v5 = vpop.permute.xlu1 %1128 }
 0x150   : > { %v1134_v21 = vpop.permute.xlu0 %1133 }
 0x151   : > { %v1139_v34 = vpop.permute.xlu1 %1138 }
 0x154   : > { %v1144_v39 = vpop.permute.xlu0 %1143 }
 0x1c5   : > { %v1503_v56 = vpop.f32.mrf.mxu1 }
 0x1c6   : > { %v1156_v44 = vmul.f32 %v1503_v56, %v1119_v54 }
 0x1c7   : > { %v1019_v58 = vpop.f32.mrf.mxu1 }
 0x1c8   : > { %v1410_v60 = vpack.c.bf16 %v1156_v44, %v1156_v44  ;;  %v1154_v63 = vmul.f32 %v1109_v28, %v1019_v58  ;;  %v1495_v16 = vpop.f32.mrf.mxu0 }
 0x1c9   : > { %v1504_v42 = vpop.f32.mrf.mxu1  ;;  %v1148_v32 = vmul.f32 %v1495_v16, %v1079_v51 }
 0x1ca   : > { %1243 = vst.msk [vmem:[%s2123_s19 + $0x34] sm:$0xf] %vm1170_vm12, %v1410_v60  ;;  %v1408_v14 = vpack.c.bf16 %v1154_v63, %v1154_v63  ;;  %v1157_v4 = vmul.f32 %v1504_v42, %v1124_v59  ;;  %v987_v43 = vpop.f32.mrf.mxu0 }
 0x1cb   : > { %v1022_v46 = vpop.f32.mrf.mxu1  ;;  %v1402_v10 = vpack.c.bf16 %v1148_v32, %v1148_v32  ;;  %v1146_v49 = vmul.f32 %v1069_v41, %v987_v43 }
 0x1cc   : > { %1241 = vst.msk [vmem:[%s2123_s19 + $0x2c] sm:$0xf] %vm1170_vm12, %v1408_v14  ;;  %v1411_v52 = vpack.c.bf16 %v1157_v4, %v1157_v4  ;;  %v1155_v19 = vmul.f32 %v1114_v23, %v1022_v46  ;;  %v1496_v15 = vpop.f32.mrf.mxu0 }
 0x1cd   : > { %1235 = vst.msk [vmem:[%s2123_s19 + $0x14] sm:$0xf] %vm1170_vm12, %v1402_v10  ;;  %v1400_v13 = vpack.c.bf16 %v1146_v49, %v1146_v49  ;;  %v1149_v17 = vmul.f32 %v1496_v15, %v1084_v45 }
 0x1ce   : > { %1244 = vst.msk [vmem:[%s2123_s19 + $0x38] sm:$0xf] %vm1170_vm12, %v1411_v52  ;;  %v1409_v33 = vpack.c.bf16 %v1155_v19, %v1155_v19  ;;  %v990_v0 = vpop.f32.mrf.mxu0 }
 0x1cf   : > { %1233 = vst.msk [vmem:[%s2123_s19 + $0xc] sm:$0xf] %vm1170_vm12, %v1400_v13  ;;  %v1403_v57 = vpack.c.bf16 %v1149_v17, %v1149_v17  ;;  %v1147_v61 = vmul.f32 %v1074_v30, %v990_v0 }
 0x1d0   : > { %1242 = vst.msk [vmem:[%s2123_s19 + $0x30] sm:$0xf] %vm1170_vm12, %v1409_v33 }
 0x1d1   : > { %1236 = vst.msk [vmem:[%s2123_s19 + $0x18] sm:$0xf] %vm1170_vm12, %v1403_v57  ;;  %v1401_v18 = vpack.c.bf16 %v1147_v61, %v1147_v61 }
 0x1d3   : > { %1234 = vst.msk [vmem:[%s2123_s19 + $0x10] sm:$0xf] %vm1170_vm12, %v1401_v18 }
 0x1ee   : > { %v1499_v20 = vpop.f32.mrf.mxu0 }
 0x1ef   : > { %v1152_v24 = vmul.f32 %v1499_v20, %v1099_v7 }
 0x1f0   : > { %v1003_v25 = vpop.f32.mrf.mxu0 }
 0x1f1   : > { %v1406_v3 = vpack.c.bf16 %v1152_v24, %v1152_v24  ;;  %v1150_v47 = vmul.f32 %v1089_v53, %v1003_v25 }
 0x1f2   : > { %v1500_v11 = vpop.f32.mrf.mxu0 }
 0x1f3   : > { %1239 = vst.msk [vmem:[%s2123_s19 + $0x24] sm:$0xf] %vm1170_vm12, %v1406_v3  ;;  %v1404_v26 = vpack.c.bf16 %v1150_v47, %v1150_v47  ;;  %v1153_v31 = vmul.f32 %v1500_v11, %v1104_v22 }
 0x1f4   : > { %v1006_v2 = vpop.f32.mrf.mxu0 }
 0x1f5   : > { %1237 = vst.msk [vmem:[%s2123_s19 + $0x1c] sm:$0xf] %vm1170_vm12, %v1404_v26  ;;  %v1407_v35 = vpack.c.bf16 %v1153_v31, %v1153_v31  ;;  %v1507_v9 = vpop.f32.mrf.mxu1  ;;  %v1151_v38 = vmul.f32 %v1094_v37, %v1006_v2 }
 0x1f6   : > { %v1160_v12 = vmul.f32 %v1507_v9, %v1139_v34 }
 0x1f7   : > { %1240 = vst.msk [vmem:[%s2123_s19 + $0x28] sm:$0xf] %vm1170_vm12, %v1407_v35  ;;  %v1405_v55 = vpack.c.bf16 %v1151_v38, %v1151_v38  ;;  %v1035_v1 = vpop.f32.mrf.mxu1 }
 0x1f8   : > { %v1414_v40 = vpack.c.bf16 %v1160_v12, %v1160_v12  ;;  %v1158_v62 = vmul.f32 %v1129_v5, %v1035_v1 }
 0x1f9   : > { %1238 = vst.msk [vmem:[%s2123_s19 + $0x20] sm:$0xf] %vm1170_vm12, %v1405_v55  ;;  %v1508_v29 = vpop.f32.mrf.mxu1 }
 0x1fa   : > { %1247 = vst.msk [vmem:[%s2123_s19 + $0x44] sm:$0xf] %vm1170_vm12, %v1414_v40  ;;  %v1412_v48 = vpack.c.bf16 %v1158_v62, %v1158_v62  ;;  %v1161_v6 = vmul.f32 %v1508_v29, %v1144_v39 }
 0x1fb   : > { %v1038_v27 = vpop.f32.mrf.mxu1 }
 0x1fc   : > { %1245 = vst.msk [vmem:[%s2123_s19 + $0x3c] sm:$0xf] %vm1170_vm12, %v1412_v48  ;;  %v1415_v36 = vpack.c.bf16 %v1161_v6, %v1161_v6  ;;  %v1159_v8 = vmul.f32 %v1134_v21, %v1038_v27 }
 0x1fe   : > { %1248 = vst.msk [vmem:[%s2123_s19 + $0x48] sm:$0xf] %vm1170_vm12, %v1415_v36  ;;  %v1413_v50 = vpack.c.bf16 %v1159_v8, %v1159_v8 }
 0x200   : > { %1246 = vst.msk [vmem:[%s2123_s19 + $0x40] sm:$0xf] %vm1170_vm12, %v1413_v50 }
 0x201 PF: > { %s13_s14 = sadd.s32 1, %s1627_s14   ;;  %s2371_s12 = smov %s1623_s13 }
 0x202   : > { %p10_p5 = scmp.ge.s32.totalorder %s13_s14, 4   ;;  %s2372_s13 = smov %s2374_s15 }
 0x204   :  { %12 = sbr.rel (!%p10_p5) target bundleno = 2 (0x2), region = 65 }

// kernel: _lambda_.24
= control target key start
LH: loop header
LB: loop body
LE: loop exit
PB: predicated region body
PF: predicated region fallthrough
CT: control target
= control target key end

     0   :  { %s1973_s18 = smov 0   ;;  %s1975_s19 = smov 0   ;;  %s2803_s0 = inlined_call_operand.vmem [shape: bf16[352,8], index: 0, kind: input, shape index: {}]   ;;  %s2804_s1 = inlined_call_operand.vmem [shape: bf16[80,8], index: 1, kind: input, shape index: {}]   ;;  %s2805_s2 = inlined_call_operand.vmem [shape: f32[128,1], index: 2, kind: input, shape index: {}]   ;;  %s2806_s3 = inlined_call_operand.vmem [shape: f32[1,8], index: 3, kind: input, shape index: {}]   ;;  %s2807_s4 = inlined_call_operand.vmem [shape: bf16[352,8], index: 4, kind: input, shape index: {}]   ;;  %s2808_s5 = inlined_call_operand.vmem [shape: bf16[352,8], index: 5, kind: output, shape index: {}]  }
   0x1   :  { %s1977_s20 = smov 0  }
   0x2 LB: > { %s27_s21 = sadd.s32 1, %s1927_s19  ;;  %p1631_p0 = scmp.ge.s32.totalorder %s1931_s20, 1  ;;  %s1931_s20 = sphi %s1977_s20, %s15_s20   ;;  %s1927_s19 = sphi %s1975_s19, %s2810_s19   ;;  %s1923_s18 = sphi %s1973_s18, %s2809_s18  }
   0x3   : > { %p29_p1 = scmp.ge.s32.totalorder %s27_s21, 2  ;;  %p230_p2 = scmp.lt.s32.totalorder %s1931_s20, 3 }
   0x5   : > { %s2812_s21 = smov (%p29_p1, %s27_s21), 0  ;;  %p231_p3 = pnand %p1631_p0, %p230_p2 }
   0x6   : > { %s273_s22 = smul.u32 (!%p231_p3), 22, %s1923_s18  ;;  %s1933_s30 = smov (!%p231_p3), 24  }
   0x7   : > { %234 = sbr.rel (%p231_p3) target bundleno = 534 (0x216), region = 40  ;;  %s1934_s6 = smov (!%p231_p3), 16  }
   0x8   : > { %p274_p4 = scmp.lt.s32.totalorder (!%p231_p3), %s273_s22, 43  ;;  %s1935_s7 = smov (!%p231_p3), 8  }
   0x9   : > { %s1936_s8 = smov (!%p231_p3), 32   ;;  %s1937_s9 = smov (!%p231_p3), 40  }
   0xa   : > { %s1938_s10 = smov (!%p231_p3), 48   ;;  %s1939_s11 = smov (!%p231_p3), 56  }
   0xb   : > { %s1940_s12 = smov (!%p231_p3), 64  }
   0xc   : > { %s2814_s22 = smov (!%p274_p4, %s273_s22), 43  ;;  %vm604_vm12 = vcmask 1046528  }
   0xd   : > { %s1991_s23 = sshll.u32 %s2814_s22, 2  ;;  %s1941_s22 = smov 72  }
   0xe   : > { %s1997_s26 = scalar_lea.vmem %s2803_s0, %s1991_s23  ;;  %s2019_s29 = scalar_lea.vmem %s2807_s4, %s1991_s23 }
   0xf   : > { %v1758_v0 = vld [vmem:[%s1997_s26 + $0x10] sm:$0xff]   ;;  %v1757_v1 = vld [vmem:[%s1997_s26 + $0x8] sm:$0xff]   ;;  %v1763_v18 = vld [vmem:[%s1997_s26 + $0x38] sm:$0xff]  }
  0x10   : > { %v1762_v2 = vld [vmem:[%s1997_s26 + $0x30] sm:$0xff]   ;;  %v2002_v3 = vunpack.c.l.bf16 %v1758_v0  ;;  %v2004_v4 = vunpack.c.h.bf16 %v1758_v0  ;;  %v2006_v5 = vunpack.c.l.bf16 %v1757_v1  ;;  %v2008_v6 = vunpack.c.h.bf16 %v1757_v1  ;;  %v1761_v7 = vld [vmem:[%s1997_s26 + $0x28] sm:$0xff]   ;;  %v1759_v24 = vld [vmem:[%s1997_s26 + $0x18] sm:$0xff]  }
  0x11   : > { %v2011_v8 = vunpack.c.l.bf16 %v1762_v2  ;;  %v2013_v9 = vunpack.c.h.bf16 %v1762_v2  ;;  %v2023_v12 = vunpack.c.l.bf16 %v1761_v7  ;;  %v2027_v15 = vunpack.c.h.bf16 %v1761_v7  ;;  %v1714_v35 = vld [vmem:[%s1997_s26] sm:$0xff]  }
  0x12   : > { %v372_v10 = vmin.f32 %v2002_v3, 0.0  ;;  %v373_v11 = vmin.f32 %v2004_v4, 0.0  ;;  %v370_v13 = vmin.f32 %v2006_v5, 0.0  ;;  %v371_v14 = vmin.f32 %v2008_v6, 0.0  ;;  %v1760_v37 = vld [vmem:[%s1997_s26 + $0x20] sm:$0xff]  }
  0x13   : > { %v380_v21 = vmin.f32 %v2011_v8, 0.0  ;;  %v381_v22 = vmin.f32 %v2013_v9, 0.0  ;;  %v378_v23 = vmin.f32 %v2023_v12, 0.0  ;;  %v379_v27 = vmin.f32 %v2027_v15, 0.0  ;;  %v1764_v50 = vld [vmem:[%s1997_s26 + $0x40] sm:$0xff]  }
  0x14   : > { %v398_v16 = vmul.f32 1.442695, %v372_v10  ;;  %v400_v17 = vmul.f32 1.442695, %v373_v11  ;;  %v394_v19 = vmul.f32 1.442695, %v370_v13  ;;  %v2035_v29 = vunpack.c.l.bf16 %v1763_v18 }
  0x15   : > { %v396_v20 = vmul.f32 1.442695, %v371_v14  ;;  %v414_v25 = vmul.f32 1.442695, %v380_v21  ;;  %v416_v26 = vmul.f32 1.442695, %v381_v22  ;;  %v2037_v30 = vunpack.c.h.bf16 %v1763_v18 }
  0x16   : > { %1865 = vpow2.f32 %v398_v16  ;;  %v410_v28 = vmul.f32 1.442695, %v378_v23  ;;  %v412_v31 = vmul.f32 1.442695, %v379_v27  ;;  %v2039_v32 = vunpack.c.l.bf16 %v1759_v24 }
  0x17   : > { %1867 = vpow2.f32 %v400_v17  ;;  %v2041_v33 = vunpack.c.h.bf16 %v1759_v24  ;;  %v382_v34 = vmin.f32 %v2035_v29, 0.0  ;;  %v383_v36 = vmin.f32 %v2037_v30, 0.0 }
  0x18   : > { %1869 = vpow2.f32 %v394_v19  ;;  %v374_v39 = vmin.f32 %v2039_v32, 0.0  ;;  %v2049_v42 = vunpack.c.l.bf16 %v1714_v35  ;;  %v2051_v43 = vunpack.c.h.bf16 %v1714_v35 }
  0x19   : > { %1871 = vpow2.f32 %v396_v20  ;;  %v418_v38 = vmul.f32 1.442695, %v382_v34  ;;  %v375_v40 = vmin.f32 %v2041_v33, 0.0  ;;  %v420_v41 = vmul.f32 1.442695, %v383_v36 }
  0x1a   : > { %1873 = vpow2.f32 %v414_v25  ;;  %v402_v44 = vmul.f32 1.442695, %v374_v39  ;;  %v2053_v46 = vunpack.c.l.bf16 %v1760_v37  ;;  %v368_v47 = vmin.f32 %v2049_v42, 0.0 }
  0x1b   : > { %1875 = vpow2.f32 %v416_v26  ;;  %v404_v45 = vmul.f32 1.442695, %v375_v40  ;;  %v369_v48 = vmin.f32 %v2051_v43, 0.0  ;;  %v2057_v49 = vunpack.c.h.bf16 %v1760_v37 }
  0x1c   : > { %1877 = vpow2.f32 %v410_v28  ;;  %vm350_vm0 = vcmp.gt.f32.partialorder %v2002_v3, 0.0  ;;  %v390_v51 = vmul.f32 1.442695, %v368_v47  ;;  %v376_v52 = vmin.f32 %v2053_v46, 0.0 }
  0x1d   : > { %1879 = vpow2.f32 %v412_v31  ;;  %vm351_vm1 = vcmp.gt.f32.partialorder %v2004_v4, 0.0  ;;  %v392_v53 = vmul.f32 1.442695, %v369_v48  ;;  %v377_v54 = vmin.f32 %v2057_v49, 0.0 }
  0x1e   : > { %1881 = vpow2.f32 %v418_v38  ;;  %vm348_vm2 = vcmp.gt.f32.partialorder %v2006_v5, 0.0  ;;  %v406_v56 = vmul.f32 1.442695, %v376_v52  ;;  %v2065_v57 = vunpack.c.l.bf16 %v1764_v50 }
  0x1f   : > { %1883 = vpow2.f32 %v420_v41  ;;  %v408_v60 = vmul.f32 1.442695, %v377_v54  ;;  %v2067_v61 = vunpack.c.h.bf16 %v1764_v50  ;;  %vm349_vm3 = vcmp.gt.f32.partialorder %v2008_v6, 0.0 }
  0x20   : > { %1885 = vpow2.f32 %v402_v44  ;;  %vm358_vm4 = vcmp.gt.f32.partialorder %v2011_v8, 0.0  ;;  %vm359_vm5 = vcmp.gt.f32.partialorder %v2013_v9, 0.0  ;;  %vm356_vm6 = vcmp.gt.f32.partialorder %v2023_v12, 0.0 }
  0x21   : > { %1887 = vpow2.f32 %v404_v45  ;;  %v384_v13 = vmin.f32 %v2065_v57, 0.0  ;;  %v385_v18 = vmin.f32 %v2067_v61, 0.0  ;;  %vm357_vm7 = vcmp.gt.f32.partialorder %v2027_v15, 0.0 }
  0x22   : > { %1889 = vpow2.f32 %v390_v51  ;;  %vm360_vm8 = vcmp.gt.f32.partialorder %v2035_v29, 0.0  ;;  %vm361_vm9 = vcmp.gt.f32.partialorder %v2037_v30, 0.0  ;;  %vm352_vm10 = vcmp.gt.f32.partialorder %v2039_v32, 0.0 }
  0x23   : > { %v1866_v55 = vpop.eup %1865  ;;  %1891 = vpow2.f32 %v392_v53  ;;  %v422_v26 = vmul.f32 1.442695, %v384_v13  ;;  %v424_v34 = vmul.f32 1.442695, %v385_v18  ;;  %vm353_vm11 = vcmp.gt.f32.partialorder %v2041_v33, 0.0 }
  0x24   : > { %v1868_v58 = vpop.eup %1867  ;;  %v1639_v59 = vadd.f32 -1.0, %v1866_v55  ;;  %1893 = vpow2.f32 %v406_v56  ;;  %vm346_vm13 = vcmp.gt.f32.partialorder %v2049_v42, 0.0  ;;  %vm347_vm14 = vcmp.gt.f32.partialorder %v2051_v43, 0.0 }
  0x25   : > { %v1870_v62 = vpop.eup %1869  ;;  %v1640_v63 = vadd.f32 -1.0, %v1868_v58  ;;  %1895 = vpow2.f32 %v408_v60  ;;  %vm354_vm15 = vcmp.gt.f32.partialorder %v2053_v46, 0.0 }
  0x26   : > { %v1872_v0 = vpop.eup %1871  ;;  %v460_v1 = vsel %vm350_vm0, %v2002_v3, %v1639_v59  ;;  %v1637_v2 = vadd.f32 -1.0, %v1870_v62  ;;  %1897 = vpow2.f32 %v422_v26  ;;  %vm355_vm0 = vcmp.gt.f32.partialorder %v2057_v49, 0.0 }
  0x27   : > { %v1874_v7 = vpop.eup %1873  ;;  %v461_v10 = vsel %vm351_vm1, %v2004_v4, %v1640_v63  ;;  %v1638_v11 = vadd.f32 -1.0, %v1872_v0  ;;  %1899 = vpow2.f32 %v424_v34  ;;  %vm505_vm1 = vsmask.f32 7424 }
  0x28   : > { %v1876_v14 = vpop.eup %1875  ;;  %v2080_v16 = vpack.c.bf16 %v461_v10, %v460_v1  ;;  %v458_v3 = vsel %vm348_vm2, %v2006_v5, %v1637_v2  ;;  %v1647_v17 = vadd.f32 -1.0, %v1874_v7  ;;  %vm362_vm2 = vcmp.gt.f32.partialorder %v2065_v57, 0.0 }
  0x29   : > { %v1878_v19 = vpop.eup %1877  ;;  %v459_v4 = vsel %vm349_vm3, %v2008_v6, %v1638_v11  ;;  %v1648_v20 = vadd.f32 -1.0, %v1876_v14  ;;  %vm363_vm3 = vcmp.gt.f32.partialorder %v2067_v61, 0.0 }
  0x2a   : > { %v1880_v21 = vpop.eup %1879  ;;  %643 = vrot.lane.b32.xlu1 %v2080_v16, %s1933_s30  ;;  %v2093_v22 = vpack.c.bf16 %v459_v4, %v458_v3  ;;  %v468_v5 = vsel %vm358_vm4, %v2011_v8, %v1647_v17  ;;  %v1645_v23 = vadd.f32 -1.0, %v1878_v19  ;;  %v608_v37 = vrot.slane %v2080_v16, 1  ;;  %v1765_v17 = vld [vmem:[%s1997_s26 + $0x48] sm:$0xff]  }
  0x2b   : > { %v1882_v6 = vpop.eup %1881  ;;  %v469_v24 = vsel %vm359_vm5, %v2013_v9, %v1648_v20  ;;  %v1646_v25 = vadd.f32 -1.0, %v1880_v21  ;;  %v2199_v26 = vunpack.c.h.bf16 %v1765_v17  ;;  %v522_v34 = vshll.u32 %v2080_v16, 16 }
  0x2c   : > { %v1884_v27 = vpop.eup %1883  ;;  %641 = vrot.lane.b32.xlu0 %v2093_v22, %s1933_s30  ;;  %v2105_v28 = vpack.c.bf16 %v469_v24, %v468_v5  ;;  %v466_v8 = vsel %vm356_vm6, %v2023_v12, %v1645_v23  ;;  %v1649_v31 = vadd.f32 -1.0, %v1882_v6  ;;  %v606_v41 = vrot.slane %v2093_v22, 1 }
  0x2d   : > { %v1886_v35 = vpop.eup %1885  ;;  %v467_v9 = vsel %vm357_vm7, %v2027_v15, %v1646_v25  ;;  %v1650_v36 = vadd.f32 -1.0, %v1884_v27  ;;  %v514_v10 = vshll.u32 %v2093_v22, 16  ;;  %v2197_v25 = vunpack.c.l.bf16 %v1765_v17 }
  0x2e   : > { %v1888_v38 = vpop.eup %1887  ;;  %651 = vrot.lane.b32.xlu1 %v2105_v28, %s1933_s30  ;;  %v2117_v39 = vpack.c.bf16 %v467_v9, %v466_v8  ;;  %v470_v12 = vsel %vm360_vm8, %v2035_v29, %v1649_v31  ;;  %v1641_v40 = vadd.f32 -1.0, %v1886_v35  ;;  %v616_v56 = vrot.slane %v2105_v28, 1 }
  0x2f   : > { %v471_v15 = vsel %vm361_vm9, %v2037_v30, %v1650_v36  ;;  %v1642_v44 = vadd.f32 -1.0, %v1888_v38  ;;  %v1890_v45 = vpop.eup %1889  ;;  %v554_v20 = vshll.u32 %v2105_v28, 16  ;;  %v518_v31 = vshrl.u32 %v2093_v22, 16 }
  0x30   : > { %649 = vrot.lane.b32.xlu0 %v2117_v39, %s1933_s30  ;;  %v2128_v47 = vpack.c.bf16 %v471_v15, %v470_v12  ;;  %v462_v29 = vsel %vm352_vm10, %v2039_v32, %v1641_v40  ;;  %v1892_v48 = vpop.eup %1891  ;;  %v1635_v50 = vadd.f32 -1.0, %v1890_v45  ;;  %v2146_v32 = vsel %vm604_vm12, %v606_v41, %v608_v37 }
  0x31   : > { %v463_v30 = vsel %vm353_vm11, %v2041_v33, %v1642_v44  ;;  %v1894_v51 = vpop.eup %1893  ;;  %v1636_v53 = vadd.f32 -1.0, %v1892_v48  ;;  %v614_v55 = vrot.slane %v2117_v39, 1  ;;  %v546_v1 = vshll.u32 %v2117_v39, 16 }
  0x32   : > { %653 = vrot.lane.b32.xlu1 %v2128_v47, %s1933_s30  ;;  %v2141_v52 = vpack.c.bf16 %v463_v30, %v462_v29  ;;  %v1896_v33 = vpop.eup %1895  ;;  %v456_v54 = vsel %vm346_vm13, %v2049_v42, %v1635_v50  ;;  %v1643_v58 = vadd.f32 -1.0, %v1894_v51  ;;  %v618_v0 = vrot.slane %v2128_v47, 1 }
  0x33   : > { %v457_v59 = vsel %vm347_vm14, %v2051_v43, %v1636_v53  ;;  %v1644_v60 = vadd.f32 -1.0, %v1896_v33  ;;  %v2167_v2 = vsel %vm604_vm12, %v614_v55, %v616_v56  ;;  %v550_v11 = vshrl.u32 %v2117_v39, 16  ;;  %v1898_v24 = vpop.eup %1897 }
  0x34   : > { %645 = vrot.lane.b32.xlu0 %v2141_v52, %s1933_s30  ;;  %v2155_v62 = vpack.c.bf16 %v457_v59, %v456_v54  ;;  %v464_v63 = vsel %vm354_vm15, %v2053_v46, %v1643_v58  ;;  %v2185_v18 = vsel %vm604_vm12, %v616_v56, %v618_v0  ;;  %v610_v19 = vrot.slane %v2141_v52, 1  ;;  %v1900_v27 = vpop.eup %1899 }
  0x35   : > { %v465_v42 = vsel %vm355_vm0, %v2057_v49, %v1644_v60  ;;  %v548_v4 = vrot.slane %v546_v1, 1  ;;  %v516_v35 = vrot.slane %v514_v10, 1  ;;  %v556_v36 = vrot.slane %v554_v20, 1  ;;  %v1766_v10 = vld [vmem:[%s1997_s26 + $0x50] sm:$0xff]  }
  0x36   : > { %624 = vrot.lane.b32.xlu1 %v2146_v32, %s1934_s6  ;;  %v605_v43 = vrot.slane %v2155_v62, 1  ;;  %v2169_v7 = vpack.c.bf16 %v465_v42, %v464_v63  ;;  %v509_v46 = vshll.u32 %v2155_v62, 16  ;;  %v507_v23 = vshrl.u32 %v2155_v62, 16 }
  0x37   : > { %v552_v9 = vor.u32 %v550_v11, %v548_v4  ;;  %v558_v38 = vshrl.u32 %v2105_v28, 16  ;;  %v2214_v12 = vsel %vm604_vm12, %v608_v37, %v610_v19  ;;  %v562_v15 = vshll.u32 %v2128_v47, 16 }
  0x38   : > { %v607_v13 = vsel %vm604_vm12, %v605_v43, %v606_v41  ;;  %v612_v49 = vrot.slane %v2169_v7, 1  ;;  %v538_v14 = vshll.u32 %v2169_v7, 16  ;;  %v542_v3 = vshrl.u32 %v2169_v7, 16 }
  0x39   : > { %622 = vrot.lane.b32.xlu0 %v607_v13, %s1934_s6  ;;  %v511_v6 = vrot.slane %v509_v46, 1  ;;  %v1651_v44 = vadd.f32 -1.0, %v1898_v24  ;;  %v1652_v45 = vadd.f32 -1.0, %v1900_v27  ;;  %v386_v29 = vmin.f32 %v2197_v25, 0.0 }
  0x3a   : > { %632 = vrot.lane.b32.xlu1 %v2167_v2, %s1934_s6  ;;  %v2192_v21 = vsel %vm604_vm12, %v612_v49, %v614_v55  ;;  %v2194_v5 = vrot.slane %v538_v14, 1  ;;  %v387_v48 = vmin.f32 %v2199_v26, 0.0  ;;  %v520_v30 = vor.u32 %v518_v31, %v516_v35 }
  0x3b   : > { %v512_v41 = vor.u32 %v511_v6, %v507_v23  ;;  %v526_v50 = vshrl.u32 %v2080_v16, 16  ;;  %v2230_v37 = vsel %vm505_vm1, %v552_v9, %v556_v36  ;;  %v524_v51 = vrot.slane %v522_v34, 1 }
  0x3c   : > { %v544_v8 = vor.u32 %v542_v3, %v2194_v5  ;;  %v560_v53 = vor.u32 %v558_v38, %v556_v36  ;;  %v426_v33 = vmul.f32 1.442695, %v386_v29  ;;  %v564_v55 = vrot.slane %v562_v15, 1 }
  0x3d   : > { %630 = vrot.lane.b32.xlu0 %v2192_v21, %s1934_s6  ;;  %v517_v54 = vsel %vm505_vm1, %v512_v41, %v516_v35  ;;  %v530_v56 = vshll.u32 %v2141_v52, 16  ;;  %v428_v58 = vmul.f32 1.442695, %v387_v48  ;;  %v472_v59 = vsel %vm362_vm2, %v2065_v57, %v1651_v44 }
  0x3e   : > { %634 = vrot.lane.b32.xlu1 %v2185_v18, %s1934_s6  ;;  %v2217_v40 = vsel %vm505_vm1, %v544_v8, %v548_v4  ;;  %v473_v60 = vsel %vm363_vm3, %v2067_v61, %v1652_v45  ;;  %v525_v63 = vsel %vm505_vm1, %v520_v30, %v524_v51  ;;  %v528_v42 = vor.u32 %v526_v50, %v524_v51 }
  0x3f   : > { %1901 = vpow2.f32 %v426_v33  ;;  %v2241_v1 = vsel %vm505_vm1, %v560_v53, %v564_v55  ;;  %v532_v43 = vrot.slane %v530_v56, 1  ;;  %v2243_v46 = vpack.c.bf16 %v473_v60, %v472_v59 }
  0x40   : > { %1903 = vpow2.f32 %v428_v58  ;;  %v566_v61 = vshrl.u32 %v2128_v47, 16  ;;  %v1755_v13 = vunpack.c.l.bf16 %v1766_v10  ;;  %v1756_v14 = vunpack.c.h.bf16 %v1766_v10 }
  0x41   : > { %626 = vrot.lane.b32.xlu0 %v2214_v12, %s1934_s6  ;;  %v2250_v57 = vsel %vm505_vm1, %v528_v42, %v532_v43  ;;  %v570_v11 = vshll.u32 %v2243_v46, 16  ;;  %v534_v20 = vshrl.u32 %v2141_v52, 16  ;;  %vm364_vm4 = vcmp.gt.f32.partialorder %v2197_v25, 0.0  ;;  %v1852_v42 = vld [vmem:[%s2019_s29 + $0xc] sm:$0xff]  }
  0x42   : > { %585 = vrot.lane.b32.xlu1 %v2217_v40, %s1935_s7  ;;  %v388_v3 = vmin.f32 %v1755_v13, 0.0  ;;  %v568_v17 = vor.u32 %v566_v61, %v564_v55  ;;  %v389_v23 = vmin.f32 %v1756_v14, 0.0  ;;  %vm365_vm5 = vcmp.gt.f32.partialorder %v2199_v26, 0.0 }
  0x43   : > { %v2258_v4 = vrot.slane %v570_v11, 1  ;;  %v536_v31 = vor.u32 %v534_v20, %v532_v43  ;;  %v2283_v38 = vrot.slane %v2243_v46, 1  ;;  %vm366_vm6 = vcmp.gt.f32.partialorder %v1755_v13, 0.0  ;;  %v1853_v43 = vld [vmem:[%s2019_s29 + $0x14] sm:$0xff]  }
  0x44   : > { %v430_v6 = vmul.f32 1.442695, %v388_v3  ;;  %v432_v24 = vmul.f32 1.442695, %v389_v23  ;;  %vm367_vm7 = vcmp.gt.f32.partialorder %v1756_v14, 0.0  ;;  %v574_v59 = vshrl.u32 %v2243_v46, 16 }
  0x45   : > { %577 = vrot.lane.b32.xlu0 %v517_v54, %s1935_s7  ;;  %v2266_v8 = vsel %vm505_vm1, %v568_v17, %v2258_v4  ;;  %v2274_v35 = vsel %vm505_vm1, %v536_v31, %v2194_v5  ;;  %v2297_v45 = vsel %vm604_vm12, %v618_v0, %v2283_v38  ;;  %v2309_v0 = vsel %vm604_vm12, %v610_v19, %v612_v49  ;;  %v1856_v23 = vld [vmem:[%s2019_s29 + $0x24] sm:$0xff]  }
  0x46   : > { %587 = vrot.lane.b32.xlu1 %v2230_v37, %s1935_s7  ;;  %1905 = vpow2.f32 %v430_v6  ;;  %v2352_v60 = vor.u32 %v574_v59, %v2258_v4  ;;  %v812_v10 = vshrl.u32 %v1852_v42, 16  ;;  %v815_v61 = vshll.u32 %v1852_v42, 16  ;;  %v1860_v31 = vld [vmem:[%s2804_s1 + $0x20] sm:$0xff]   ;;  %v1862_v59 = vld [vmem:[%s2804_s1 + $0x10] sm:$0xff]  }
  0x47   : > { %1907 = vpow2.f32 %v432_v24  ;;  %v823_v11 = vshll.u32 %v1853_v43, 16  ;;  %vm810_vm8 = vsmask.f32 3328  ;;  %1780 = vmatprep.subr.bf16.mxu0 %v1860_v31  ;;  %1806 = vmatprep.subr.bf16.mxu1 %v1860_v31  ;;  %vm900_vm9 = vcmask 64512  }
  0x48   : > { %v814_v3 = vrot.slane %v812_v10, 4  ;;  %1781 = vmatpush3.bf16.msra.mxu0 %v1860_v31  ;;  %1811 = vmatpush3.bf16.msra.mxu1 %v1860_v31  ;;  %vm919_vm10 = vcmask 130048   ;;  %vm938_vm11 = vcmask 195584   ;;  %vm1432_vm13 = vcmask 60416  }
  0x49   : > { %579 = vrot.lane.b32.xlu0 %v525_v63, %s1935_s7  ;;  %v825_v4 = vrot.slane %v823_v11, 5  ;;  %vm976_vm14 = vcmask 326656   ;;  %vm995_vm15 = vcmask 392192   ;;  %vm1014_vm0 = vcmask 457728  }
  0x4a   : > { %589 = vrot.lane.b32.xlu1 %v2241_v1, %s1935_s7  ;;  %vm1052_vm2 = vcmask 588800   ;;  %vm1088_vm3 = vsmask.f32 4352 }
  0x4c   : > { %v1902_v27 = vpop.eup %1901 }
  0x4d   : > { %581 = vrot.lane.b32.xlu0 %v2250_v57, %s1935_s7  ;;  %v1904_v34 = vpop.eup %1903  ;;  %v1653_v9 = vadd.f32 -1.0, %v1902_v27 }
  0x4e   : > { %669 = vrot.lane.b32.xlu1 %v2250_v57, %s1936_s8  ;;  %v1654_v36 = vadd.f32 -1.0, %v1904_v34 }
  0x4f   : > { %v474_v41 = vsel %vm364_vm4, %v2197_v25, %v1653_v9  ;;  %vm1190_vm4 = vcmask 654336  }
  0x50   : > { %v475_v5 = vsel %vm365_vm5, %v2199_v26, %v1654_v36  ;;  %v838_v36 = vshrl.u32 %v1856_v23, 16 }
  0x51   : > { %667 = vrot.lane.b32.xlu0 %v525_v63, %s1936_s8  ;;  %v2291_v15 = vpack.c.bf16 %v475_v5, %v474_v41  ;;  %v841_v41 = vshll.u32 %v1856_v23, 16  ;;  %v1857_v5 = vld [vmem:[%s2019_s29 + $0x1c] sm:$0xff]  }
  0x52   : > { %677 = vrot.lane.b32.xlu1 %v2241_v1, %s1936_s8 }
  0x53   : > { %v1906_v44 = vpop.eup %1905  ;;  %v664_v50 = vshrl.u32 %v2291_v15, 16  ;;  %v2319_v33 = vrot.slane %v2291_v15, 1 }
  0x54   : > { %v1908_v29 = vpop.eup %1907  ;;  %v1655_v25 = vadd.f32 -1.0, %v1906_v44 }
  0x55   : > { %675 = vrot.lane.b32.xlu0 %v2230_v37, %s1936_s8  ;;  %v1656_v26 = vadd.f32 -1.0, %v1908_v29  ;;  %v2390_v44 = vsel %vm604_vm12, %v2283_v38, %v2319_v33 }
  0x56   : > { %679 = vrot.lane.b32.xlu1 %v2266_v8, %s1936_s8  ;;  %v476_v48 = vsel %vm366_vm6, %v1755_v13, %v1655_v25  ;;  %v1854_v13 = vld [vmem:[%s2019_s29 + $0x2c] sm:$0xff]  }
  0x57   : > { %v477_v30 = vsel %vm367_vm7, %v1756_v14, %v1656_v26  ;;  %v1855_v14 = vld [vmem:[%s2019_s29 + $0x34] sm:$0xff]   ;;  %v847_v20 = vshrl.u32 %v1854_v13, 16  ;;  %v850_v6 = vshll.u32 %v1854_v13, 16 }
  0x58   : > { %v2312_v51 = vpack.c.bf16 %v477_v30, %v476_v48  ;;  %v856_v24 = vshrl.u32 %v1855_v14, 16  ;;  %v859_v27 = vshll.u32 %v1855_v14, 16  ;;  %v832_v48 = vshll.u32 %v1857_v5, 16 }
  0x59   : > { %671 = vrot.lane.b32.xlu0 %v2274_v35, %s1936_s8  ;;  %v849_v9 = vrot.slane %v847_v20, 4  ;;  %v852_v29 = vrot.slane %v850_v6, 5 }
  0x5a   : > { %689 = vrot.lane.b32.xlu1 %v2214_v12, %s1937_s9  ;;  %v725_v54 = vshll.u32 %v2312_v51, 16  ;;  %v750_v49 = vrot.slane %v2312_v51, 1  ;;  %v858_v25 = vrot.slane %v856_v24, 4  ;;  %v861_v26 = vrot.slane %v859_v27, 5 }
  0x5b   : > { %v853_v30 = vor.u32 %v852_v29, %v849_v9  ;;  %v834_v10 = vrot.slane %v832_v48, 5 }
  0x5c   : > { %v2325_v55 = vrot.slane %v725_v54, 1  ;;  %v2331_v56 = vsel %vm604_vm12, %v2319_v33, %v750_v49  ;;  %v843_v54 = vrot.slane %v841_v41, 5  ;;  %vm957_vm12 = vcmask 261120  }
  0x5d   : > { %687 = vrot.lane.b32.xlu0 %v2146_v32, %s1937_s9  ;;  %v660_v32 = vshll.u32 %v2291_v15, 16 }
  0x5e   : > { %697 = vrot.lane.b32.xlu1 %v2185_v18, %s1937_s9 }
  0x5f   : > { %v662_v53 = vrot.slane %v660_v32, 1  ;;  %v829_v32 = vshrl.u32 %v1857_v5, 16 }
  0x61   : > { %695 = vrot.lane.b32.xlu0 %v2167_v2, %s1937_s9  ;;  %v2323_v19 = vor.u32 %v664_v50, %v662_v53  ;;  %v2360_v63 = vsel %vm505_vm1, %v2352_v60, %v662_v53  ;;  %v862_v50 = vor.u32 %v861_v26, %v858_v25  ;;  %v840_v53 = vrot.slane %v838_v36, 4 }
  0x62   : > { %699 = vrot.lane.b32.xlu1 %v2297_v45, %s1937_s9 }
  0x63   : > { %v2340_v58 = vsel %vm505_vm1, %v2323_v19, %v2325_v55  ;;  %v2407_v42 = vor.u32 %v843_v54, %v840_v53  ;;  %vm1033_vm1 = vcmask 523264  }
  0x65   : > { %691 = vrot.lane.b32.xlu0 %v2309_v0, %s1937_s9  ;;  %v854_v11 = vsel %vm810_vm8, %v2407_v42, %v853_v30 }
  0x66   : > { %708 = vrot.lane.b32.xlu1 %v2141_v52, %s1938_s10 }
  0x69   : > { %706 = vrot.lane.b32.xlu0 %v2080_v16, %s1938_s10 }
  0x6a   : > { %716 = vrot.lane.b32.xlu1 %v2128_v47, %s1938_s10 }
  0x6d   : > { %714 = vrot.lane.b32.xlu0 %v2105_v28, %s1938_s10 }
  0x6e   : > { %718 = vrot.lane.b32.xlu1 %v2243_v46, %s1938_s10 }
  0x71   : > { %710 = vrot.lane.b32.xlu0 %v2169_v7, %s1938_s10 }
  0x72   : > { %734 = vrot.lane.b32.xlu1 %v2274_v35, %s1939_s11 }
  0x75   : > { %732 = vrot.lane.b32.xlu0 %v2250_v57, %s1939_s11  ;;  %v820_v57 = vshrl.u32 %v1853_v43, 16  ;;  %v831_v43 = vrot.slane %v829_v32, 4  ;;  %v729_v32 = vshrl.u32 %v2312_v51, 16 }
  0x76   : > { %742 = vrot.lane.b32.xlu1 %v2266_v8, %s1939_s11 }
  0x77   : > { %v822_v17 = vrot.slane %v820_v57, 4  ;;  %v1863_v57 = vld [vmem:[%s2804_s1 + $0x8] sm:$0xff]   ;;  %v2417_v13 = vor.u32 %v834_v10, %v831_v43 }
  0x79   : > { %740 = vrot.lane.b32.xlu0 %v2241_v1, %s1939_s11  ;;  %v817_v1 = vrot.slane %v815_v61, 5  ;;  %v1858_v61 = vld [vmem:[%s2019_s29 + $0x3c] sm:$0xff]  }
  0x7a   : > { %744 = vrot.lane.b32.xlu1 %v2360_v63, %s1939_s11  ;;  %v865_v14 = vshrl.u32 %v1858_v61, 16 }
  0x7b   : > { %v818_v34 = vor.u32 %v817_v1, %v814_v3  ;;  %v868_v3 = vshll.u32 %v1858_v61, 16  ;;  %v1864_v1 = vld [vmem:[%s2804_s1] sm:$0xff]  }
  0x7d   : > { %736 = vrot.lane.b32.xlu0 %v2217_v40, %s1939_s11  ;;  %v870_v20 = vrot.slane %v868_v3, 5 }
  0x7e   : > { %754 = vrot.lane.b32.xlu1 %v2309_v0, %s1940_s12 }
  0x81   : > { %752 = vrot.lane.b32.xlu0 %v2214_v12, %s1940_s12  ;;  %v826_v12 = vor.u32 %v825_v4, %v822_v17  ;;  %v867_v4 = vrot.slane %v865_v14, 4 }
  0x82   : > { %762 = vrot.lane.b32.xlu1 %v2297_v45, %s1940_s12 }
  0x83   : > { %v836_v17 = vsel %vm810_vm8, %v826_v12, %v2417_v13  ;;  %v2430_v23 = vor.u32 %v870_v20, %v867_v4  ;;  %v1313_v4 = vld [vmem:[%s2805_s2 + $0x8] sm:$0xff] }
  0x85   : > { %760 = vrot.lane.b32.xlu0 %v2185_v18, %s1940_s12  ;;  %v1861_v18 = vld [vmem:[%s2804_s1 + $0x18] sm:$0xff]  }
  0x86   : > { %591 = vrot.lane.b32.xlu1 %v2266_v8, %s1935_s7  ;;  %1782 = vmatprep.subr.bf16.mxu0 %v1861_v18  ;;  %v827_v8 = vsel %vm810_vm8, %v818_v34, %v826_v12 }
  0x87   : > { %1807 = vmatprep.subr.bf16.mxu1 %v1861_v18  ;;  %1783 = vmatpush3.bf16.msra.mxu0 %v1861_v18 }
  0x88   : > { %1812 = vmatpush3.bf16.msra.mxu1 %v1861_v18  ;;  %1784 = vmatprep.subr.bf16.mxu0 %v1862_v59 }
  0x89   : > { %583 = vrot.lane.b32.xlu0 %v2274_v35, %s1935_s7  ;;  %1808 = vmatprep.subr.bf16.mxu1 %v1862_v59  ;;  %v863_v35 = vsel %vm810_vm8, %v853_v30, %v862_v50 }
  0x8a   : > { %764 = vrot.lane.b32.xlu1 %v2390_v44, %s1940_s12 }
  0x8b   : > { %1785 = vmatpush3.bf16.msra.mxu0 %v1862_v59 }
  0x8c   : > { %1813 = vmatpush3.bf16.msra.mxu1 %v1862_v59  ;;  %1786 = vmatprep.subr.bf16.mxu0 %v1863_v57 }
  0x8d   : > { %756 = vrot.lane.b32.xlu0 %v2192_v21, %s1940_s12  ;;  %1809 = vmatprep.subr.bf16.mxu1 %v1863_v57 }
  0x8e   : > { %884 = vrot.lane.b32.xlu1 %v827_v8, %s1941_s22 }
  0x8f   : > { %1787 = vmatpush3.bf16.msra.mxu0 %v1863_v57 }
  0x90   : > { %1814 = vmatpush3.bf16.msra.mxu1 %v1863_v57  ;;  %1788 = vmatprep.subr.bf16.mxu0 %v1864_v1 }
  0x91   : > { %882 = vrot.lane.b32.xlu0 %v818_v34, %s1941_s22  ;;  %1810 = vmatprep.subr.bf16.mxu1 %v1864_v1 }
  0x92   : > { %892 = vrot.lane.b32.xlu1 %v863_v35, %s1941_s22  ;;  %v731_v35 = vor.u32 %v729_v32, %v2325_v55 }
  0x93   : > { %1789 = vmatpush3.bf16.msra.mxu0 %v1864_v1 }
  0x94   : > { %1815 = vmatpush3.bf16.msra.mxu1 %v1864_v1 }
  0x95   : > { %890 = vrot.lane.b32.xlu0 %v854_v11, %s1941_s22 }
  0x96   : > { %628 = vrot.lane.b32.xlu1 %v2309_v0, %s1934_s6  ;;  %v872_v0 = vsel %vm810_vm8, %v862_v50, %v2430_v23 }
  0x99   : > { %593 = vrot.lane.b32.xlu0 %v2352_v60, %s1935_s7 }
  0x9a   : > { %886 = vrot.lane.b32.xlu1 %v836_v17, %s1941_s22  ;;  %v1314_v17 = vld [vmem:[%s2805_s2 + $0x10] sm:$0xff] }
  0x9c   : > { %v644_v6 = vpop.permute.xlu1 %643 }
  0x9d   : > { %636 = vrot.lane.b32.xlu0 %v2297_v45, %s1934_s6 }
  0x9e   : > { %v642_v24 = vpop.permute.xlu0 %641  ;;  %638 = vrot.lane.b32.xlu1 %v2283_v38, %s1934_s6 }
  0xa0   : > { %v652_v27 = vpop.permute.xlu1 %651 }
  0xa1   : > { %894 = vrot.lane.b32.xlu0 %v872_v0, %s1941_s22 }
  0xa2   : > { %v650_v31 = vpop.permute.xlu0 %649  ;;  %655 = vrot.lane.b32.xlu1 %v2243_v46, %s1933_s30 }
  0xa4   : > { %v654_v60 = vpop.permute.xlu1 %653 }
  0xa5   : > { %647 = vrot.lane.b32.xlu0 %v2169_v7, %s1933_s30 }
  0xa6   : > { %v646_v45 = vpop.permute.xlu0 %645  ;;  %673 = vrot.lane.b32.xlu1 %v2217_v40, %s1936_s8  ;;  %v1859_v40 = vld [vmem:[%s2019_s29 + $0x44] sm:$0xff]  }
  0xa7   : > { %v877_v29 = vshll.u32 %v1859_v40, 16 }
  0xa8   : > { %v625_v38 = vpop.permute.xlu1 %624 }
  0xa9   : > { %657 = vrot.lane.b32.xlu0 %v2291_v15, %s1933_s30  ;;  %s2530_s30 = scalar_lea.vmem %s2808_s5, %s1991_s23 }
  0xaa   : > { %683 = vrot.lane.b32.xlu1 %v2323_v19, %s1936_s8 }
  0xab   : > { %v623_v34 = vpop.permute.xlu0 %622 }
  0xac   : > { %v633_v12 = vpop.permute.xlu1 %632 }
  0xad   : > { %681 = vrot.lane.b32.xlu0 %v2360_v63, %s1936_s8 }
  0xae   : > { %701 = vrot.lane.b32.xlu1 %v2390_v44, %s1937_s9  ;;  %v874_v44 = vshrl.u32 %v1859_v40, 16  ;;  %v1321_v40 = vld [vmem:[%s2805_s2 + $0x48] sm:$0xff] }
  0xaf   : > { %v631_v9 = vpop.permute.xlu0 %630 }
  0xb0   : > { %v635_v36 = vpop.permute.xlu1 %634  ;;  %v876_v30 = vrot.slane %v874_v44, 4  ;;  %v1324_v44 = vld [vmem:[%s2805_s2 + $0x60] sm:$0xff] }
  0xb1   : > { %693 = vrot.lane.b32.xlu0 %v2192_v21, %s1937_s9 }
  0xb2   : > { %712 = vrot.lane.b32.xlu1 %v2117_v39, %s1938_s10 }
  0xb3   : > { %v627_v19 = vpop.permute.xlu0 %626 }
  0xb4   : > { %v586_v41 = vpop.permute.xlu1 %585 }
  0xb5   : > { %v910_v63 = vsel %vm900_vm9, %v2169_v7, %v586_v41  ;;  %703 = vrot.lane.b32.xlu0 %v2319_v33, %s1937_s9 }
  0xb6   : > { %v929_v5 = vsel %vm919_vm10, %v910_v63, %v631_v9  ;;  %722 = vrot.lane.b32.xlu1 %v2312_v51, %s1938_s10 }
  0xb7   : > { %v2466_v21 = vsel %vm938_vm11, %v929_v5, %v650_v31  ;;  %v578_v25 = vpop.permute.xlu0 %577  ;;  %v1317_v31 = vld [vmem:[%s2805_s2 + $0x28] sm:$0xff]  ;;  %v1323_v5 = vld [vmem:[%s2805_s2 + $0x58] sm:$0xff] }
  0xb8   : > { %v588_v26 = vpop.permute.xlu1 %587  ;;  %v902_v18 = vsel %vm900_vm9, %v2155_v62, %v578_v25 }
  0xb9   : > { %v912_v7 = vsel %vm900_vm9, %v2117_v39, %v588_v26  ;;  %v921_v33 = vsel %vm919_vm10, %v902_v18, %v623_v34  ;;  %720 = vrot.lane.b32.xlu0 %v2291_v15, %s1938_s10  ;;  %v879_v39 = vrot.slane %v877_v29, 5  ;;  %v1319_v34 = vld [vmem:[%s2805_s2 + $0x38] sm:$0xff]  ;;  %v1325_v26 = vld [vmem:[%s2805_s2 + $0x68] sm:$0xff]  ;;  %v1326_v18 = vld [vmem:[%s2805_s2 + $0x70] sm:$0xff] }
  0xba   : > { %v931_v8 = vsel %vm919_vm10, %v912_v7, %v633_v12  ;;  %746 = vrot.lane.b32.xlu1 %v2340_v58, %s1939_s11  ;;  %v2480_v48 = vsel %vm938_vm11, %v921_v33, %v642_v24  ;;  %v1316_v24 = vld [vmem:[%s2805_s2 + $0x20] sm:$0xff] }
  0xbb   : > { %v2483_v62 = vsel %vm938_vm11, %v931_v8, %v652_v27  ;;  %v580_v50 = vpop.permute.xlu0 %579  ;;  %v880_v10 = vor.u32 %v879_v39, %v876_v30  ;;  %v1320_v12 = vld [vmem:[%s2805_s2 + $0x40] sm:$0xff]  ;;  %v1327_v8 = vld [vmem:[%s2805_s2 + $0x78] sm:$0xff] }
  0xbc   : > { %v590_v53 = vpop.permute.xlu1 %589  ;;  %v904_v15 = vsel %vm900_vm9, %v2093_v22, %v580_v50 }
  0xbd   : > { %v914_v54 = vsel %vm900_vm9, %v2105_v28, %v590_v53  ;;  %v923_v58 = vsel %vm919_vm10, %v904_v15, %v625_v38  ;;  %738 = vrot.lane.b32.xlu0 %v2230_v37, %s1939_s11 }
  0xbe   : > { %v933_v59 = vsel %vm919_vm10, %v914_v54, %v635_v36  ;;  %758 = vrot.lane.b32.xlu1 %v2167_v2, %s1940_s12  ;;  %v2497_v43 = vsel %vm938_vm11, %v923_v58, %v644_v6  ;;  %v881_v2 = vsel %vm810_vm8, %v2430_v23, %v880_v10  ;;  %v1315_v6 = vld [vmem:[%s2805_s2 + $0x18] sm:$0xff] }
  0xbf   : > { %v952_v22 = vsel %vm938_vm11, %v933_v59, %v654_v60  ;;  %v582_v61 = vpop.permute.xlu0 %581  ;;  %v1318_v60 = vld [vmem:[%s2805_s2 + $0x30] sm:$0xff] }
  0xc0   : > { %v2500_v28 = vpop.permute.xlu1 %669  ;;  %v906_v37 = vsel %vm900_vm9, %v2080_v16, %v582_v61  ;;  %v845_v16 = vsel %vm810_vm8, %v2417_v13, %v2407_v42  ;;  %v1312_v42 = vld [vmem:[%s2805_s2] sm:$0xff]  ;;  %v1942_v13 = vmov 0  }
  0xc1   : > { %v925_v57 = vsel %vm919_vm10, %v906_v37, %v627_v19  ;;  %748 = vrot.lane.b32.xlu0 %v731_v35, %s1939_s11  ;;  %1850 = vset.pattern.permute.xlu1 %v1942_v13  ;;  %1433 = vst.msk [vmem:[%s2530_s30] sm:$0xf] %vm1432_vm13, %v1942_v13  ;;  %1434 = vst.msk [vmem:[%s2530_s30 + $0x4] sm:$0xf] %vm1432_vm13, %v1942_v13  ;;  %v1322_v19 = vld [vmem:[%s2805_s2 + $0x50] sm:$0xff]  ;;  %v961_v59 = vsel %vm957_vm12, %v2497_v43, %v2500_v28 }
  0xc2   : > { %768 = vrot.lane.b32.xlu1 %v750_v49, %s1940_s12  ;;  %v2512_v55 = vsel %vm938_vm11, %v925_v57, %v646_v45  ;;  %1435 = vst.msk [vmem:[%s2530_s30 + $0x8] sm:$0xf] %vm1432_vm13, %v1942_v13  ;;  %1436 = vst.msk [vmem:[%s2530_s30 + $0x4c] sm:$0xf] %vm1432_vm13, %v1942_v13  ;;  %1851 = vset.pattern.permute.xlu0 %v1942_v13 }
  0xc3   : > { %v2514_v11 = vpop.permute.xlu0 %667  ;;  %1437 = vst.msk [vmem:[%s2530_s30 + $0x50] sm:$0xf] %vm1432_vm13, %v1942_v13  ;;  %1438 = vst.msk [vmem:[%s2530_s30 + $0x54] sm:$0xf] %vm1432_vm13, %v1942_v13 }
  0xc4   : > { %v2516_v14 = vpop.permute.xlu1 %677  ;;  %v959_v57 = vsel %vm957_vm12, %v2480_v48, %v2514_v11 }
  0xc5   : > { %766 = vrot.lane.b32.xlu0 %v2331_v56, %s1940_s12  ;;  %v969_v43 = vsel %vm957_vm12, %v2483_v62, %v2516_v14 }
  0xc6   : > { %896 = vrot.lane.b32.xlu1 %v881_v2, %s1941_s22 }
  0xc7   : > { %v2524_v51 = vpop.permute.xlu0 %675 }
  0xc8   : > { %v680_v49 = vpop.permute.xlu1 %679  ;;  %v967_v28 = vsel %vm957_vm12, %v2466_v21, %v2524_v51 }
  0xc9   : > { %v2533_v56 = vsel %vm957_vm12, %v952_v22, %v680_v49  ;;  %888 = vrot.lane.b32.xlu0 %v845_v16, %s1941_s22 }
  0xca   : > { %1330 = vperm.xlu1 %1850, %v1312_v42  }
  0xcb   : > { %v2551_v3 = vpop.permute.xlu0 %671 }
  0xcc   : > { %v690_v1 = vpop.permute.xlu1 %689 }
  0xcd   : > { %898 = vrot.lane.b32.xlu0 %v880_v10, %s1941_s22  ;;  %v980_v22 = vsel %vm976_vm14, %v961_v59, %v690_v1 }
  0xce   : > { %1340 = vperm.xlu1 %1850, %v1314_v17  }
  0xcf   : > { %v2560_v20 = vpop.permute.xlu0 %687 }
  0xd0   : > { %v2562_v23 = vpop.permute.xlu1 %697  ;;  %v978_v42 = vsel %vm976_vm14, %v959_v57, %v2560_v20 }
  0xd1   : > { %1335 = vperm.xlu0 %1851, %v1313_v4   ;;  %v988_v13 = vsel %vm976_vm14, %v969_v43, %v2562_v23 }
  0xd2   : > { %1345 = vperm.xlu1 %1850, %v1315_v6  }
  0xd3   : > { %v2570_v0 = vpop.permute.xlu0 %695 }
  0xd4   : > { %v2572_v27 = vpop.permute.xlu1 %699  ;;  %v986_v48 = vsel %vm976_vm14, %v967_v28, %v2570_v0 }
  0xd5   : > { %1350 = vperm.xlu0 %1851, %v1316_v24  }
  0xd6   : > { %1355 = vperm.xlu1 %1850, %v1317_v31  }
  0xd7   : > { %v2580_v45 = vpop.permute.xlu0 %691 }
  0xd8   : > { %v709_v38 = vpop.permute.xlu1 %708 }
  0xd9   : > { %1360 = vperm.xlu0 %1851, %v1318_v60   ;;  %v999_v61 = vsel %vm995_vm15, %v980_v22, %v709_v38  ;;  %v963_v60 = vsel %vm957_vm12, %v2512_v55, %v2551_v3 }
  0xda   : > { %1365 = vperm.xlu1 %1850, %v1319_v34  }
  0xdb   : > { %v707_v9 = vpop.permute.xlu0 %706 }
  0xdc   : > { %v717_v36 = vpop.permute.xlu1 %716  ;;  %v997_v62 = vsel %vm995_vm15, %v978_v42, %v707_v9 }
  0xdd   : > { %1370 = vperm.xlu0 %1851, %v1320_v12   ;;  %v1007_v14 = vsel %vm995_vm15, %v988_v13, %v717_v36 }
  0xde   : > { %1375 = vperm.xlu1 %1850, %v1321_v40  }
  0xdf   : > { %v715_v41 = vpop.permute.xlu0 %714 }
  0xe0   : > { %v2594_v63 = vpop.permute.xlu1 %718  ;;  %v1005_v1 = vsel %vm995_vm15, %v986_v48, %v715_v41  ;;  %v982_v41 = vsel %vm976_vm14, %v963_v60, %v2580_v45  ;;  %v990_v48 = vsel %vm976_vm14, %v2533_v56, %v2572_v27 }
  0xe1   : > { %1380 = vperm.xlu0 %1851, %v1322_v19  }
  0xe2   : > { %1385 = vperm.xlu1 %1850, %v1323_v5  }
  0xe3   : > { %v2602_v29 = vpop.permute.xlu0 %710 }
  0xe4   : > { %v735_v25 = vpop.permute.xlu1 %734 }
  0xe5   : > { %1390 = vperm.xlu0 %1851, %v1324_v44   ;;  %v1018_v37 = vsel %vm1014_vm0, %v999_v61, %v735_v25 }
  0xe6   : > { %1395 = vperm.xlu1 %1850, %v1325_v26  }
  0xe7   : > { %v733_v7 = vpop.permute.xlu0 %732 }
  0xe8   : > { %v743_v33 = vpop.permute.xlu1 %742  ;;  %v1016_v17 = vsel %vm1014_vm0, %v997_v62, %v733_v7 }
  0xe9   : > { %1400 = vperm.xlu0 %1851, %v1326_v18   ;;  %v1026_v4 = vsel %vm1014_vm0, %v1007_v14, %v743_v33  ;;  %v1001_v33 = vsel %vm995_vm15, %v982_v41, %v2602_v29 }
  0xea   : > { %1405 = vperm.xlu1 %1850, %v1327_v8  }
  0xeb   : > { %v741_v32 = vpop.permute.xlu0 %740 }
  0xec   : > { %v2613_v30 = vpop.permute.xlu1 %744  ;;  %v1024_v38 = vsel %vm1014_vm0, %v1005_v1, %v741_v32 }
  0xef   : > { %v737_v39 = vpop.permute.xlu0 %736 }
  0xf0   : > { %v755_v50 = vpop.permute.xlu1 %754  ;;  %v1020_v32 = vsel %vm1014_vm0, %v1001_v33, %v737_v39 }
  0xf1   : > { %v1037_v2 = vsel %vm1033_vm1, %v1018_v37, %v755_v50 }
  0xf3   : > { %v753_v53 = vpop.permute.xlu0 %752 }
  0xf4   : > { %v763_v15 = vpop.permute.xlu1 %762  ;;  %v1035_v20 = vsel %vm1033_vm1, %v1016_v17, %v753_v53 }
  0xf5   : > { %v1045_v23 = vsel %vm1033_vm1, %v1026_v4, %v763_v15 }
  0xf7   : > { %v761_v54 = vpop.permute.xlu0 %760 }
  0xf8   : > { %v2615_v58 = vpop.permute.xlu1 %591  ;;  %v1043_v5 = vsel %vm1033_vm1, %v1024_v38, %v761_v54 }
  0xfb   : > { %v2620_v35 = vpop.permute.xlu0 %583 }
  0xfc   : > { %v2622_v10 = vpop.permute.xlu1 %764 }
  0xff   : > { %v757_v16 = vpop.permute.xlu0 %756 }
 0x100   : > { %v885_v49 = vpop.permute.xlu1 %884  ;;  %v1039_v15 = vsel %vm1033_vm1, %v1020_v32, %v757_v16 }
 0x101   : > { %v1056_v11 = vsel %vm1052_vm2, %v1037_v2, %v885_v49 }
 0x102   : > { %v1096_v21 = vshrl.u32 %v1056_v11, 16  ;;  %v1099_v51 = vshll.u32 %v1056_v11, 16  ;;  %v1009_v11 = vsel %vm995_vm15, %v990_v48, %v2594_v63 }
 0x103   : > { %v883_v0 = vpop.permute.xlu0 %882  ;;  %v1028_v14 = vsel %vm1014_vm0, %v1009_v11, %v2613_v30 }
 0x104   : > { %v1098_v6 = vrot.slane %v1096_v21, 3  ;;  %v1101_v24 = vrot.slane %v1099_v51, 4  ;;  %v893_v31 = vpop.permute.xlu1 %892  ;;  %v1054_v34 = vsel %vm1052_vm2, %v1035_v20, %v883_v0  ;;  %v1047_v21 = vsel %vm1033_vm1, %v1028_v14, %v2622_v10 }
 0x105   : > { %v1064_v12 = vsel %vm1052_vm2, %v1045_v23, %v893_v31  ;;  %v1089_v9 = vshrl.u32 %v1054_v34, 16  ;;  %v1092_v36 = vshll.u32 %v1054_v34, 16 }
 0x106   : > { %v1128_v40 = vshrl.u32 %v1064_v12, 16  ;;  %v1131_v19 = vshll.u32 %v1064_v12, 16  ;;  %v1102_v44 = vor.u32 %v1101_v24, %v1098_v6 }
 0x107   : > { %v1091_v25 = vrot.slane %v1089_v9, 3  ;;  %v1094_v26 = vrot.slane %v1092_v36, 4  ;;  %v891_v3 = vpop.permute.xlu0 %890 }
 0x108   : > { %v1130_v18 = vrot.slane %v1128_v40, 3  ;;  %v1133_v55 = vrot.slane %v1131_v19, 4  ;;  %v2660_v7 = vpop.permute.xlu1 %628  ;;  %v1062_v8 = vsel %vm1052_vm2, %v1043_v5, %v891_v3  ;;  %v916_v5 = vsel %vm900_vm9, %v2128_v47, %v2615_v58 }
 0x109   : > { %v1120_v45 = vshrl.u32 %v1062_v8, 16  ;;  %v1123_v50 = vshll.u32 %v1062_v8, 16  ;;  %v1095_v53 = vor.u32 %v1094_v26, %v1091_v25 }
 0x10a   : > { %v1134_v57 = vor.u32 %v1133_v55, %v1130_v18  ;;  %v908_v55 = vsel %vm900_vm9, %v2141_v52, %v2620_v35 }
 0x10b   : > { %v1122_v54 = vrot.slane %v1120_v45, 3  ;;  %v1125_v59 = vrot.slane %v1123_v50, 4  ;;  %v594_v22 = vpop.permute.xlu0 %593  ;;  %v1103_v61 = vsel %vm1088_vm3, %v1095_v53, %v1102_v44  ;;  %v927_v33 = vsel %vm919_vm10, %v908_v55, %v2660_v7 }
 0x10c   : > { %v887_v37 = vpop.permute.xlu1 %886  ;;  %1790 = vmatprep.mubr.msk.bf16.mxu0 %vm1190_vm4, %v1103_v61  ;;  %v918_v52 = vsel %vm900_vm9, %v2243_v46, %v594_v22 }
 0x10d   : > { %v1058_v29 = vsel %vm1052_vm2, %v1039_v15, %v887_v37  ;;  %v2670_v2 = vor.u32 %v1125_v59, %v1122_v54 }
 0x10e   : > { %v1104_v43 = vshrl.u32 %v1058_v29, 16  ;;  %v1107_v28 = vshll.u32 %v1058_v29, 16 }
 0x10f   : > { %v637_v42 = vpop.permute.xlu0 %636  ;;  %v1135_v16 = vsel %vm1088_vm3, %v2670_v2, %v1134_v57 }
 0x110   : > { %v1106_v39 = vrot.slane %v1104_v43, 3  ;;  %v1109_v49 = vrot.slane %v1107_v28, 4  ;;  %v639_v13 = vpop.permute.xlu1 %638  ;;  %1798 = vmatprep.mubr.msk.bf16.mxu1 %vm1190_vm4, %v1135_v16 }
 0x111   : > { %v937_v7 = vsel %vm919_vm10, %v918_v52, %v639_v13 }
 0x112   : > { %v2680_v62 = vor.u32 %v1109_v49, %v1106_v39 }
 0x113   : > { %v895_v51 = vpop.permute.xlu0 %894 }
 0x114   : > { %v656_v1 = vpop.permute.xlu1 %655  ;;  %v1111_v17 = vsel %vm1088_vm3, %v1102_v44, %v2680_v62  ;;  %v1066_v56 = vsel %vm1052_vm2, %v1047_v21, %v895_v51  ;;  %v935_v44 = vsel %vm919_vm10, %v916_v5, %v637_v42 }
 0x115   : > { %1791 = vmatmul.mubr.msk.bf16.vlgmr.msra.gmra.mxu0 %vm1190_vm4, %v1111_v17  ;;  %v1136_v27 = vshrl.u32 %v1066_v56, 16  ;;  %v1139_v4 = vshll.u32 %v1066_v56, 16  ;;  %v954_v25 = vsel %vm938_vm11, %v935_v44, %v656_v1 }
 0x117   : > { %v1138_v63 = vrot.slane %v1136_v27, 3  ;;  %v1141_v20 = vrot.slane %v1139_v4, 4  ;;  %v648_v23 = vpop.permute.xlu0 %647 }
 0x118   : > { %v674_v6 = vpop.permute.xlu1 %673  ;;  %v946_v32 = vsel %vm938_vm11, %v927_v33, %v648_v23 }
 0x119   : > { %v1142_v24 = vor.u32 %v1141_v20, %v1138_v63  ;;  %v965_v58 = vsel %vm957_vm12, %v946_v32, %v674_v6 }
 0x11b   : > { %v658_v30 = vpop.permute.xlu0 %657  ;;  %v1143_v0 = vsel %vm1088_vm3, %v1134_v57, %v1142_v24 }
 0x11c   : > { %v684_v10 = vpop.permute.xlu1 %683  ;;  %1799 = vmatmul.mubr.msk.bf16.vlgmr.msra.gmra.mxu1 %vm1190_vm4, %v1143_v0  ;;  %v956_v61 = vsel %vm938_vm11, %v937_v7, %v658_v30 }
 0x11d   : > { %v975_v43 = vsel %vm957_vm12, %v956_v61, %v684_v10 }
 0x11f   : > { %v682_v31 = vpop.permute.xlu0 %681 }
 0x120   : > { %v702_v60 = vpop.permute.xlu1 %701  ;;  %v973_v3 = vsel %vm957_vm12, %v954_v25, %v682_v31 }
 0x121   : > { %v992_v8 = vsel %vm976_vm14, %v973_v3, %v702_v60 }
 0x123   : > { %v694_v38 = vpop.permute.xlu0 %693 }
 0x124   : > { %v713_v34 = vpop.permute.xlu1 %712  ;;  %v984_v35 = vsel %vm976_vm14, %v965_v58, %v694_v38 }
 0x125   : > { %v1003_v54 = vsel %vm995_vm15, %v984_v35, %v713_v34 }
 0x127   : > { %v704_v12 = vpop.permute.xlu0 %703 }
 0x128   : > { %v723_v9 = vpop.permute.xlu1 %722  ;;  %v994_v28 = vsel %vm976_vm14, %v975_v43, %v704_v12 }
 0x129   : > { %v1013_v16 = vsel %vm995_vm15, %v994_v28, %v723_v9 }
 0x12b   : > { %v721_v36 = vpop.permute.xlu0 %720 }
 0x12c   : > { %v747_v40 = vpop.permute.xlu1 %746  ;;  %v1011_v47 = vsel %vm995_vm15, %v992_v8, %v721_v36 }
 0x12d   : > { %v1030_v45 = vsel %vm1014_vm0, %v1011_v47, %v747_v40 }
 0x12f   : > { %v739_v19 = vpop.permute.xlu0 %738 }
 0x130   : > { %v759_v41 = vpop.permute.xlu1 %758  ;;  %v1022_v37 = vsel %vm1014_vm0, %v1003_v54, %v739_v19 }
 0x131   : > { %v1041_v46 = vsel %vm1033_vm1, %v1022_v37, %v759_v41 }
 0x133   : > { %v749_v26 = vpop.permute.xlu0 %748 }
 0x134   : > { %v769_v18 = vpop.permute.xlu1 %768  ;;  %v1032_v11 = vsel %vm1014_vm0, %v1013_v16, %v749_v26 }
 0x135   : > { %v1051_v21 = vsel %vm1033_vm1, %v1032_v11, %v769_v18 }
 0x137   : > { %v767_v50 = vpop.permute.xlu0 %766 }
 0x138   : > { %v897_v53 = vpop.permute.xlu1 %896  ;;  %v1049_v15 = vsel %vm1033_vm1, %v1030_v45, %v767_v50 }
 0x139   : > { %v1068_v59 = vsel %vm1052_vm2, %v1049_v15, %v897_v53 }
 0x13a   : > { %v1144_v57 = vshrl.u32 %v1068_v59, 16  ;;  %v1147_v29 = vshll.u32 %v1068_v59, 16 }
 0x13b   : > { %v889_v22 = vpop.permute.xlu0 %888 }
 0x13c   : > { %v1146_v39 = vrot.slane %v1144_v57, 3  ;;  %v1149_v49 = vrot.slane %v1147_v29, 4  ;;  %v1060_v42 = vsel %vm1052_vm2, %v1041_v46, %v889_v22 }
 0x13d   : > { %v1112_v13 = vshrl.u32 %v1060_v42, 16  ;;  %v1115_v48 = vshll.u32 %v1060_v42, 16 }
 0x13e   : > { %v1150_v14 = vor.u32 %v1149_v49, %v1146_v39 }
 0x13f   : > { %v1114_v51 = vrot.slane %v1112_v13, 3  ;;  %v1117_v1 = vrot.slane %v1115_v48, 4  ;;  %v899_v17 = vpop.permute.xlu0 %898 }
 0x140   : > { %v1070_v56 = vsel %vm1052_vm2, %v1051_v21, %v899_v17  ;;  %v1151_v27 = vsel %vm1088_vm3, %v1142_v24, %v1150_v14 }
 0x141   : > { %v1118_v4 = vor.u32 %v1117_v1, %v1114_v51  ;;  %v1152_v63 = vshrl.u32 %v1070_v56, 16  ;;  %v1155_v20 = vshll.u32 %v1070_v56, 16  ;;  %1802 = vmatprep.mubr.msk.bf16.mxu1 %vm1190_vm4, %v1151_v27 }
 0x143   : > { %v1154_v23 = vrot.slane %v1152_v63, 3  ;;  %v1157_v6 = vrot.slane %v1155_v20, 4  ;;  %v1119_v30 = vsel %vm1088_vm3, %v2680_v62, %v1118_v4  ;;  %v1127_v0 = vsel %vm1088_vm3, %v1118_v4, %v2670_v2  ;;  %v2740_v2 = vld [vmem:[%s2806_s3] ss:$0 sm:$0xff] }
 0x144   : > { %1794 = vmatprep.mubr.msk.bf16.mxu0 %vm1190_vm4, %v1119_v30 }
 0x145   : > { %v1158_v10 = vor.u32 %v1157_v6, %v1154_v23  ;;  %1795 = vmatmul.mubr.msk.bf16.gmra.mxu0 %vm1190_vm4, %v1127_v0  ;;  %v1331_v31 = vpop.permute.xlu1 %1330 }
 0x147   : > { %v1159_v24 = vsel %vm1088_vm3, %v1150_v14, %v1158_v10 }
 0x148   : > { %1803 = vmatmul.mubr.msk.bf16.gmra.mxu1 %vm1190_vm4, %v1159_v24 }
 0x149   : > { %v1341_v60 = vpop.permute.xlu1 %1340 }
 0x14c   : > { %v1336_v38 = vpop.permute.xlu0 %1335 }
 0x14d   : > { %v1346_v34 = vpop.permute.xlu1 %1345 }
 0x150   : > { %v1351_v12 = vpop.permute.xlu0 %1350 }
 0x151   : > { %v2735_v9 = vpop.permute.xlu1 %1355 }
 0x154   : > { %v1361_v62 = vpop.permute.xlu0 %1360 }
 0x155   : > { %v2742_v40 = vpop.permute.xlu1 %1365 }
 0x158   : > { %v1371_v5 = vpop.permute.xlu0 %1370 }
 0x159   : > { %v1376_v33 = vpop.permute.xlu1 %1375 }
 0x15c   : > { %v1381_v50 = vpop.permute.xlu0 %1380 }
 0x15d   : > { %v1386_v37 = vpop.permute.xlu1 %1385 }
 0x160   : > { %v1391_v13 = vpop.permute.xlu0 %1390 }
 0x161   : > { %v1396_v21 = vpop.permute.xlu1 %1395 }
 0x164   : > { %v1401_v4 = vpop.permute.xlu0 %1400 }
 0x1d5   : > { %v1792_v36 = vpop.f32.mrf.mxu0 }
 0x1d6   : > { %v1258_v19 = vadd.f32 %v1792_v36, %v2740_v2  ;;  %v1406_v36 = vpop.permute.xlu1 %1405 }
 0x1d7   : > { %v1249_v41 = vpop.f32.mrf.mxu0 }
 0x1d8   : > { %v1410_v44 = vmul.f32 %v1341_v60, %v1258_v19  ;;  %v1250_v25 = vadd.f32 %v2740_v2, %v1249_v41 }
 0x1d9   : > { %v1793_v26 = vpop.f32.mrf.mxu0 }
 0x1da   : > { %v1699_v18 = vpack.c.bf16 %v1410_v44, %v1410_v44  ;;  %v1408_v55 = vmul.f32 %v1331_v31, %v1250_v25  ;;  %v1261_v3 = vadd.f32 %v1793_v26, %v2740_v2 }
 0x1db   : > { %v1252_v8 = vpop.f32.mrf.mxu0 }
 0x1dc   : > { %1497 = vst.msk [vmem:[%s2530_s30 + $0x14] sm:$0xf] %vm1432_vm13, %v1699_v18  ;;  %v1697_v32 = vpack.c.bf16 %v1408_v55, %v1408_v55  ;;  %v1411_v47 = vmul.f32 %v1346_v34, %v1261_v3  ;;  %v1253_v58 = vadd.f32 %v2740_v2, %v1252_v8  ;;  %v1800_v45 = vpop.f32.mrf.mxu1 }
 0x1dd   : > { %v1290_v52 = vadd.f32 %v1800_v45, %v2740_v2 }
 0x1de   : > { %1495 = vst.msk [vmem:[%s2530_s30 + $0xc] sm:$0xf] %vm1432_vm13, %v1697_v32  ;;  %v1700_v53 = vpack.c.bf16 %v1411_v47, %v1411_v47  ;;  %v1409_v35 = vmul.f32 %v1336_v38, %v1253_v58  ;;  %v1281_v15 = vpop.f32.mrf.mxu1 }
 0x1df   : > { %v1282_v54 = vadd.f32 %v2740_v2, %v1281_v15  ;;  %v1418_v59 = vmul.f32 %v1381_v50, %v1290_v52 }
 0x1e0   : > { %1498 = vst.msk [vmem:[%s2530_s30 + $0x18] sm:$0xf] %vm1432_vm13, %v1700_v53  ;;  %v1698_v7 = vpack.c.bf16 %v1409_v35, %v1409_v35  ;;  %v1801_v61 = vpop.f32.mrf.mxu1 }
 0x1e1   : > { %v1416_v57 = vmul.f32 %v1371_v5, %v1282_v54  ;;  %v1707_v29 = vpack.c.bf16 %v1418_v59, %v1418_v59  ;;  %v1293_v43 = vadd.f32 %v1801_v61, %v2740_v2 }
 0x1e2   : > { %1496 = vst.msk [vmem:[%s2530_s30 + $0x10] sm:$0xf] %vm1432_vm13, %v1698_v7  ;;  %v1284_v46 = vpop.f32.mrf.mxu1 }
 0x1e3   : > { %v1705_v22 = vpack.c.bf16 %v1416_v57, %v1416_v57  ;;  %1505 = vst.msk [vmem:[%s2530_s30 + $0x34] sm:$0xf] %vm1432_vm13, %v1707_v29  ;;  %v1419_v28 = vmul.f32 %v1386_v37, %v1293_v43  ;;  %v1285_v39 = vadd.f32 %v2740_v2, %v1284_v46 }
 0x1e5   : > { %1503 = vst.msk [vmem:[%s2530_s30 + $0x2c] sm:$0xf] %vm1432_vm13, %v1705_v22  ;;  %v1708_v49 = vpack.c.bf16 %v1419_v28, %v1419_v28  ;;  %v1417_v42 = vmul.f32 %v1376_v33, %v1285_v39 }
 0x1e7   : > { %1506 = vst.msk [vmem:[%s2530_s30 + $0x38] sm:$0xf] %vm1432_vm13, %v1708_v49  ;;  %v1706_v16 = vpack.c.bf16 %v1417_v42, %v1417_v42 }
 0x1e9   : > { %1504 = vst.msk [vmem:[%s2530_s30 + $0x30] sm:$0xf] %vm1432_vm13, %v1706_v16 }
 0x205   : > { %v1796_v48 = vpop.f32.mrf.mxu0 }
 0x206   : > { %v1274_v11 = vadd.f32 %v1796_v48, %v2740_v2 }
 0x207   : > { %v1265_v14 = vpop.f32.mrf.mxu0 }
 0x208   : > { %v1414_v51 = vmul.f32 %v1361_v62, %v1274_v11  ;;  %v1266_v1 = vadd.f32 %v2740_v2, %v1265_v14  ;;  %v1804_v17 = vpop.f32.mrf.mxu1 }
 0x209   : > { %v1306_v56 = vadd.f32 %v1804_v17, %v2740_v2  ;;  %v1797_v27 = vpop.f32.mrf.mxu0 }
 0x20a   : > { %v1703_v63 = vpack.c.bf16 %v1414_v51, %v1414_v51  ;;  %v1412_v20 = vmul.f32 %v1351_v12, %v1266_v1  ;;  %v1277_v23 = vadd.f32 %v1797_v27, %v2740_v2  ;;  %v1297_v6 = vpop.f32.mrf.mxu1 }
 0x20b   : > { %v1422_v30 = vmul.f32 %v1401_v4, %v1306_v56  ;;  %v1298_v0 = vadd.f32 %v2740_v2, %v1297_v6  ;;  %v1268_v10 = vpop.f32.mrf.mxu0 }
 0x20c   : > { %1501 = vst.msk [vmem:[%s2530_s30 + $0x24] sm:$0xf] %vm1432_vm13, %v1703_v63  ;;  %v1701_v24 = vpack.c.bf16 %v1412_v20, %v1412_v20  ;;  %v1415_v31 = vmul.f32 %v2742_v40, %v1277_v23  ;;  %v1269_v60 = vadd.f32 %v2740_v2, %v1268_v10  ;;  %v1805_v38 = vpop.f32.mrf.mxu1 }
 0x20d   : > { %v1711_v34 = vpack.c.bf16 %v1422_v30, %v1422_v30  ;;  %v1420_v12 = vmul.f32 %v1391_v13, %v1298_v0  ;;  %v1309_v62 = vadd.f32 %v1805_v38, %v2740_v2 }
 0x20e   : > { %1499 = vst.msk [vmem:[%s2530_s30 + $0x1c] sm:$0xf] %vm1432_vm13, %v1701_v24  ;;  %v1704_v19 = vpack.c.bf16 %v1415_v31, %v1415_v31  ;;  %v1413_v41 = vmul.f32 %v2735_v9, %v1269_v60  ;;  %v1300_v5 = vpop.f32.mrf.mxu1 }
 0x20f   : > { %1509 = vst.msk [vmem:[%s2530_s30 + $0x44] sm:$0xf] %vm1432_vm13, %v1711_v34  ;;  %v1709_v40 = vpack.c.bf16 %v1420_v12, %v1420_v12  ;;  %v1423_v44 = vmul.f32 %v1406_v36, %v1309_v62  ;;  %v1301_v25 = vadd.f32 %v2740_v2, %v1300_v5 }
 0x210   : > { %1502 = vst.msk [vmem:[%s2530_s30 + $0x28] sm:$0xf] %vm1432_vm13, %v1704_v19  ;;  %v1702_v26 = vpack.c.bf16 %v1413_v41, %v1413_v41 }
 0x211   : > { %1507 = vst.msk [vmem:[%s2530_s30 + $0x3c] sm:$0xf] %vm1432_vm13, %v1709_v40  ;;  %v1712_v18 = vpack.c.bf16 %v1423_v44, %v1423_v44  ;;  %v1421_v55 = vmul.f32 %v1396_v21, %v1301_v25 }
 0x212   : > { %1500 = vst.msk [vmem:[%s2530_s30 + $0x20] sm:$0xf] %vm1432_vm13, %v1702_v26 }
 0x213   : > { %1510 = vst.msk [vmem:[%s2530_s30 + $0x48] sm:$0xf] %vm1432_vm13, %v1712_v18  ;;  %v1710_v3 = vpack.c.bf16 %v1421_v55, %v1421_v55 }
 0x215   : > { %1508 = vst.msk [vmem:[%s2530_s30 + $0x40] sm:$0xf] %vm1432_vm13, %v1710_v3 }
 0x216 PF: > { %s15_s20 = sadd.s32 1, %s1931_s20   ;;  %s2809_s18 = smov %s1927_s19 }
 0x217   : > { %p12_p5 = scmp.ge.s32.totalorder %s15_s20, 4   ;;  %s2810_s19 = smov %s2812_s21 }
 0x219   :  { %14 = sbr.rel (!%p12_p5) target bundleno = 2 (0x2), region = 79 }

// kernel: _lambda_.26
= control target key start
LH: loop header
LB: loop body
LE: loop exit
PB: predicated region body
PF: predicated region fallthrough
CT: control target
= control target key end

     0   :  { %s1973_s18 = smov 0   ;;  %s1975_s19 = smov 0   ;;  %s2803_s0 = inlined_call_operand.vmem [shape: bf16[352,8], index: 0, kind: input, shape index: {}]   ;;  %s2804_s1 = inlined_call_operand.vmem [shape: bf16[80,4], index: 1, kind: input, shape index: {}]   ;;  %s2805_s2 = inlined_call_operand.vmem [shape: f32[128,1], index: 2, kind: input, shape index: {}]   ;;  %s2806_s3 = inlined_call_operand.vmem [shape: f32[1,4], index: 3, kind: input, shape index: {}]   ;;  %s2807_s4 = inlined_call_operand.vmem [shape: bf16[352,8], index: 4, kind: input, shape index: {}]   ;;  %s2808_s5 = inlined_call_operand.vmem [shape: bf16[352,4], index: 5, kind: output, shape index: {}]  }
   0x1   :  { %s1977_s20 = smov 0  }
   0x2 LB: > { %s27_s21 = sadd.s32 1, %s1927_s19  ;;  %p1631_p0 = scmp.ge.s32.totalorder %s1931_s20, 1  ;;  %s1931_s20 = sphi %s1977_s20, %s15_s20   ;;  %s1927_s19 = sphi %s1975_s19, %s2810_s19   ;;  %s1923_s18 = sphi %s1973_s18, %s2809_s18  }
   0x3   : > { %p29_p1 = scmp.ge.s32.totalorder %s27_s21, 2  ;;  %p230_p2 = scmp.lt.s32.totalorder %s1931_s20, 3 }
   0x5   : > { %s2812_s21 = smov (%p29_p1, %s27_s21), 0  ;;  %p231_p3 = pnand %p1631_p0, %p230_p2 }
   0x6   : > { %s273_s22 = smul.u32 (!%p231_p3), 22, %s1923_s18  ;;  %s1933_s30 = smov (!%p231_p3), 24  }
   0x7   : > { %234 = sbr.rel (%p231_p3) target bundleno = 534 (0x216), region = 40  ;;  %s1934_s6 = smov (!%p231_p3), 16  }
   0x8   : > { %p274_p4 = scmp.lt.s32.totalorder (!%p231_p3), %s273_s22, 43  ;;  %s1935_s7 = smov (!%p231_p3), 8  }
   0x9   : > { %s1936_s8 = smov (!%p231_p3), 32   ;;  %s1937_s9 = smov (!%p231_p3), 40  }
   0xa   : > { %s1938_s10 = smov (!%p231_p3), 48   ;;  %s1939_s11 = smov (!%p231_p3), 56  }
   0xb   : > { %s1940_s12 = smov (!%p231_p3), 64  }
   0xc   : > { %s2814_s22 = smov (!%p274_p4, %s273_s22), 43  ;;  %vm604_vm12 = vcmask 1046528  }
   0xd   : > { %s1991_s23 = sshll.u32 %s2814_s22, 2  ;;  %s1941_s22 = smov 72  }
   0xe   : > { %s1997_s26 = scalar_lea.vmem %s2803_s0, %s1991_s23  ;;  %s2019_s29 = scalar_lea.vmem %s2807_s4, %s1991_s23 }
   0xf   : > { %v1758_v0 = vld [vmem:[%s1997_s26 + $0x10] sm:$0xff]   ;;  %v1757_v1 = vld [vmem:[%s1997_s26 + $0x8] sm:$0xff]   ;;  %v1763_v18 = vld [vmem:[%s1997_s26 + $0x38] sm:$0xff]  }
  0x10   : > { %v1762_v2 = vld [vmem:[%s1997_s26 + $0x30] sm:$0xff]   ;;  %v2002_v3 = vunpack.c.l.bf16 %v1758_v0  ;;  %v2004_v4 = vunpack.c.h.bf16 %v1758_v0  ;;  %v2006_v5 = vunpack.c.l.bf16 %v1757_v1  ;;  %v2008_v6 = vunpack.c.h.bf16 %v1757_v1  ;;  %v1761_v7 = vld [vmem:[%s1997_s26 + $0x28] sm:$0xff]   ;;  %v1759_v24 = vld [vmem:[%s1997_s26 + $0x18] sm:$0xff]  }
  0x11   : > { %v2011_v8 = vunpack.c.l.bf16 %v1762_v2  ;;  %v2013_v9 = vunpack.c.h.bf16 %v1762_v2  ;;  %v2023_v12 = vunpack.c.l.bf16 %v1761_v7  ;;  %v2027_v15 = vunpack.c.h.bf16 %v1761_v7  ;;  %v1714_v35 = vld [vmem:[%s1997_s26] sm:$0xff]  }
  0x12   : > { %v372_v10 = vmin.f32 %v2002_v3, 0.0  ;;  %v373_v11 = vmin.f32 %v2004_v4, 0.0  ;;  %v370_v13 = vmin.f32 %v2006_v5, 0.0  ;;  %v371_v14 = vmin.f32 %v2008_v6, 0.0  ;;  %v1760_v37 = vld [vmem:[%s1997_s26 + $0x20] sm:$0xff]  }
  0x13   : > { %v380_v21 = vmin.f32 %v2011_v8, 0.0  ;;  %v381_v22 = vmin.f32 %v2013_v9, 0.0  ;;  %v378_v23 = vmin.f32 %v2023_v12, 0.0  ;;  %v379_v27 = vmin.f32 %v2027_v15, 0.0  ;;  %v1764_v50 = vld [vmem:[%s1997_s26 + $0x40] sm:$0xff]  }
  0x14   : > { %v398_v16 = vmul.f32 1.442695, %v372_v10  ;;  %v400_v17 = vmul.f32 1.442695, %v373_v11  ;;  %v394_v19 = vmul.f32 1.442695, %v370_v13  ;;  %v2035_v29 = vunpack.c.l.bf16 %v1763_v18 }
  0x15   : > { %v396_v20 = vmul.f32 1.442695, %v371_v14  ;;  %v414_v25 = vmul.f32 1.442695, %v380_v21  ;;  %v416_v26 = vmul.f32 1.442695, %v381_v22  ;;  %v2037_v30 = vunpack.c.h.bf16 %v1763_v18 }
  0x16   : > { %1865 = vpow2.f32 %v398_v16  ;;  %v410_v28 = vmul.f32 1.442695, %v378_v23  ;;  %v412_v31 = vmul.f32 1.442695, %v379_v27  ;;  %v2039_v32 = vunpack.c.l.bf16 %v1759_v24 }
  0x17   : > { %1867 = vpow2.f32 %v400_v17  ;;  %v2041_v33 = vunpack.c.h.bf16 %v1759_v24  ;;  %v382_v34 = vmin.f32 %v2035_v29, 0.0  ;;  %v383_v36 = vmin.f32 %v2037_v30, 0.0 }
  0x18   : > { %1869 = vpow2.f32 %v394_v19  ;;  %v374_v39 = vmin.f32 %v2039_v32, 0.0  ;;  %v2049_v42 = vunpack.c.l.bf16 %v1714_v35  ;;  %v2051_v43 = vunpack.c.h.bf16 %v1714_v35 }
  0x19   : > { %1871 = vpow2.f32 %v396_v20  ;;  %v418_v38 = vmul.f32 1.442695, %v382_v34  ;;  %v375_v40 = vmin.f32 %v2041_v33, 0.0  ;;  %v420_v41 = vmul.f32 1.442695, %v383_v36 }
  0x1a   : > { %1873 = vpow2.f32 %v414_v25  ;;  %v402_v44 = vmul.f32 1.442695, %v374_v39  ;;  %v2053_v46 = vunpack.c.l.bf16 %v1760_v37  ;;  %v368_v47 = vmin.f32 %v2049_v42, 0.0 }
  0x1b   : > { %1875 = vpow2.f32 %v416_v26  ;;  %v404_v45 = vmul.f32 1.442695, %v375_v40  ;;  %v369_v48 = vmin.f32 %v2051_v43, 0.0  ;;  %v2057_v49 = vunpack.c.h.bf16 %v1760_v37 }
  0x1c   : > { %1877 = vpow2.f32 %v410_v28  ;;  %vm350_vm0 = vcmp.gt.f32.partialorder %v2002_v3, 0.0  ;;  %v390_v51 = vmul.f32 1.442695, %v368_v47  ;;  %v376_v52 = vmin.f32 %v2053_v46, 0.0 }
  0x1d   : > { %1879 = vpow2.f32 %v412_v31  ;;  %vm351_vm1 = vcmp.gt.f32.partialorder %v2004_v4, 0.0  ;;  %v392_v53 = vmul.f32 1.442695, %v369_v48  ;;  %v377_v54 = vmin.f32 %v2057_v49, 0.0 }
  0x1e   : > { %1881 = vpow2.f32 %v418_v38  ;;  %vm348_vm2 = vcmp.gt.f32.partialorder %v2006_v5, 0.0  ;;  %v406_v56 = vmul.f32 1.442695, %v376_v52  ;;  %v2065_v57 = vunpack.c.l.bf16 %v1764_v50 }
  0x1f   : > { %1883 = vpow2.f32 %v420_v41  ;;  %v408_v60 = vmul.f32 1.442695, %v377_v54  ;;  %v2067_v61 = vunpack.c.h.bf16 %v1764_v50  ;;  %vm349_vm3 = vcmp.gt.f32.partialorder %v2008_v6, 0.0 }
  0x20   : > { %1885 = vpow2.f32 %v402_v44  ;;  %vm358_vm4 = vcmp.gt.f32.partialorder %v2011_v8, 0.0  ;;  %vm359_vm5 = vcmp.gt.f32.partialorder %v2013_v9, 0.0  ;;  %vm356_vm6 = vcmp.gt.f32.partialorder %v2023_v12, 0.0 }
  0x21   : > { %1887 = vpow2.f32 %v404_v45  ;;  %v384_v13 = vmin.f32 %v2065_v57, 0.0  ;;  %v385_v18 = vmin.f32 %v2067_v61, 0.0  ;;  %vm357_vm7 = vcmp.gt.f32.partialorder %v2027_v15, 0.0 }
  0x22   : > { %1889 = vpow2.f32 %v390_v51  ;;  %vm360_vm8 = vcmp.gt.f32.partialorder %v2035_v29, 0.0  ;;  %vm361_vm9 = vcmp.gt.f32.partialorder %v2037_v30, 0.0  ;;  %vm352_vm10 = vcmp.gt.f32.partialorder %v2039_v32, 0.0 }
  0x23   : > { %v1866_v55 = vpop.eup %1865  ;;  %1891 = vpow2.f32 %v392_v53  ;;  %v422_v26 = vmul.f32 1.442695, %v384_v13  ;;  %v424_v34 = vmul.f32 1.442695, %v385_v18  ;;  %vm353_vm11 = vcmp.gt.f32.partialorder %v2041_v33, 0.0 }
  0x24   : > { %v1868_v58 = vpop.eup %1867  ;;  %v1639_v59 = vadd.f32 -1.0, %v1866_v55  ;;  %1893 = vpow2.f32 %v406_v56  ;;  %vm346_vm13 = vcmp.gt.f32.partialorder %v2049_v42, 0.0  ;;  %vm347_vm14 = vcmp.gt.f32.partialorder %v2051_v43, 0.0 }
  0x25   : > { %v1870_v62 = vpop.eup %1869  ;;  %v1640_v63 = vadd.f32 -1.0, %v1868_v58  ;;  %1895 = vpow2.f32 %v408_v60  ;;  %vm354_vm15 = vcmp.gt.f32.partialorder %v2053_v46, 0.0 }
  0x26   : > { %v1872_v0 = vpop.eup %1871  ;;  %v460_v1 = vsel %vm350_vm0, %v2002_v3, %v1639_v59  ;;  %v1637_v2 = vadd.f32 -1.0, %v1870_v62  ;;  %1897 = vpow2.f32 %v422_v26  ;;  %vm355_vm0 = vcmp.gt.f32.partialorder %v2057_v49, 0.0 }
  0x27   : > { %v1874_v7 = vpop.eup %1873  ;;  %v461_v10 = vsel %vm351_vm1, %v2004_v4, %v1640_v63  ;;  %v1638_v11 = vadd.f32 -1.0, %v1872_v0  ;;  %1899 = vpow2.f32 %v424_v34  ;;  %vm505_vm1 = vsmask.f32 7424 }
  0x28   : > { %v1876_v14 = vpop.eup %1875  ;;  %v2080_v16 = vpack.c.bf16 %v461_v10, %v460_v1  ;;  %v458_v3 = vsel %vm348_vm2, %v2006_v5, %v1637_v2  ;;  %v1647_v17 = vadd.f32 -1.0, %v1874_v7  ;;  %vm362_vm2 = vcmp.gt.f32.partialorder %v2065_v57, 0.0 }
  0x29   : > { %v1878_v19 = vpop.eup %1877  ;;  %v459_v4 = vsel %vm349_vm3, %v2008_v6, %v1638_v11  ;;  %v1648_v20 = vadd.f32 -1.0, %v1876_v14  ;;  %vm363_vm3 = vcmp.gt.f32.partialorder %v2067_v61, 0.0 }
  0x2a   : > { %v1880_v21 = vpop.eup %1879  ;;  %643 = vrot.lane.b32.xlu1 %v2080_v16, %s1933_s30  ;;  %v2093_v22 = vpack.c.bf16 %v459_v4, %v458_v3  ;;  %v468_v5 = vsel %vm358_vm4, %v2011_v8, %v1647_v17  ;;  %v1645_v23 = vadd.f32 -1.0, %v1878_v19  ;;  %v608_v37 = vrot.slane %v2080_v16, 1  ;;  %v1765_v17 = vld [vmem:[%s1997_s26 + $0x48] sm:$0xff]  }
  0x2b   : > { %v1882_v6 = vpop.eup %1881  ;;  %v469_v24 = vsel %vm359_vm5, %v2013_v9, %v1648_v20  ;;  %v1646_v25 = vadd.f32 -1.0, %v1880_v21  ;;  %v2199_v26 = vunpack.c.h.bf16 %v1765_v17  ;;  %v522_v34 = vshll.u32 %v2080_v16, 16 }
  0x2c   : > { %v1884_v27 = vpop.eup %1883  ;;  %641 = vrot.lane.b32.xlu0 %v2093_v22, %s1933_s30  ;;  %v2105_v28 = vpack.c.bf16 %v469_v24, %v468_v5  ;;  %v466_v8 = vsel %vm356_vm6, %v2023_v12, %v1645_v23  ;;  %v1649_v31 = vadd.f32 -1.0, %v1882_v6  ;;  %v606_v41 = vrot.slane %v2093_v22, 1 }
  0x2d   : > { %v1886_v35 = vpop.eup %1885  ;;  %v467_v9 = vsel %vm357_vm7, %v2027_v15, %v1646_v25  ;;  %v1650_v36 = vadd.f32 -1.0, %v1884_v27  ;;  %v514_v10 = vshll.u32 %v2093_v22, 16  ;;  %v2197_v25 = vunpack.c.l.bf16 %v1765_v17 }
  0x2e   : > { %v1888_v38 = vpop.eup %1887  ;;  %651 = vrot.lane.b32.xlu1 %v2105_v28, %s1933_s30  ;;  %v2117_v39 = vpack.c.bf16 %v467_v9, %v466_v8  ;;  %v470_v12 = vsel %vm360_vm8, %v2035_v29, %v1649_v31  ;;  %v1641_v40 = vadd.f32 -1.0, %v1886_v35  ;;  %v616_v56 = vrot.slane %v2105_v28, 1 }
  0x2f   : > { %v471_v15 = vsel %vm361_vm9, %v2037_v30, %v1650_v36  ;;  %v1642_v44 = vadd.f32 -1.0, %v1888_v38  ;;  %v1890_v45 = vpop.eup %1889  ;;  %v554_v20 = vshll.u32 %v2105_v28, 16  ;;  %v518_v31 = vshrl.u32 %v2093_v22, 16 }
  0x30   : > { %649 = vrot.lane.b32.xlu0 %v2117_v39, %s1933_s30  ;;  %v2128_v47 = vpack.c.bf16 %v471_v15, %v470_v12  ;;  %v462_v29 = vsel %vm352_vm10, %v2039_v32, %v1641_v40  ;;  %v1892_v48 = vpop.eup %1891  ;;  %v1635_v50 = vadd.f32 -1.0, %v1890_v45  ;;  %v2146_v32 = vsel %vm604_vm12, %v606_v41, %v608_v37 }
  0x31   : > { %v463_v30 = vsel %vm353_vm11, %v2041_v33, %v1642_v44  ;;  %v1894_v51 = vpop.eup %1893  ;;  %v1636_v53 = vadd.f32 -1.0, %v1892_v48  ;;  %v614_v55 = vrot.slane %v2117_v39, 1  ;;  %v546_v1 = vshll.u32 %v2117_v39, 16 }
  0x32   : > { %653 = vrot.lane.b32.xlu1 %v2128_v47, %s1933_s30  ;;  %v2141_v52 = vpack.c.bf16 %v463_v30, %v462_v29  ;;  %v1896_v33 = vpop.eup %1895  ;;  %v456_v54 = vsel %vm346_vm13, %v2049_v42, %v1635_v50  ;;  %v1643_v58 = vadd.f32 -1.0, %v1894_v51  ;;  %v618_v0 = vrot.slane %v2128_v47, 1 }
  0x33   : > { %v457_v59 = vsel %vm347_vm14, %v2051_v43, %v1636_v53  ;;  %v1644_v60 = vadd.f32 -1.0, %v1896_v33  ;;  %v2167_v2 = vsel %vm604_vm12, %v614_v55, %v616_v56  ;;  %v550_v11 = vshrl.u32 %v2117_v39, 16  ;;  %v1898_v24 = vpop.eup %1897 }
  0x34   : > { %645 = vrot.lane.b32.xlu0 %v2141_v52, %s1933_s30  ;;  %v2155_v62 = vpack.c.bf16 %v457_v59, %v456_v54  ;;  %v464_v63 = vsel %vm354_vm15, %v2053_v46, %v1643_v58  ;;  %v2185_v18 = vsel %vm604_vm12, %v616_v56, %v618_v0  ;;  %v610_v19 = vrot.slane %v2141_v52, 1  ;;  %v1900_v27 = vpop.eup %1899 }
  0x35   : > { %v465_v42 = vsel %vm355_vm0, %v2057_v49, %v1644_v60  ;;  %v548_v4 = vrot.slane %v546_v1, 1  ;;  %v516_v35 = vrot.slane %v514_v10, 1  ;;  %v556_v36 = vrot.slane %v554_v20, 1  ;;  %v1766_v10 = vld [vmem:[%s1997_s26 + $0x50] sm:$0xff]  }
  0x36   : > { %624 = vrot.lane.b32.xlu1 %v2146_v32, %s1934_s6  ;;  %v605_v43 = vrot.slane %v2155_v62, 1  ;;  %v2169_v7 = vpack.c.bf16 %v465_v42, %v464_v63  ;;  %v509_v46 = vshll.u32 %v2155_v62, 16  ;;  %v507_v23 = vshrl.u32 %v2155_v62, 16 }
  0x37   : > { %v552_v9 = vor.u32 %v550_v11, %v548_v4  ;;  %v558_v38 = vshrl.u32 %v2105_v28, 16  ;;  %v2214_v12 = vsel %vm604_vm12, %v608_v37, %v610_v19  ;;  %v562_v15 = vshll.u32 %v2128_v47, 16 }
  0x38   : > { %v607_v13 = vsel %vm604_vm12, %v605_v43, %v606_v41  ;;  %v612_v49 = vrot.slane %v2169_v7, 1  ;;  %v538_v14 = vshll.u32 %v2169_v7, 16  ;;  %v542_v3 = vshrl.u32 %v2169_v7, 16 }
  0x39   : > { %622 = vrot.lane.b32.xlu0 %v607_v13, %s1934_s6  ;;  %v511_v6 = vrot.slane %v509_v46, 1  ;;  %v1651_v44 = vadd.f32 -1.0, %v1898_v24  ;;  %v1652_v45 = vadd.f32 -1.0, %v1900_v27  ;;  %v386_v29 = vmin.f32 %v2197_v25, 0.0 }
  0x3a   : > { %632 = vrot.lane.b32.xlu1 %v2167_v2, %s1934_s6  ;;  %v2192_v21 = vsel %vm604_vm12, %v612_v49, %v614_v55  ;;  %v2194_v5 = vrot.slane %v538_v14, 1  ;;  %v387_v48 = vmin.f32 %v2199_v26, 0.0  ;;  %v520_v30 = vor.u32 %v518_v31, %v516_v35 }
  0x3b   : > { %v512_v41 = vor.u32 %v511_v6, %v507_v23  ;;  %v526_v50 = vshrl.u32 %v2080_v16, 16  ;;  %v2230_v37 = vsel %vm505_vm1, %v552_v9, %v556_v36  ;;  %v524_v51 = vrot.slane %v522_v34, 1 }
  0x3c   : > { %v544_v8 = vor.u32 %v542_v3, %v2194_v5  ;;  %v560_v53 = vor.u32 %v558_v38, %v556_v36  ;;  %v426_v33 = vmul.f32 1.442695, %v386_v29  ;;  %v564_v55 = vrot.slane %v562_v15, 1 }
  0x3d   : > { %630 = vrot.lane.b32.xlu0 %v2192_v21, %s1934_s6  ;;  %v517_v54 = vsel %vm505_vm1, %v512_v41, %v516_v35  ;;  %v530_v56 = vshll.u32 %v2141_v52, 16  ;;  %v428_v58 = vmul.f32 1.442695, %v387_v48  ;;  %v472_v59 = vsel %vm362_vm2, %v2065_v57, %v1651_v44 }
  0x3e   : > { %634 = vrot.lane.b32.xlu1 %v2185_v18, %s1934_s6  ;;  %v2217_v40 = vsel %vm505_vm1, %v544_v8, %v548_v4  ;;  %v473_v60 = vsel %vm363_vm3, %v2067_v61, %v1652_v45  ;;  %v525_v63 = vsel %vm505_vm1, %v520_v30, %v524_v51  ;;  %v528_v42 = vor.u32 %v526_v50, %v524_v51 }
  0x3f   : > { %1901 = vpow2.f32 %v426_v33  ;;  %v2241_v1 = vsel %vm505_vm1, %v560_v53, %v564_v55  ;;  %v532_v43 = vrot.slane %v530_v56, 1  ;;  %v2243_v46 = vpack.c.bf16 %v473_v60, %v472_v59 }
  0x40   : > { %1903 = vpow2.f32 %v428_v58  ;;  %v566_v61 = vshrl.u32 %v2128_v47, 16  ;;  %v1755_v13 = vunpack.c.l.bf16 %v1766_v10  ;;  %v1756_v14 = vunpack.c.h.bf16 %v1766_v10 }
  0x41   : > { %626 = vrot.lane.b32.xlu0 %v2214_v12, %s1934_s6  ;;  %v2250_v57 = vsel %vm505_vm1, %v528_v42, %v532_v43  ;;  %v570_v11 = vshll.u32 %v2243_v46, 16  ;;  %v534_v20 = vshrl.u32 %v2141_v52, 16  ;;  %vm364_vm4 = vcmp.gt.f32.partialorder %v2197_v25, 0.0  ;;  %v1852_v42 = vld [vmem:[%s2019_s29 + $0xc] sm:$0xff]  }
  0x42   : > { %585 = vrot.lane.b32.xlu1 %v2217_v40, %s1935_s7  ;;  %v388_v3 = vmin.f32 %v1755_v13, 0.0  ;;  %v568_v17 = vor.u32 %v566_v61, %v564_v55  ;;  %v389_v23 = vmin.f32 %v1756_v14, 0.0  ;;  %vm365_vm5 = vcmp.gt.f32.partialorder %v2199_v26, 0.0 }
  0x43   : > { %v2258_v4 = vrot.slane %v570_v11, 1  ;;  %v536_v31 = vor.u32 %v534_v20, %v532_v43  ;;  %v2283_v38 = vrot.slane %v2243_v46, 1  ;;  %vm366_vm6 = vcmp.gt.f32.partialorder %v1755_v13, 0.0  ;;  %v1853_v43 = vld [vmem:[%s2019_s29 + $0x14] sm:$0xff]  }
  0x44   : > { %v430_v6 = vmul.f32 1.442695, %v388_v3  ;;  %v432_v24 = vmul.f32 1.442695, %v389_v23  ;;  %vm367_vm7 = vcmp.gt.f32.partialorder %v1756_v14, 0.0  ;;  %v574_v59 = vshrl.u32 %v2243_v46, 16 }
  0x45   : > { %577 = vrot.lane.b32.xlu0 %v517_v54, %s1935_s7  ;;  %v2266_v8 = vsel %vm505_vm1, %v568_v17, %v2258_v4  ;;  %v2274_v35 = vsel %vm505_vm1, %v536_v31, %v2194_v5  ;;  %v2297_v45 = vsel %vm604_vm12, %v618_v0, %v2283_v38  ;;  %v2309_v0 = vsel %vm604_vm12, %v610_v19, %v612_v49  ;;  %v1856_v23 = vld [vmem:[%s2019_s29 + $0x24] sm:$0xff]  }
  0x46   : > { %587 = vrot.lane.b32.xlu1 %v2230_v37, %s1935_s7  ;;  %1905 = vpow2.f32 %v430_v6  ;;  %v2352_v60 = vor.u32 %v574_v59, %v2258_v4  ;;  %v812_v10 = vshrl.u32 %v1852_v42, 16  ;;  %v815_v61 = vshll.u32 %v1852_v42, 16  ;;  %v1860_v31 = vld [vmem:[%s2804_s1 + $0x20] sm:$0xff]   ;;  %v1862_v59 = vld [vmem:[%s2804_s1 + $0x10] sm:$0xff]  }
  0x47   : > { %1907 = vpow2.f32 %v432_v24  ;;  %v823_v11 = vshll.u32 %v1853_v43, 16  ;;  %vm810_vm8 = vsmask.f32 3328  ;;  %1780 = vmatprep.subr.bf16.mxu0 %v1860_v31  ;;  %1806 = vmatprep.subr.bf16.mxu1 %v1860_v31  ;;  %vm900_vm9 = vcmask 64512  }
  0x48   : > { %v814_v3 = vrot.slane %v812_v10, 4  ;;  %1781 = vmatpush3.bf16.msra.mxu0 %v1860_v31  ;;  %1811 = vmatpush3.bf16.msra.mxu1 %v1860_v31  ;;  %vm919_vm10 = vcmask 130048   ;;  %vm938_vm11 = vcmask 195584   ;;  %vm1432_vm13 = vcmask 27648  }
  0x49   : > { %579 = vrot.lane.b32.xlu0 %v525_v63, %s1935_s7  ;;  %v825_v4 = vrot.slane %v823_v11, 5  ;;  %vm976_vm14 = vcmask 326656   ;;  %vm995_vm15 = vcmask 392192   ;;  %vm1014_vm0 = vcmask 457728  }
  0x4a   : > { %589 = vrot.lane.b32.xlu1 %v2241_v1, %s1935_s7  ;;  %vm1052_vm2 = vcmask 588800   ;;  %vm1088_vm3 = vsmask.f32 4352 }
  0x4c   : > { %v1902_v27 = vpop.eup %1901 }
  0x4d   : > { %581 = vrot.lane.b32.xlu0 %v2250_v57, %s1935_s7  ;;  %v1904_v34 = vpop.eup %1903  ;;  %v1653_v9 = vadd.f32 -1.0, %v1902_v27 }
  0x4e   : > { %669 = vrot.lane.b32.xlu1 %v2250_v57, %s1936_s8  ;;  %v1654_v36 = vadd.f32 -1.0, %v1904_v34 }
  0x4f   : > { %v474_v41 = vsel %vm364_vm4, %v2197_v25, %v1653_v9  ;;  %vm1190_vm4 = vcmask 654336  }
  0x50   : > { %v475_v5 = vsel %vm365_vm5, %v2199_v26, %v1654_v36  ;;  %v838_v36 = vshrl.u32 %v1856_v23, 16 }
  0x51   : > { %667 = vrot.lane.b32.xlu0 %v525_v63, %s1936_s8  ;;  %v2291_v15 = vpack.c.bf16 %v475_v5, %v474_v41  ;;  %v841_v41 = vshll.u32 %v1856_v23, 16  ;;  %v1857_v5 = vld [vmem:[%s2019_s29 + $0x1c] sm:$0xff]  }
  0x52   : > { %677 = vrot.lane.b32.xlu1 %v2241_v1, %s1936_s8 }
  0x53   : > { %v1906_v44 = vpop.eup %1905  ;;  %v664_v50 = vshrl.u32 %v2291_v15, 16  ;;  %v2319_v33 = vrot.slane %v2291_v15, 1 }
  0x54   : > { %v1908_v29 = vpop.eup %1907  ;;  %v1655_v25 = vadd.f32 -1.0, %v1906_v44 }
  0x55   : > { %675 = vrot.lane.b32.xlu0 %v2230_v37, %s1936_s8  ;;  %v1656_v26 = vadd.f32 -1.0, %v1908_v29  ;;  %v2390_v44 = vsel %vm604_vm12, %v2283_v38, %v2319_v33 }
  0x56   : > { %679 = vrot.lane.b32.xlu1 %v2266_v8, %s1936_s8  ;;  %v476_v48 = vsel %vm366_vm6, %v1755_v13, %v1655_v25  ;;  %v1854_v13 = vld [vmem:[%s2019_s29 + $0x2c] sm:$0xff]  }
  0x57   : > { %v477_v30 = vsel %vm367_vm7, %v1756_v14, %v1656_v26  ;;  %v1855_v14 = vld [vmem:[%s2019_s29 + $0x34] sm:$0xff]   ;;  %v847_v20 = vshrl.u32 %v1854_v13, 16  ;;  %v850_v6 = vshll.u32 %v1854_v13, 16 }
  0x58   : > { %v2312_v51 = vpack.c.bf16 %v477_v30, %v476_v48  ;;  %v856_v24 = vshrl.u32 %v1855_v14, 16  ;;  %v859_v27 = vshll.u32 %v1855_v14, 16  ;;  %v832_v48 = vshll.u32 %v1857_v5, 16 }
  0x59   : > { %671 = vrot.lane.b32.xlu0 %v2274_v35, %s1936_s8  ;;  %v849_v9 = vrot.slane %v847_v20, 4  ;;  %v852_v29 = vrot.slane %v850_v6, 5 }
  0x5a   : > { %689 = vrot.lane.b32.xlu1 %v2214_v12, %s1937_s9  ;;  %v725_v54 = vshll.u32 %v2312_v51, 16  ;;  %v750_v49 = vrot.slane %v2312_v51, 1  ;;  %v858_v25 = vrot.slane %v856_v24, 4  ;;  %v861_v26 = vrot.slane %v859_v27, 5 }
  0x5b   : > { %v853_v30 = vor.u32 %v852_v29, %v849_v9  ;;  %v834_v10 = vrot.slane %v832_v48, 5 }
  0x5c   : > { %v2325_v55 = vrot.slane %v725_v54, 1  ;;  %v2331_v56 = vsel %vm604_vm12, %v2319_v33, %v750_v49  ;;  %v843_v54 = vrot.slane %v841_v41, 5  ;;  %vm957_vm12 = vcmask 261120  }
  0x5d   : > { %687 = vrot.lane.b32.xlu0 %v2146_v32, %s1937_s9  ;;  %v660_v32 = vshll.u32 %v2291_v15, 16 }
  0x5e   : > { %697 = vrot.lane.b32.xlu1 %v2185_v18, %s1937_s9 }
  0x5f   : > { %v662_v53 = vrot.slane %v660_v32, 1  ;;  %v829_v32 = vshrl.u32 %v1857_v5, 16 }
  0x61   : > { %695 = vrot.lane.b32.xlu0 %v2167_v2, %s1937_s9  ;;  %v2323_v19 = vor.u32 %v664_v50, %v662_v53  ;;  %v2360_v63 = vsel %vm505_vm1, %v2352_v60, %v662_v53  ;;  %v862_v50 = vor.u32 %v861_v26, %v858_v25  ;;  %v840_v53 = vrot.slane %v838_v36, 4 }
  0x62   : > { %699 = vrot.lane.b32.xlu1 %v2297_v45, %s1937_s9 }
  0x63   : > { %v2340_v58 = vsel %vm505_vm1, %v2323_v19, %v2325_v55  ;;  %v2407_v42 = vor.u32 %v843_v54, %v840_v53  ;;  %vm1033_vm1 = vcmask 523264  }
  0x65   : > { %691 = vrot.lane.b32.xlu0 %v2309_v0, %s1937_s9  ;;  %v854_v11 = vsel %vm810_vm8, %v2407_v42, %v853_v30 }
  0x66   : > { %708 = vrot.lane.b32.xlu1 %v2141_v52, %s1938_s10 }
  0x69   : > { %706 = vrot.lane.b32.xlu0 %v2080_v16, %s1938_s10 }
  0x6a   : > { %716 = vrot.lane.b32.xlu1 %v2128_v47, %s1938_s10 }
  0x6d   : > { %714 = vrot.lane.b32.xlu0 %v2105_v28, %s1938_s10 }
  0x6e   : > { %718 = vrot.lane.b32.xlu1 %v2243_v46, %s1938_s10 }
  0x71   : > { %710 = vrot.lane.b32.xlu0 %v2169_v7, %s1938_s10 }
  0x72   : > { %734 = vrot.lane.b32.xlu1 %v2274_v35, %s1939_s11 }
  0x75   : > { %732 = vrot.lane.b32.xlu0 %v2250_v57, %s1939_s11  ;;  %v820_v57 = vshrl.u32 %v1853_v43, 16  ;;  %v831_v43 = vrot.slane %v829_v32, 4  ;;  %v729_v32 = vshrl.u32 %v2312_v51, 16 }
  0x76   : > { %742 = vrot.lane.b32.xlu1 %v2266_v8, %s1939_s11 }
  0x77   : > { %v822_v17 = vrot.slane %v820_v57, 4  ;;  %v1863_v57 = vld [vmem:[%s2804_s1 + $0x8] sm:$0xff]   ;;  %v2417_v13 = vor.u32 %v834_v10, %v831_v43 }
  0x79   : > { %740 = vrot.lane.b32.xlu0 %v2241_v1, %s1939_s11  ;;  %v817_v1 = vrot.slane %v815_v61, 5  ;;  %v1858_v61 = vld [vmem:[%s2019_s29 + $0x3c] sm:$0xff]  }
  0x7a   : > { %744 = vrot.lane.b32.xlu1 %v2360_v63, %s1939_s11  ;;  %v865_v14 = vshrl.u32 %v1858_v61, 16 }
  0x7b   : > { %v818_v34 = vor.u32 %v817_v1, %v814_v3  ;;  %v868_v3 = vshll.u32 %v1858_v61, 16  ;;  %v1864_v1 = vld [vmem:[%s2804_s1] sm:$0xff]  }
  0x7d   : > { %736 = vrot.lane.b32.xlu0 %v2217_v40, %s1939_s11  ;;  %v870_v20 = vrot.slane %v868_v3, 5 }
  0x7e   : > { %754 = vrot.lane.b32.xlu1 %v2309_v0, %s1940_s12 }
  0x81   : > { %752 = vrot.lane.b32.xlu0 %v2214_v12, %s1940_s12  ;;  %v826_v12 = vor.u32 %v825_v4, %v822_v17  ;;  %v867_v4 = vrot.slane %v865_v14, 4 }
  0x82   : > { %762 = vrot.lane.b32.xlu1 %v2297_v45, %s1940_s12 }
  0x83   : > { %v836_v17 = vsel %vm810_vm8, %v826_v12, %v2417_v13  ;;  %v2430_v23 = vor.u32 %v870_v20, %v867_v4  ;;  %v1313_v4 = vld [vmem:[%s2805_s2 + $0x8] sm:$0xff] }
  0x85   : > { %760 = vrot.lane.b32.xlu0 %v2185_v18, %s1940_s12  ;;  %v1861_v18 = vld [vmem:[%s2804_s1 + $0x18] sm:$0xff]  }
  0x86   : > { %591 = vrot.lane.b32.xlu1 %v2266_v8, %s1935_s7  ;;  %1782 = vmatprep.subr.bf16.mxu0 %v1861_v18  ;;  %v827_v8 = vsel %vm810_vm8, %v818_v34, %v826_v12 }
  0x87   : > { %1807 = vmatprep.subr.bf16.mxu1 %v1861_v18  ;;  %1783 = vmatpush3.bf16.msra.mxu0 %v1861_v18 }
  0x88   : > { %1812 = vmatpush3.bf16.msra.mxu1 %v1861_v18  ;;  %1784 = vmatprep.subr.bf16.mxu0 %v1862_v59 }
  0x89   : > { %583 = vrot.lane.b32.xlu0 %v2274_v35, %s1935_s7  ;;  %1808 = vmatprep.subr.bf16.mxu1 %v1862_v59  ;;  %v863_v35 = vsel %vm810_vm8, %v853_v30, %v862_v50 }
  0x8a   : > { %764 = vrot.lane.b32.xlu1 %v2390_v44, %s1940_s12 }
  0x8b   : > { %1785 = vmatpush3.bf16.msra.mxu0 %v1862_v59 }
  0x8c   : > { %1813 = vmatpush3.bf16.msra.mxu1 %v1862_v59  ;;  %1786 = vmatprep.subr.bf16.mxu0 %v1863_v57 }
  0x8d   : > { %756 = vrot.lane.b32.xlu0 %v2192_v21, %s1940_s12  ;;  %1809 = vmatprep.subr.bf16.mxu1 %v1863_v57 }
  0x8e   : > { %884 = vrot.lane.b32.xlu1 %v827_v8, %s1941_s22 }
  0x8f   : > { %1787 = vmatpush3.bf16.msra.mxu0 %v1863_v57 }
  0x90   : > { %1814 = vmatpush3.bf16.msra.mxu1 %v1863_v57  ;;  %1788 = vmatprep.subr.bf16.mxu0 %v1864_v1 }
  0x91   : > { %882 = vrot.lane.b32.xlu0 %v818_v34, %s1941_s22  ;;  %1810 = vmatprep.subr.bf16.mxu1 %v1864_v1 }
  0x92   : > { %892 = vrot.lane.b32.xlu1 %v863_v35, %s1941_s22  ;;  %v731_v35 = vor.u32 %v729_v32, %v2325_v55 }
  0x93   : > { %1789 = vmatpush3.bf16.msra.mxu0 %v1864_v1 }
  0x94   : > { %1815 = vmatpush3.bf16.msra.mxu1 %v1864_v1 }
  0x95   : > { %890 = vrot.lane.b32.xlu0 %v854_v11, %s1941_s22 }
  0x96   : > { %628 = vrot.lane.b32.xlu1 %v2309_v0, %s1934_s6  ;;  %v872_v0 = vsel %vm810_vm8, %v862_v50, %v2430_v23 }
  0x99   : > { %593 = vrot.lane.b32.xlu0 %v2352_v60, %s1935_s7 }
  0x9a   : > { %886 = vrot.lane.b32.xlu1 %v836_v17, %s1941_s22  ;;  %v1314_v17 = vld [vmem:[%s2805_s2 + $0x10] sm:$0xff] }
  0x9c   : > { %v644_v6 = vpop.permute.xlu1 %643 }
  0x9d   : > { %636 = vrot.lane.b32.xlu0 %v2297_v45, %s1934_s6 }
  0x9e   : > { %v642_v24 = vpop.permute.xlu0 %641  ;;  %638 = vrot.lane.b32.xlu1 %v2283_v38, %s1934_s6 }
  0xa0   : > { %v652_v27 = vpop.permute.xlu1 %651 }
  0xa1   : > { %894 = vrot.lane.b32.xlu0 %v872_v0, %s1941_s22 }
  0xa2   : > { %v650_v31 = vpop.permute.xlu0 %649  ;;  %655 = vrot.lane.b32.xlu1 %v2243_v46, %s1933_s30 }
  0xa4   : > { %v654_v60 = vpop.permute.xlu1 %653 }
  0xa5   : > { %647 = vrot.lane.b32.xlu0 %v2169_v7, %s1933_s30 }
  0xa6   : > { %v646_v45 = vpop.permute.xlu0 %645  ;;  %673 = vrot.lane.b32.xlu1 %v2217_v40, %s1936_s8  ;;  %v1859_v40 = vld [vmem:[%s2019_s29 + $0x44] sm:$0xff]  }
  0xa7   : > { %v877_v29 = vshll.u32 %v1859_v40, 16 }
  0xa8   : > { %v625_v38 = vpop.permute.xlu1 %624 }
  0xa9   : > { %657 = vrot.lane.b32.xlu0 %v2291_v15, %s1933_s30  ;;  %s2530_s30 = scalar_lea.vmem %s2808_s5, %s1991_s23 }
  0xaa   : > { %683 = vrot.lane.b32.xlu1 %v2323_v19, %s1936_s8 }
  0xab   : > { %v623_v34 = vpop.permute.xlu0 %622 }
  0xac   : > { %v633_v12 = vpop.permute.xlu1 %632 }
  0xad   : > { %681 = vrot.lane.b32.xlu0 %v2360_v63, %s1936_s8 }
  0xae   : > { %701 = vrot.lane.b32.xlu1 %v2390_v44, %s1937_s9  ;;  %v874_v44 = vshrl.u32 %v1859_v40, 16  ;;  %v1321_v40 = vld [vmem:[%s2805_s2 + $0x48] sm:$0xff] }
  0xaf   : > { %v631_v9 = vpop.permute.xlu0 %630 }
  0xb0   : > { %v635_v36 = vpop.permute.xlu1 %634  ;;  %v876_v30 = vrot.slane %v874_v44, 4  ;;  %v1324_v44 = vld [vmem:[%s2805_s2 + $0x60] sm:$0xff] }
  0xb1   : > { %693 = vrot.lane.b32.xlu0 %v2192_v21, %s1937_s9 }
  0xb2   : > { %712 = vrot.lane.b32.xlu1 %v2117_v39, %s1938_s10 }
  0xb3   : > { %v627_v19 = vpop.permute.xlu0 %626 }
  0xb4   : > { %v586_v41 = vpop.permute.xlu1 %585 }
  0xb5   : > { %v910_v63 = vsel %vm900_vm9, %v2169_v7, %v586_v41  ;;  %703 = vrot.lane.b32.xlu0 %v2319_v33, %s1937_s9 }
  0xb6   : > { %v929_v5 = vsel %vm919_vm10, %v910_v63, %v631_v9  ;;  %722 = vrot.lane.b32.xlu1 %v2312_v51, %s1938_s10 }
  0xb7   : > { %v2466_v21 = vsel %vm938_vm11, %v929_v5, %v650_v31  ;;  %v578_v25 = vpop.permute.xlu0 %577  ;;  %v1317_v31 = vld [vmem:[%s2805_s2 + $0x28] sm:$0xff]  ;;  %v1323_v5 = vld [vmem:[%s2805_s2 + $0x58] sm:$0xff] }
  0xb8   : > { %v588_v26 = vpop.permute.xlu1 %587  ;;  %v902_v18 = vsel %vm900_vm9, %v2155_v62, %v578_v25 }
  0xb9   : > { %v912_v7 = vsel %vm900_vm9, %v2117_v39, %v588_v26  ;;  %v921_v33 = vsel %vm919_vm10, %v902_v18, %v623_v34  ;;  %720 = vrot.lane.b32.xlu0 %v2291_v15, %s1938_s10  ;;  %v879_v39 = vrot.slane %v877_v29, 5  ;;  %v1319_v34 = vld [vmem:[%s2805_s2 + $0x38] sm:$0xff]  ;;  %v1325_v26 = vld [vmem:[%s2805_s2 + $0x68] sm:$0xff]  ;;  %v1326_v18 = vld [vmem:[%s2805_s2 + $0x70] sm:$0xff] }
  0xba   : > { %v931_v8 = vsel %vm919_vm10, %v912_v7, %v633_v12  ;;  %746 = vrot.lane.b32.xlu1 %v2340_v58, %s1939_s11  ;;  %v2480_v48 = vsel %vm938_vm11, %v921_v33, %v642_v24  ;;  %v1316_v24 = vld [vmem:[%s2805_s2 + $0x20] sm:$0xff] }
  0xbb   : > { %v2483_v62 = vsel %vm938_vm11, %v931_v8, %v652_v27  ;;  %v580_v50 = vpop.permute.xlu0 %579  ;;  %v880_v10 = vor.u32 %v879_v39, %v876_v30  ;;  %v1320_v12 = vld [vmem:[%s2805_s2 + $0x40] sm:$0xff]  ;;  %v1327_v8 = vld [vmem:[%s2805_s2 + $0x78] sm:$0xff] }
  0xbc   : > { %v590_v53 = vpop.permute.xlu1 %589  ;;  %v904_v15 = vsel %vm900_vm9, %v2093_v22, %v580_v50 }
  0xbd   : > { %v914_v54 = vsel %vm900_vm9, %v2105_v28, %v590_v53  ;;  %v923_v58 = vsel %vm919_vm10, %v904_v15, %v625_v38  ;;  %738 = vrot.lane.b32.xlu0 %v2230_v37, %s1939_s11 }
  0xbe   : > { %v933_v59 = vsel %vm919_vm10, %v914_v54, %v635_v36  ;;  %758 = vrot.lane.b32.xlu1 %v2167_v2, %s1940_s12  ;;  %v2497_v43 = vsel %vm938_vm11, %v923_v58, %v644_v6  ;;  %v881_v2 = vsel %vm810_vm8, %v2430_v23, %v880_v10  ;;  %v1315_v6 = vld [vmem:[%s2805_s2 + $0x18] sm:$0xff] }
  0xbf   : > { %v952_v22 = vsel %vm938_vm11, %v933_v59, %v654_v60  ;;  %v582_v61 = vpop.permute.xlu0 %581  ;;  %v1318_v60 = vld [vmem:[%s2805_s2 + $0x30] sm:$0xff] }
  0xc0   : > { %v2500_v28 = vpop.permute.xlu1 %669  ;;  %v906_v37 = vsel %vm900_vm9, %v2080_v16, %v582_v61  ;;  %v845_v16 = vsel %vm810_vm8, %v2417_v13, %v2407_v42  ;;  %v1312_v42 = vld [vmem:[%s2805_s2] sm:$0xff]  ;;  %v1942_v13 = vmov 0  }
  0xc1   : > { %v925_v57 = vsel %vm919_vm10, %v906_v37, %v627_v19  ;;  %748 = vrot.lane.b32.xlu0 %v731_v35, %s1939_s11  ;;  %1850 = vset.pattern.permute.xlu1 %v1942_v13  ;;  %1433 = vst.msk [vmem:[%s2530_s30] sm:$0xf] %vm1432_vm13, %v1942_v13  ;;  %1434 = vst.msk [vmem:[%s2530_s30 + $0x4] sm:$0xf] %vm1432_vm13, %v1942_v13  ;;  %v1322_v19 = vld [vmem:[%s2805_s2 + $0x50] sm:$0xff]  ;;  %v961_v59 = vsel %vm957_vm12, %v2497_v43, %v2500_v28 }
  0xc2   : > { %768 = vrot.lane.b32.xlu1 %v750_v49, %s1940_s12  ;;  %v2512_v55 = vsel %vm938_vm11, %v925_v57, %v646_v45  ;;  %1435 = vst.msk [vmem:[%s2530_s30 + $0x8] sm:$0xf] %vm1432_vm13, %v1942_v13  ;;  %1436 = vst.msk [vmem:[%s2530_s30 + $0x4c] sm:$0xf] %vm1432_vm13, %v1942_v13  ;;  %1851 = vset.pattern.permute.xlu0 %v1942_v13 }
  0xc3   : > { %v2514_v11 = vpop.permute.xlu0 %667  ;;  %1437 = vst.msk [vmem:[%s2530_s30 + $0x50] sm:$0xf] %vm1432_vm13, %v1942_v13  ;;  %1438 = vst.msk [vmem:[%s2530_s30 + $0x54] sm:$0xf] %vm1432_vm13, %v1942_v13 }
  0xc4   : > { %v2516_v14 = vpop.permute.xlu1 %677  ;;  %v959_v57 = vsel %vm957_vm12, %v2480_v48, %v2514_v11 }
  0xc5   : > { %766 = vrot.lane.b32.xlu0 %v2331_v56, %s1940_s12  ;;  %v969_v43 = vsel %vm957_vm12, %v2483_v62, %v2516_v14 }
  0xc6   : > { %896 = vrot.lane.b32.xlu1 %v881_v2, %s1941_s22 }
  0xc7   : > { %v2524_v51 = vpop.permute.xlu0 %675 }
  0xc8   : > { %v680_v49 = vpop.permute.xlu1 %679  ;;  %v967_v28 = vsel %vm957_vm12, %v2466_v21, %v2524_v51 }
  0xc9   : > { %v2533_v56 = vsel %vm957_vm12, %v952_v22, %v680_v49  ;;  %888 = vrot.lane.b32.xlu0 %v845_v16, %s1941_s22 }
  0xca   : > { %1330 = vperm.xlu1 %1850, %v1312_v42  }
  0xcb   : > { %v2551_v3 = vpop.permute.xlu0 %671 }
  0xcc   : > { %v690_v1 = vpop.permute.xlu1 %689 }
  0xcd   : > { %898 = vrot.lane.b32.xlu0 %v880_v10, %s1941_s22  ;;  %v980_v22 = vsel %vm976_vm14, %v961_v59, %v690_v1 }
  0xce   : > { %1340 = vperm.xlu1 %1850, %v1314_v17  }
  0xcf   : > { %v2560_v20 = vpop.permute.xlu0 %687 }
  0xd0   : > { %v2562_v23 = vpop.permute.xlu1 %697  ;;  %v978_v42 = vsel %vm976_vm14, %v959_v57, %v2560_v20 }
  0xd1   : > { %1335 = vperm.xlu0 %1851, %v1313_v4   ;;  %v988_v13 = vsel %vm976_vm14, %v969_v43, %v2562_v23 }
  0xd2   : > { %1345 = vperm.xlu1 %1850, %v1315_v6  }
  0xd3   : > { %v2570_v0 = vpop.permute.xlu0 %695 }
  0xd4   : > { %v2572_v27 = vpop.permute.xlu1 %699  ;;  %v986_v48 = vsel %vm976_vm14, %v967_v28, %v2570_v0 }
  0xd5   : > { %1350 = vperm.xlu0 %1851, %v1316_v24  }
  0xd6   : > { %1355 = vperm.xlu1 %1850, %v1317_v31  }
  0xd7   : > { %v2580_v45 = vpop.permute.xlu0 %691 }
  0xd8   : > { %v709_v38 = vpop.permute.xlu1 %708 }
  0xd9   : > { %1360 = vperm.xlu0 %1851, %v1318_v60   ;;  %v999_v61 = vsel %vm995_vm15, %v980_v22, %v709_v38  ;;  %v963_v60 = vsel %vm957_vm12, %v2512_v55, %v2551_v3 }
  0xda   : > { %1365 = vperm.xlu1 %1850, %v1319_v34  }
  0xdb   : > { %v707_v9 = vpop.permute.xlu0 %706 }
  0xdc   : > { %v717_v36 = vpop.permute.xlu1 %716  ;;  %v997_v62 = vsel %vm995_vm15, %v978_v42, %v707_v9 }
  0xdd   : > { %1370 = vperm.xlu0 %1851, %v1320_v12   ;;  %v1007_v14 = vsel %vm995_vm15, %v988_v13, %v717_v36 }
  0xde   : > { %1375 = vperm.xlu1 %1850, %v1321_v40  }
  0xdf   : > { %v715_v41 = vpop.permute.xlu0 %714 }
  0xe0   : > { %v2594_v63 = vpop.permute.xlu1 %718  ;;  %v1005_v1 = vsel %vm995_vm15, %v986_v48, %v715_v41  ;;  %v982_v41 = vsel %vm976_vm14, %v963_v60, %v2580_v45  ;;  %v990_v48 = vsel %vm976_vm14, %v2533_v56, %v2572_v27 }
  0xe1   : > { %1380 = vperm.xlu0 %1851, %v1322_v19  }
  0xe2   : > { %1385 = vperm.xlu1 %1850, %v1323_v5  }
  0xe3   : > { %v2602_v29 = vpop.permute.xlu0 %710 }
  0xe4   : > { %v735_v25 = vpop.permute.xlu1 %734 }
  0xe5   : > { %1390 = vperm.xlu0 %1851, %v1324_v44   ;;  %v1018_v37 = vsel %vm1014_vm0, %v999_v61, %v735_v25 }
  0xe6   : > { %1395 = vperm.xlu1 %1850, %v1325_v26  }
  0xe7   : > { %v733_v7 = vpop.permute.xlu0 %732 }
  0xe8   : > { %v743_v33 = vpop.permute.xlu1 %742  ;;  %v1016_v17 = vsel %vm1014_vm0, %v997_v62, %v733_v7 }
  0xe9   : > { %1400 = vperm.xlu0 %1851, %v1326_v18   ;;  %v1026_v4 = vsel %vm1014_vm0, %v1007_v14, %v743_v33  ;;  %v1001_v33 = vsel %vm995_vm15, %v982_v41, %v2602_v29 }
  0xea   : > { %1405 = vperm.xlu1 %1850, %v1327_v8  }
  0xeb   : > { %v741_v32 = vpop.permute.xlu0 %740 }
  0xec   : > { %v2613_v30 = vpop.permute.xlu1 %744  ;;  %v1024_v38 = vsel %vm1014_vm0, %v1005_v1, %v741_v32 }
  0xef   : > { %v737_v39 = vpop.permute.xlu0 %736 }
  0xf0   : > { %v755_v50 = vpop.permute.xlu1 %754  ;;  %v1020_v32 = vsel %vm1014_vm0, %v1001_v33, %v737_v39 }
  0xf1   : > { %v1037_v2 = vsel %vm1033_vm1, %v1018_v37, %v755_v50 }
  0xf3   : > { %v753_v53 = vpop.permute.xlu0 %752 }
  0xf4   : > { %v763_v15 = vpop.permute.xlu1 %762  ;;  %v1035_v20 = vsel %vm1033_vm1, %v1016_v17, %v753_v53 }
  0xf5   : > { %v1045_v23 = vsel %vm1033_vm1, %v1026_v4, %v763_v15 }
  0xf7   : > { %v761_v54 = vpop.permute.xlu0 %760 }
  0xf8   : > { %v2615_v58 = vpop.permute.xlu1 %591  ;;  %v1043_v5 = vsel %vm1033_vm1, %v1024_v38, %v761_v54 }
  0xfb   : > { %v2620_v35 = vpop.permute.xlu0 %583 }
  0xfc   : > { %v2622_v10 = vpop.permute.xlu1 %764 }
  0xff   : > { %v757_v16 = vpop.permute.xlu0 %756 }
 0x100   : > { %v885_v49 = vpop.permute.xlu1 %884  ;;  %v1039_v15 = vsel %vm1033_vm1, %v1020_v32, %v757_v16 }
 0x101   : > { %v1056_v11 = vsel %vm1052_vm2, %v1037_v2, %v885_v49 }
 0x102   : > { %v1096_v21 = vshrl.u32 %v1056_v11, 16  ;;  %v1099_v51 = vshll.u32 %v1056_v11, 16  ;;  %v1009_v11 = vsel %vm995_vm15, %v990_v48, %v2594_v63 }
 0x103   : > { %v883_v0 = vpop.permute.xlu0 %882  ;;  %v1028_v14 = vsel %vm1014_vm0, %v1009_v11, %v2613_v30 }
 0x104   : > { %v1098_v6 = vrot.slane %v1096_v21, 3  ;;  %v1101_v24 = vrot.slane %v1099_v51, 4  ;;  %v893_v31 = vpop.permute.xlu1 %892  ;;  %v1054_v34 = vsel %vm1052_vm2, %v1035_v20, %v883_v0  ;;  %v1047_v21 = vsel %vm1033_vm1, %v1028_v14, %v2622_v10 }
 0x105   : > { %v1064_v12 = vsel %vm1052_vm2, %v1045_v23, %v893_v31  ;;  %v1089_v9 = vshrl.u32 %v1054_v34, 16  ;;  %v1092_v36 = vshll.u32 %v1054_v34, 16 }
 0x106   : > { %v1128_v40 = vshrl.u32 %v1064_v12, 16  ;;  %v1131_v19 = vshll.u32 %v1064_v12, 16  ;;  %v1102_v44 = vor.u32 %v1101_v24, %v1098_v6 }
 0x107   : > { %v1091_v25 = vrot.slane %v1089_v9, 3  ;;  %v1094_v26 = vrot.slane %v1092_v36, 4  ;;  %v891_v3 = vpop.permute.xlu0 %890 }
 0x108   : > { %v1130_v18 = vrot.slane %v1128_v40, 3  ;;  %v1133_v55 = vrot.slane %v1131_v19, 4  ;;  %v2660_v7 = vpop.permute.xlu1 %628  ;;  %v1062_v8 = vsel %vm1052_vm2, %v1043_v5, %v891_v3  ;;  %v916_v5 = vsel %vm900_vm9, %v2128_v47, %v2615_v58 }
 0x109   : > { %v1120_v45 = vshrl.u32 %v1062_v8, 16  ;;  %v1123_v50 = vshll.u32 %v1062_v8, 16  ;;  %v1095_v53 = vor.u32 %v1094_v26, %v1091_v25 }
 0x10a   : > { %v1134_v57 = vor.u32 %v1133_v55, %v1130_v18  ;;  %v908_v55 = vsel %vm900_vm9, %v2141_v52, %v2620_v35 }
 0x10b   : > { %v1122_v54 = vrot.slane %v1120_v45, 3  ;;  %v1125_v59 = vrot.slane %v1123_v50, 4  ;;  %v594_v22 = vpop.permute.xlu0 %593  ;;  %v1103_v61 = vsel %vm1088_vm3, %v1095_v53, %v1102_v44  ;;  %v927_v33 = vsel %vm919_vm10, %v908_v55, %v2660_v7 }
 0x10c   : > { %v887_v37 = vpop.permute.xlu1 %886  ;;  %1790 = vmatprep.mubr.msk.bf16.mxu0 %vm1190_vm4, %v1103_v61  ;;  %v918_v52 = vsel %vm900_vm9, %v2243_v46, %v594_v22 }
 0x10d   : > { %v1058_v29 = vsel %vm1052_vm2, %v1039_v15, %v887_v37  ;;  %v2670_v2 = vor.u32 %v1125_v59, %v1122_v54 }
 0x10e   : > { %v1104_v43 = vshrl.u32 %v1058_v29, 16  ;;  %v1107_v28 = vshll.u32 %v1058_v29, 16 }
 0x10f   : > { %v637_v42 = vpop.permute.xlu0 %636  ;;  %v1135_v16 = vsel %vm1088_vm3, %v2670_v2, %v1134_v57 }
 0x110   : > { %v1106_v39 = vrot.slane %v1104_v43, 3  ;;  %v1109_v49 = vrot.slane %v1107_v28, 4  ;;  %v639_v13 = vpop.permute.xlu1 %638  ;;  %1798 = vmatprep.mubr.msk.bf16.mxu1 %vm1190_vm4, %v1135_v16 }
 0x111   : > { %v937_v7 = vsel %vm919_vm10, %v918_v52, %v639_v13 }
 0x112   : > { %v2680_v62 = vor.u32 %v1109_v49, %v1106_v39 }
 0x113   : > { %v895_v51 = vpop.permute.xlu0 %894 }
 0x114   : > { %v656_v1 = vpop.permute.xlu1 %655  ;;  %v1111_v17 = vsel %vm1088_vm3, %v1102_v44, %v2680_v62  ;;  %v1066_v56 = vsel %vm1052_vm2, %v1047_v21, %v895_v51  ;;  %v935_v44 = vsel %vm919_vm10, %v916_v5, %v637_v42 }
 0x115   : > { %1791 = vmatmul.mubr.msk.bf16.vlgmr.msra.gmra.mxu0 %vm1190_vm4, %v1111_v17  ;;  %v1136_v27 = vshrl.u32 %v1066_v56, 16  ;;  %v1139_v4 = vshll.u32 %v1066_v56, 16  ;;  %v954_v25 = vsel %vm938_vm11, %v935_v44, %v656_v1 }
 0x117   : > { %v1138_v63 = vrot.slane %v1136_v27, 3  ;;  %v1141_v20 = vrot.slane %v1139_v4, 4  ;;  %v648_v23 = vpop.permute.xlu0 %647 }
 0x118   : > { %v674_v6 = vpop.permute.xlu1 %673  ;;  %v946_v32 = vsel %vm938_vm11, %v927_v33, %v648_v23 }
 0x119   : > { %v1142_v24 = vor.u32 %v1141_v20, %v1138_v63  ;;  %v965_v58 = vsel %vm957_vm12, %v946_v32, %v674_v6 }
 0x11b   : > { %v658_v30 = vpop.permute.xlu0 %657  ;;  %v1143_v0 = vsel %vm1088_vm3, %v1134_v57, %v1142_v24 }
 0x11c   : > { %v684_v10 = vpop.permute.xlu1 %683  ;;  %1799 = vmatmul.mubr.msk.bf16.vlgmr.msra.gmra.mxu1 %vm1190_vm4, %v1143_v0  ;;  %v956_v61 = vsel %vm938_vm11, %v937_v7, %v658_v30 }
 0x11d   : > { %v975_v43 = vsel %vm957_vm12, %v956_v61, %v684_v10 }
 0x11f   : > { %v682_v31 = vpop.permute.xlu0 %681 }
 0x120   : > { %v702_v60 = vpop.permute.xlu1 %701  ;;  %v973_v3 = vsel %vm957_vm12, %v954_v25, %v682_v31 }
 0x121   : > { %v992_v8 = vsel %vm976_vm14, %v973_v3, %v702_v60 }
 0x123   : > { %v694_v38 = vpop.permute.xlu0 %693 }
 0x124   : > { %v713_v34 = vpop.permute.xlu1 %712  ;;  %v984_v35 = vsel %vm976_vm14, %v965_v58, %v694_v38 }
 0x125   : > { %v1003_v54 = vsel %vm995_vm15, %v984_v35, %v713_v34 }
 0x127   : > { %v704_v12 = vpop.permute.xlu0 %703 }
 0x128   : > { %v723_v9 = vpop.permute.xlu1 %722  ;;  %v994_v28 = vsel %vm976_vm14, %v975_v43, %v704_v12 }
 0x129   : > { %v1013_v16 = vsel %vm995_vm15, %v994_v28, %v723_v9 }
 0x12b   : > { %v721_v36 = vpop.permute.xlu0 %720 }
 0x12c   : > { %v747_v40 = vpop.permute.xlu1 %746  ;;  %v1011_v47 = vsel %vm995_vm15, %v992_v8, %v721_v36 }
 0x12d   : > { %v1030_v45 = vsel %vm1014_vm0, %v1011_v47, %v747_v40 }
 0x12f   : > { %v739_v19 = vpop.permute.xlu0 %738 }
 0x130   : > { %v759_v41 = vpop.permute.xlu1 %758  ;;  %v1022_v37 = vsel %vm1014_vm0, %v1003_v54, %v739_v19 }
 0x131   : > { %v1041_v46 = vsel %vm1033_vm1, %v1022_v37, %v759_v41 }
 0x133   : > { %v749_v26 = vpop.permute.xlu0 %748 }
 0x134   : > { %v769_v18 = vpop.permute.xlu1 %768  ;;  %v1032_v11 = vsel %vm1014_vm0, %v1013_v16, %v749_v26 }
 0x135   : > { %v1051_v21 = vsel %vm1033_vm1, %v1032_v11, %v769_v18 }
 0x137   : > { %v767_v50 = vpop.permute.xlu0 %766 }
 0x138   : > { %v897_v53 = vpop.permute.xlu1 %896  ;;  %v1049_v15 = vsel %vm1033_vm1, %v1030_v45, %v767_v50 }
 0x139   : > { %v1068_v59 = vsel %vm1052_vm2, %v1049_v15, %v897_v53 }
 0x13a   : > { %v1144_v57 = vshrl.u32 %v1068_v59, 16  ;;  %v1147_v29 = vshll.u32 %v1068_v59, 16 }
 0x13b   : > { %v889_v22 = vpop.permute.xlu0 %888 }
 0x13c   : > { %v1146_v39 = vrot.slane %v1144_v57, 3  ;;  %v1149_v49 = vrot.slane %v1147_v29, 4  ;;  %v1060_v42 = vsel %vm1052_vm2, %v1041_v46, %v889_v22 }
 0x13d   : > { %v1112_v13 = vshrl.u32 %v1060_v42, 16  ;;  %v1115_v48 = vshll.u32 %v1060_v42, 16 }
 0x13e   : > { %v1150_v14 = vor.u32 %v1149_v49, %v1146_v39 }
 0x13f   : > { %v1114_v51 = vrot.slane %v1112_v13, 3  ;;  %v1117_v1 = vrot.slane %v1115_v48, 4  ;;  %v899_v17 = vpop.permute.xlu0 %898 }
 0x140   : > { %v1070_v56 = vsel %vm1052_vm2, %v1051_v21, %v899_v17  ;;  %v1151_v27 = vsel %vm1088_vm3, %v1142_v24, %v1150_v14 }
 0x141   : > { %v1118_v4 = vor.u32 %v1117_v1, %v1114_v51  ;;  %v1152_v63 = vshrl.u32 %v1070_v56, 16  ;;  %v1155_v20 = vshll.u32 %v1070_v56, 16  ;;  %1802 = vmatprep.mubr.msk.bf16.mxu1 %vm1190_vm4, %v1151_v27 }
 0x143   : > { %v1154_v23 = vrot.slane %v1152_v63, 3  ;;  %v1157_v6 = vrot.slane %v1155_v20, 4  ;;  %v1119_v30 = vsel %vm1088_vm3, %v2680_v62, %v1118_v4  ;;  %v1127_v0 = vsel %vm1088_vm3, %v1118_v4, %v2670_v2  ;;  %v2740_v2 = vld [vmem:[%s2806_s3] ss:$0 sm:$0xff] }
 0x144   : > { %1794 = vmatprep.mubr.msk.bf16.mxu0 %vm1190_vm4, %v1119_v30 }
 0x145   : > { %v1158_v10 = vor.u32 %v1157_v6, %v1154_v23  ;;  %1795 = vmatmul.mubr.msk.bf16.gmra.mxu0 %vm1190_vm4, %v1127_v0  ;;  %v1331_v31 = vpop.permute.xlu1 %1330 }
 0x147   : > { %v1159_v24 = vsel %vm1088_vm3, %v1150_v14, %v1158_v10 }
 0x148   : > { %1803 = vmatmul.mubr.msk.bf16.gmra.mxu1 %vm1190_vm4, %v1159_v24 }
 0x149   : > { %v1341_v60 = vpop.permute.xlu1 %1340 }
 0x14c   : > { %v1336_v38 = vpop.permute.xlu0 %1335 }
 0x14d   : > { %v1346_v34 = vpop.permute.xlu1 %1345 }
 0x150   : > { %v1351_v12 = vpop.permute.xlu0 %1350 }
 0x151   : > { %v2735_v9 = vpop.permute.xlu1 %1355 }
 0x154   : > { %v1361_v62 = vpop.permute.xlu0 %1360 }
 0x155   : > { %v2742_v40 = vpop.permute.xlu1 %1365 }
 0x158   : > { %v1371_v5 = vpop.permute.xlu0 %1370 }
 0x159   : > { %v1376_v33 = vpop.permute.xlu1 %1375 }
 0x15c   : > { %v1381_v50 = vpop.permute.xlu0 %1380 }
 0x15d   : > { %v1386_v37 = vpop.permute.xlu1 %1385 }
 0x160   : > { %v1391_v13 = vpop.permute.xlu0 %1390 }
 0x161   : > { %v1396_v21 = vpop.permute.xlu1 %1395 }
 0x164   : > { %v1401_v4 = vpop.permute.xlu0 %1400 }
 0x1d5   : > { %v1792_v36 = vpop.f32.mrf.mxu0 }
 0x1d6   : > { %v1258_v19 = vadd.f32 %v1792_v36, %v2740_v2  ;;  %v1406_v36 = vpop.permute.xlu1 %1405 }
 0x1d7   : > { %v1249_v41 = vpop.f32.mrf.mxu0 }
 0x1d8   : > { %v1410_v44 = vmul.f32 %v1341_v60, %v1258_v19  ;;  %v1250_v25 = vadd.f32 %v2740_v2, %v1249_v41 }
 0x1d9   : > { %v1793_v26 = vpop.f32.mrf.mxu0 }
 0x1da   : > { %v1699_v18 = vpack.c.bf16 %v1410_v44, %v1410_v44  ;;  %v1408_v55 = vmul.f32 %v1331_v31, %v1250_v25  ;;  %v1261_v3 = vadd.f32 %v1793_v26, %v2740_v2 }
 0x1db   : > { %v1252_v8 = vpop.f32.mrf.mxu0 }
 0x1dc   : > { %1497 = vst.msk [vmem:[%s2530_s30 + $0x14] sm:$0xf] %vm1432_vm13, %v1699_v18  ;;  %v1697_v32 = vpack.c.bf16 %v1408_v55, %v1408_v55  ;;  %v1411_v47 = vmul.f32 %v1346_v34, %v1261_v3  ;;  %v1253_v58 = vadd.f32 %v2740_v2, %v1252_v8  ;;  %v1800_v45 = vpop.f32.mrf.mxu1 }
 0x1dd   : > { %v1290_v52 = vadd.f32 %v1800_v45, %v2740_v2 }
 0x1de   : > { %1495 = vst.msk [vmem:[%s2530_s30 + $0xc] sm:$0xf] %vm1432_vm13, %v1697_v32  ;;  %v1700_v53 = vpack.c.bf16 %v1411_v47, %v1411_v47  ;;  %v1409_v35 = vmul.f32 %v1336_v38, %v1253_v58  ;;  %v1281_v15 = vpop.f32.mrf.mxu1 }
 0x1df   : > { %v1282_v54 = vadd.f32 %v2740_v2, %v1281_v15  ;;  %v1418_v59 = vmul.f32 %v1381_v50, %v1290_v52 }
 0x1e0   : > { %1498 = vst.msk [vmem:[%s2530_s30 + $0x18] sm:$0xf] %vm1432_vm13, %v1700_v53  ;;  %v1698_v7 = vpack.c.bf16 %v1409_v35, %v1409_v35  ;;  %v1801_v61 = vpop.f32.mrf.mxu1 }
 0x1e1   : > { %v1416_v57 = vmul.f32 %v1371_v5, %v1282_v54  ;;  %v1707_v29 = vpack.c.bf16 %v1418_v59, %v1418_v59  ;;  %v1293_v43 = vadd.f32 %v1801_v61, %v2740_v2 }
 0x1e2   : > { %1496 = vst.msk [vmem:[%s2530_s30 + $0x10] sm:$0xf] %vm1432_vm13, %v1698_v7  ;;  %v1284_v46 = vpop.f32.mrf.mxu1 }
 0x1e3   : > { %v1705_v22 = vpack.c.bf16 %v1416_v57, %v1416_v57  ;;  %1505 = vst.msk [vmem:[%s2530_s30 + $0x34] sm:$0xf] %vm1432_vm13, %v1707_v29  ;;  %v1419_v28 = vmul.f32 %v1386_v37, %v1293_v43  ;;  %v1285_v39 = vadd.f32 %v2740_v2, %v1284_v46 }
 0x1e5   : > { %1503 = vst.msk [vmem:[%s2530_s30 + $0x2c] sm:$0xf] %vm1432_vm13, %v1705_v22  ;;  %v1708_v49 = vpack.c.bf16 %v1419_v28, %v1419_v28  ;;  %v1417_v42 = vmul.f32 %v1376_v33, %v1285_v39 }
 0x1e7   : > { %1506 = vst.msk [vmem:[%s2530_s30 + $0x38] sm:$0xf] %vm1432_vm13, %v1708_v49  ;;  %v1706_v16 = vpack.c.bf16 %v1417_v42, %v1417_v42 }
 0x1e9   : > { %1504 = vst.msk [vmem:[%s2530_s30 + $0x30] sm:$0xf] %vm1432_vm13, %v1706_v16 }
 0x205   : > { %v1796_v48 = vpop.f32.mrf.mxu0 }
 0x206   : > { %v1274_v11 = vadd.f32 %v1796_v48, %v2740_v2 }
 0x207   : > { %v1265_v14 = vpop.f32.mrf.mxu0 }
 0x208   : > { %v1414_v51 = vmul.f32 %v1361_v62, %v1274_v11  ;;  %v1266_v1 = vadd.f32 %v2740_v2, %v1265_v14  ;;  %v1804_v17 = vpop.f32.mrf.mxu1 }
 0x209   : > { %v1306_v56 = vadd.f32 %v1804_v17, %v2740_v2  ;;  %v1797_v27 = vpop.f32.mrf.mxu0 }
 0x20a   : > { %v1703_v63 = vpack.c.bf16 %v1414_v51, %v1414_v51  ;;  %v1412_v20 = vmul.f32 %v1351_v12, %v1266_v1  ;;  %v1277_v23 = vadd.f32 %v1797_v27, %v2740_v2  ;;  %v1297_v6 = vpop.f32.mrf.mxu1 }
 0x20b   : > { %v1422_v30 = vmul.f32 %v1401_v4, %v1306_v56  ;;  %v1298_v0 = vadd.f32 %v2740_v2, %v1297_v6  ;;  %v1268_v10 = vpop.f32.mrf.mxu0 }
 0x20c   : > { %1501 = vst.msk [vmem:[%s2530_s30 + $0x24] sm:$0xf] %vm1432_vm13, %v1703_v63  ;;  %v1701_v24 = vpack.c.bf16 %v1412_v20, %v1412_v20  ;;  %v1415_v31 = vmul.f32 %v2742_v40, %v1277_v23  ;;  %v1269_v60 = vadd.f32 %v2740_v2, %v1268_v10  ;;  %v1805_v38 = vpop.f32.mrf.mxu1 }
 0x20d   : > { %v1711_v34 = vpack.c.bf16 %v1422_v30, %v1422_v30  ;;  %v1420_v12 = vmul.f32 %v1391_v13, %v1298_v0  ;;  %v1309_v62 = vadd.f32 %v1805_v38, %v2740_v2 }
 0x20e   : > { %1499 = vst.msk [vmem:[%s2530_s30 + $0x1c] sm:$0xf] %vm1432_vm13, %v1701_v24  ;;  %v1704_v19 = vpack.c.bf16 %v1415_v31, %v1415_v31  ;;  %v1413_v41 = vmul.f32 %v2735_v9, %v1269_v60  ;;  %v1300_v5 = vpop.f32.mrf.mxu1 }
 0x20f   : > { %1509 = vst.msk [vmem:[%s2530_s30 + $0x44] sm:$0xf] %vm1432_vm13, %v1711_v34  ;;  %v1709_v40 = vpack.c.bf16 %v1420_v12, %v1420_v12  ;;  %v1423_v44 = vmul.f32 %v1406_v36, %v1309_v62  ;;  %v1301_v25 = vadd.f32 %v2740_v2, %v1300_v5 }
 0x210   : > { %1502 = vst.msk [vmem:[%s2530_s30 + $0x28] sm:$0xf] %vm1432_vm13, %v1704_v19  ;;  %v1702_v26 = vpack.c.bf16 %v1413_v41, %v1413_v41 }
 0x211   : > { %1507 = vst.msk [vmem:[%s2530_s30 + $0x3c] sm:$0xf] %vm1432_vm13, %v1709_v40  ;;  %v1712_v18 = vpack.c.bf16 %v1423_v44, %v1423_v44  ;;  %v1421_v55 = vmul.f32 %v1396_v21, %v1301_v25 }
 0x212   : > { %1500 = vst.msk [vmem:[%s2530_s30 + $0x20] sm:$0xf] %vm1432_vm13, %v1702_v26 }
 0x213   : > { %1510 = vst.msk [vmem:[%s2530_s30 + $0x48] sm:$0xf] %vm1432_vm13, %v1712_v18  ;;  %v1710_v3 = vpack.c.bf16 %v1421_v55, %v1421_v55 }
 0x215   : > { %1508 = vst.msk [vmem:[%s2530_s30 + $0x40] sm:$0xf] %vm1432_vm13, %v1710_v3 }
 0x216 PF: > { %s15_s20 = sadd.s32 1, %s1931_s20   ;;  %s2809_s18 = smov %s1927_s19 }
 0x217   : > { %p12_p5 = scmp.ge.s32.totalorder %s15_s20, 4   ;;  %s2810_s19 = smov %s2812_s21 }
 0x219   :  { %14 = sbr.rel (!%p12_p5) target bundleno = 2 (0x2), region = 79 }

// kernel: _lambda_.27
= control target key start
LH: loop header
LB: loop body
LE: loop exit
PB: predicated region body
PF: predicated region fallthrough
CT: control target
= control target key end

     0   :  { %s3598_s15 = smov 0   ;;  %s3600_s16 = smov 0   ;;  %s6078_s0 = inlined_call_operand.vmem [shape: bf16[896,4], index: 0, kind: input, shape index: {}]   ;;  %s6079_s1 = inlined_call_operand.vmem [shape: bf16[36,3], index: 1, kind: input, shape index: {}]   ;;  %s6080_s2 = inlined_call_operand.vmem [shape: f32[384,1], index: 2, kind: input, shape index: {}]   ;;  %s6081_s3 = inlined_call_operand.vmem [shape: f32[1,3], index: 3, kind: input, shape index: {}]   ;;  %s6082_s4 = inlined_call_operand.vmem [shape: f32[896,3], index: 4, kind: output, shape index: {}]  }
   0x1   :  { %s3602_s17 = smov 0  }
   0x2 LB: > { %s26_s18 = sadd.s32 1, %s3557_s16  ;;  %p3071_p0 = scmp.ge.s32.totalorder %s3561_s17, 1  ;;  %s3561_s17 = sphi %s3602_s17, %s14_s17   ;;  %s3557_s16 = sphi %s3600_s16, %s6465_s16   ;;  %s3553_s15 = sphi %s3598_s15, %s6464_s15  }
   0x3   : > { %p28_p1 = scmp.ge.s32.totalorder %s26_s18, 2  ;;  %p194_p2 = scmp.lt.s32.totalorder %s3561_s17, 3 }
   0x5   : > { %s6467_s18 = smov (%p28_p1, %s26_s18), 0  ;;  %p195_p3 = pnand %p3071_p0, %p194_p2 }
   0x7   : > { %198 = sbr.rel (%p195_p3) target bundleno = 829 (0x33d), region = 36 }
   0xc   : > { %s230_s19 = smul.u32 56, %s3553_s15  ;;  %vm729_vm8 = vsmask.f32 7424  ;;  %s3563_s24 = smov 4  }
   0xd   : > { %s3564_s25 = smov 8   ;;  %s3565_s26 = smov 12  }
   0xe   : > { %p231_p4 = scmp.lt.s32.totalorder %s230_s19, 111  ;;  %s3566_s27 = smov 16  }
   0xf   : > { %s3567_s28 = smov 20   ;;  %s3568_s29 = smov 24  }
  0x10   : > { %s6469_s19 = smov (!%p231_p4, %s230_s19), 111  ;;  %s3569_s30 = smov 28  }
  0x11   : > { %s3072_s20 = sshll.u32 %s6469_s19, 2  ;;  %s3571_s11 = smov 32  }
  0x12   : > { %s3622_s23 = scalar_lea.vmem %s6078_s0, %s3072_s20 }
  0x13   : > { %v3273_v0 = vld [vmem:[%s3622_s23 + $0x10] sm:$0xff]   ;;  %v3274_v1 = vld [vmem:[%s3622_s23 + $0x18] sm:$0xff]   ;;  %v3161_v2 = vld [vmem:[%s3622_s23] sm:$0xff]  }
  0x14   : > { %v3627_v3 = vunpack.c.l.bf16 %v3273_v0  ;;  %v3629_v4 = vunpack.c.h.bf16 %v3273_v0  ;;  %v3631_v5 = vunpack.c.l.bf16 %v3274_v1  ;;  %v3633_v6 = vunpack.c.h.bf16 %v3274_v1  ;;  %v3272_v7 = vld [vmem:[%s3622_s23 + $0x8] sm:$0xff]   ;;  %v3275_v12 = vld [vmem:[%s3622_s23 + $0x20] sm:$0xff]   ;;  %v3277_v30 = vld [vmem:[%s3622_s23 + $0x30] sm:$0xff]  }
  0x15   : > { %v3636_v8 = vunpack.c.l.bf16 %v3161_v2  ;;  %v3638_v9 = vunpack.c.h.bf16 %v3161_v2  ;;  %v3640_v10 = vunpack.c.l.bf16 %v3272_v7  ;;  %v3642_v11 = vunpack.c.h.bf16 %v3272_v7  ;;  %v3276_v27 = vld [vmem:[%s3622_s23 + $0x28] sm:$0xff]   ;;  %v3278_v41 = vld [vmem:[%s3622_s23 + $0x38] sm:$0xff]   ;;  %v3279_v46 = vld [vmem:[%s3622_s23 + $0x40] sm:$0xff]  }
  0x16   : > { %v425_v13 = vmin.f32 %v3627_v3, 0.0  ;;  %v426_v14 = vmin.f32 %v3629_v4, 0.0  ;;  %v427_v15 = vmin.f32 %v3631_v5, 0.0  ;;  %v428_v16 = vmin.f32 %v3633_v6, 0.0  ;;  %v3280_v1 = vld [vmem:[%s3622_s23 + $0x48] sm:$0xff]  }
  0x17   : > { %v3649_v20 = vunpack.c.l.bf16 %v3275_v12  ;;  %v421_v22 = vmin.f32 %v3636_v8, 0.0  ;;  %v422_v23 = vmin.f32 %v3638_v9, 0.0  ;;  %v423_v24 = vmin.f32 %v3640_v10, 0.0 }
  0x18   : > { %v485_v17 = vmul.f32 1.442695, %v425_v13  ;;  %v487_v18 = vmul.f32 1.442695, %v426_v14  ;;  %v489_v19 = vmul.f32 1.442695, %v427_v15  ;;  %v3655_v26 = vunpack.c.h.bf16 %v3275_v12 }
  0x19   : > { %v491_v21 = vmul.f32 1.442695, %v428_v16  ;;  %v424_v25 = vmin.f32 %v3642_v11, 0.0  ;;  %v477_v28 = vmul.f32 1.442695, %v421_v22  ;;  %v429_v33 = vmin.f32 %v3649_v20, 0.0 }
  0x1a   : > { %3427 = vpow2.f32 %v485_v17  ;;  %v479_v29 = vmul.f32 1.442695, %v422_v23  ;;  %v481_v31 = vmul.f32 1.442695, %v423_v24  ;;  %v430_v34 = vmin.f32 %v3655_v26, 0.0  ;;  %v3281_v16 = vld [vmem:[%s3622_s23 + $0x50] sm:$0xff]  }
  0x1b   : > { %3429 = vpow2.f32 %v487_v18  ;;  %v483_v32 = vmul.f32 1.442695, %v424_v25  ;;  %v3661_v35 = vunpack.c.l.bf16 %v3276_v27  ;;  %v3663_v36 = vunpack.c.h.bf16 %v3276_v27 }
  0x1c   : > { %3431 = vpow2.f32 %v489_v19  ;;  %v493_v37 = vmul.f32 1.442695, %v429_v33  ;;  %v3665_v38 = vunpack.c.l.bf16 %v3277_v30  ;;  %v3667_v39 = vunpack.c.h.bf16 %v3277_v30 }
  0x1d   : > { %3433 = vpow2.f32 %v491_v21  ;;  %v495_v40 = vmul.f32 1.442695, %v430_v34  ;;  %vm369_vm0 = vcmp.gt.f32.partialorder %v3627_v3, 0.0  ;;  %vm370_vm1 = vcmp.gt.f32.partialorder %v3629_v4, 0.0 }
  0x1e   : > { %3435 = vpow2.f32 %v477_v28  ;;  %v431_v42 = vmin.f32 %v3661_v35, 0.0  ;;  %v432_v43 = vmin.f32 %v3663_v36, 0.0  ;;  %v433_v44 = vmin.f32 %v3665_v38, 0.0 }
  0x1f   : > { %3437 = vpow2.f32 %v479_v29  ;;  %v434_v45 = vmin.f32 %v3667_v39, 0.0  ;;  %v3677_v48 = vunpack.c.l.bf16 %v3278_v41  ;;  %v3679_v49 = vunpack.c.h.bf16 %v3278_v41 }
  0x20   : > { %3439 = vpow2.f32 %v481_v31  ;;  %v497_v47 = vmul.f32 1.442695, %v431_v42  ;;  %v499_v50 = vmul.f32 1.442695, %v432_v43  ;;  %v501_v51 = vmul.f32 1.442695, %v433_v44 }
  0x21   : > { %3441 = vpow2.f32 %v483_v32  ;;  %v503_v52 = vmul.f32 1.442695, %v434_v45  ;;  %vm371_vm2 = vcmp.gt.f32.partialorder %v3631_v5, 0.0  ;;  %v3682_v53 = vunpack.c.l.bf16 %v3279_v46 }
  0x22   : > { %3443 = vpow2.f32 %v493_v37  ;;  %v3684_v54 = vunpack.c.h.bf16 %v3279_v46  ;;  %vm372_vm3 = vcmp.gt.f32.partialorder %v3633_v6, 0.0  ;;  %v435_v55 = vmin.f32 %v3677_v48, 0.0 }
  0x23   : > { %3445 = vpow2.f32 %v495_v40  ;;  %v436_v56 = vmin.f32 %v3679_v49, 0.0  ;;  %vm365_vm4 = vcmp.gt.f32.partialorder %v3636_v8, 0.0  ;;  %vm366_vm5 = vcmp.gt.f32.partialorder %v3638_v9, 0.0 }
  0x24   : > { %3447 = vpow2.f32 %v497_v47  ;;  %v437_v57 = vmin.f32 %v3682_v53, 0.0  ;;  %v438_v59 = vmin.f32 %v3684_v54, 0.0  ;;  %v505_v60 = vmul.f32 1.442695, %v435_v55 }
  0x25   : > { %3449 = vpow2.f32 %v499_v50  ;;  %v507_v61 = vmul.f32 1.442695, %v436_v56  ;;  %vm367_vm6 = vcmp.gt.f32.partialorder %v3640_v10, 0.0  ;;  %vm368_vm7 = vcmp.gt.f32.partialorder %v3642_v11, 0.0 }
  0x26   : > { %3451 = vpow2.f32 %v501_v51  ;;  %v509_v0 = vmul.f32 1.442695, %v437_v57  ;;  %vm373_vm9 = vcmp.gt.f32.partialorder %v3649_v20, 0.0  ;;  %v511_v12 = vmul.f32 1.442695, %v438_v59 }
  0x27   : > { %v3428_v58 = vpop.eup %3427  ;;  %3453 = vpow2.f32 %v503_v52  ;;  %vm374_vm10 = vcmp.gt.f32.partialorder %v3655_v26, 0.0  ;;  %vm375_vm11 = vcmp.gt.f32.partialorder %v3661_v35, 0.0  ;;  %v3706_v21 = vunpack.c.l.bf16 %v3280_v1 }
  0x28   : > { %v3430_v62 = vpop.eup %3429  ;;  %v3078_v63 = vadd.f32 -1.0, %v3428_v58  ;;  %3455 = vpow2.f32 %v505_v60  ;;  %vm376_vm12 = vcmp.gt.f32.partialorder %v3663_v36, 0.0  ;;  %vm377_vm13 = vcmp.gt.f32.partialorder %v3665_v38, 0.0 }
  0x29   : > { %v3432_v2 = vpop.eup %3431  ;;  %v3079_v7 = vadd.f32 -1.0, %v3430_v62  ;;  %3457 = vpow2.f32 %v507_v61  ;;  %vm378_vm14 = vcmp.gt.f32.partialorder %v3667_v39, 0.0  ;;  %v3719_v28 = vunpack.c.h.bf16 %v3280_v1 }
  0x2a   : > { %v3434_v13 = vpop.eup %3433  ;;  %v3080_v14 = vadd.f32 -1.0, %v3432_v2  ;;  %v649_v15 = vsel %vm369_vm0, %v3627_v3, %v3078_v63  ;;  %3459 = vpow2.f32 %v509_v0  ;;  %v3721_v29 = vunpack.c.l.bf16 %v3281_v16 }
  0x2b   : > { %v3436_v17 = vpop.eup %3435  ;;  %v3081_v18 = vadd.f32 -1.0, %v3434_v13  ;;  %v650_v19 = vsel %vm370_vm1, %v3629_v4, %v3079_v7  ;;  %3461 = vpow2.f32 %v511_v12  ;;  %v3733_v41 = vunpack.c.h.bf16 %v3281_v16 }
  0x2c   : > { %v3438_v22 = vpop.eup %3437  ;;  %v651_v3 = vsel %vm371_vm2, %v3631_v5, %v3080_v14  ;;  %v3711_v23 = vpack.c.bf16 %v650_v19, %v649_v15  ;;  %v3074_v24 = vadd.f32 -1.0, %v3436_v17  ;;  %vm379_vm15 = vcmp.gt.f32.partialorder %v3677_v48, 0.0 }
  0x2d   : > { %v3440_v25 = vpop.eup %3439  ;;  %v652_v4 = vsel %vm372_vm3, %v3633_v6, %v3081_v18  ;;  %v3075_v27 = vadd.f32 -1.0, %v3438_v22  ;;  %vm380_vm0 = vcmp.gt.f32.partialorder %v3679_v49, 0.0  ;;  %vm381_vm1 = vcmp.gt.f32.partialorder %v3682_v53, 0.0 }
  0x2e   : > { %v3442_v5 = vpop.eup %3441  ;;  %v3723_v30 = vpack.c.bf16 %v652_v4, %v651_v3  ;;  %v6108_v31 = vshll.u32 %v3711_v23, 16  ;;  %v6109_v32 = vshrl.u32 %v3711_v23, 16  ;;  %v3076_v33 = vadd.f32 -1.0, %v3440_v25 }
  0x2f   : > { %v3444_v34 = vpop.eup %3443  ;;  %v3077_v37 = vadd.f32 -1.0, %v3442_v5  ;;  %v645_v6 = vsel %vm365_vm4, %v3636_v8, %v3074_v24  ;;  %v646_v40 = vsel %vm366_vm5, %v3638_v9, %v3075_v27  ;;  %vm382_vm2 = vcmp.gt.f32.partialorder %v3684_v54, 0.0 }
  0x30   : > { %v3446_v42 = vpop.eup %3445  ;;  %v748_v43 = vrot.slane %v6108_v31, 1  ;;  %v6110_v44 = vshll.u32 %v3723_v30, 16  ;;  %v647_v45 = vsel %vm367_vm6, %v3640_v10, %v3076_v33  ;;  %v3741_v46 = vpack.c.bf16 %v646_v40, %v645_v6 }
  0x31   : > { %v3448_v47 = vpop.eup %3447  ;;  %v648_v8 = vsel %vm368_vm7, %v3642_v11, %v3077_v37  ;;  %v3082_v9 = vadd.f32 -1.0, %v3444_v34  ;;  %v3083_v50 = vadd.f32 -1.0, %v3446_v42  ;;  %v6111_v51 = vshrl.u32 %v3723_v30, 16 }
  0x32   : > { %6180 = vst [vmem:[#allocation2_spill] sm:$0xff] %v3741_v46  ;;  %v3450_v52 = vpop.eup %3449  ;;  %v752_v55 = vor.u32 %v6109_v32, %v748_v43  ;;  %v756_v10 = vrot.slane %v6110_v44, 1  ;;  %v3753_v56 = vpack.c.bf16 %v648_v8, %v647_v45  ;;  %v731_v57 = vshrl.u32 %v3741_v46, 16 }
  0x33   : > { %v3452_v11 = vpop.eup %3451  ;;  %v733_v58 = vshll.u32 %v3741_v46, 16  ;;  %v653_v59 = vsel %vm373_vm9, %v3649_v20, %v3082_v9  ;;  %v654_v60 = vsel %vm374_vm10, %v3655_v26, %v3083_v50  ;;  %v3084_v61 = vadd.f32 -1.0, %v3448_v47 }
  0x34   : > { %6181 = vst [vmem:[#allocation3_spill] sm:$0xff] %v3753_v56  ;;  %v3454_v62 = vpop.eup %3453  ;;  %v757_v63 = vsel %vm729_vm8, %v752_v55, %v756_v10  ;;  %v738_v0 = vshll.u32 %v3753_v56, 16  ;;  %v3767_v1 = vpack.c.bf16 %v654_v60, %v653_v59  ;;  %v760_v2 = vor.u32 %v6111_v51, %v756_v10 }
  0x35   : > { %933 = vrot.lane.b32.xlu1 %v757_v63, %s3563_s24  ;;  %v735_v7 = vrot.slane %v733_v58, 1  ;;  %v742_v20 = vshrl.u32 %v3753_v56, 16  ;;  %v3085_v12 = vadd.f32 -1.0, %v3450_v52  ;;  %v3086_v13 = vadd.f32 -1.0, %v3452_v11  ;;  %v3456_v26 = vpop.eup %3455  ;;  %v3282_v63 = vld [vmem:[%s3622_s23 + $0x58] sm:$0xff]  }
  0x36   : > { %v740_v14 = vrot.slane %v738_v0, 1  ;;  %v6106_v15 = vshll.u32 %v3767_v1, 16  ;;  %v3087_v16 = vadd.f32 -1.0, %v3454_v62  ;;  %v655_v17 = vsel %vm375_vm11, %v3661_v35, %v3084_v61  ;;  %v3458_v18 = vpop.eup %3457 }
  0x37   : > { %v736_v19 = vor.u32 %v735_v7, %v731_v57  ;;  %v656_v22 = vsel %vm376_vm12, %v3663_v36, %v3085_v12  ;;  %v657_v3 = vsel %vm377_vm13, %v3665_v38, %v3086_v13  ;;  %v6107_v24 = vshrl.u32 %v3767_v1, 16  ;;  %v3460_v25 = vpop.eup %3459 }
  0x38   : > { %v764_v4 = vrot.slane %v6106_v15, 1  ;;  %v744_v27 = vor.u32 %v742_v20, %v740_v14  ;;  %v658_v35 = vsel %vm378_vm14, %v3667_v39, %v3087_v16  ;;  %v3789_v5 = vpack.c.bf16 %v656_v22, %v655_v17  ;;  %v3462_v33 = vpop.eup %3461 }
  0x39   : > { %v741_v36 = vsel %vm729_vm8, %v736_v19, %v740_v14  ;;  %v3792_v34 = vpack.c.bf16 %v658_v35, %v657_v3  ;;  %v3088_v37 = vadd.f32 -1.0, %v3456_v26  ;;  %v3089_v38 = vadd.f32 -1.0, %v3458_v18  ;;  %v3283_v14 = vld [vmem:[%s3622_s23 + $0x60] sm:$0xff]   ;;  %v3284_v35 = vld [vmem:[%s3622_s23 + $0x68] sm:$0xff]  }
  0x3a   : > { %929 = vrot.lane.b32.xlu0 %v741_v36, %s3563_s24  ;;  %v3796_v6 = vsel %vm729_vm8, %v760_v2, %v764_v4  ;;  %v749_v40 = vsel %vm729_vm8, %v744_v27, %v748_v43  ;;  %v6104_v42 = vshll.u32 %v3789_v5, 16  ;;  %v6105_v39 = vshrl.u32 %v3789_v5, 16  ;;  %v3285_v36 = vld [vmem:[%s3622_s23 + $0x70] sm:$0xff]  }
  0x3b   : > { %6182 = vst [vmem:[#allocation4_spill] sm:$0xff] %v3792_v34  ;;  %935 = vrot.lane.b32.xlu1 %v3796_v6, %s3563_s24  ;;  %v6102_v45 = vshll.u32 %v3792_v34, 16  ;;  %v768_v47 = vor.u32 %v6107_v24, %v764_v4  ;;  %v3090_v8 = vadd.f32 -1.0, %v3460_v25  ;;  %v3091_v9 = vadd.f32 -1.0, %v3462_v33 }
  0x3c   : > { %v772_v50 = vrot.slane %v6104_v42, 1  ;;  %v659_v43 = vsel %vm379_vm15, %v3677_v48, %v3088_v37  ;;  %v660_v52 = vsel %vm380_vm0, %v3679_v49, %v3089_v38  ;;  %v6103_v55 = vshrl.u32 %v3792_v34, 16 }
  0x3d   : > { %v780_v10 = vrot.slane %v6102_v45, 1  ;;  %v661_v57 = vsel %vm381_vm1, %v3682_v53, %v3090_v8  ;;  %v662_v11 = vsel %vm382_vm2, %v3684_v54, %v3091_v9  ;;  %v3823_v58 = vpack.c.bf16 %v660_v52, %v659_v43 }
  0x3e   : > { %931 = vrot.lane.b32.xlu0 %v749_v40, %s3563_s24  ;;  %v776_v48 = vor.u32 %v6105_v39, %v772_v50  ;;  %v3829_v49 = vsel %vm729_vm8, %v768_v47, %v772_v50  ;;  %v3831_v59 = vpack.c.bf16 %v662_v11, %v661_v57  ;;  %v439_v60 = vmin.f32 %v3706_v21, 0.0 }
  0x3f   : > { %6183 = vst [vmem:[#allocation5_spill] sm:$0xff] %v3823_v58  ;;  %v6088_v53 = vshll.u32 %v3823_v58, 16  ;;  %v6089_v61 = vshrl.u32 %v3823_v58, 16  ;;  %v784_v54 = vor.u32 %v6103_v55, %v780_v10  ;;  %v440_v62 = vmin.f32 %v3719_v28, 0.0 }
  0x40   : > { %v3841_v0 = vsel %vm729_vm8, %v776_v48, %v780_v10  ;;  %v6086_v2 = vshll.u32 %v3831_v59, 16  ;;  %v441_v7 = vmin.f32 %v3721_v29, 0.0  ;;  %v442_v20 = vmin.f32 %v3733_v41, 0.0  ;;  %v3286_v10 = vld [vmem:[%s3622_s23 + $0x78] sm:$0xff]  }
  0x41   : > { %6184 = vst [vmem:[#allocation6_spill] sm:$0xff] %v3841_v0  ;;  %939 = vrot.lane.b32.xlu1 %v3841_v0, %s3563_s24  ;;  %v788_v12 = vrot.slane %v6088_v53, 1  ;;  %v513_v13 = vmul.f32 1.442695, %v439_v60  ;;  %v515_v26 = vmul.f32 1.442695, %v440_v62  ;;  %v3855_v19 = vunpack.c.l.bf16 %v3282_v63 }
  0x42   : > { %937 = vrot.lane.b32.xlu0 %v3829_v49, %s3563_s24  ;;  %v796_v16 = vrot.slane %v6086_v2, 1  ;;  %v517_v17 = vmul.f32 1.442695, %v441_v7  ;;  %v519_v18 = vmul.f32 1.442695, %v442_v20  ;;  %v3862_v25 = vunpack.c.h.bf16 %v3282_v63 }
  0x43   : > { %v792_v22 = vor.u32 %v6089_v61, %v788_v12  ;;  %v3860_v3 = vsel %vm729_vm8, %v784_v54, %v788_v12  ;;  %3463 = vpow2.f32 %v513_v13  ;;  %v3864_v4 = vunpack.c.l.bf16 %v3283_v14  ;;  %v3287_v54 = vld [vmem:[%s3622_s23 + $0x80] sm:$0xff]  }
  0x44   : > { %6185 = vst [vmem:[#allocation7_spill] sm:$0xff] %v3860_v3  ;;  %3465 = vpow2.f32 %v515_v26  ;;  %v3866_v27 = vunpack.c.h.bf16 %v3283_v14  ;;  %v443_v37 = vmin.f32 %v3855_v19, 0.0  ;;  %v444_v38 = vmin.f32 %v3862_v25, 0.0 }
  0x45   : > { %v3870_v33 = vsel %vm729_vm8, %v792_v22, %v796_v16  ;;  %3467 = vpow2.f32 %v517_v17  ;;  %v445_v40 = vmin.f32 %v3864_v4, 0.0  ;;  %v3881_v8 = vunpack.c.l.bf16 %v3284_v35 }
  0x46   : > { %6186 = vst [vmem:[#allocation8_spill] sm:$0xff] %v3870_v33  ;;  %943 = vrot.lane.b32.xlu1 %v3870_v33, %s3563_s24  ;;  %941 = vrot.lane.b32.xlu0 %v3860_v3, %s3563_s24  ;;  %3469 = vpow2.f32 %v519_v18  ;;  %v446_v47 = vmin.f32 %v3866_v27, 0.0  ;;  %v521_v9 = vmul.f32 1.442695, %v443_v37  ;;  %v3883_v50 = vunpack.c.h.bf16 %v3284_v35 }
  0x47   : > { %v3885_v43 = vunpack.c.l.bf16 %v3285_v36  ;;  %v3887_v52 = vunpack.c.h.bf16 %v3285_v36  ;;  %v523_v57 = vmul.f32 1.442695, %v444_v38  ;;  %v525_v11 = vmul.f32 1.442695, %v445_v40 }
  0x48   : > { %v527_v48 = vmul.f32 1.442695, %v446_v47  ;;  %vm383_vm3 = vcmp.gt.f32.partialorder %v3706_v21, 0.0  ;;  %vm384_vm4 = vcmp.gt.f32.partialorder %v3719_v28, 0.0  ;;  %v6087_v60 = vshrl.u32 %v3831_v59, 16 }
  0x49   : > { %3471 = vpow2.f32 %v521_v9  ;;  %v447_v62 = vmin.f32 %v3881_v8, 0.0  ;;  %v448_v63 = vmin.f32 %v3883_v50, 0.0  ;;  %v3896_v7 = vunpack.c.l.bf16 %v3286_v10 }
  0x4a   : > { %3473 = vpow2.f32 %v523_v57  ;;  %v449_v20 = vmin.f32 %v3885_v43, 0.0  ;;  %v450_v12 = vmin.f32 %v3887_v52, 0.0  ;;  %v3900_v13 = vunpack.c.h.bf16 %v3286_v10 }
  0x4b   : > { %3475 = vpow2.f32 %v525_v11  ;;  %v529_v26 = vmul.f32 1.442695, %v447_v62  ;;  %v531_v14 = vmul.f32 1.442695, %v448_v63  ;;  %v3902_v17 = vunpack.c.l.bf16 %v3287_v54 }
  0x4c   : > { %3477 = vpow2.f32 %v527_v48  ;;  %vm385_vm5 = vcmp.gt.f32.partialorder %v3721_v29, 0.0  ;;  %v533_v18 = vmul.f32 1.442695, %v449_v20  ;;  %v535_v22 = vmul.f32 1.442695, %v450_v12 }
  0x4d   : > { %v3905_v35 = vunpack.c.h.bf16 %v3287_v54  ;;  %vm386_vm6 = vcmp.gt.f32.partialorder %v3733_v41, 0.0  ;;  %v3910_v36 = vor.u32 %v6087_v60, %v796_v16  ;;  %3479 = vpow2.f32 %v529_v26 }
  0x4e   : > { %v451_v37 = vmin.f32 %v3896_v7, 0.0  ;;  %vm387_vm7 = vcmp.gt.f32.partialorder %v3855_v19, 0.0  ;;  %3481 = vpow2.f32 %v531_v14  ;;  %v452_v40 = vmin.f32 %v3900_v13, 0.0  ;;  %v3288_v14 = vld [vmem:[%s3622_s23 + $0x88] sm:$0xff]  }
  0x4f   : > { %v453_v47 = vmin.f32 %v3902_v17, 0.0  ;;  %vm388_vm9 = vcmp.gt.f32.partialorder %v3862_v25, 0.0  ;;  %vm389_vm10 = vcmp.gt.f32.partialorder %v3864_v4, 0.0  ;;  %3483 = vpow2.f32 %v533_v18 }
  0x50   : > { %v3464_v38 = vpop.eup %3463  ;;  %v454_v16 = vmin.f32 %v3905_v35, 0.0  ;;  %v537_v57 = vmul.f32 1.442695, %v451_v37  ;;  %3485 = vpow2.f32 %v535_v22  ;;  %v539_v54 = vmul.f32 1.442695, %v452_v40 }
  0x51   : > { %v3466_v9 = vpop.eup %3465  ;;  %v3092_v10 = vadd.f32 -1.0, %v3464_v38  ;;  %v541_v62 = vmul.f32 1.442695, %v453_v47  ;;  %vm390_vm11 = vcmp.gt.f32.partialorder %v3866_v27, 0.0  ;;  %vm391_vm12 = vcmp.gt.f32.partialorder %v3881_v8, 0.0 }
  0x52   : > { %v3468_v11 = vpop.eup %3467  ;;  %v3093_v48 = vadd.f32 -1.0, %v3466_v9  ;;  %3487 = vpow2.f32 %v537_v57  ;;  %v543_v26 = vmul.f32 1.442695, %v454_v16  ;;  %vm392_vm13 = vcmp.gt.f32.partialorder %v3883_v50, 0.0 }
  0x53   : > { %v3470_v63 = vpop.eup %3469  ;;  %v3094_v20 = vadd.f32 -1.0, %v3468_v11  ;;  %v663_v12 = vsel %vm383_vm3, %v3706_v21, %v3092_v10  ;;  %3489 = vpow2.f32 %v539_v54  ;;  %v3289_v21 = vld [vmem:[%s3622_s23 + $0x90] sm:$0xff]   ;;  %v3940_v47 = vunpack.c.h.bf16 %v3288_v14 }
  0x54   : > { %v3095_v38 = vadd.f32 -1.0, %v3470_v63  ;;  %v664_v18 = vsel %vm384_vm4, %v3719_v28, %v3093_v48  ;;  %3491 = vpow2.f32 %v541_v62  ;;  %v3938_v28 = vunpack.c.l.bf16 %v3288_v14 }
  0x55   : > { %v665_v22 = vsel %vm385_vm5, %v3721_v29, %v3094_v20  ;;  %v3930_v37 = vpack.c.bf16 %v664_v18, %v663_v12  ;;  %3493 = vpow2.f32 %v543_v26  ;;  %vm393_vm14 = vcmp.gt.f32.partialorder %v3885_v43, 0.0 }
  0x56   : > { %v666_v40 = vsel %vm386_vm6, %v3733_v41, %v3095_v38  ;;  %v3472_v9 = vpop.eup %3471  ;;  %vm394_vm15 = vcmp.gt.f32.partialorder %v3887_v52, 0.0  ;;  %v3948_v48 = vunpack.c.l.bf16 %v3289_v21  ;;  %v3950_v41 = vunpack.c.h.bf16 %v3289_v21 }
  0x57   : > { %v3942_v10 = vpack.c.bf16 %v666_v40, %v665_v22  ;;  %v6084_v29 = vshll.u32 %v3930_v37, 16  ;;  %v6085_v16 = vshrl.u32 %v3930_v37, 16  ;;  %v3474_v57 = vpop.eup %3473  ;;  %v3096_v11 = vadd.f32 -1.0, %v3472_v9 }
  0x58   : > { %v3476_v54 = vpop.eup %3475  ;;  %v3097_v20 = vadd.f32 -1.0, %v3474_v57  ;;  %vm395_vm0 = vcmp.gt.f32.partialorder %v3896_v7, 0.0  ;;  %v455_v18 = vmin.f32 %v3938_v28, 0.0  ;;  %v456_v22 = vmin.f32 %v3940_v47, 0.0 }
  0x59   : > { %v804_v62 = vrot.slane %v6084_v29, 1  ;;  %v6083_v63 = vshll.u32 %v3942_v10, 16  ;;  %v6090_v12 = vshrl.u32 %v3942_v10, 16  ;;  %v3478_v26 = vpop.eup %3477  ;;  %v3098_v14 = vadd.f32 -1.0, %v3476_v54 }
  0x5a   : > { %v667_v38 = vsel %vm387_vm7, %v3855_v19, %v3096_v11  ;;  %v3099_v57 = vadd.f32 -1.0, %v3478_v26  ;;  %vm396_vm1 = vcmp.gt.f32.partialorder %v3900_v13, 0.0  ;;  %vm397_vm2 = vcmp.gt.f32.partialorder %v3902_v17, 0.0  ;;  %v3480_v19 = vpop.eup %3479 }
  0x5b   : > { %v808_v21 = vor.u32 %v6085_v16, %v804_v62  ;;  %v812_v40 = vrot.slane %v6083_v63, 1  ;;  %v3968_v9 = vsel %vm729_vm8, %v3910_v36, %v804_v62  ;;  %vm398_vm3 = vcmp.gt.f32.partialorder %v3905_v35, 0.0  ;;  %v3482_v26 = vpop.eup %3481 }
  0x5c   : > { %6187 = vst [vmem:[#allocation9_spill] sm:$0xff] %v3968_v9  ;;  %945 = vrot.lane.b32.xlu0 %v3968_v9, %s3563_s24  ;;  %v668_v11 = vsel %vm388_vm9, %v3862_v25, %v3097_v20  ;;  %v669_v36 = vsel %vm389_vm10, %v3864_v4, %v3098_v14  ;;  %v457_v54 = vmin.f32 %v3948_v48, 0.0  ;;  %v458_v62 = vmin.f32 %v3950_v41, 0.0  ;;  %v3484_v20 = vpop.eup %3483 }
  0x5d   : > { %v3984_v63 = vsel %vm729_vm8, %v808_v21, %v812_v40  ;;  %v670_v29 = vsel %vm390_vm11, %v3866_v27, %v3099_v57  ;;  %v3989_v16 = vpack.c.bf16 %v668_v11, %v667_v38  ;;  %v816_v25 = vor.u32 %v6090_v12, %v812_v40  ;;  %v3486_v21 = vpop.eup %3485 }
  0x5e   : > { %6188 = vst [vmem:[#allocation10_spill] sm:$0xff] %v3984_v63  ;;  %947 = vrot.lane.b32.xlu1 %v3984_v63, %s3563_s24  ;;  %v3995_v4 = vpack.c.bf16 %v670_v29, %v669_v36  ;;  %v3100_v14 = vadd.f32 -1.0, %v3480_v19  ;;  %v3101_v2 = vadd.f32 -1.0, %v3482_v26  ;;  %v545_v60 = vmul.f32 1.442695, %v455_v18 }
  0x5f   : > { %v6091_v53 = vshll.u32 %v3989_v16, 16  ;;  %v6101_v61 = vshrl.u32 %v3989_v16, 16  ;;  %v3102_v27 = vadd.f32 -1.0, %v3484_v20  ;;  %v547_v38 = vmul.f32 1.442695, %v456_v22  ;;  %v3488_v57 = vpop.eup %3487 }
  0x60   : > { %v6099_v11 = vshll.u32 %v3995_v4, 16  ;;  %v3103_v40 = vadd.f32 -1.0, %v3486_v21  ;;  %v671_v12 = vsel %vm391_vm12, %v3881_v8, %v3100_v14  ;;  %v672_v29 = vsel %vm392_vm13, %v3883_v50, %v3101_v2  ;;  %v3490_v18 = vpop.eup %3489 }
  0x61   : > { %v820_v19 = vrot.slane %v6091_v53, 1  ;;  %v673_v22 = vsel %vm393_vm14, %v3885_v43, %v3102_v27  ;;  %v4011_v36 = vpack.c.bf16 %v672_v29, %v671_v12  ;;  %v6100_v26 = vshrl.u32 %v3995_v4, 16  ;;  %v3492_v20 = vpop.eup %3491 }
  0x62   : > { %v828_v8 = vrot.slane %v6099_v11, 1  ;;  %v674_v2 = vsel %vm394_vm15, %v3887_v52, %v3103_v40  ;;  %v3104_v50 = vadd.f32 -1.0, %v3488_v57  ;;  %v3105_v14 = vadd.f32 -1.0, %v3490_v18  ;;  %v3494_v21 = vpop.eup %3493 }
  0x63   : > { %v824_v53 = vor.u32 %v6101_v61, %v820_v19  ;;  %v4022_v43 = vsel %vm729_vm8, %v816_v25, %v820_v19  ;;  %v4024_v12 = vpack.c.bf16 %v674_v2, %v673_v22  ;;  %v6092_v27 = vshll.u32 %v4011_v36, 16  ;;  %v3294_v61 = vld [vmem:[%s3622_s23 + $0xb8] sm:$0xff]  }
  0x64   : > { %6189 = vst [vmem:[#allocation11_spill] sm:$0xff] %v4022_v43  ;;  %949 = vrot.lane.b32.xlu0 %v4022_v43, %s3563_s24  ;;  %v6098_v29 = vshrl.u32 %v4011_v36, 16  ;;  %v832_v52 = vor.u32 %v6100_v26, %v828_v8  ;;  %v3106_v57 = vadd.f32 -1.0, %v3492_v20  ;;  %v3107_v40 = vadd.f32 -1.0, %v3494_v21 }
  0x65   : > { %v4033_v18 = vsel %vm729_vm8, %v824_v53, %v828_v8  ;;  %v836_v25 = vrot.slane %v6092_v27, 1  ;;  %v6093_v19 = vshll.u32 %v4024_v12, 16  ;;  %v675_v22 = vsel %vm395_vm0, %v3896_v7, %v3104_v50 }
  0x66   : > { %6190 = vst [vmem:[#allocation12_spill] sm:$0xff] %v4033_v18  ;;  %951 = vrot.lane.b32.xlu1 %v4033_v18, %s3563_s24  ;;  %v676_v20 = vsel %vm396_vm1, %v3900_v13, %v3105_v14  ;;  %v677_v53 = vsel %vm397_vm2, %v3902_v17, %v3106_v57  ;;  %v678_v8 = vsel %vm398_vm3, %v3905_v35, %v3107_v40  ;;  %v6097_v2 = vshrl.u32 %v4024_v12, 16  ;;  %v3290_v14 = vld [vmem:[%s3622_s23 + $0x98] sm:$0xff]   ;;  %v3291_v40 = vld [vmem:[%s3622_s23 + $0xa0] sm:$0xff]  }
  0x67   : > { %v840_v7 = vor.u32 %v6098_v29, %v836_v25  ;;  %v844_v50 = vrot.slane %v6093_v19, 1  ;;  %v4058_v21 = vsel %vm729_vm8, %v832_v52, %v836_v25  ;;  %v4060_v13 = vpack.c.bf16 %v676_v20, %v675_v22 }
  0x68   : > { %6191 = vst [vmem:[#allocation13_spill] sm:$0xff] %v4058_v21  ;;  %953 = vrot.lane.b32.xlu0 %v4058_v21, %s3563_s24  ;;  %v4065_v17 = vpack.c.bf16 %v678_v8, %v677_v53  ;;  %3495 = vpow2.f32 %v545_v60  ;;  %v549_v35 = vmul.f32 1.442695, %v457_v54  ;;  %v551_v57 = vmul.f32 1.442695, %v458_v62 }
  0x69   : > { %v4069_v27 = vsel %vm729_vm8, %v840_v7, %v844_v50  ;;  %v6094_v19 = vshll.u32 %v4060_v13, 16  ;;  %v6096_v52 = vshrl.u32 %v4060_v13, 16  ;;  %v848_v25 = vor.u32 %v6097_v2, %v844_v50  ;;  %v3292_v7 = vld [vmem:[%s3622_s23 + $0xa8] sm:$0xff]  }
  0x6a   : > { %6192 = vst [vmem:[#allocation14_spill] sm:$0xff] %v4069_v27  ;;  %955 = vrot.lane.b32.xlu1 %v4069_v27, %s3563_s24  ;;  %v6095_v60 = vshll.u32 %v4065_v17, 16  ;;  %3497 = vpow2.f32 %v547_v38  ;;  %v4078_v54 = vunpack.c.l.bf16 %v3290_v14  ;;  %v4082_v22 = vunpack.c.h.bf16 %v3290_v14 }
  0x6b   : > { %v852_v62 = vrot.slane %v6094_v19, 1  ;;  %3499 = vpow2.f32 %v549_v35  ;;  %v4084_v20 = vunpack.c.l.bf16 %v3291_v40  ;;  %v4090_v8 = vunpack.c.h.bf16 %v3291_v40  ;;  %v3293_v19 = vld [vmem:[%s3622_s23 + $0xb0] sm:$0xff]  }
  0x6c   : > { %v4088_v53 = vrot.slane %v6095_v60, 1  ;;  %3501 = vpow2.f32 %v551_v57  ;;  %v459_v14 = vmin.f32 %v4078_v54, 0.0  ;;  %v460_v35 = vmin.f32 %v4082_v22, 0.0 }
  0x6d   : > { %v856_v38 = vor.u32 %v6096_v52, %v852_v62  ;;  %v4096_v50 = vsel %vm729_vm8, %v848_v25, %v852_v62  ;;  %v461_v40 = vmin.f32 %v4084_v20, 0.0  ;;  %v462_v60 = vmin.f32 %v4090_v8, 0.0 }
  0x6e   : > { %6193 = vst [vmem:[#allocation15_spill] sm:$0xff] %v4096_v50  ;;  %957 = vrot.lane.b32.xlu0 %v4096_v50, %s3563_s24  ;;  %v4109_v52 = vunpack.c.l.bf16 %v3292_v7  ;;  %v553_v25 = vmul.f32 1.442695, %v459_v14  ;;  %v555_v62 = vmul.f32 1.442695, %v460_v35  ;;  %v4113_v2 = vunpack.c.h.bf16 %v3292_v7  ;;  %v3295_v35 = vld [vmem:[%s3622_s23 + $0xc0] sm:$0xff]  }
  0x6f   : > { %v4105_v57 = vsel %vm729_vm8, %v856_v38, %v4088_v53  ;;  %v4115_v29 = vunpack.c.l.bf16 %v3293_v19  ;;  %v557_v11 = vmul.f32 1.442695, %v461_v40  ;;  %v559_v26 = vmul.f32 1.442695, %v462_v60 }
  0x70   : > { %6194 = vst [vmem:[#allocation16_spill] sm:$0xff] %v4105_v57  ;;  %959 = vrot.lane.b32.xlu1 %v4105_v57, %s3563_s24  ;;  %v4117_v38 = vunpack.c.h.bf16 %v3293_v19  ;;  %3503 = vpow2.f32 %v553_v25  ;;  %v463_v45 = vmin.f32 %v4109_v52, 0.0  ;;  %vm399_vm4 = vcmp.gt.f32.partialorder %v3938_v28, 0.0 }
  0x71   : > { %3505 = vpow2.f32 %v555_v62  ;;  %v464_v55 = vmin.f32 %v4113_v2, 0.0  ;;  %v465_v14 = vmin.f32 %v4115_v29, 0.0  ;;  %v4126_v40 = vunpack.c.l.bf16 %v3294_v61 }
  0x72   : > { %3507 = vpow2.f32 %v557_v11  ;;  %v466_v7 = vmin.f32 %v4117_v38, 0.0  ;;  %v561_v42 = vmul.f32 1.442695, %v463_v45  ;;  %v4128_v39 = vunpack.c.h.bf16 %v3294_v61 }
  0x73   : > { %3509 = vpow2.f32 %v559_v26  ;;  %v563_v60 = vmul.f32 1.442695, %v464_v55  ;;  %v565_v25 = vmul.f32 1.442695, %v465_v14  ;;  %v4130_v24 = vunpack.c.l.bf16 %v3295_v35 }
  0x74   : > { %3511 = vpow2.f32 %v561_v42  ;;  %v567_v62 = vmul.f32 1.442695, %v466_v7  ;;  %vm400_vm5 = vcmp.gt.f32.partialorder %v3940_v47, 0.0  ;;  %vm401_vm6 = vcmp.gt.f32.partialorder %v3948_v48, 0.0 }
  0x75   : > { %v3496_v19 = vpop.eup %3495  ;;  %3513 = vpow2.f32 %v563_v60  ;;  %v4134_v45 = vunpack.c.h.bf16 %v3295_v35  ;;  %v6112_v61 = vshrl.u32 %v4065_v17, 16  ;;  %vm402_vm7 = vcmp.gt.f32.partialorder %v3950_v41, 0.0 }
  0x76   : > { %v3108_v15 = vadd.f32 -1.0, %v3496_v19  ;;  %3515 = vpow2.f32 %v565_v25  ;;  %v467_v14 = vmin.f32 %v4126_v40, 0.0  ;;  %v468_v19 = vmin.f32 %v4128_v39, 0.0 }
  0x77   : > { %v3498_v31 = vpop.eup %3497  ;;  %3517 = vpow2.f32 %v567_v62  ;;  %v470_v60 = vmin.f32 %v4134_v45, 0.0  ;;  %vm403_vm9 = vcmp.gt.f32.partialorder %v4078_v54, 0.0  ;;  %vm404_vm10 = vcmp.gt.f32.partialorder %v4082_v22, 0.0 }
  0x78   : > { %v3500_v11 = vpop.eup %3499  ;;  %v3109_v32 = vadd.f32 -1.0, %v3498_v31  ;;  %v679_v55 = vsel %vm399_vm4, %v3938_v28, %v3108_v15  ;;  %v469_v31 = vmin.f32 %v4130_v24, 0.0  ;;  %v569_v25 = vmul.f32 1.442695, %v467_v14 }
  0x79   : > { %v3502_v42 = vpop.eup %3501  ;;  %v3110_v26 = vadd.f32 -1.0, %v3500_v11  ;;  %v864_v11 = vor.u32 %v6112_v61, %v4088_v53  ;;  %vm405_vm11 = vcmp.gt.f32.partialorder %v4084_v20, 0.0  ;;  %vm406_vm12 = vcmp.gt.f32.partialorder %v4090_v8, 0.0 }
  0x7a   : > { %v3111_v7 = vadd.f32 -1.0, %v3502_v42  ;;  %v680_v35 = vsel %vm400_vm5, %v3940_v47, %v3109_v32  ;;  %v571_v32 = vmul.f32 1.442695, %v468_v19  ;;  %v573_v47 = vmul.f32 1.442695, %v469_v31 }
  0x7b   : > { %v681_v15 = vsel %vm401_vm6, %v3948_v48, %v3110_v26  ;;  %v4148_v28 = vpack.c.bf16 %v680_v35, %v679_v55  ;;  %3519 = vpow2.f32 %v569_v25  ;;  %v575_v48 = vmul.f32 1.442695, %v470_v60 }
  0x7c   : > { %v682_v62 = vsel %vm402_vm7, %v3950_v41, %v3111_v7  ;;  %3521 = vpow2.f32 %v571_v32  ;;  %vm407_vm13 = vcmp.gt.f32.partialorder %v4109_v52, 0.0  ;;  %vm408_vm14 = vcmp.gt.f32.partialorder %v4113_v2, 0.0 }
  0x7d   : > { %6195 = vst [vmem:[#allocation17_spill] sm:$0xff] %v4148_v28  ;;  %v4155_v42 = vpack.c.bf16 %v682_v62, %v681_v15  ;;  %v6126_v44 = vshll.u32 %v4148_v28, 16  ;;  %v6128_v51 = vshrl.u32 %v4148_v28, 16  ;;  %v3504_v55 = vpop.eup %3503  ;;  %3523 = vpow2.f32 %v573_v47 }
  0x7e   : > { %v3506_v53 = vpop.eup %3505  ;;  %v3112_v14 = vadd.f32 -1.0, %v3504_v55  ;;  %3525 = vpow2.f32 %v575_v48  ;;  %vm409_vm15 = vcmp.gt.f32.partialorder %v4115_v29, 0.0  ;;  %vm410_vm0 = vcmp.gt.f32.partialorder %v4117_v38, 0.0 }
  0x7f   : > { %6196 = vst [vmem:[#allocation18_spill] sm:$0xff] %v4155_v42  ;;  %v868_v41 = vrot.slane %v6126_v44, 1  ;;  %v6116_v26 = vshll.u32 %v4155_v42, 16  ;;  %v6125_v7 = vshrl.u32 %v4155_v42, 16  ;;  %v3508_v35 = vpop.eup %3507  ;;  %v3113_v60 = vadd.f32 -1.0, %v3506_v53 }
  0x80   : > { %v3510_v25 = vpop.eup %3509  ;;  %v3114_v62 = vadd.f32 -1.0, %v3508_v35  ;;  %v683_v32 = vsel %vm403_vm9, %v4078_v54, %v3112_v14  ;;  %vm411_vm1 = vcmp.gt.f32.partialorder %v4126_v40, 0.0  ;;  %vm412_vm2 = vcmp.gt.f32.partialorder %v4128_v39, 0.0 }
  0x81   : > { %v872_v19 = vor.u32 %v6128_v51, %v868_v41  ;;  %v876_v31 = vrot.slane %v6116_v26, 1  ;;  %v4171_v15 = vsel %vm729_vm8, %v864_v11, %v868_v41  ;;  %v3512_v47 = vpop.eup %3511  ;;  %v3115_v11 = vadd.f32 -1.0, %v3510_v25 }
  0x82   : > { %6197 = vst [vmem:[#allocation19_spill] sm:$0xff] %v4171_v15  ;;  %961 = vrot.lane.b32.xlu0 %v4171_v15, %s3563_s24  ;;  %v684_v55 = vsel %vm404_vm10, %v4082_v22, %v3113_v60  ;;  %v3514_v41 = vpop.eup %3513  ;;  %v685_v54 = vsel %vm405_vm11, %v4084_v20, %v3114_v62  ;;  %v3116_v14 = vadd.f32 -1.0, %v3512_v47  ;;  %vm413_vm3 = vcmp.gt.f32.partialorder %v4130_v24, 0.0 }
  0x83   : > { %v4181_v48 = vsel %vm729_vm8, %v872_v19, %v876_v31  ;;  %v4192_v53 = vpack.c.bf16 %v684_v55, %v683_v32  ;;  %v3516_v35 = vpop.eup %3515  ;;  %v686_v22 = vsel %vm406_vm12, %v4090_v8, %v3115_v11  ;;  %v880_v19 = vor.u32 %v6125_v7, %v876_v31 }
  0x84   : > { %6198 = vst [vmem:[#allocation20_spill] sm:$0xff] %v4181_v48  ;;  %963 = vrot.lane.b32.xlu1 %v4181_v48, %s3563_s24  ;;  %v3117_v60 = vadd.f32 -1.0, %v3514_v41  ;;  %v3518_v25 = vpop.eup %3517  ;;  %v4201_v61 = vpack.c.bf16 %v686_v22, %v685_v54  ;;  %v3118_v32 = vadd.f32 -1.0, %v3516_v35  ;;  %v687_v55 = vsel %vm407_vm13, %v4109_v52, %v3116_v14 }
  0x85   : > { %6199 = vst [vmem:[#allocation21_spill] sm:$0xff] %v4192_v53  ;;  %v6114_v20 = vshll.u32 %v4192_v53, 16  ;;  %v6115_v62 = vshrl.u32 %v4192_v53, 16  ;;  %v3119_v47 = vadd.f32 -1.0, %v3518_v25  ;;  %vm414_vm4 = vcmp.gt.f32.partialorder %v4134_v45, 0.0 }
  0x86   : > { %v688_v8 = vsel %vm408_vm14, %v4113_v2, %v3117_v60  ;;  %v6113_v11 = vshll.u32 %v4201_v61, 16  ;;  %v689_v41 = vsel %vm409_vm15, %v4115_v29, %v3118_v32  ;;  %v6124_v52 = vshrl.u32 %v4201_v61, 16 }
  0x87   : > { %v884_v31 = vrot.slane %v6114_v20, 1  ;;  %v4218_v54 = vpack.c.bf16 %v688_v8, %v687_v55  ;;  %v690_v35 = vsel %vm410_vm0, %v4117_v38, %v3119_v47  ;;  %vm1004_vm5 = vcmask 1046528  }
  0x88   : > { %v3520_v2 = vpop.eup %3519  ;;  %v892_v22 = vrot.slane %v6113_v11, 1  ;;  %v4231_v29 = vpack.c.bf16 %v690_v35, %v689_v41  ;;  %v1030_v7 = vrot.slane %v4011_v36, 1  ;;  %v1032_v44 = vrot.slane %v4024_v12, 1 }
  0x89   : > { %v888_v14 = vor.u32 %v6115_v62, %v884_v31  ;;  %v4229_v60 = vsel %vm729_vm8, %v880_v19, %v884_v31  ;;  %v3522_v25 = vpop.eup %3521  ;;  %v6117_v38 = vshll.u32 %v4218_v54, 16  ;;  %v6123_v32 = vshrl.u32 %v4218_v54, 16 }
  0x8a   : > { %6200 = vst [vmem:[#allocation22_spill] sm:$0xff] %v4229_v60  ;;  %965 = vrot.lane.b32.xlu0 %v4229_v60, %s3563_s24  ;;  %v3120_v47 = vadd.f32 -1.0, %v3520_v2  ;;  %v3524_v55 = vpop.eup %3523  ;;  %v6121_v19 = vshll.u32 %v4231_v29, 16  ;;  %v896_v31 = vor.u32 %v6124_v52, %v892_v22  ;;  %v3121_v41 = vadd.f32 -1.0, %v3522_v25 }
  0x8b   : > { %v4239_v8 = vsel %vm729_vm8, %v888_v14, %v892_v22  ;;  %v3526_v35 = vpop.eup %3525  ;;  %v900_v11 = vrot.slane %v6117_v38, 1  ;;  %v3122_v20 = vadd.f32 -1.0, %v3524_v55  ;;  %v6122_v14 = vshrl.u32 %v4231_v29, 16 }
  0x8c   : > { %6201 = vst [vmem:[#allocation23_spill] sm:$0xff] %v4239_v8  ;;  %967 = vrot.lane.b32.xlu1 %v4239_v8, %s3563_s24  ;;  %v691_v2 = vsel %vm411_vm1, %v4126_v40, %v3120_v47  ;;  %v908_v62 = vrot.slane %v6121_v19, 1  ;;  %v3123_v26 = vadd.f32 -1.0, %v3526_v35  ;;  %v692_v22 = vsel %vm412_vm2, %v4128_v39, %v3121_v41 }
  0x8d   : > { %v904_v25 = vor.u32 %v6123_v32, %v900_v11  ;;  %v4260_v38 = vsel %vm729_vm8, %v896_v31, %v900_v11  ;;  %v693_v40 = vsel %vm413_vm3, %v4130_v24, %v3122_v20  ;;  %v4265_v47 = vpack.c.bf16 %v692_v22, %v691_v2 }
  0x8e   : > { %6202 = vst [vmem:[#allocation24_spill] sm:$0xff] %v4260_v38  ;;  %969 = vrot.lane.b32.xlu0 %v4260_v38, %s3563_s24  ;;  %v694_v55 = vsel %vm414_vm4, %v4134_v45, %v3123_v26  ;;  %v912_v39 = vor.u32 %v6122_v14, %v908_v62  ;;  %v1005_v35 = vrot.slane %v3741_v46, 1  ;;  %v1016_v19 = vrot.slane %v3792_v34, 1 }
  0x8f   : > { %v4275_v41 = vsel %vm729_vm8, %v904_v25, %v908_v62  ;;  %v4277_v11 = vpack.c.bf16 %v694_v55, %v693_v40  ;;  %v6118_v31 = vshll.u32 %v4265_v47, 16  ;;  %v6120_v24 = vshrl.u32 %v4265_v47, 16 }
  0x90   : > { %6203 = vst [vmem:[#allocation25_spill] sm:$0xff] %v4275_v41  ;;  %971 = vrot.lane.b32.xlu1 %v4275_v41, %s3563_s24  ;;  %v1006_v25 = vrot.slane %v3753_v56, 1  ;;  %v1018_v14 = vrot.slane %v3823_v58, 1  ;;  %v1026_v32 = vrot.slane %v3989_v16, 1  ;;  %v1028_v52 = vrot.slane %v3995_v4, 1 }
  0x91   : > { %v916_v20 = vrot.slane %v6118_v31, 1  ;;  %v6119_v45 = vshll.u32 %v4277_v11, 16  ;;  %v6127_v26 = vshrl.u32 %v4277_v11, 16  ;;  %v1008_v31 = vrot.slane %v3711_v23, 1 }
  0x92   : > { %v1036_v51 = vrot.slane %v4065_v17, 1  ;;  %v1038_v46 = vrot.slane %v4148_v28, 1  ;;  %v1040_v50 = vrot.slane %v4155_v42, 1  ;;  %v6222_v27 = vshrl.u32 %v4148_v28, 16 }
  0x93   : > { %v920_v62 = vor.u32 %v6120_v24, %v916_v20  ;;  %v924_v2 = vrot.slane %v6119_v45, 1  ;;  %v4293_v22 = vsel %vm729_vm8, %v912_v39, %v916_v20  ;;  %v1007_v39 = vsel %vm1004_vm5, %v1005_v35, %v1006_v25 }
  0x94   : > { %6204 = vst [vmem:[#allocation26_spill] sm:$0xff] %v4293_v22  ;;  %973 = vrot.lane.b32.xlu0 %v4293_v22, %s3563_s24  ;;  %v1010_v20 = vrot.slane %v3723_v30, 1  ;;  %v1009_v45 = vsel %vm1004_vm5, %v1006_v25, %v1008_v31  ;;  %v1014_v24 = vrot.slane %v3789_v5, 1  ;;  %v1265_v21 = vrot.slane %v6222_v27, 4 }
  0x95   : > { %v4299_v40 = vsel %vm729_vm8, %v920_v62, %v924_v2  ;;  %v4303_v55 = vor.u32 %v6127_v26, %v924_v2  ;;  %v1012_v62 = vrot.slane %v3767_v1, 1  ;;  %v1034_v26 = vrot.slane %v4060_v13, 1 }
  0x96   : > { %6205 = vst [vmem:[#allocation27_spill] sm:$0xff] %v4299_v40  ;;  %975 = vrot.lane.b32.xlu1 %v4299_v40, %s3563_s24  ;;  %v1011_v2 = vsel %vm1004_vm5, %v1008_v31, %v1010_v20  ;;  %v4330_v31 = vsel %vm1004_vm5, %v1014_v24, %v1016_v19  ;;  %v6226_v40 = vshrl.u32 %v4155_v42, 16  ;;  %v6227_v22 = vshll.u32 %v4155_v42, 16 }
  0x97   : > { %6206 = vst [vmem:[#allocation28_spill] sm:$0xff] %v4303_v55  ;;  %v4319_v35 = vsel %vm1004_vm5, %v1010_v20, %v1012_v62  ;;  %v4324_v25 = vsel %vm1004_vm5, %v1012_v62, %v1014_v24  ;;  %6209 = vst [vmem:[#allocation31_spill] sm:$0xff] %v4330_v31  ;;  %v1022_v20 = vrot.slane %v3930_v37, 1  ;;  %v6232_v63 = vshrl.u32 %v4201_v61, 16 }
  0x98   : > { %977 = vrot.lane.b32.xlu0 %v4303_v55, %s3563_s24  ;;  %6207 = vst [vmem:[#allocation29_spill] sm:$0xff] %v4319_v35  ;;  %6208 = vst [vmem:[#allocation30_spill] sm:$0xff] %v4324_v25  ;;  %v1269_v18 = vrot.slane %v6226_v40, 4  ;;  %v1270_v27 = vrot.slane %v6227_v22, 5  ;;  %vm1205_vm6 = vsmask.f32 3328 }
  0x99   : > { %v1277_v38 = vrot.slane %v6232_v63, 4  ;;  %v6236_v63 = vshll.u32 %v4218_v54, 16  ;;  %v6241_v33 = vshll.u32 %v4265_v47, 16  ;;  %v6242_v60 = vshll.u32 %v4277_v11, 16  ;;  %s3073_s24 = sshll.u32 %s6469_s19, 3 }
  0x9a   : > { %1054 = vrot.lane.b32.xlu1 %v1007_v39, %s3564_s25  ;;  %v4336_v39 = vsel %vm1004_vm5, %v1016_v19, %v1018_v14  ;;  %v1271_v22 = vor.u32 %v1270_v27, %v1269_v18  ;;  %vm1105_vm7 = vcmask 1043456   ;;  %v6284_v0 = vshll.u32 %v4011_v36, 16 }
  0x9b   : > { %6210 = vst [vmem:[#allocation32_spill] sm:$0xff] %v4336_v39  ;;  %v6289_v57 = vshll.u32 %v4060_v13, 16  ;;  %vm1357_vm11 = vcmask 1042432   ;;  %vm1633_vm12 = vcmask 31744   ;;  %vm1684_vm13 = vcmask 64512  }
  0x9c   : > { %1056 = vrot.lane.b32.xlu0 %v1009_v45, %s3564_s25  ;;  %v1020_v45 = vrot.slane %v3831_v59, 1  ;;  %vm1735_vm14 = vcmask 97280   ;;  %vm1786_vm1 = vcmask 130048   ;;  %vm2341_vm2 = vcmask 1041408  }
  0x9d   : > { %vm1837_vm3 = vcmask 162816  }
  0x9e   : > { %1058 = vrot.lane.b32.xlu1 %v1011_v2, %s3564_s25  ;;  %v4342_v62 = vsel %vm1004_vm5, %v1018_v14, %v1020_v45  ;;  %v1024_v2 = vrot.slane %v3942_v10, 1  ;;  %v4348_v24 = vsel %vm1004_vm5, %v1020_v45, %v1022_v20  ;;  %v4366_v45 = vsel %vm1004_vm5, %v1026_v32, %v1028_v52 }
  0x9f   : > { %6211 = vst [vmem:[#allocation33_spill] sm:$0xff] %v4342_v62  ;;  %6212 = vst [vmem:[#allocation34_spill] sm:$0xff] %v4348_v24 }
  0xa0   : > { %1060 = vrot.lane.b32.xlu0 %v4319_v35, %s3564_s25  ;;  %v4354_v19 = vsel %vm1004_vm5, %v1022_v20, %v1024_v2  ;;  %v4360_v14 = vsel %vm1004_vm5, %v1024_v2, %v1026_v32  ;;  %6215 = vst [vmem:[#allocation37_spill] sm:$0xff] %v4366_v45  ;;  %v4372_v20 = vsel %vm1004_vm5, %v1028_v52, %v1030_v7 }
  0xa1   : > { %6213 = vst [vmem:[#allocation35_spill] sm:$0xff] %v4354_v19  ;;  %6214 = vst [vmem:[#allocation36_spill] sm:$0xff] %v4360_v14  ;;  %v4378_v2 = vsel %vm1004_vm5, %v1030_v7, %v1032_v44  ;;  %v4384_v32 = vsel %vm1004_vm5, %v1032_v44, %v1034_v26  ;;  %v4390_v52 = vsel %vm1004_vm5, %v1034_v26, %v1036_v51  ;;  %v1046_v26 = vrot.slane %v4218_v54, 1 }
  0xa2   : > { %1062 = vrot.lane.b32.xlu1 %v4324_v25, %s3564_s25  ;;  %6216 = vst [vmem:[#allocation38_spill] sm:$0xff] %v4372_v20  ;;  %6217 = vst [vmem:[#allocation39_spill] sm:$0xff] %v4378_v2  ;;  %v4396_v7 = vsel %vm1004_vm5, %v1036_v51, %v1038_v46  ;;  %v4402_v44 = vsel %vm1004_vm5, %v1038_v46, %v1040_v50  ;;  %v6224_v51 = vshll.u32 %v4148_v28, 16  ;;  %v1048_v46 = vrot.slane %v4231_v29, 1 }
  0xa3   : > { %6218 = vst [vmem:[#allocation40_spill] sm:$0xff] %v4384_v32  ;;  %6219 = vst [vmem:[#allocation41_spill] sm:$0xff] %v4390_v52 }
  0xa4   : > { %1064 = vrot.lane.b32.xlu0 %v4330_v31, %s3564_s25  ;;  %6220 = vst [vmem:[#allocation42_spill] sm:$0xff] %v4396_v7  ;;  %6221 = vst [vmem:[#allocation43_spill] sm:$0xff] %v4402_v44  ;;  %v4466_v8 = vsel %vm1004_vm5, %v1046_v26, %v1048_v46 }
  0xa5   : > { %6240 = vst [vmem:[#allocation48_spill] sm:$0xff] %v4466_v8 }
  0xa6   : > { %1066 = vrot.lane.b32.xlu1 %v4336_v39, %s3564_s25 }
  0xa8   : > { %1068 = vrot.lane.b32.xlu0 %v4342_v62, %s3564_s25  ;;  %v4446_v62 = vrot.slane %v4277_v11, 1 }
  0xaa   : > { %1070 = vrot.lane.b32.xlu1 %v4348_v24, %s3564_s25  ;;  %6235 = vst [vmem:[#allocation47_spill] sm:$0xff] %v4446_v62 }
  0xac   : > { %1072 = vrot.lane.b32.xlu0 %v4354_v19, %s3564_s25 }
  0xae   : > { %1074 = vrot.lane.b32.xlu1 %v4360_v14, %s3564_s25 }
  0xb0   : > { %1076 = vrot.lane.b32.xlu0 %v4366_v45, %s3564_s25  ;;  %v1266_v45 = vrot.slane %v6224_v51, 5  ;;  %v6228_v51 = vshrl.u32 %v4192_v53, 16 }
  0xb2   : > { %1078 = vrot.lane.b32.xlu1 %v4372_v20, %s3564_s25  ;;  %v1042_v20 = vrot.slane %v4192_v53, 1  ;;  %v4425_v43 = vor.u32 %v1266_v45, %v1265_v21  ;;  %v1273_v19 = vrot.slane %v6228_v51, 4  ;;  %v6233_v45 = vshll.u32 %v4201_v61, 16 }
  0xb4   : > { %1080 = vrot.lane.b32.xlu0 %v4378_v2, %s3564_s25  ;;  %v1044_v2 = vrot.slane %v4201_v61, 1  ;;  %v4415_v14 = vsel %vm1004_vm5, %v1040_v50, %v1042_v20  ;;  %v6229_v50 = vshll.u32 %v4192_v53, 16  ;;  %v1278_v51 = vrot.slane %v6233_v45, 5 }
  0xb5   : > { %6225 = vst [vmem:[#allocation44_spill] sm:$0xff] %v4415_v14  ;;  %v4450_v18 = vsel %vm1205_vm6, %v4425_v43, %v1271_v22  ;;  %v6238_v45 = vshll.u32 %v4231_v29, 16 }
  0xb6   : > { %1082 = vrot.lane.b32.xlu1 %v4384_v32, %s3564_s25  ;;  %v6223_v32 = vshrl.u32 %v4277_v11, 16  ;;  %v1274_v24 = vrot.slane %v6229_v50, 5  ;;  %v4432_v41 = vsel %vm1004_vm5, %v1044_v2, %v1046_v26  ;;  %v4435_v40 = vsel %vm1004_vm5, %v1042_v20, %v1044_v2 }
  0xb7   : > { %6230 = vst [vmem:[#allocation45_spill] sm:$0xff] %v4432_v41  ;;  %6231 = vst [vmem:[#allocation46_spill] sm:$0xff] %v4435_v40  ;;  %v6234_v50 = vshrl.u32 %v4218_v54, 16  ;;  %v1282_v20 = vrot.slane %v6236_v63, 5  ;;  %v6237_v2 = vshrl.u32 %v4231_v29, 16 }
  0xb8   : > { %1084 = vrot.lane.b32.xlu0 %v4390_v52, %s3564_s25  ;;  %v1293_v55 = vrot.slane %v6223_v32, 4  ;;  %v1050_v32 = vrot.slane %v4265_v47, 1  ;;  %v1275_v21 = vor.u32 %v1274_v24, %v1273_v19  ;;  %v1279_v24 = vor.u32 %v1278_v51, %v1277_v38 }
  0xb9   : > { %v1281_v9 = vrot.slane %v6234_v50, 4  ;;  %v1285_v27 = vrot.slane %v6237_v2, 4  ;;  %v1286_v50 = vrot.slane %v6238_v45, 5  ;;  %v1290_v2 = vrot.slane %v6241_v33, 5 }
  0xba   : > { %1086 = vrot.lane.b32.xlu1 %v4396_v7, %s3564_s25  ;;  %v4459_v19 = vsel %vm1205_vm6, %v1271_v22, %v1275_v21  ;;  %v4475_v38 = vsel %vm1205_vm6, %v1275_v21, %v1279_v24  ;;  %v4478_v51 = vsel %vm1004_vm5, %v1048_v46, %v1050_v32  ;;  %v1107_v33 = vrot.slane %v3711_v23, 4 }
  0xbb   : > { %v1283_v63 = vor.u32 %v1282_v20, %v1281_v9  ;;  %v1287_v22 = vor.u32 %v1286_v50, %v1285_v27  ;;  %6243 = vst [vmem:[#allocation49_spill] sm:$0xff] %v4478_v51  ;;  %v4493_v21 = vsel %vm1004_vm5, %v1050_v32, %v4446_v62  ;;  %v1106_v46 = vrot.slane %v3753_v56, 4  ;;  %v4496_v20 = vpop.permute.xlu0 %929  ;;  %v4508_v27 = vpop.permute.xlu1 %933  ;;  %v3296_v32 = vld [vmem:[%s3622_s23 + $0xc8] sm:$0xff]  }
  0xbc   : > { %1088 = vrot.lane.b32.xlu0 %v4402_v44, %s3564_s25  ;;  %6244 = vst [vmem:[#allocation50_spill] sm:$0xff] %v4493_v21  ;;  %6245 = vst [vmem:[#allocation51_spill] sm:$0xff] %v4496_v20  ;;  %v1111_v45 = vrot.slane %v3767_v1, 4  ;;  %v1115_v56 = vrot.slane %v3792_v34, 4 }
  0xbd   : > { %6246 = vst [vmem:[#allocation52_spill] sm:$0xff] %v4508_v27  ;;  %v1117_v27 = vrot.slane %v3823_v58, 4 }
  0xbe   : > { %1090 = vrot.lane.b32.xlu1 %v4415_v14, %s3564_s25  ;;  %v6239_v14 = vshrl.u32 %v4265_v47, 16 }
  0xbf   : > { %v4528_v20 = vpop.permute.xlu1 %935 }
  0xc0   : > { %1092 = vrot.lane.b32.xlu0 %v4435_v40, %s3564_s25  ;;  %v1289_v39 = vrot.slane %v6239_v14, 4  ;;  %v1294_v40 = vrot.slane %v6242_v60, 5  ;;  %v4481_v14 = vsel %vm1205_vm6, %v1279_v24, %v1283_v63  ;;  %v4489_v60 = vsel %vm1205_vm6, %v1283_v63, %v1287_v22  ;;  %6248 = vst [vmem:[#allocation54_spill] sm:$0xff] %v4528_v20 }
  0xc1   : > { %v1108_v24 = vsel %vm1105_vm7, %v1106_v46, %v1107_v33  ;;  %v1113_v63 = vrot.slane %v3789_v5, 4 }
  0xc2   : > { %1094 = vrot.lane.b32.xlu1 %v4432_v41, %s3564_s25  ;;  %v1291_v9 = vor.u32 %v1290_v2, %v1289_v39  ;;  %v4483_v26 = vor.u32 %v1294_v40, %v1293_v55  ;;  %v1109_v40 = vrot.slane %v3723_v30, 4  ;;  %v4519_v2 = vpop.permute.xlu0 %931 }
  0xc3   : > { %6247 = vst [vmem:[#allocation53_spill] sm:$0xff] %v4519_v2  ;;  %v4543_v20 = vpop.permute.xlu1 %939 }
  0xc4   : > { %1096 = vrot.lane.b32.xlu0 %v4466_v8, %s3564_s25  ;;  %v4500_v55 = vsel %vm1205_vm6, %v1291_v9, %v4483_v26  ;;  %v4503_v39 = vsel %vm1205_vm6, %v1287_v22, %v1291_v9  ;;  %v1110_v50 = vsel %vm1105_vm7, %v1107_v33, %v1109_v40  ;;  %v4521_v22 = vunpack.c.l.bf16 %v3296_v32  ;;  %6250 = vst [vmem:[#allocation56_spill] sm:$0xff] %v4543_v20 }
  0xc5   : > { %v4524_v9 = vunpack.c.h.bf16 %v3296_v32  ;;  %v1112_v46 = vsel %vm1105_vm7, %v1109_v40, %v1111_v45  ;;  %v1114_v33 = vsel %vm1105_vm7, %v1111_v45, %v1113_v63  ;;  %v1116_v32 = vsel %vm1105_vm7, %v1113_v63, %v1115_v56 }
  0xc6   : > { %1098 = vrot.lane.b32.xlu1 %v4478_v51, %s3564_s25  ;;  %v471_v2 = vmin.f32 %v4521_v22, 0.0  ;;  %v1119_v40 = vrot.slane %v3831_v59, 4  ;;  %v1121_v45 = vrot.slane %v3930_v37, 4  ;;  %v1123_v63 = vrot.slane %v3942_v10, 4 }
  0xc7   : > { %vm415_vm9 = vcmp.gt.f32.partialorder %v4521_v22, 0.0  ;;  %vm416_vm10 = vcmp.gt.f32.partialorder %v4524_v9, 0.0 }
  0xc8   : > { %1100 = vrot.lane.b32.xlu0 %v4493_v21, %s3564_s25  ;;  %v577_v21 = vmul.f32 1.442695, %v471_v2  ;;  %v1120_v51 = vsel %vm1105_vm7, %v1117_v27, %v1119_v40  ;;  %v1127_v2 = vrot.slane %v3995_v4, 4 }
  0xca   : > { %1102 = vrot.lane.b32.xlu1 %v4446_v62, %s3564_s25  ;;  %v4538_v62 = vpop.permute.xlu0 %937  ;;  %3527 = vpow2.f32 %v577_v21  ;;  %v1131_v21 = vrot.slane %v4024_v12, 4 }
  0xcb   : > { %6249 = vst [vmem:[#allocation55_spill] sm:$0xff] %v4538_v62  ;;  %v1122_v62 = vsel %vm1105_vm7, %v1119_v40, %v1121_v45 }
  0xcc   : > { %1155 = vrot.lane.b32.xlu0 %v1108_v24, %s3565_s26  ;;  %v472_v24 = vmin.f32 %v4524_v9, 0.0 }
  0xce   : > { %1157 = vrot.lane.b32.xlu1 %v1110_v50, %s3565_s26  ;;  %v1118_v50 = vsel %vm1105_vm7, %v1115_v56, %v1117_v27  ;;  %v4551_v8 = vpop.permute.xlu0 %941  ;;  %v1124_v56 = vsel %vm1105_vm7, %v1121_v45, %v1123_v63  ;;  %v1133_v45 = vrot.slane %v4060_v13, 4 }
  0xcf   : > { %6251 = vst [vmem:[#allocation57_spill] sm:$0xff] %v4551_v8 }
  0xd0   : > { %1159 = vrot.lane.b32.xlu0 %v1112_v46, %s3565_s26  ;;  %v579_v46 = vmul.f32 1.442695, %v472_v24  ;;  %v4556_v24 = vpop.permute.xlu1 %943 }
  0xd1   : > { %6252 = vst [vmem:[#allocation58_spill] sm:$0xff] %v4556_v24 }
  0xd2   : > { %1161 = vrot.lane.b32.xlu1 %v1114_v33, %s3565_s26  ;;  %v1125_v33 = vrot.slane %v3989_v16, 4  ;;  %3529 = vpow2.f32 %v579_v46 }
  0xd4   : > { %1163 = vrot.lane.b32.xlu0 %v1116_v32, %s3565_s26  ;;  %v1126_v27 = vsel %vm1105_vm7, %v1123_v63, %v1125_v33  ;;  %v1129_v32 = vrot.slane %v4011_v36, 4  ;;  %v1128_v40 = vsel %vm1105_vm7, %v1125_v33, %v1127_v2  ;;  %v4569_v46 = vpop.permute.xlu1 %947  ;;  %v1135_v63 = vrot.slane %v4065_v17, 4 }
  0xd5   : > { %v1134_v33 = vsel %vm1105_vm7, %v1131_v21, %v1133_v45 }
  0xd6   : > { %1165 = vrot.lane.b32.xlu1 %v1118_v50, %s3565_s26  ;;  %v1130_v50 = vsel %vm1105_vm7, %v1127_v2, %v1129_v32  ;;  %v1136_v8 = vsel %vm1105_vm7, %v1133_v45, %v1135_v63 }
  0xd8   : > { %1167 = vrot.lane.b32.xlu0 %v1120_v51, %s3565_s26  ;;  %v4564_v51 = vpop.permute.xlu0 %945  ;;  %v4582_v20 = vpop.permute.xlu1 %951 }
  0xda   : > { %1169 = vrot.lane.b32.xlu1 %v1122_v62, %s3565_s26  ;;  %v1132_v62 = vsel %vm1105_vm7, %v1129_v32, %v1131_v21  ;;  %v1141_v21 = vrot.slane %v4192_v53, 4 }
  0xdc   : > { %1171 = vrot.lane.b32.xlu0 %v1124_v56, %s3565_s26  ;;  %v1137_v56 = vrot.slane %v4148_v28, 4  ;;  %v4577_v24 = vpop.permute.xlu0 %949 }
  0xde   : > { %1173 = vrot.lane.b32.xlu1 %v1126_v27, %s3565_s26  ;;  %v3528_v27 = vpop.eup %3527  ;;  %v1138_v32 = vsel %vm1105_vm7, %v1135_v63, %v1137_v56  ;;  %v1145_v63 = vrot.slane %v4218_v54, 4 }
  0xdf   : > { %v3530_v2 = vpop.eup %3529 }
  0xe0   : > { %1175 = vrot.lane.b32.xlu0 %v1128_v40, %s3565_s26  ;;  %v1139_v40 = vrot.slane %v4155_v42, 4  ;;  %v3125_v41 = vadd.f32 -1.0, %v3530_v2  ;;  %v4590_v44 = vpop.permute.xlu0 %953  ;;  %v1147_v2 = vrot.slane %v4231_v29, 4 }
  0xe1   : > { %6253 = vst [vmem:[#allocation59_spill] sm:$0xff] %v4590_v44 }
  0xe2   : > { %1177 = vrot.lane.b32.xlu1 %v1130_v50, %s3565_s26  ;;  %v3124_v50 = vadd.f32 -1.0, %v3528_v27  ;;  %v1140_v3 = vsel %vm1105_vm7, %v1137_v56, %v1139_v40  ;;  %v1142_v45 = vsel %vm1105_vm7, %v1139_v40, %v1141_v21  ;;  %v696_v56 = vsel %vm416_vm10, %v4524_v9, %v3125_v41 }
  0xe3   : > { %v1149_v40 = vrot.slane %v4265_v47, 4  ;;  %v1151_v41 = vrot.slane %v4277_v11, 4  ;;  %vm2268_vm10 = vcmask 293888  }
  0xe4   : > { %1179 = vrot.lane.b32.xlu0 %v1132_v62, %s3565_s26  ;;  %v1143_v62 = vrot.slane %v4201_v61, 4  ;;  %v4607_v44 = vpop.permute.xlu0 %957 }
  0xe5   : > { %6255 = vst [vmem:[#allocation61_spill] sm:$0xff] %v4607_v44  ;;  %v1150_v9 = vsel %vm1105_vm7, %v1147_v2, %v1149_v40 }
  0xe6   : > { %1181 = vrot.lane.b32.xlu1 %v1134_v33, %s3565_s26  ;;  %v4597_v33 = vpop.permute.xlu1 %955  ;;  %v1144_v27 = vsel %vm1105_vm7, %v1141_v21, %v1143_v62 }
  0xe7   : > { %6254 = vst [vmem:[#allocation60_spill] sm:$0xff] %v4597_v33 }
  0xe8   : > { %1183 = vrot.lane.b32.xlu0 %v1136_v8, %s3565_s26  ;;  %v695_v8 = vsel %vm415_vm9, %v4521_v22, %v3124_v50  ;;  %v1152_v50 = vsel %vm1105_vm7, %v1149_v40, %v1151_v41  ;;  %v6263_v40 = vshrl.u32 %v3767_v1, 16  ;;  %vm2053_vm9 = vsmask.f32 4352 }
  0xe9   : > { %v4609_v31 = vpack.c.bf16 %v696_v56, %v695_v8 }
  0xea   : > { %1185 = vrot.lane.b32.xlu1 %v1138_v32, %s3565_s26  ;;  %v1146_v32 = vsel %vm1105_vm7, %v1143_v62, %v1145_v63  ;;  %v4613_v22 = vpop.permute.xlu1 %959 }
  0xeb   : > { %6256 = vst [vmem:[#allocation62_spill] sm:$0xff] %v4613_v22  ;;  %v1153_v21 = vrot.slane %v4609_v31, 4 }
  0xec   : > { %1187 = vrot.lane.b32.xlu0 %v1140_v3, %s3565_s26  ;;  %v1148_v3 = vsel %vm1105_vm7, %v1145_v63, %v1147_v2  ;;  %v6259_v63 = vshll.u32 %v3723_v30, 16  ;;  %v6261_v2 = vshll.u32 %v3711_v23, 16 }
  0xee   : > { %1189 = vrot.lane.b32.xlu1 %v1142_v45, %s3565_s26  ;;  %v6258_v45 = vshrl.u32 %v3723_v30, 16  ;;  %v1210_v56 = vrot.slane %v6259_v63, 5  ;;  %v1207_v22 = vrot.slane %v6261_v2, 5 }
  0xf0   : > { %1191 = vrot.lane.b32.xlu0 %v1144_v27, %s3565_s26  ;;  %v1209_v8 = vrot.slane %v6258_v45, 4  ;;  %v6260_v27 = vshrl.u32 %v3711_v23, 16  ;;  %v6264_v45 = vshll.u32 %v3767_v1, 16 }
  0xf2   : > { %1193 = vrot.lane.b32.xlu1 %v1146_v32, %s3565_s26  ;;  %v1206_v32 = vrot.slane %v6260_v27, 4  ;;  %v1214_v33 = vrot.slane %v6264_v45, 5  ;;  %v1211_v63 = vor.u32 %v1210_v56, %v1209_v8  ;;  %v6266_v27 = vshll.u32 %v3789_v5, 16 }
  0xf3   : > { %v6269_v45 = vshll.u32 %v3792_v34, 16 }
  0xf4   : > { %1195 = vrot.lane.b32.xlu0 %v1148_v3, %s3565_s26  ;;  %v4621_v62 = vpop.permute.xlu0 %961  ;;  %v1154_v3 = vsel %vm1105_vm7, %v1151_v41, %v1153_v21  ;;  %v1218_v52 = vrot.slane %v6266_v27, 5  ;;  %v1208_v41 = vor.u32 %v1207_v22, %v1206_v32  ;;  %v6272_v22 = vshll.u32 %v3823_v58, 16 }
  0xf5   : > { %6257 = vst [vmem:[#allocation63_spill] sm:$0xff] %v4621_v62  ;;  %v1213_v62 = vrot.slane %v6263_v40, 4  ;;  %v6268_v40 = vshrl.u32 %v3792_v34, 16  ;;  %v1222_v35 = vrot.slane %v6269_v45, 5  ;;  %v6273_v27 = vshrl.u32 %v3831_v59, 16 }
  0xf6   : > { %1197 = vrot.lane.b32.xlu1 %v1150_v9, %s3565_s26  ;;  %v4633_v44 = vpop.permute.xlu1 %963  ;;  %v6265_v9 = vshrl.u32 %v3789_v5, 16  ;;  %v1212_v8 = vsel %vm1205_vm6, %v1208_v41, %v1211_v63  ;;  %v1226_v32 = vrot.slane %v6272_v22, 5  ;;  %v6275_v22 = vshrl.u32 %v3930_v37, 16 }
  0xf7   : > { %6262 = vst [vmem:[#allocation64_spill] sm:$0xff] %v4633_v44  ;;  %v1215_v44 = vor.u32 %v1214_v33, %v1213_v62  ;;  %v1221_v25 = vrot.slane %v6268_v40, 4  ;;  %v6274_v40 = vshll.u32 %v3831_v59, 16  ;;  %vm1990_vm7 = vcmask 261120  }
  0xf8   : > { %1199 = vrot.lane.b32.xlu0 %v1152_v50, %s3565_s26  ;;  %v1217_v7 = vrot.slane %v6265_v9, 4  ;;  %v6271_v9 = vshrl.u32 %v3823_v58, 16 }
  0xf9   : > { %v1216_v33 = vsel %vm1205_vm6, %v1211_v63, %v1215_v44  ;;  %v1223_v62 = vor.u32 %v1222_v35, %v1221_v25  ;;  %v1230_v45 = vrot.slane %v6274_v40, 5 }
  0xfa   : > { %1201 = vrot.lane.b32.xlu1 %v1154_v3, %s3565_s26  ;;  %v1219_v56 = vor.u32 %v1218_v52, %v1217_v7  ;;  %v1225_v3 = vrot.slane %v6271_v9, 4 }
  0xfc   : > { %v4645_v2 = vpop.permute.xlu0 %965  ;;  %1203 = vrot.lane.b32.xlu0 %v1153_v21, %s3565_s26  ;;  %v1229_v21 = vrot.slane %v6273_v27, 4  ;;  %v1220_v7 = vsel %vm1205_vm6, %v1215_v44, %v1219_v56  ;;  %v1227_v9 = vor.u32 %v1226_v32, %v1225_v3  ;;  %v1224_v25 = vsel %vm1205_vm6, %v1219_v56, %v1223_v62 }
  0xfd   : > { %6267 = vst [vmem:[#allocation65_spill] sm:$0xff] %v4645_v2  ;;  %v6278_v2 = vshll.u32 %v3942_v10, 16 }
  0xfe   : > { %v4652_v50 = vpop.permute.xlu1 %967  ;;  %1306 = vrot.lane.b32.xlu1 %v1208_v41, %s3566_s27  ;;  %v6276_v41 = vshll.u32 %v3930_v37, 16  ;;  %v1231_v27 = vor.u32 %v1230_v45, %v1229_v21  ;;  %v1228_v3 = vsel %vm1205_vm6, %v1223_v62, %v1227_v9 }
  0xff   : > { %6270 = vst [vmem:[#allocation66_spill] sm:$0xff] %v4652_v50  ;;  %v1233_v50 = vrot.slane %v6275_v22, 4  ;;  %v1238_v44 = vrot.slane %v6278_v2, 5  ;;  %v6279_v22 = vshrl.u32 %v3989_v16, 16  ;;  %v6281_v2 = vshrl.u32 %v3995_v4, 16 }
 0x100   : > { %1308 = vrot.lane.b32.xlu0 %v1212_v8, %s3566_s27  ;;  %v4666_v52 = vpop.permute.xlu0 %969  ;;  %v1234_v63 = vrot.slane %v6276_v41, 5  ;;  %v6277_v8 = vshrl.u32 %v3942_v10, 16  ;;  %v1232_v21 = vsel %vm1205_vm6, %v1227_v9, %v1231_v27  ;;  %v1250_v9 = vrot.slane %v6284_v0, 5 }
 0x101   : > { %v1241_v41 = vrot.slane %v6279_v22, 4 }
 0x102   : > { %1310 = vrot.lane.b32.xlu1 %v1216_v33, %s3566_s27  ;;  %v4674_v35 = vpop.permute.xlu1 %971  ;;  %v1237_v40 = vrot.slane %v6277_v8, 4  ;;  %v1235_v32 = vor.u32 %v1234_v63, %v1233_v50  ;;  %v6280_v33 = vshll.u32 %v3989_v16, 16  ;;  %v1245_v8 = vrot.slane %v6281_v2, 4 }
 0x104   : > { %1312 = vrot.lane.b32.xlu0 %v1220_v7, %s3566_s27  ;;  %v1242_v48 = vrot.slane %v6280_v33, 5  ;;  %v1239_v45 = vor.u32 %v1238_v44, %v1237_v40  ;;  %v6282_v7 = vshll.u32 %v3995_v4, 16  ;;  %v1236_v63 = vsel %vm1205_vm6, %v1231_v27, %v1235_v32 }
 0x106   : > { %1314 = vrot.lane.b32.xlu1 %v1224_v25, %s3566_s27  ;;  %v4688_v56 = vpop.permute.xlu0 %973  ;;  %v1246_v62 = vrot.slane %v6282_v7, 5  ;;  %v1243_v22 = vor.u32 %v1242_v48, %v1241_v41  ;;  %v6283_v25 = vshrl.u32 %v4011_v36, 16  ;;  %v1240_v44 = vsel %vm1205_vm6, %v1235_v32, %v1239_v45 }
 0x107   : > { %v6285_v7 = vshrl.u32 %v4024_v12, 16  ;;  %v1258_v32 = vrot.slane %v6289_v57, 5 }
 0x108   : > { %v4695_v50 = vpop.permute.xlu1 %975  ;;  %1316 = vrot.lane.b32.xlu0 %v1228_v3, %s3566_s27  ;;  %v1249_v33 = vrot.slane %v6283_v25, 4  ;;  %v1247_v2 = vor.u32 %v1246_v62, %v1245_v8  ;;  %v6286_v3 = vshll.u32 %v4024_v12, 16  ;;  %v1244_v41 = vsel %vm1205_vm6, %v1239_v45, %v1243_v22 }
 0x109   : > { %v1253_v15 = vrot.slane %v6285_v7, 4 }
 0x10a   : > { %1318 = vrot.lane.b32.xlu1 %v1232_v21, %s3566_s27  ;;  %v4704_v40 = vpop.permute.xlu0 %977  ;;  %v1254_v27 = vrot.slane %v6286_v3, 5  ;;  %v1251_v0 = vor.u32 %v1250_v9, %v1249_v33  ;;  %v6288_v21 = vshrl.u32 %v4060_v13, 16  ;;  %v1248_v62 = vsel %vm1205_vm6, %v1243_v22, %v1247_v2 }
 0x10b   : > { %v6290_v3 = vshrl.u32 %v4065_v17, 16 }
 0x10c   : > { %v4711_v48 = vpop.permute.xlu1 %1054  ;;  %1320 = vrot.lane.b32.xlu0 %v1236_v63, %s3566_s27  ;;  %v1257_v25 = vrot.slane %v6288_v21, 4  ;;  %v1255_v7 = vor.u32 %v1254_v27, %v1253_v15  ;;  %v6291_v63 = vshll.u32 %v4065_v17, 16  ;;  %v1252_v9 = vsel %vm1205_vm6, %v1247_v2, %v1251_v0 }
 0x10d   : > { %6287 = vst [vmem:[#allocation67_spill] sm:$0xff] %v4711_v48  ;;  %v1261_v48 = vrot.slane %v6290_v3, 4 }
 0x10e   : > { %1322 = vrot.lane.b32.xlu1 %v1240_v44, %s3566_s27  ;;  %v4720_v8 = vpop.permute.xlu0 %1056  ;;  %v1262_v45 = vrot.slane %v6291_v63, 5  ;;  %v1259_v57 = vor.u32 %v1258_v32, %v1257_v25  ;;  %v1256_v22 = vsel %vm1205_vm6, %v1251_v0, %v1255_v7  ;;  %v6173_v32 = vshrl.u32 %v4609_v31, 16 }
 0x110   : > { %v4727_v33 = vpop.permute.xlu1 %1058  ;;  %1324 = vrot.lane.b32.xlu0 %v1244_v41, %s3566_s27  ;;  %v1263_v15 = vor.u32 %v1262_v45, %v1261_v48  ;;  %v1260_v21 = vsel %vm1205_vm6, %v1255_v7, %v1259_v57 }
 0x112   : > { %1326 = vrot.lane.b32.xlu1 %v1248_v62, %s3566_s27  ;;  %v4732_v44 = vpop.permute.xlu0 %1060  ;;  %v1264_v2 = vsel %vm1205_vm6, %v1259_v57, %v1263_v15  ;;  %v1268_v0 = vsel %vm1205_vm6, %v1263_v15, %v4425_v43  ;;  %v6174_v62 = vshll.u32 %v4609_v31, 16  ;;  %v1300_v43 = vrot.slane %v6173_v32, 4 }
 0x113   : > { %6292 = vst [vmem:[#allocation68_spill] sm:$0xff] %v4732_v44 }
 0x114   : > { %v4735_v27 = vpop.permute.xlu1 %1062  ;;  %1328 = vrot.lane.b32.xlu0 %v1252_v9, %s3566_s27  ;;  %v1303_v45 = vrot.slane %v6174_v62, 5 }
 0x115   : > { %6293 = vst [vmem:[#allocation69_spill] sm:$0xff] %v4735_v27 }
 0x116   : > { %1330 = vrot.lane.b32.xlu1 %v1256_v22, %s3566_s27  ;;  %v4740_v3 = vpop.permute.xlu0 %1064 }
 0x117   : > { %6294 = vst [vmem:[#allocation70_spill] sm:$0xff] %v4740_v3 }
 0x118   : > { %v4743_v41 = vpop.permute.xlu1 %1066  ;;  %1332 = vrot.lane.b32.xlu0 %v1260_v21, %s3566_s27  ;;  %v1359_v21 = vrot.slane %v3723_v30, 5 }
 0x119   : > { %6295 = vst [vmem:[#allocation71_spill] sm:$0xff] %v4743_v41  ;;  %v1367_v41 = vrot.slane %v3823_v58, 5 }
 0x11a   : > { %1334 = vrot.lane.b32.xlu1 %v1264_v2, %s3566_s27  ;;  %v4749_v48 = vpop.permute.xlu0 %1068  ;;  %v1361_v2 = vrot.slane %v3767_v1, 5 }
 0x11b   : > { %6296 = vst [vmem:[#allocation72_spill] sm:$0xff] %v4749_v48 }
 0x11c   : > { %v4751_v25 = vpop.permute.xlu1 %1070  ;;  %1336 = vrot.lane.b32.xlu0 %v1268_v0, %s3566_s27  ;;  %v1363_v0 = vrot.slane %v3789_v5, 5 }
 0x11e   : > { %1338 = vrot.lane.b32.xlu1 %v4450_v18, %s3566_s27  ;;  %v4758_v7 = vpop.permute.xlu0 %1072  ;;  %v1304_v18 = vor.u32 %v1303_v45, %v1300_v43  ;;  %v1362_v45 = vsel %vm1357_vm11, %v1359_v21, %v1361_v2  ;;  %v1364_v48 = vsel %vm1357_vm11, %v1361_v2, %v1363_v0 }
 0x120   : > { %v4760_v63 = vpop.permute.xlu1 %1074  ;;  %1340 = vrot.lane.b32.xlu0 %v4459_v19, %s3566_s27 }
 0x122   : > { %1342 = vrot.lane.b32.xlu1 %v4475_v38, %s3566_s27  ;;  %v4770_v9 = vpop.permute.xlu0 %1076  ;;  %v1305_v38 = vsel %vm1205_vm6, %v4483_v26, %v1304_v18  ;;  %v3297_v26 = vld [vmem:[%s3622_s23 + $0xd0] sm:$0xff]  }
 0x123   : > { %v4807_v32 = vunpack.c.l.bf16 %v3297_v26  ;;  %v4812_v62 = vunpack.c.h.bf16 %v3297_v26 }
 0x124   : > { %v4772_v57 = vpop.permute.xlu1 %1078  ;;  %1344 = vrot.lane.b32.xlu0 %v4481_v14, %s3566_s27  ;;  %v1358_v14 = vrot.slane %v3711_v23, 5 }
 0x125   : > { %6297 = vst [vmem:[#allocation73_spill] sm:$0xff] %v4772_v57  ;;  %v474_v26 = vmin.f32 %v4812_v62, 0.0  ;;  %v1395_v57 = vrot.slane %v4218_v54, 5  ;;  %vm417_vm15 = vcmp.gt.f32.partialorder %v4807_v32, 0.0  ;;  %vm418_vm0 = vcmp.gt.f32.partialorder %v4812_v62, 0.0 }
 0x126   : > { %1346 = vrot.lane.b32.xlu1 %v4489_v60, %s3566_s27  ;;  %v4778_v19 = vpop.permute.xlu0 %1080 }
 0x127   : > { %6298 = vst [vmem:[#allocation74_spill] sm:$0xff] %v4778_v19  ;;  %v583_v27 = vmul.f32 1.442695, %v474_v26 }
 0x128   : > { %v4780_v22 = vpop.permute.xlu1 %1082  ;;  %1348 = vrot.lane.b32.xlu0 %v4503_v39, %s3566_s27 }
 0x129   : > { %6299 = vst [vmem:[#allocation75_spill] sm:$0xff] %v4780_v22 }
 0x12a   : > { %1350 = vrot.lane.b32.xlu1 %v4500_v55, %s3566_s27  ;;  %v4788_v15 = vpop.permute.xlu0 %1084  ;;  %v1360_v55 = vsel %vm1357_vm11, %v1358_v14, %v1359_v21  ;;  %v1369_v21 = vrot.slane %v3831_v59, 5 }
 0x12b   : > { %6300 = vst [vmem:[#allocation76_spill] sm:$0xff] %v4788_v15 }
 0x12c   : > { %v4792_v60 = vpop.permute.xlu1 %1086  ;;  %1352 = vrot.lane.b32.xlu0 %v1305_v38, %s3566_s27  ;;  %v1365_v38 = vrot.slane %v3792_v34, 5 }
 0x12d   : > { %6301 = vst [vmem:[#allocation77_spill] sm:$0xff] %v4792_v60 }
 0x12e   : > { %1354 = vrot.lane.b32.xlu1 %v1304_v18, %s3566_s27  ;;  %v4797_v39 = vpop.permute.xlu0 %1088  ;;  %v1368_v2 = vsel %vm1357_vm11, %v1365_v38, %v1367_v41  ;;  %s5869_s27 = scalar_lea.vmem %s6082_s4, %s3073_s24 }
 0x12f   : > { %6302 = vst [vmem:[#allocation78_spill] sm:$0xff] %v4797_v39  ;;  %v473_v39 = vmin.f32 %v4807_v32, 0.0 }
 0x130   : > { %v4802_v43 = vpop.permute.xlu1 %1090  ;;  %1407 = vrot.lane.b32.xlu0 %v1358_v14, %s3567_s28  ;;  %v1366_v14 = vsel %vm1357_vm11, %v1363_v0, %v1365_v38  ;;  %v1370_v0 = vsel %vm1357_vm11, %v1367_v41, %v1369_v21  ;;  %v1375_v38 = vrot.slane %v3989_v16, 5  ;;  %v1377_v41 = vrot.slane %v3995_v4, 5 }
 0x131   : > { %6303 = vst [vmem:[#allocation79_spill] sm:$0xff] %v4802_v43  ;;  %v581_v60 = vmul.f32 1.442695, %v473_v39 }
 0x132   : > { %1409 = vrot.lane.b32.xlu1 %v1360_v55, %s3567_s28  ;;  %v4810_v18 = vpop.permute.xlu0 %1092 }
 0x133   : > { %6304 = vst [vmem:[#allocation80_spill] sm:$0xff] %v4810_v18  ;;  %v1371_v18 = vrot.slane %v3930_v37, 5  ;;  %3531 = vpow2.f32 %v581_v60 }
 0x134   : > { %v4816_v43 = vpop.permute.xlu1 %1094  ;;  %1411 = vrot.lane.b32.xlu0 %v1362_v45, %s3567_s28  ;;  %v1373_v45 = vrot.slane %v3942_v10, 5  ;;  %3533 = vpow2.f32 %v583_v27  ;;  %v1383_v27 = vrot.slane %v4060_v13, 5 }
 0x135   : > { %v1372_v15 = vsel %vm1357_vm11, %v1369_v21, %v1371_v18  ;;  %v1379_v21 = vrot.slane %v4011_v36, 5 }
 0x136   : > { %1413 = vrot.lane.b32.xlu1 %v1364_v48, %s3567_s28  ;;  %v4823_v55 = vpop.permute.xlu0 %1096  ;;  %v1376_v26 = vsel %vm1357_vm11, %v1373_v45, %v1375_v38 }
 0x138   : > { %v4828_v3 = vpop.permute.xlu1 %1098  ;;  %1415 = vrot.lane.b32.xlu0 %v1366_v14, %s3567_s28  ;;  %v1374_v14 = vsel %vm1357_vm11, %v1371_v18, %v1373_v45  ;;  %v1381_v18 = vrot.slane %v4024_v12, 5 }
 0x13a   : > { %1417 = vrot.lane.b32.xlu1 %v1368_v2, %s3567_s28  ;;  %v4834_v48 = vpop.permute.xlu0 %1100  ;;  %v1382_v45 = vsel %vm1357_vm11, %v1379_v21, %v1381_v18 }
 0x13c   : > { %v4838_v44 = vpop.permute.xlu1 %1102  ;;  %1419 = vrot.lane.b32.xlu0 %v1370_v0, %s3567_s28  ;;  %v1378_v0 = vsel %vm1357_vm11, %v1375_v38, %v1377_v41 }
 0x13e   : > { %1421 = vrot.lane.b32.xlu1 %v1372_v15, %s3567_s28  ;;  %v4844_v39 = vpop.permute.xlu0 %1155  ;;  %v1380_v15 = vsel %vm1357_vm11, %v1377_v41, %v1379_v21 }
 0x13f   : > { %6305 = vst [vmem:[#allocation81_spill] sm:$0xff] %v4844_v39 }
 0x140   : > { %v4848_v2 = vpop.permute.xlu1 %1157  ;;  %1423 = vrot.lane.b32.xlu0 %v1374_v14, %s3567_s28  ;;  %v1385_v14 = vrot.slane %v4065_v17, 5 }
 0x141   : > { %6306 = vst [vmem:[#allocation82_spill] sm:$0xff] %v4848_v2 }
 0x142   : > { %1425 = vrot.lane.b32.xlu1 %v1376_v26, %s3567_s28  ;;  %v4854_v60 = vpop.permute.xlu0 %1159  ;;  %v1384_v26 = vsel %vm1357_vm11, %v1381_v18, %v1383_v27  ;;  %v1386_v41 = vsel %vm1357_vm11, %v1383_v27, %v1385_v14  ;;  %v1653_v27 = vsel %vm1633_vm12, %v3930_v37, %v4569_v46 }
 0x143   : > { %6307 = vst [vmem:[#allocation83_spill] sm:$0xff] %v4854_v60  ;;  %v1387_v60 = vrot.slane %v4148_v28, 5 }
 0x144   : > { %v4858_v39 = vpop.permute.xlu1 %1161  ;;  %1427 = vrot.lane.b32.xlu0 %v1378_v0, %s3567_s28  ;;  %v1389_v0 = vrot.slane %v4155_v42, 5 }
 0x145   : > { %6308 = vst [vmem:[#allocation84_spill] sm:$0xff] %v4858_v39  ;;  %v3532_v39 = vpop.eup %3531  ;;  %v1388_v18 = vsel %vm1357_vm11, %v1385_v14, %v1387_v60 }
 0x146   : > { %1429 = vrot.lane.b32.xlu1 %v1380_v15, %s3567_s28  ;;  %v4864_v38 = vpop.permute.xlu0 %1163  ;;  %v1391_v15 = vrot.slane %v4192_v53, 5  ;;  %v3126_v19 = vadd.f32 -1.0, %v3532_v39  ;;  %v1655_v39 = vsel %vm1633_vm12, %v3942_v10, %v4577_v24  ;;  %v1657_v24 = vsel %vm1633_vm12, %v3989_v16, %v4582_v20 }
 0x147   : > { %6309 = vst [vmem:[#allocation85_spill] sm:$0xff] %v4864_v38  ;;  %v3534_v38 = vpop.eup %3533  ;;  %v1401_v20 = vrot.slane %v4277_v11, 5 }
 0x148   : > { %v4868_v2 = vpop.permute.xlu1 %1165  ;;  %1431 = vrot.lane.b32.xlu0 %v1382_v45, %s3567_s28  ;;  %v1651_v45 = vsel %vm1633_vm12, %v3831_v59, %v4564_v51  ;;  %v3127_v22 = vadd.f32 -1.0, %v3534_v38  ;;  %v1704_v51 = vsel %vm1684_vm13, %v1653_v27, %v4758_v7  ;;  %v1397_v38 = vrot.slane %v4231_v29, 5 }
 0x149   : > { %6310 = vst [vmem:[#allocation86_spill] sm:$0xff] %v4868_v2  ;;  %v1702_v14 = vsel %vm1684_vm13, %v1651_v45, %v4751_v25 }
 0x14a   : > { %1433 = vrot.lane.b32.xlu1 %v1384_v26, %s3567_s28  ;;  %v4874_v21 = vpop.permute.xlu0 %1167  ;;  %v1390_v26 = vsel %vm1357_vm11, %v1387_v60, %v1389_v0  ;;  %v698_v27 = vsel %vm418_vm0, %v4812_v62, %v3127_v22  ;;  %v1398_v62 = vsel %vm1357_vm11, %v1395_v57, %v1397_v38 }
 0x14b   : > { %6311 = vst [vmem:[#allocation87_spill] sm:$0xff] %v4874_v21  ;;  %v1393_v21 = vrot.slane %v4201_v61, 5 }
 0x14c   : > { %v4878_v2 = vpop.permute.xlu1 %1169  ;;  %1435 = vrot.lane.b32.xlu0 %v1386_v41, %s3567_s28  ;;  %v1392_v41 = vsel %vm1357_vm11, %v1389_v0, %v1391_v15  ;;  %v1706_v0 = vsel %vm1684_vm13, %v1655_v39, %v4760_v63  ;;  %v1708_v63 = vsel %vm1684_vm13, %v1657_v24, %v4770_v9  ;;  %v1403_v9 = vrot.slane %v4609_v31, 5 }
 0x14d   : > { %6312 = vst [vmem:[#allocation88_spill] sm:$0xff] %v4878_v2  ;;  %v1675_v24 = vsel %vm1633_vm12, %v4201_v61, %v4666_v52  ;;  %v1679_v52 = vsel %vm1633_vm12, %v4231_v29, %v4688_v56 }
 0x14e   : > { %1437 = vrot.lane.b32.xlu1 %v1388_v18, %s3567_s28  ;;  %v1172_v2 = vpop.permute.xlu0 %1171  ;;  %v697_v18 = vsel %vm417_vm15, %v4807_v32, %v3126_v19  ;;  %v1404_v39 = vsel %vm1357_vm11, %v1401_v20, %v1403_v9 }
 0x14f   : > { %v4894_v46 = vsel %vm1735_vm14, %v1702_v14, %v1172_v2  ;;  %v1394_v2 = vsel %vm1357_vm11, %v1391_v15, %v1393_v21  ;;  %v1396_v15 = vsel %vm1357_vm11, %v1393_v21, %v1395_v57  ;;  %v4931_v19 = vpack.c.bf16 %v698_v27, %v697_v18 }
 0x150   : > { %v1174_v25 = vpop.permute.xlu1 %1173  ;;  %1439 = vrot.lane.b32.xlu0 %v1390_v26, %s3567_s28  ;;  %v1399_v26 = vrot.slane %v4265_v47, 5 }
 0x151   : > { %v4906_v60 = vsel %vm1735_vm14, %v1704_v51, %v1174_v25  ;;  %v1405_v57 = vrot.slane %v4931_v19, 5 }
 0x152   : > { %1441 = vrot.lane.b32.xlu1 %v1392_v41, %s3567_s28  ;;  %v1176_v7 = vpop.permute.xlu0 %1175  ;;  %v1400_v21 = vsel %vm1357_vm11, %v1397_v38, %v1399_v26  ;;  %v1402_v51 = vsel %vm1357_vm11, %v1399_v26, %v1401_v20 }
 0x153   : > { %v4919_v45 = vsel %vm1735_vm14, %v1706_v0, %v1176_v7  ;;  %v1406_v38 = vsel %vm1357_vm11, %v1403_v9, %v1405_v57  ;;  %vm2906_vm11 = vcmask 23552  }
 0x154   : > { %v1178_v14 = vpop.permute.xlu1 %1177  ;;  %1443 = vrot.lane.b32.xlu0 %v1394_v2, %s3567_s28 }
 0x155   : > { %v4927_v32 = vsel %vm1735_vm14, %v1708_v63, %v1178_v14  ;;  %v1677_v63 = vsel %vm1633_vm12, %v4218_v54, %v4674_v35  ;;  %v1730_v35 = vsel %vm1684_vm13, %v1679_v52, %v4828_v3  ;;  %v1683_v3 = vsel %vm1633_vm12, %v4277_v11, %v4704_v40 }
 0x156   : > { %1445 = vrot.lane.b32.xlu1 %v1396_v15, %s3567_s28  ;;  %v4934_v22 = vpop.permute.xlu0 %1179  ;;  %v1726_v15 = vsel %vm1684_vm13, %v1675_v24, %v4816_v43 }
 0x158   : > { %v4938_v41 = vpop.permute.xlu1 %1181  ;;  %1447 = vrot.lane.b32.xlu0 %v1398_v62, %s3567_s28  ;;  %v1728_v62 = vsel %vm1684_vm13, %v1677_v63, %v4823_v55  ;;  %v1681_v55 = vsel %vm1633_vm12, %v4265_v47, %v4695_v50  ;;  %v1734_v50 = vsel %vm1684_vm13, %v1683_v3, %v4838_v44 }
 0x159   : > { %v1732_v56 = vsel %vm1684_vm13, %v1681_v55, %v4834_v48 }
 0x15a   : > { %1449 = vrot.lane.b32.xlu1 %v1400_v21, %s3567_s28  ;;  %v4944_v25 = vpop.permute.xlu0 %1183 }
 0x15c   : > { %v4947_v2 = vpop.permute.xlu1 %1185  ;;  %1451 = vrot.lane.b32.xlu0 %v1402_v51, %s3567_s28 }
 0x15e   : > { %1453 = vrot.lane.b32.xlu1 %v1404_v39, %s3567_s28  ;;  %v4952_v0 = vpop.permute.xlu0 %1187 }
 0x160   : > { %v4954_v7 = vpop.permute.xlu1 %1189  ;;  %1455 = vrot.lane.b32.xlu0 %v1406_v38, %s3567_s28 }
 0x161   : > { %6313 = vst [vmem:[#allocation89_spill] sm:$0xff] %v4954_v7 }
 0x162   : > { %1458 = vrot.lane.b32.xlu1 %v3723_v30, %s3568_s29  ;;  %v4959_v18 = vpop.permute.xlu0 %1191 }
 0x163   : > { %6314 = vst [vmem:[#allocation90_spill] sm:$0xff] %v4959_v18 }
 0x164   : > { %v4961_v27 = vpop.permute.xlu1 %1193  ;;  %1460 = vrot.lane.b32.xlu0 %v3767_v1, %s3568_s29 }
 0x165   : > { %6315 = vst [vmem:[#allocation91_spill] sm:$0xff] %v4961_v27 }
 0x166   : > { %1462 = vrot.lane.b32.xlu1 %v3789_v5, %s3568_s29  ;;  %v1196_v26 = vpop.permute.xlu0 %1195 }
 0x167   : > { %v4976_v14 = vsel %vm1735_vm14, %v1726_v15, %v1196_v26 }
 0x168   : > { %v1198_v20 = vpop.permute.xlu1 %1197  ;;  %1464 = vrot.lane.b32.xlu0 %v3792_v34, %s3568_s29 }
 0x169   : > { %v4986_v43 = vsel %vm1735_vm14, %v1728_v62, %v1198_v20  ;;  %v3424_v20 = vld [vmem:[%s6079_s1 + $0x10] ss:$0 sps:$4 sm:$0x33]  }
 0x16a   : > { %1466 = vrot.lane.b32.xlu1 %v3823_v58, %s3568_s29  ;;  %v1200_v21 = vpop.permute.xlu0 %1199  ;;  %3386 = vmatprep.subr.msk.bf16.mxu0 %vm2341_vm2, %v3424_v20 }
 0x16b   : > { %v4996_v9 = vsel %vm1735_vm14, %v1730_v35, %v1200_v21  ;;  %3387 = vmatprep.subr.msk.bf16.mxu1 %vm2341_vm2, %v3424_v20  ;;  %v6319_v35 = vld [vmem:[#allocation16_spill] sm:$0xff]  ;;  %v3570_v21 = vmov 0  }
 0x16c   : > { %v1202_v51 = vpop.permute.xlu1 %1201  ;;  %1468 = vrot.lane.b32.xlu0 %v3831_v59, %s3568_s29  ;;  %3423 = vset.pattern.permute.xlu1 %v3570_v21 }
 0x16d   : > { %v5006_v57 = vsel %vm1735_vm14, %v1732_v56, %v1202_v51  ;;  %3422 = vset.pattern.permute.xlu0 %v3570_v21  ;;  %v6320_v56 = vld [vmem:[#allocation19_spill] sm:$0xff]  ;;  %v6321_v51 = vld [vmem:[#allocation6_spill] sm:$0xff] }
 0x16e   : > { %1470 = vrot.lane.b32.xlu1 %v3930_v37, %s3568_s29  ;;  %v1204_v39 = vpop.permute.xlu0 %1203  ;;  %v6328_v21 = vld [vmem:[#allocation42_spill] sm:$0xff] }
 0x16f   : > { %v5013_v48 = vsel %vm1735_vm14, %v1734_v50, %v1204_v39  ;;  %v6322_v39 = vld [vmem:[#allocation20_spill] sm:$0xff] }
 0x170   : > { %v5015_v38 = vpop.permute.xlu1 %1306  ;;  %1472 = vrot.lane.b32.xlu0 %v3942_v10, %s3568_s29 }
 0x172   : > { %1474 = vrot.lane.b32.xlu1 %v3989_v16, %s3568_s29  ;;  %v5021_v59 = vpop.permute.xlu0 %1308 }
 0x174   : > { %v5023_v40 = vpop.permute.xlu1 %1310  ;;  %1476 = vrot.lane.b32.xlu0 %v3995_v4, %s3568_s29 }
 0x176   : > { %1478 = vrot.lane.b32.xlu1 %v4011_v36, %s3568_s29  ;;  %v5029_v37 = vpop.permute.xlu0 %1312 }
 0x178   : > { %v5031_v44 = vpop.permute.xlu1 %1314  ;;  %1480 = vrot.lane.b32.xlu0 %v4024_v12, %s3568_s29 }
 0x17a   : > { %1482 = vrot.lane.b32.xlu1 %v4060_v13, %s3568_s29  ;;  %v5037_v10 = vpop.permute.xlu0 %1316 }
 0x17b   : > { %6316 = vst [vmem:[#allocation92_spill] sm:$0xff] %v5037_v10  ;;  %v6394_v10 = vld [vmem:[#allocation60_spill] sm:$0xff] }
 0x17c   : > { %v5039_v16 = vpop.permute.xlu1 %1318  ;;  %1484 = vrot.lane.b32.xlu0 %v4065_v17, %s3568_s29 }
 0x17d   : > { %6317 = vst [vmem:[#allocation93_spill] sm:$0xff] %v5039_v16 }
 0x17e   : > { %1486 = vrot.lane.b32.xlu1 %v4148_v28, %s3568_s29  ;;  %v5045_v24 = vpop.permute.xlu0 %1320  ;;  %v6398_v28 = vld [vmem:[#allocation75_spill] sm:$0xff] }
 0x17f   : > { %6318 = vst [vmem:[#allocation94_spill] sm:$0xff] %v5045_v24 }
 0x180   : > { %v1323_v15 = vpop.permute.xlu1 %1322  ;;  %1488 = vrot.lane.b32.xlu0 %v4155_v42, %s3568_s29 }
 0x181   : > { %v5051_v26 = vsel %vm1786_vm1, %v4894_v46, %v1323_v15  ;;  %v6323_v15 = vld [vmem:[#allocation29_spill] sm:$0xff] }
 0x182   : > { %1527 = vrot.lane.b32.xlu1 %v3796_v6, %s3569_s30  ;;  %v1325_v63 = vpop.permute.xlu0 %1324  ;;  %v2343_v6 = vsel %vm2341_vm2, %v3424_v20, 0 }
 0x183   : > { %v5057_v62 = vsel %vm1786_vm1, %v4906_v60, %v1325_v63  ;;  %3327 = vmatpush3.bf16.msra.mxu0 %v2343_v6  ;;  %3383 = vmatpush3.bf16.msra.mxu1 %v2343_v6  ;;  %v6325_v6 = vld [vmem:[#allocation41_spill] sm:$0xff] }
 0x184   : > { %v1327_v52 = vpop.permute.xlu1 %1326  ;;  %1529 = vrot.lane.b32.xlu0 %v3829_v49, %s3569_s30  ;;  %v3425_v49 = vld [vmem:[%s6079_s1 + $0x8] sm:$0xff]  }
 0x185   : > { %v5066_v46 = vsel %vm1786_vm1, %v4919_v45, %v1327_v52  ;;  %3328 = vmatprep.subr.bf16.mxu0 %v3425_v49  ;;  %3381 = vmatprep.subr.bf16.mxu1 %v3425_v49  ;;  %v6324_v52 = vld [vmem:[#allocation30_spill] sm:$0xff] }
 0x186   : > { %1551 = vrot.lane.b32.xlu1 %v6319_v35, %s3569_s30  ;;  %v1329_v60 = vpop.permute.xlu0 %1328 }
 0x187   : > { %v5072_v55 = vsel %vm1786_vm1, %v4927_v32, %v1329_v60  ;;  %3329 = vmatpush3.bf16.msra.mxu0 %v3425_v49  ;;  %v3426_v32 = vld [vmem:[%s6079_s1] sm:$0xff]   ;;  %3384 = vmatpush3.bf16.msra.mxu1 %v3425_v49  ;;  %v6329_v49 = vld [vmem:[#allocation31_spill] sm:$0xff] }
 0x188   : > { %v5077_v45 = vpop.permute.xlu1 %1330  ;;  %1553 = vrot.lane.b32.xlu0 %v6320_v56, %s3569_s30  ;;  %3330 = vmatprep.subr.bf16.mxu0 %v3426_v32 }
 0x189   : > { %3382 = vmatprep.subr.bf16.mxu1 %v3426_v32 }
 0x18a   : > { %1531 = vrot.lane.b32.xlu1 %v6321_v51, %s3569_s30  ;;  %v5083_v3 = vpop.permute.xlu0 %1332 }
 0x18b   : > { %3331 = vmatpush3.bf16.msra.mxu0 %v3426_v32  ;;  %3385 = vmatpush3.bf16.msra.mxu1 %v3426_v32 }
 0x18c   : > { %v5088_v50 = vpop.permute.xlu1 %1334  ;;  %1555 = vrot.lane.b32.xlu0 %v6322_v39, %s3569_s30  ;;  %v6331_v39 = vld [vmem:[#allocation43_spill] sm:$0xff] }
 0x18e   : > { %1583 = vrot.lane.b32.xlu1 %v6323_v15, %s3571_s11  ;;  %v5094_v63 = vpop.permute.xlu0 %1336 }
 0x190   : > { %v5096_v20 = vpop.permute.xlu1 %1338  ;;  %1585 = vrot.lane.b32.xlu0 %v6324_v52, %s3571_s11 }
 0x192   : > { %1607 = vrot.lane.b32.xlu1 %v6325_v6, %s3571_s11  ;;  %v5102_v35 = vpop.permute.xlu0 %1340 }
 0x193   : > { %6326 = vst [vmem:[#allocation16_spill] sm:$0xff] %v5102_v35  ;;  %v6360_v35 = vld [vmem:[#allocation12_spill] sm:$0xff] }
 0x194   : > { %v5104_v60 = vpop.permute.xlu1 %1342  ;;  %1609 = vrot.lane.b32.xlu0 %v6328_v21, %s3571_s11  ;;  %v6332_v21 = vld [vmem:[#allocation7_spill] sm:$0xff] }
 0x195   : > { %6327 = vst [vmem:[#allocation19_spill] sm:$0xff] %v5104_v60  ;;  %v6357_v60 = vld [vmem:[#allocation26_spill] sm:$0xff] }
 0x196   : > { %1587 = vrot.lane.b32.xlu1 %v6329_v49, %s3571_s11  ;;  %v5110_v56 = vpop.permute.xlu0 %1344 }
 0x197   : > { %6330 = vst [vmem:[#allocation6_spill] sm:$0xff] %v5110_v56 }
 0x198   : > { %v1347_v51 = vpop.permute.xlu1 %1346  ;;  %1611 = vrot.lane.b32.xlu0 %v6331_v39, %s3571_s11  ;;  %v6333_v39 = vld [vmem:[#allocation22_spill] sm:$0xff] }
 0x199   : > { %v5116_v32 = vsel %vm1786_vm1, %v4976_v14, %v1347_v51 }
 0x19a   : > { %1490 = vrot.lane.b32.xlu1 %v4192_v53, %s3568_s29  ;;  %v1349_v15 = vpop.permute.xlu0 %1348 }
 0x19b   : > { %v5122_v52 = vsel %vm1786_vm1, %v4986_v43, %v1349_v15  ;;  %v6334_v43 = vld [vmem:[#allocation8_spill] sm:$0xff] }
 0x19c   : > { %v1351_v6 = vpop.permute.xlu1 %1350  ;;  %1533 = vrot.lane.b32.xlu0 %v6332_v21, %s3569_s30  ;;  %v6335_v21 = vld [vmem:[#allocation23_spill] sm:$0xff] }
 0x19d   : > { %v5128_v49 = vsel %vm1786_vm1, %v4996_v9, %v1351_v6 }
 0x19e   : > { %1557 = vrot.lane.b32.xlu1 %v6333_v39, %s3569_s30  ;;  %v1353_v14 = vpop.permute.xlu0 %1352  ;;  %v6336_v39 = vld [vmem:[#allocation32_spill] sm:$0xff] }
 0x19f   : > { %v5134_v51 = vsel %vm1786_vm1, %v5006_v57, %v1353_v14  ;;  %v6337_v57 = vld [vmem:[#allocation44_spill] sm:$0xff] }
 0x1a0   : > { %v1355_v56 = vpop.permute.xlu1 %1354  ;;  %1535 = vrot.lane.b32.xlu0 %v6334_v43, %s3569_s30 }
 0x1a1   : > { %v5140_v15 = vsel %vm1786_vm1, %v5013_v48, %v1355_v56  ;;  %v6338_v48 = vld [vmem:[#allocation33_spill] sm:$0xff]  ;;  %v6339_v56 = vld [vmem:[#allocation46_spill] sm:$0xff] }
 0x1a2   : > { %1559 = vrot.lane.b32.xlu1 %v6335_v21, %s3569_s30  ;;  %v5144_v9 = vpop.permute.xlu0 %1407 }
 0x1a4   : > { %v5146_v6 = vpop.permute.xlu1 %1409  ;;  %1589 = vrot.lane.b32.xlu0 %v6336_v39, %s3571_s11 }
 0x1a6   : > { %1613 = vrot.lane.b32.xlu1 %v6337_v57, %s3571_s11  ;;  %v5152_v14 = vpop.permute.xlu0 %1411 }
 0x1a8   : > { %v5154_v43 = vpop.permute.xlu1 %1413  ;;  %1591 = vrot.lane.b32.xlu0 %v6338_v48, %s3571_s11  ;;  %v6343_v48 = vld [vmem:[#allocation9_spill] sm:$0xff] }
 0x1aa   : > { %1615 = vrot.lane.b32.xlu1 %v6339_v56, %s3571_s11  ;;  %v5160_v21 = vpop.permute.xlu0 %1415  ;;  %v6344_v56 = vld [vmem:[#allocation24_spill] sm:$0xff] }
 0x1ac   : > { %v5162_v27 = vpop.permute.xlu1 %1417  ;;  %1492 = vrot.lane.b32.xlu0 %v4201_v61, %s3568_s29 }
 0x1ad   : > { %6340 = vst [vmem:[#allocation20_spill] sm:$0xff] %v5162_v27 }
 0x1ae   : > { %1494 = vrot.lane.b32.xlu1 %v4218_v54, %s3568_s29  ;;  %v5168_v39 = vpop.permute.xlu0 %1419  ;;  %v6346_v54 = vld [vmem:[#allocation10_spill] sm:$0xff] }
 0x1af   : > { %6341 = vst [vmem:[#allocation29_spill] sm:$0xff] %v5168_v39 }
 0x1b0   : > { %v5170_v57 = vpop.permute.xlu1 %1421  ;;  %1537 = vrot.lane.b32.xlu0 %v6343_v48, %s3569_s30 }
 0x1b1   : > { %6342 = vst [vmem:[#allocation30_spill] sm:$0xff] %v5170_v57  ;;  %v6348_v57 = vld [vmem:[#allocation25_spill] sm:$0xff] }
 0x1b2   : > { %1561 = vrot.lane.b32.xlu1 %v6344_v56, %s3569_s30  ;;  %v1424_v24 = vpop.permute.xlu0 %1423 }
 0x1b3   : > { %v5178_v53 = vsel %vm1837_vm3, %v5051_v26, %v1424_v24  ;;  %v6350_v24 = vld [vmem:[#allocation34_spill] sm:$0xff]  ;;  %v3298_v26 = vld [vmem:[%s3622_s23 + $0xd8] sm:$0xff]  }
 0x1b4   : > { %6345 = vst [vmem:[#allocation41_spill] sm:$0xff] %v5178_v53  ;;  %v1426_v61 = vpop.permute.xlu1 %1425  ;;  %1539 = vrot.lane.b32.xlu0 %v6346_v54, %s3569_s30 }
 0x1b5   : > { %v5184_v58 = vsel %vm1837_vm3, %v5057_v62, %v1426_v61  ;;  %v6352_v62 = vld [vmem:[#allocation45_spill] sm:$0xff] }
 0x1b6   : > { %6347 = vst [vmem:[#allocation42_spill] sm:$0xff] %v5184_v58  ;;  %1563 = vrot.lane.b32.xlu1 %v6348_v57, %s3569_s30  ;;  %v1428_v48 = vpop.permute.xlu0 %1427  ;;  %v3270_v57 = vunpack.c.l.bf16 %v3298_v26 }
 0x1b7   : > { %v5190_v56 = vsel %vm1837_vm3, %v5066_v46, %v1428_v48  ;;  %v6353_v46 = vld [vmem:[#allocation35_spill] sm:$0xff]  ;;  %v3271_v48 = vunpack.c.h.bf16 %v3298_v26 }
 0x1b8   : > { %6349 = vst [vmem:[#allocation31_spill] sm:$0xff] %v5190_v56  ;;  %v1430_v39 = vpop.permute.xlu1 %1429  ;;  %1593 = vrot.lane.b32.xlu0 %v6350_v24, %s3571_s11  ;;  %v6354_v56 = vld [vmem:[#allocation48_spill] sm:$0xff]  ;;  %v475_v53 = vmin.f32 %v3270_v57, 0.0  ;;  %v6356_v26 = vld [vmem:[#allocation11_spill] sm:$0xff]  ;;  %vm419_vm4 = vcmp.gt.f32.partialorder %v3270_v57, 0.0 }
 0x1b9   : > { %v5197_v54 = vsel %vm1837_vm3, %v5072_v55, %v1430_v39  ;;  %v476_v39 = vmin.f32 %v3271_v48, 0.0  ;;  %vm420_vm6 = vcmp.gt.f32.partialorder %v3271_v48, 0.0 }
 0x1ba   : > { %6351 = vst [vmem:[#allocation43_spill] sm:$0xff] %v5197_v54  ;;  %1617 = vrot.lane.b32.xlu1 %v6352_v62, %s3571_s11  ;;  %v5201_v61 = vpop.permute.xlu0 %1431  ;;  %v585_v54 = vmul.f32 1.442695, %v475_v53  ;;  %v6361_v53 = vld [vmem:[#allocation27_spill] sm:$0xff] }
 0x1bc   : > { %v5203_v58 = vpop.permute.xlu1 %1433  ;;  %1595 = vrot.lane.b32.xlu0 %v6353_v46, %s3571_s11  ;;  %3535 = vpow2.f32 %v585_v54 }
 0x1be   : > { %1619 = vrot.lane.b32.xlu1 %v6354_v56, %s3571_s11  ;;  %v5209_v24 = vpop.permute.xlu0 %1435  ;;  %v587_v56 = vmul.f32 1.442695, %v476_v39 }
 0x1c0   : > { %v5211_v55 = vpop.permute.xlu1 %1437  ;;  %1496 = vrot.lane.b32.xlu0 %v4231_v29, %s3568_s29  ;;  %3537 = vpow2.f32 %v587_v56 }
 0x1c2   : > { %1498 = vrot.lane.b32.xlu1 %v4265_v47, %s3568_s29  ;;  %v5217_v62 = vpop.permute.xlu0 %1439 }
 0x1c4   : > { %v5219_v46 = vpop.permute.xlu1 %1441  ;;  %1541 = vrot.lane.b32.xlu0 %v6356_v26, %s3569_s30 }
 0x1c5   : > { %6355 = vst [vmem:[#allocation7_spill] sm:$0xff] %v5219_v46 }
 0x1c6   : > { %1565 = vrot.lane.b32.xlu1 %v6357_v60, %s3569_s30  ;;  %v5225_v16 = vpop.permute.xlu0 %1443  ;;  %v6363_v60 = vld [vmem:[#allocation36_spill] sm:$0xff] }
 0x1c7   : > { %6358 = vst [vmem:[#allocation22_spill] sm:$0xff] %v5225_v16 }
 0x1c8   : > { %v5227_v29 = vpop.permute.xlu1 %1445  ;;  %1543 = vrot.lane.b32.xlu0 %v6360_v35, %s3569_s30 }
 0x1c9   : > { %6359 = vst [vmem:[#allocation8_spill] sm:$0xff] %v5227_v29  ;;  %v6365_v29 = vld [vmem:[#allocation49_spill] sm:$0xff] }
 0x1ca   : > { %1567 = vrot.lane.b32.xlu1 %v6361_v53, %s3569_s30  ;;  %v1448_v47 = vpop.permute.xlu0 %1447 }
 0x1cb   : > { %v5235_v26 = vsel %vm1837_vm3, %v5116_v32, %v1448_v47  ;;  %v6367_v32 = vld [vmem:[#allocation37_spill] sm:$0xff] }
 0x1cc   : > { %6362 = vst [vmem:[#allocation23_spill] sm:$0xff] %v5235_v26  ;;  %v1450_v39 = vpop.permute.xlu1 %1449  ;;  %1597 = vrot.lane.b32.xlu0 %v6363_v60, %s3571_s11  ;;  %v6369_v60 = vld [vmem:[#allocation50_spill] sm:$0xff] }
 0x1cd   : > { %v5241_v54 = vsel %vm1837_vm3, %v5122_v52, %v1450_v39  ;;  %v6371_v39 = vshll.u32 %v4609_v31, 16 }
 0x1ce   : > { %6364 = vst [vmem:[#allocation32_spill] sm:$0xff] %v5241_v54  ;;  %1621 = vrot.lane.b32.xlu1 %v6365_v29, %s3571_s11  ;;  %v1452_v35 = vpop.permute.xlu0 %1451 }
 0x1cf   : > { %v5247_v56 = vsel %vm1837_vm3, %v5128_v49, %v1452_v35  ;;  %v1508_v49 = vrot.slane %v6371_v39, 1  ;;  %v1512_v35 = vshll.u32 %v4931_v19, 16 }
 0x1d0   : > { %6366 = vst [vmem:[#allocation44_spill] sm:$0xff] %v5247_v56  ;;  %v1454_v53 = vpop.permute.xlu1 %1453  ;;  %1599 = vrot.lane.b32.xlu0 %v6367_v32, %s3571_s11  ;;  %v3536_v56 = vpop.eup %3535  ;;  %v6372_v32 = vld [vmem:[#allocation28_spill] sm:$0xff] }
 0x1d1   : > { %v5253_v47 = vsel %vm1837_vm3, %v5134_v51, %v1454_v53  ;;  %v3538_v51 = vpop.eup %3537  ;;  %v1514_v39 = vrot.slane %v1512_v35, 1  ;;  %v3128_v26 = vadd.f32 -1.0, %v3536_v56 }
 0x1d2   : > { %6368 = vst [vmem:[#allocation33_spill] sm:$0xff] %v5253_v47  ;;  %1623 = vrot.lane.b32.xlu1 %v6369_v60, %s3571_s11  ;;  %v1456_v52 = vpop.permute.xlu0 %1455  ;;  %v6373_v60 = vshrl.u32 %v4609_v31, 16  ;;  %v6374_v47 = vld [vmem:[#allocation13_spill] sm:$0xff] }
 0x1d3   : > { %v5259_v29 = vsel %vm1837_vm3, %v5140_v15, %v1456_v52  ;;  %v1509_v15 = vsel %vm729_vm8, %v6372_v32, %v1508_v49  ;;  %v1577_v32 = vrot.slane %v4609_v31, 1  ;;  %v699_v35 = vsel %vm419_vm4, %v3270_v57, %v3128_v26 }
 0x1d4   : > { %6370 = vst [vmem:[#allocation46_spill] sm:$0xff] %v5259_v29  ;;  %v5264_v54 = vpop.permute.xlu1 %1458  ;;  %1500 = vrot.lane.b32.xlu0 %v4277_v11, %s3568_s29  ;;  %v1510_v52 = vor.u32 %v1508_v49, %v6373_v60  ;;  %v3129_v11 = vadd.f32 -1.0, %v3538_v51  ;;  %v6375_v49 = vld [vmem:[#allocation14_spill] sm:$0xff] }
 0x1d6   : > { %1502 = vrot.lane.b32.xlu1 %v4609_v31, %s3568_s29  ;;  %v5270_v53 = vpop.permute.xlu0 %1460  ;;  %v1515_v46 = vsel %vm729_vm8, %v1510_v52, %v1514_v39  ;;  %v700_v60 = vsel %vm420_vm6, %v3271_v48, %v3129_v11  ;;  %v6379_v31 = vld [vmem:[#allocation38_spill] sm:$0xff]  ;;  %v1516_v48 = vshrl.u32 %v4931_v19, 16  ;;  %v6382_v11 = vld [vmem:[#allocation39_spill] sm:$0xff] }
 0x1d7   : > { %v728_v27 = vpack.c.bf16 %v700_v60, %v699_v35 }
 0x1d8   : > { %v5276_v29 = vpop.permute.xlu1 %1462  ;;  %1545 = vrot.lane.b32.xlu0 %v6374_v47, %s3569_s30  ;;  %v6377_v47 = vld [vmem:[#allocation47_spill] sm:$0xff]  ;;  %v1518_v60 = vor.u32 %v1516_v48, %v1514_v39 }
 0x1d9   : > { %v1578_v51 = vsel %vm1004_vm5, %v6377_v47, %v1577_v32  ;;  %v1581_v39 = vrot.slane %v728_v27, 1 }
 0x1da   : > { %1569 = vrot.lane.b32.xlu1 %v1509_v15, %s3569_s30  ;;  %v5281_v16 = vpop.permute.xlu0 %1464  ;;  %v1579_v15 = vrot.slane %v4931_v19, 1 }
 0x1dc   : > { %v5285_v18 = vpop.permute.xlu1 %1466  ;;  %1547 = vrot.lane.b32.xlu0 %v6375_v49, %s3569_s30  ;;  %v1580_v57 = vsel %vm1004_vm5, %v1577_v32, %v1579_v15  ;;  %v1524_v32 = vshrl.u32 %v728_v27, 16 }
 0x1de   : > { %1571 = vrot.lane.b32.xlu1 %v1515_v46, %s3569_s30  ;;  %v5290_v56 = vpop.permute.xlu0 %1468  ;;  %v1520_v46 = vshll.u32 %v728_v27, 16 }
 0x1df   : > { %6376 = vst [vmem:[#allocation9_spill] sm:$0xff] %v5290_v56 }
 0x1e0   : > { %v5295_v52 = vpop.permute.xlu1 %1470  ;;  %1601 = vrot.lane.b32.xlu0 %v6379_v31, %s3571_s11  ;;  %v1522_v47 = vrot.slane %v1520_v46, 1 }
 0x1e1   : > { %6378 = vst [vmem:[#allocation24_spill] sm:$0xff] %v5295_v52  ;;  %v6392_v52 = vld [vmem:[#allocation3_spill] sm:$0xff] }
 0x1e2   : > { %1625 = vrot.lane.b32.xlu1 %v1578_v51, %s3571_s11  ;;  %v5300_v49 = vpop.permute.xlu0 %1472 }
 0x1e3   : > { %6380 = vst [vmem:[#allocation10_spill] sm:$0xff] %v5300_v49 }
 0x1e4   : > { %v5304_v26 = vpop.permute.xlu1 %1474  ;;  %1603 = vrot.lane.b32.xlu0 %v6382_v11, %s3571_s11  ;;  %v1526_v11 = vor.u32 %v1524_v32, %v1522_v47  ;;  %v6388_v32 = vld [vmem:[#allocation52_spill] sm:$0xff] }
 0x1e5   : > { %6381 = vst [vmem:[#allocation25_spill] sm:$0xff] %v5304_v26  ;;  %v1523_v26 = vsel %vm729_vm8, %v1518_v60, %v1522_v47  ;;  %v2571_v47 = vld [vmem:[%s6080_s2 + $0x8] sm:$0xff]  ;;  %vm1888_vm8 = vcmask 195584  }
 0x1e6   : > { %1627 = vrot.lane.b32.xlu1 %v1580_v57, %s3571_s11  ;;  %v5309_v35 = vpop.permute.xlu0 %1476  ;;  %v6386_v57 = vld [vmem:[#allocation15_spill] sm:$0xff] }
 0x1e7   : > { %6383 = vst [vmem:[#allocation34_spill] sm:$0xff] %v5309_v35  ;;  %v6391_v35 = vld [vmem:[#allocation53_spill] sm:$0xff] }
 0x1e8   : > { %v5311_v31 = vpop.permute.xlu1 %1478  ;;  %1504 = vrot.lane.b32.xlu0 %v4931_v19, %s3568_s29  ;;  %v1582_v19 = vsel %vm1004_vm5, %v1579_v15, %v1581_v39  ;;  %v1637_v56 = vsel %vm1633_vm12, %v6392_v52, %v6391_v35  ;;  %vm1939_vm5 = vcmask 228352  }
 0x1e9   : > { %6384 = vst [vmem:[#allocation45_spill] sm:$0xff] %v5311_v31  ;;  %v1688_v52 = vsel %vm1684_vm13, %v1637_v56, %v4720_v8  ;;  %v6401_v56 = vld [vmem:[#allocation81_spill] sm:$0xff] }
 0x1ea   : > { %1506 = vrot.lane.b32.xlu1 %v728_v27, %s3568_s29  ;;  %v5316_v51 = vpop.permute.xlu0 %1480  ;;  %v2570_v27 = vld [vmem:[%s6080_s2] sm:$0xff] }
 0x1eb   : > { %6385 = vst [vmem:[#allocation35_spill] sm:$0xff] %v5316_v51  ;;  %v6387_v51 = vld [vmem:[#allocation40_spill] sm:$0xff] }
 0x1ec   : > { %v5319_v49 = vpop.permute.xlu1 %1482  ;;  %1549 = vrot.lane.b32.xlu0 %v6386_v57, %s3569_s30  ;;  %v6389_v57 = vld [vmem:[#allocation51_spill] sm:$0xff] }
 0x1ee   : > { %1573 = vrot.lane.b32.xlu1 %v1523_v26, %s3569_s30  ;;  %v5324_v48 = vpop.permute.xlu0 %1484 }
 0x1f0   : > { %v5326_v46 = vpop.permute.xlu1 %1486  ;;  %1575 = vrot.lane.b32.xlu0 %v1526_v11, %s3569_s30  ;;  %v6390_v11 = vld [vmem:[#allocation2_spill] sm:$0xff] }
 0x1f2   : > { %1605 = vrot.lane.b32.xlu1 %v6387_v51, %s3571_s11  ;;  %v5332_v60 = vpop.permute.xlu0 %1488  ;;  %v1639_v51 = vsel %vm1633_vm12, %v3711_v23, %v6388_v32  ;;  %v1661_v23 = vsel %vm1633_vm12, %v4011_v36, %v6394_v10  ;;  %v6395_v32 = vld [vmem:[#allocation61_spill] sm:$0xff]  ;;  %v6399_v10 = vld [vmem:[#allocation74_spill] sm:$0xff] }
 0x1f4   : > { %v1528_v31 = vpop.permute.xlu1 %1527  ;;  %1629 = vrot.lane.b32.xlu0 %v1582_v19, %s3571_s11  ;;  %v1635_v19 = vsel %vm1633_vm12, %v6390_v11, %v6389_v57  ;;  %v1663_v57 = vsel %vm1633_vm12, %v4024_v12, %v6395_v32  ;;  %v6396_v11 = vld [vmem:[#allocation67_spill] sm:$0xff]  ;;  %v1712_v12 = vsel %vm1684_vm13, %v1661_v23, %v6399_v10  ;;  %v6400_v32 = vld [vmem:[#allocation82_spill] sm:$0xff] }
 0x1f5   : > { %v1686_v42 = vsel %vm1684_vm13, %v1635_v19, %v6396_v11  ;;  %v1714_v36 = vsel %vm1684_vm13, %v1663_v57, %v6398_v28  ;;  %v2572_v19 = vld [vmem:[%s6080_s2 + $0x10] sm:$0xff]  ;;  %v1739_v8 = vsel %vm1735_vm14, %v1688_v52, %v6400_v32  ;;  %v1763_v28 = vsel %vm1735_vm14, %v1712_v12, %v4938_v41 }
 0x1f6   : > { %1631 = vrot.lane.b32.xlu1 %v1581_v39, %s3571_s11  ;;  %v1530_v26 = vpop.permute.xlu0 %1529  ;;  %v6393_v39 = vld [vmem:[#allocation59_spill] sm:$0xff]  ;;  %v1765_v11 = vsel %vm1735_vm14, %v1714_v36, %v4944_v25 }
 0x1f7   : > { %v1659_v7 = vsel %vm1633_vm12, %v3995_v4, %v6393_v39  ;;  %v1690_v4 = vsel %vm1684_vm13, %v1639_v51, %v4727_v33  ;;  %v6397_v39 = vld [vmem:[#allocation73_spill] sm:$0xff]  ;;  %v6402_v33 = vld [vmem:[#allocation83_spill] sm:$0xff] }
 0x1f8   : > { %v1552_v15 = vpop.permute.xlu1 %1551  ;;  %2620 = vperm.xlu0 %3422, %v2570_v27   ;;  %v2573_v27 = vld [vmem:[%s6080_s2 + $0x18] sm:$0xff]  ;;  %v1710_v34 = vsel %vm1684_vm13, %v1659_v7, %v6397_v39  ;;  %v1741_v51 = vsel %vm1735_vm14, %v1690_v4, %v6402_v33 }
 0x1f9   : > { %v1761_v23 = vsel %vm1735_vm14, %v1710_v34, %v4934_v22  ;;  %v1792_v34 = vsel %vm1786_vm1, %v1741_v51, %v5023_v40 }
 0x1fa   : > { %v1554_v35 = vpop.permute.xlu0 %1553  ;;  %2625 = vperm.xlu1 %3423, %v2571_v47   ;;  %v1737_v47 = vsel %vm1735_vm14, %v1686_v42, %v6401_v56  ;;  %v2575_v42 = vld [vmem:[%s6080_s2 + $0x28] sm:$0xff]  ;;  %v1812_v22 = vsel %vm1786_vm1, %v1761_v23, %v5077_v45 }
 0x1fb   : > { %v1788_v57 = vsel %vm1786_vm1, %v1737_v47, %v5015_v38  ;;  %v1814_v38 = vsel %vm1786_vm1, %v1763_v28, %v5083_v3  ;;  %v1863_v3 = vsel %vm1837_vm3, %v1812_v22, %v5201_v61  ;;  %v1843_v61 = vsel %vm1837_vm3, %v1792_v34, %v5152_v14  ;;  %v2579_v28 = vld [vmem:[%s6080_s2 + $0x48] sm:$0xff] }
 0x1fc   : > { %v1532_v7 = vpop.permute.xlu1 %1531  ;;  %2635 = vperm.xlu0 %3422, %v2573_v27   ;;  %v1790_v27 = vsel %vm1786_vm1, %v1739_v8, %v5021_v59  ;;  %v1839_v41 = vsel %vm1837_vm3, %v1788_v57, %v5144_v9  ;;  %v2574_v59 = vld [vmem:[%s6080_s2 + $0x20] sm:$0xff]  ;;  %v1816_v9 = vsel %vm1786_vm1, %v1765_v11, %v5088_v50  ;;  %v1865_v45 = vsel %vm1837_vm3, %v1814_v38, %v5203_v58  ;;  %v2577_v50 = vld [vmem:[%s6080_s2 + $0x38] sm:$0xff] }
 0x1fd   : > { %v1890_v25 = vsel %vm1888_vm8, %v1839_v41, %v5264_v54  ;;  %v1841_v4 = vsel %vm1837_vm3, %v1790_v27, %v5146_v6  ;;  %v1914_v6 = vsel %vm1888_vm8, %v1863_v3, %v5319_v49  ;;  %v2576_v49 = vld [vmem:[%s6080_s2 + $0x30] sm:$0xff]  ;;  %v1867_v14 = vsel %vm1837_vm3, %v1816_v9, %v5209_v24 }
 0x1fe   : > { %v1556_v52 = vpop.permute.xlu0 %1555  ;;  %2630 = vperm.xlu1 %3423, %v2572_v19   ;;  %v1941_v40 = vsel %vm1939_vm5, %v1890_v25, %v1528_v31  ;;  %v1892_v54 = vsel %vm1888_vm8, %v1841_v4, %v5270_v53  ;;  %v1916_v53 = vsel %vm1888_vm8, %v1865_v45, %v5324_v48  ;;  %v1965_v19 = vsel %vm1939_vm5, %v1914_v6, %v1552_v15  ;;  %v2580_v6 = vld [vmem:[%s6080_s2 + $0x50] sm:$0xff] }
 0x1ff   : > { %v1943_v31 = vsel %vm1939_vm5, %v1892_v54, %v1530_v26  ;;  %v1894_v48 = vsel %vm1888_vm8, %v1843_v61, %v5276_v29  ;;  %v1967_v15 = vsel %vm1939_vm5, %v1916_v53, %v1554_v35  ;;  %v1918_v24 = vsel %vm1888_vm8, %v1867_v14, %v5326_v46  ;;  %v2578_v35 = vld [vmem:[%s6080_s2 + $0x40] sm:$0xff] }
 0x200   : > { %v1584_v39 = vpop.permute.xlu1 %1583  ;;  %2645 = vperm.xlu0 %3422, %v2575_v42   ;;  %v1945_v41 = vsel %vm1939_vm5, %v1894_v48, %v1532_v7  ;;  %v1969_v34 = vsel %vm1939_vm5, %v1918_v24, %v1556_v52  ;;  %v2581_v7 = vld [vmem:[%s6080_s2 + $0x58] sm:$0xff]  ;;  %v6403_v14 = vld [vmem:[#allocation54_spill] sm:$0xff] }
 0x201   : > { %v1992_v36 = vsel %vm1990_vm7, %v1941_v40, %v1584_v39  ;;  %v1641_v48 = vsel %vm1633_vm12, %v3723_v30, %v6403_v14 }
 0x202   : > { %v2054_v10 = vshrl.u32 %v1992_v36, 16  ;;  %v2057_v12 = vshll.u32 %v1992_v36, 16  ;;  %v1586_v58 = vpop.permute.xlu0 %1585  ;;  %2640 = vperm.xlu1 %3423, %v2574_v59  }
 0x203   : > { %v1994_v32 = vsel %vm1990_vm7, %v1943_v31, %v1586_v58 }
 0x204   : > { %v2056_v8 = vrot.slane %v2054_v10, 3  ;;  %v2059_v26 = vrot.slane %v2057_v12, 4  ;;  %v1608_v56 = vpop.permute.xlu1 %1607  ;;  %v2061_v47 = vshrl.u32 %v1994_v32, 16  ;;  %v2064_v33 = vshll.u32 %v1994_v32, 16  ;;  %2655 = vperm.xlu0 %3422, %v2577_v50   ;;  %v2583_v32 = vld [vmem:[%s6080_s2 + $0x68] sm:$0xff] }
 0x205   : > { %v2016_v51 = vsel %vm1990_vm7, %v1965_v19, %v1608_v56 }
 0x206   : > { %v2149_v23 = vshrl.u32 %v2016_v51, 16  ;;  %v2152_v57 = vshll.u32 %v2016_v51, 16  ;;  %v2063_v42 = vrot.slane %v2061_v47, 3  ;;  %v2066_v11 = vrot.slane %v2064_v33, 4  ;;  %v1610_v27 = vpop.permute.xlu0 %1609  ;;  %2650 = vperm.xlu1 %3423, %v2576_v49   ;;  %v2582_v33 = vld [vmem:[%s6080_s2 + $0x60] sm:$0xff] }
 0x207   : > { %v2018_v29 = vsel %vm1990_vm7, %v1967_v15, %v1610_v27  ;;  %v2060_v59 = vor.u32 %v2059_v26, %v2056_v8  ;;  %v6406_v27 = vld [vmem:[#allocation84_spill] sm:$0xff] }
 0x208   : > { %v1588_v22 = vpop.permute.xlu1 %1587  ;;  %v2157_v38 = vshrl.u32 %v2018_v29, 16  ;;  %v2160_v25 = vshll.u32 %v2018_v29, 16  ;;  %2665 = vperm.xlu0 %3422, %v2579_v28   ;;  %v2151_v9 = vrot.slane %v2149_v23, 3  ;;  %v2154_v4 = vrot.slane %v2152_v57, 4  ;;  %v6404_v23 = vld [vmem:[#allocation68_spill] sm:$0xff] }
 0x209   : > { %v1996_v46 = vsel %vm1990_vm7, %v1945_v41, %v1588_v22  ;;  %v2067_v40 = vor.u32 %v2066_v11, %v2063_v42  ;;  %v1692_v57 = vsel %vm1684_vm13, %v1641_v48, %v6404_v23  ;;  %v2585_v42 = vld [vmem:[%s6080_s2 + $0x78] sm:$0xff]  ;;  %v6405_v11 = vld [vmem:[#allocation62_spill] sm:$0xff]  ;;  %v6408_v22 = vld [vmem:[#allocation63_spill] sm:$0xff] }
 0x20a   : > { %v2069_v39 = vshrl.u32 %v1996_v46, 16  ;;  %v2072_v45 = vshll.u32 %v1996_v46, 16  ;;  %v2159_v3 = vrot.slane %v2157_v38, 3  ;;  %v2162_v54 = vrot.slane %v2160_v25, 4  ;;  %v1612_v36 = vpop.permute.xlu0 %1611  ;;  %2660 = vperm.xlu1 %3423, %v2578_v35   ;;  %v6407_v35 = vld [vmem:[#allocation55_spill] sm:$0xff]  ;;  %v6409_v25 = vld [vmem:[#allocation76_spill] sm:$0xff] }
 0x20b   : > { %v2020_v52 = vsel %vm1990_vm7, %v1969_v34, %v1612_v36  ;;  %v2068_v50 = vsel %vm2053_vm9, %v2060_v59, %v2067_v40  ;;  %v5466_v53 = vor.u32 %v2154_v4, %v2151_v9  ;;  %v1665_v30 = vsel %vm1633_vm12, %v4060_v13, %v6405_v11  ;;  %v2584_v9 = vld [vmem:[%s6080_s2 + $0x70] sm:$0xff]  ;;  %v6410_v4 = vld [vmem:[#allocation69_spill] sm:$0xff] }
 0x20c   : > { %v2071_v31 = vrot.slane %v2069_v39, 3  ;;  %v2074_v10 = vrot.slane %v2072_v45, 4  ;;  %v5463_v12 = vpop.permute.xlu1 %1490  ;;  %v2165_v58 = vshrl.u32 %v2020_v52, 16  ;;  %v2168_v61 = vshll.u32 %v2020_v52, 16  ;;  %3332 = vmatprep.mubr.msk.bf16.mxu0 %vm2268_vm10, %v2068_v50  ;;  %2675 = vperm.xlu0 %3422, %v2581_v7  }
 0x20d   : > { %v2163_v19 = vor.u32 %v2162_v54, %v2159_v3  ;;  %v1743_v24 = vsel %vm1735_vm14, %v1692_v57, %v6406_v27  ;;  %v1643_v34 = vsel %vm1633_vm12, %v3767_v1, %v6407_v35  ;;  %v1667_v38 = vsel %vm1633_vm12, %v4065_v17, %v6408_v22  ;;  %v6411_v1 = vld [vmem:[#allocation77_spill] sm:$0xff] }
 0x20e   : > { %v5471_v49 = vor.u32 %v2074_v10, %v2071_v31  ;;  %v2167_v8 = vrot.slane %v2165_v58, 3  ;;  %v2170_v26 = vrot.slane %v2168_v61, 4  ;;  %v1534_v56 = vpop.permute.xlu0 %1533  ;;  %2670 = vperm.xlu1 %3423, %v2580_v6   ;;  %v1716_v59 = vsel %vm1684_vm13, %v1665_v30, %v6409_v25  ;;  %v2591_v30 = vld [vmem:[%s6080_s2 + $0xa8] sm:$0xff] }
 0x20f   : > { %v2164_v47 = vsel %vm2053_vm9, %v5466_v53, %v2163_v19  ;;  %v1794_v13 = vsel %vm1786_vm1, %v1743_v24, %v5029_v37  ;;  %v1694_v46 = vsel %vm1684_vm13, %v1643_v34, %v6410_v4  ;;  %v1767_v17 = vsel %vm1735_vm14, %v1716_v59, %v4947_v2  ;;  %v6412_v37 = vld [vmem:[#allocation85_spill] sm:$0xff]  ;;  %v2587_v2 = vld [vmem:[%s6080_s2 + $0x88] sm:$0xff] }
 0x210   : > { %v5481_v15 = vor.u32 %v2170_v26, %v2167_v8  ;;  %v1558_v51 = vpop.permute.xlu1 %1557  ;;  %v2076_v28 = vsel %vm2053_vm9, %v2067_v40, %v5471_v49  ;;  %3356 = vmatprep.mubr.msk.bf16.mxu1 %vm2268_vm10, %v2164_v47  ;;  %2685 = vperm.xlu0 %3422, %v2583_v32   ;;  %v1718_v40 = vsel %vm1684_vm13, %v1667_v38, %v6411_v1  ;;  %v2589_v32 = vld [vmem:[%s6080_s2 + $0x98] sm:$0xff]  ;;  %v2590_v38 = vld [vmem:[%s6080_s2 + $0xa0] sm:$0xff] }
 0x211   : > { %3333 = vmatmul.mubr.msk.bf16.vlgmr.msra.gmra.mxu0 %vm2268_vm10, %v2076_v28  ;;  %v1845_v7 = vsel %vm1837_vm3, %v1794_v13, %v5154_v43  ;;  %v1745_v45 = vsel %vm1735_vm14, %v1694_v46, %v6412_v37  ;;  %v1769_v3 = vsel %vm1735_vm14, %v1718_v40, %v4952_v0  ;;  %v1818_v54 = vsel %vm1786_vm1, %v1767_v17, %v5094_v63  ;;  %v6413_v17 = vld [vmem:[#allocation56_spill] sm:$0xff] }
 0x212   : > { %v1536_v41 = vpop.permute.xlu0 %1535  ;;  %v2172_v29 = vsel %vm2053_vm9, %v2163_v19, %v5481_v15  ;;  %2680 = vperm.xlu1 %3423, %v2582_v33   ;;  %v1896_v36 = vsel %vm1888_vm8, %v1845_v7, %v5281_v16  ;;  %v1796_v43 = vsel %vm1786_vm1, %v1745_v45, %v5031_v44  ;;  %v1820_v52 = vsel %vm1786_vm1, %v1769_v3, %v5096_v20  ;;  %v2586_v20 = vld [vmem:[%s6080_s2 + $0x80] sm:$0xff] }
 0x213   : > { %3357 = vmatmul.mubr.msk.bf16.vlgmr.msra.gmra.mxu1 %vm2268_vm10, %v2172_v29  ;;  %v1869_v50 = vsel %vm1837_vm3, %v1818_v54, %v5211_v55  ;;  %v1947_v0 = vsel %vm1939_vm5, %v1896_v36, %v1534_v56  ;;  %v1847_v16 = vsel %vm1837_vm3, %v1796_v43, %v5160_v21  ;;  %v1871_v63 = vsel %vm1837_vm3, %v1820_v52, %v5217_v62  ;;  %v6414_v45 = vld [vmem:[#allocation70_spill] sm:$0xff]  ;;  %v2595_v54 = vld [vmem:[%s6080_s2 + $0xc8] sm:$0xff]  ;;  %v6415_v36 = vld [vmem:[#allocation64_spill] sm:$0xff] }
 0x214   : > { %v1560_v39 = vpop.permute.xlu1 %1559  ;;  %2695 = vperm.xlu0 %3422, %v2585_v42   ;;  %v1920_v31 = vsel %vm1888_vm8, %v1869_v50, %v5332_v60  ;;  %v1898_v55 = vsel %vm1888_vm8, %v1847_v16, %v5285_v18  ;;  %v1922_v62 = vsel %vm1888_vm8, %v1871_v63, %v5463_v12  ;;  %v2588_v12 = vld [vmem:[%s6080_s2 + $0x90] sm:$0xff]  ;;  %v1645_v7 = vsel %vm1633_vm12, %v3789_v5, %v6413_v17  ;;  %v6417_v43 = vld [vmem:[#allocation86_spill] sm:$0xff]  ;;  %v6420_v63 = vld [vmem:[#allocation65_spill] sm:$0xff] }
 0x215   : > { %v1971_v10 = vsel %vm1939_vm5, %v1920_v31, %v1558_v51  ;;  %v1949_v60 = vsel %vm1939_vm5, %v1898_v55, %v1536_v41  ;;  %v1973_v33 = vsel %vm1939_vm5, %v1922_v62, %v1560_v39  ;;  %v1696_v3 = vsel %vm1684_vm13, %v1645_v7, %v6414_v45  ;;  %v6421_v31 = vld [vmem:[#allocation18_spill] sm:$0xff] }
 0x216   : > { %v1590_v6 = vpop.permute.xlu0 %1589  ;;  %2690 = vperm.xlu1 %3423, %v2584_v9   ;;  %v1747_v52 = vsel %vm1735_vm14, %v1696_v3, %v6417_v43 }
 0x217   : > { %v1998_v44 = vsel %vm1990_vm7, %v1947_v0, %v1590_v6  ;;  %v6418_v0 = vld [vmem:[#allocation57_spill] sm:$0xff]  ;;  %v6419_v6 = vld [vmem:[#allocation4_spill] sm:$0xff] }
 0x218   : > { %v1614_v58 = vpop.permute.xlu1 %1613  ;;  %v2077_v61 = vshrl.u32 %v1998_v44, 16  ;;  %v2080_v21 = vshll.u32 %v1998_v44, 16  ;;  %2705 = vperm.xlu0 %3422, %v2587_v2   ;;  %v6416_v2 = vld [vmem:[#allocation17_spill] sm:$0xff]  ;;  %v1647_v16 = vsel %vm1633_vm12, %v6419_v6, %v6418_v0  ;;  %v1671_v44 = vsel %vm1633_vm12, %v6421_v31, %v6420_v63 }
 0x219   : > { %v2022_v19 = vsel %vm1990_vm7, %v1971_v10, %v1614_v58  ;;  %v1669_v5 = vsel %vm1633_vm12, %v6416_v2, %v6415_v36  ;;  %v6423_v10 = vld [vmem:[#allocation92_spill] sm:$0xff]  ;;  %v2599_v36 = vld [vmem:[%s6080_s2 + $0xe8] sm:$0xff] }
 0x21a   : > { %v2173_v8 = vshrl.u32 %v2022_v19, 16  ;;  %v2176_v26 = vshll.u32 %v2022_v19, 16  ;;  %v2079_v18 = vrot.slane %v2077_v61, 3  ;;  %v2082_v56 = vrot.slane %v2080_v21, 4  ;;  %v1592_v47 = vpop.permute.xlu0 %1591  ;;  %2700 = vperm.xlu1 %3423, %v2586_v20   ;;  %v6422_v20 = vld [vmem:[#allocation78_spill] sm:$0xff]  ;;  %v6424_v21 = vld [vmem:[#allocation71_spill] sm:$0xff] }
 0x21b   : > { %v2000_v14 = vsel %vm1990_vm7, %v1949_v60, %v1592_v47  ;;  %v1720_v55 = vsel %vm1684_vm13, %v1669_v5, %v6422_v20  ;;  %v1798_v58 = vsel %vm1786_vm1, %v1747_v52, %v6423_v10  ;;  %v2594_v61 = vld [vmem:[%s6080_s2 + $0xc0] sm:$0xff]  ;;  %v1698_v62 = vsel %vm1684_vm13, %v1647_v16, %v6424_v21  ;;  %v6425_v60 = vld [vmem:[#allocation79_spill] sm:$0xff]  ;;  %v2601_v10 = vld [vmem:[%s6080_s2 + $0xf8] sm:$0xff] }
 0x21c   : > { %v2175_v48 = vrot.slane %v2173_v8, 3  ;;  %v2178_v51 = vrot.slane %v2176_v26, 4  ;;  %v2083_v28 = vor.u32 %v2082_v56, %v2079_v18  ;;  %v1616_v23 = vpop.permute.xlu1 %1615  ;;  %v2085_v57 = vshrl.u32 %v2000_v14, 16  ;;  %2715 = vperm.xlu0 %3422, %v2589_v32   ;;  %v6426_v32 = vld [vmem:[#allocation89_spill] sm:$0xff]  ;;  %v6427_v26 = vld [vmem:[#allocation20_spill] sm:$0xff]  ;;  %v6428_v47 = vld [vmem:[#allocation87_spill] sm:$0xff] }
 0x21d   : > { %v2024_v42 = vsel %vm1990_vm7, %v1973_v33, %v1616_v23  ;;  %v2088_v11 = vshll.u32 %v2000_v14, 16  ;;  %v1722_v19 = vsel %vm1684_vm13, %v1671_v44, %v6425_v60  ;;  %v1771_v8 = vsel %vm1735_vm14, %v1720_v55, %v6426_v32  ;;  %v6429_v14 = vld [vmem:[#allocation90_spill] sm:$0xff] }
 0x21e   : > { %v2179_v27 = vor.u32 %v2178_v51, %v2175_v48  ;;  %v2181_v24 = vshrl.u32 %v2024_v42, 16  ;;  %v2184_v41 = vshll.u32 %v2024_v42, 16  ;;  %v2087_v29 = vrot.slane %v2085_v57, 3  ;;  %v1493_v35 = vpop.permute.xlu0 %1492  ;;  %2710 = vperm.xlu1 %3423, %v2588_v12   ;;  %v6430_v48 = vld [vmem:[#allocation16_spill] sm:$0xff]  ;;  %v2597_v57 = vld [vmem:[%s6080_s2 + $0xd8] sm:$0xff] }
 0x21f   : > { %v2090_v34 = vrot.slane %v2088_v11, 4  ;;  %v2084_v22 = vsel %vm2053_vm9, %v5471_v49, %v2083_v28  ;;  %v2593_v49 = vld [vmem:[%s6080_s2 + $0xb8] sm:$0xff]  ;;  %v1849_v18 = vsel %vm1837_vm3, %v1798_v58, %v6427_v26  ;;  %v1749_v33 = vsel %vm1735_vm14, %v1698_v62, %v6428_v47 }
 0x220   : > { %v2183_v25 = vrot.slane %v2181_v24, 3  ;;  %v2186_v59 = vrot.slane %v2184_v41, 4  ;;  %v1495_v13 = vpop.permute.xlu1 %1494  ;;  %3336 = vmatprep.mubr.msk.bf16.mxu0 %vm2268_vm10, %v2084_v22  ;;  %v2180_v9 = vsel %vm2053_vm9, %v5481_v15, %v2179_v27  ;;  %2725 = vperm.xlu0 %3422, %v2591_v30   ;;  %v2592_v15 = vld [vmem:[%s6080_s2 + $0xb0] sm:$0xff]  ;;  %v1773_v12 = vsel %vm1735_vm14, %v1722_v19, %v6429_v14  ;;  %v6432_v42 = vld [vmem:[#allocation93_spill] sm:$0xff]  ;;  %v6433_v30 = vld [vmem:[#allocation19_spill] sm:$0xff] }
 0x221   : > { %v5576_v4 = vor.u32 %v2090_v34, %v2087_v29  ;;  %3360 = vmatprep.mubr.msk.bf16.mxu1 %vm2268_vm10, %v2180_v9  ;;  %v1822_v51 = vsel %vm1786_vm1, %v1771_v8, %v6430_v48  ;;  %v1800_v11 = vsel %vm1786_vm1, %v1749_v33, %v6432_v42  ;;  %v6434_v24 = vld [vmem:[#allocation7_spill] sm:$0xff]  ;;  %v6435_v22 = vld [vmem:[#allocation29_spill] sm:$0xff]  ;;  %v2600_v8 = vld [vmem:[%s6080_s2 + $0xf0] sm:$0xff] }
 0x222   : > { %v5582_v46 = vor.u32 %v2186_v59, %v2183_v25  ;;  %v1538_v1 = vpop.permute.xlu0 %1537  ;;  %2720 = vperm.xlu1 %3423, %v2590_v38   ;;  %v1873_v41 = vsel %vm1837_vm3, %v1822_v51, %v6434_v24  ;;  %v1851_v38 = vsel %vm1837_vm3, %v1800_v11, %v6435_v22  ;;  %v6436_v25 = vld [vmem:[#allocation22_spill] sm:$0xff]  ;;  %v6440_v11 = vld [vmem:[#allocation72_spill] sm:$0xff] }
 0x223   : > { %v2092_v40 = vsel %vm2053_vm9, %v2083_v28, %v5576_v4  ;;  %v6431_v28 = vld [vmem:[#allocation9_spill] sm:$0xff]  ;;  %v1924_v9 = vsel %vm1888_vm8, %v1873_v41, %v1493_v35  ;;  %v6438_v51 = vld [vmem:[#allocation58_spill] sm:$0xff] }
 0x224   : > { %v1562_v39 = vpop.permute.xlu1 %1561  ;;  %3337 = vmatmul.mubr.msk.bf16.gmra.mxu0 %vm2268_vm10, %v2092_v40  ;;  %v2188_v37 = vsel %vm2053_vm9, %v2179_v27, %v5582_v46  ;;  %2735 = vperm.xlu0 %3422, %v2593_v49   ;;  %v1900_v23 = vsel %vm1888_vm8, %v1849_v18, %v6431_v28  ;;  %v1824_v27 = vsel %vm1786_vm1, %v1773_v12, %v6433_v30  ;;  %v2596_v40 = vld [vmem:[%s6080_s2 + $0xd0] sm:$0xff]  ;;  %v6439_v28 = vld [vmem:[#allocation5_spill] sm:$0xff]  ;;  %v6441_v24 = vld [vmem:[#allocation66_spill] sm:$0xff] }
 0x225   : > { %3361 = vmatmul.mubr.msk.bf16.gmra.mxu1 %vm2268_vm10, %v2188_v37  ;;  %v1951_v29 = vsel %vm1939_vm5, %v1900_v23, %v1538_v1  ;;  %v1875_v59 = vsel %vm1837_vm3, %v1824_v27, %v6436_v25  ;;  %v1975_v1 = vsel %vm1939_vm5, %v1924_v9, %v1562_v39  ;;  %v1649_v23 = vsel %vm1633_vm12, %v6439_v28, %v6438_v51  ;;  %v2605_v27 = vld [vmem:[%s6080_s2 + $0x118] sm:$0xff]  ;;  %v6444_v25 = vld [vmem:[#allocation80_spill] sm:$0xff]  ;;  %v6445_v9 = vld [vmem:[#allocation94_spill] sm:$0xff] }
 0x226   : > { %v1540_v50 = vpop.permute.xlu0 %1539  ;;  %2730 = vperm.xlu1 %3423, %v2592_v15   ;;  %v6437_v15 = vld [vmem:[#allocation24_spill] sm:$0xff]  ;;  %v1926_v3 = vsel %vm1888_vm8, %v1875_v59, %v1495_v13  ;;  %v2598_v13 = vld [vmem:[%s6080_s2 + $0xe0] sm:$0xff]  ;;  %v1700_v30 = vsel %vm1684_vm13, %v1649_v23, %v6440_v11  ;;  %v6442_v41 = vld [vmem:[#allocation21_spill] sm:$0xff] }
 0x227   : > { %v1902_v17 = vsel %vm1888_vm8, %v1851_v38, %v6437_v15  ;;  %v6446_v15 = vld [vmem:[#allocation91_spill] sm:$0xff] }
 0x228   : > { %v1564_v56 = vpop.permute.xlu1 %1563  ;;  %2745 = vperm.xlu0 %3422, %v2595_v54   ;;  %v1953_v54 = vsel %vm1939_vm5, %v1902_v17, %v1540_v50  ;;  %v2611_v23 = vld [vmem:[%s6080_s2 + $0x148] sm:$0xff] }
 0x229   : > { %v1977_v39 = vsel %vm1939_vm5, %v1926_v3, %v1564_v56 }
 0x22a   : > { %v1594_v34 = vpop.permute.xlu0 %1593  ;;  %2740 = vperm.xlu1 %3423, %v2594_v61  }
 0x22b   : > { %v2002_v49 = vsel %vm1990_vm7, %v1951_v29, %v1594_v34  ;;  %v1673_v29 = vsel %vm1633_vm12, %v6442_v41, %v6441_v24  ;;  %v6443_v34 = vld [vmem:[#allocation88_spill] sm:$0xff] }
 0x22c   : > { %v1618_v7 = vpop.permute.xlu1 %1617  ;;  %v2093_v37 = vshrl.u32 %v2002_v49, 16  ;;  %v2096_v45 = vshll.u32 %v2002_v49, 16  ;;  %2755 = vperm.xlu0 %3422, %v2597_v57   ;;  %v1751_v22 = vsel %vm1735_vm14, %v1700_v30, %v6443_v34  ;;  %v1724_v59 = vsel %vm1684_vm13, %v1673_v29, %v6444_v25  ;;  %v2610_v29 = vld [vmem:[%s6080_s2 + $0x140] sm:$0xff] }
 0x22d   : > { %v2026_v35 = vsel %vm1990_vm7, %v1975_v1, %v1618_v7  ;;  %v1802_v49 = vsel %vm1786_vm1, %v1751_v22, %v6445_v9  ;;  %v1775_v17 = vsel %vm1735_vm14, %v1724_v59, %v6446_v15  ;;  %v6447_v1 = vld [vmem:[#allocation30_spill] sm:$0xff]  ;;  %v2612_v15 = vld [vmem:[%s6080_s2 + $0x150] sm:$0xff] }
 0x22e   : > { %v2189_v2 = vshrl.u32 %v2026_v35, 16  ;;  %v2192_v5 = vshll.u32 %v2026_v35, 16  ;;  %v2095_v43 = vrot.slane %v2093_v37, 3  ;;  %v2098_v52 = vrot.slane %v2096_v45, 4  ;;  %v1596_v0 = vpop.permute.xlu0 %1595  ;;  %2750 = vperm.xlu1 %3423, %v2596_v40   ;;  %v2604_v40 = vld [vmem:[%s6080_s2 + $0x110] sm:$0xff]  ;;  %v6448_v45 = vld [vmem:[#allocation6_spill] sm:$0xff] }
 0x22f   : > { %v2004_v6 = vsel %vm1990_vm7, %v1953_v54, %v1596_v0  ;;  %v1853_v7 = vsel %vm1837_vm3, %v1802_v49, %v6447_v1  ;;  %v1826_v3 = vsel %vm1786_vm1, %v1775_v17, %v6448_v45  ;;  %v6449_v54 = vld [vmem:[#allocation10_spill] sm:$0xff]  ;;  %v2615_v1 = vld [vmem:[%s6080_s2 + $0x168] sm:$0xff] }
 0x230   : > { %v2191_v50 = vrot.slane %v2189_v2, 3  ;;  %v2194_v16 = vrot.slane %v2192_v5, 4  ;;  %v2099_v63 = vor.u32 %v2098_v52, %v2095_v43  ;;  %v1620_v31 = vpop.permute.xlu1 %1619  ;;  %v2101_v44 = vshrl.u32 %v2004_v6, 16  ;;  %2765 = vperm.xlu0 %3422, %v2599_v36   ;;  %v2607_v36 = vld [vmem:[%s6080_s2 + $0x128] sm:$0xff]  ;;  %v6450_v2 = vld [vmem:[#allocation8_spill] sm:$0xff] }
 0x231   : > { %v2028_v20 = vsel %vm1990_vm7, %v1977_v39, %v1620_v31  ;;  %v2104_v55 = vshll.u32 %v2004_v6, 16  ;;  %v1904_v35 = vsel %vm1888_vm8, %v1853_v7, %v6449_v54  ;;  %v1877_v5 = vsel %vm1837_vm3, %v1826_v3, %v6450_v2  ;;  %v2606_v6 = vld [vmem:[%s6080_s2 + $0x120] sm:$0xff] }
 0x232   : > { %v2195_v58 = vor.u32 %v2194_v16, %v2191_v50  ;;  %v2197_v61 = vshrl.u32 %v2028_v20, 16  ;;  %v2200_v21 = vshll.u32 %v2028_v20, 16  ;;  %v2103_v62 = vrot.slane %v2101_v44, 3  ;;  %v1497_v60 = vpop.permute.xlu0 %1496  ;;  %2760 = vperm.xlu1 %3423, %v2598_v13   ;;  %v6451_v13 = vld [vmem:[#allocation25_spill] sm:$0xff]  ;;  %v6454_v3 = vld [vmem:[#allocation34_spill] sm:$0xff] }
 0x233   : > { %v2106_v19 = vrot.slane %v2104_v55, 4  ;;  %v2100_v32 = vsel %vm2053_vm9, %v5576_v4, %v2099_v63  ;;  %v2603_v4 = vld [vmem:[%s6080_s2 + $0x108] sm:$0xff]  ;;  %v1928_v0 = vsel %vm1888_vm8, %v1877_v5, %v1497_v60  ;;  %v6452_v50 = vld [vmem:[#allocation41_spill] sm:$0xff]  ;;  %v6455_v54 = vld [vmem:[#allocation42_spill] sm:$0xff] }
 0x234   : > { %v2199_v26 = vrot.slane %v2197_v61, 3  ;;  %v2202_v18 = vrot.slane %v2200_v21, 4  ;;  %v1499_v56 = vpop.permute.xlu1 %1498  ;;  %3340 = vmatprep.mubr.msk.bf16.mxu0 %vm2268_vm10, %v2100_v32  ;;  %v2196_v47 = vsel %vm2053_vm9, %v5582_v46, %v2195_v58  ;;  %2775 = vperm.xlu0 %3422, %v2601_v10   ;;  %v2602_v46 = vld [vmem:[%s6080_s2 + $0x100] sm:$0xff]  ;;  %v1906_v16 = vsel %vm1888_vm8, %v6452_v50, %v6451_v13  ;;  %v6453_v55 = vld [vmem:[#allocation23_spill] sm:$0xff]  ;;  %v2609_v21 = vld [vmem:[%s6080_s2 + $0x138] sm:$0xff] }
 0x235   : > { %v5680_v33 = vor.u32 %v2106_v19, %v2103_v62  ;;  %3364 = vmatprep.mubr.msk.bf16.mxu1 %vm2268_vm10, %v2196_v47  ;;  %v1930_v10 = vsel %vm1888_vm8, %v6453_v55, %v1499_v56  ;;  %v2608_v56 = vld [vmem:[%s6080_s2 + $0x130] sm:$0xff]  ;;  %v6458_v13 = vld [vmem:[#allocation31_spill] sm:$0xff] }
 0x236   : > { %v5686_v14 = vor.u32 %v2202_v18, %v2199_v26  ;;  %v1542_v12 = vpop.permute.xlu0 %1541  ;;  %2770 = vperm.xlu1 %3423, %v2600_v8  }
 0x237   : > { %v2108_v48 = vsel %vm2053_vm9, %v2099_v63, %v5680_v33  ;;  %v1955_v43 = vsel %vm1939_vm5, %v1904_v35, %v1542_v12  ;;  %v1908_v35 = vsel %vm1888_vm8, %v6455_v54, %v6454_v3 }
 0x238   : > { %v1566_v57 = vpop.permute.xlu1 %1565  ;;  %3341 = vmatmul.mubr.msk.bf16.gmra.mxu0 %vm2268_vm10, %v2108_v48  ;;  %v2204_v42 = vsel %vm2053_vm9, %v2195_v58, %v5686_v14  ;;  %2785 = vperm.xlu0 %3422, %v2603_v4  }
 0x239   : > { %3365 = vmatmul.mubr.msk.bf16.gmra.mxu1 %vm2268_vm10, %v2204_v42  ;;  %v1979_v63 = vsel %vm1939_vm5, %v1928_v0, %v1566_v57 }
 0x23a   : > { %v1544_v38 = vpop.permute.xlu0 %1543  ;;  %2780 = vperm.xlu1 %3423, %v2602_v46  }
 0x23b   : > { %v1957_v58 = vsel %vm1939_vm5, %v1906_v16, %v1544_v38 }
 0x23c   : > { %v1568_v37 = vpop.permute.xlu1 %1567  ;;  %2795 = vperm.xlu0 %3422, %v2605_v27  }
 0x23d   : > { %v1981_v26 = vsel %vm1939_vm5, %v1930_v10, %v1568_v37  ;;  %v2614_v37 = vld [vmem:[%s6080_s2 + $0x160] sm:$0xff] }
 0x23e   : > { %v1598_v52 = vpop.permute.xlu0 %1597  ;;  %2790 = vperm.xlu1 %3423, %v2604_v40  }
 0x23f   : > { %v2006_v39 = vsel %vm1990_vm7, %v1955_v43, %v1598_v52  ;;  %v6456_v43 = vld [vmem:[#allocation32_spill] sm:$0xff] }
 0x240   : > { %v1622_v31 = vpop.permute.xlu1 %1621  ;;  %v2109_v44 = vshrl.u32 %v2006_v39, 16  ;;  %v2112_v20 = vshll.u32 %v2006_v39, 16  ;;  %2805 = vperm.xlu0 %3422, %v2607_v36   ;;  %v2617_v36 = vld [vmem:[%s6080_s2 + $0x178] sm:$0xff]  ;;  %v2616_v39 = vld [vmem:[%s6080_s2 + $0x170] sm:$0xff] }
 0x241   : > { %v2030_v61 = vsel %vm1990_vm7, %v1979_v63, %v1622_v31 }
 0x242   : > { %v2205_v62 = vshrl.u32 %v2030_v61, 16  ;;  %v2208_v60 = vshll.u32 %v2030_v61, 16  ;;  %v2111_v19 = vrot.slane %v2109_v44, 3  ;;  %v2114_v32 = vrot.slane %v2112_v20, 4  ;;  %v1600_v8 = vpop.permute.xlu0 %1599  ;;  %2800 = vperm.xlu1 %3423, %v2606_v6   ;;  %v6457_v6 = vld [vmem:[#allocation45_spill] sm:$0xff]  ;;  %v6459_v20 = vld [vmem:[#allocation44_spill] sm:$0xff] }
 0x243   : > { %v2008_v18 = vsel %vm1990_vm7, %v1957_v58, %v1600_v8  ;;  %v1910_v50 = vsel %vm1888_vm8, %v6458_v13, %v6457_v6 }
 0x244   : > { %v2207_v47 = vrot.slane %v2205_v62, 3  ;;  %v2210_v4 = vrot.slane %v2208_v60, 4  ;;  %v2115_v12 = vor.u32 %v2114_v32, %v2111_v19  ;;  %v1624_v48 = vpop.permute.xlu1 %1623  ;;  %v2117_v46 = vshrl.u32 %v2008_v18, 16  ;;  %2815 = vperm.xlu0 %3422, %v2609_v21  }
 0x245   : > { %v2032_v51 = vsel %vm1990_vm7, %v1981_v26, %v1624_v48  ;;  %v2120_v28 = vshll.u32 %v2008_v18, 16 }
 0x246   : > { %v2211_v57 = vor.u32 %v2210_v4, %v2207_v47  ;;  %v2213_v42 = vshrl.u32 %v2032_v51, 16  ;;  %v2216_v11 = vshll.u32 %v2032_v51, 16  ;;  %v2119_v30 = vrot.slane %v2117_v46, 3  ;;  %v1501_v27 = vpop.permute.xlu0 %1500  ;;  %2810 = vperm.xlu1 %3423, %v2608_v56  }
 0x247   : > { %v2122_v24 = vrot.slane %v2120_v28, 4  ;;  %v2116_v41 = vsel %vm2053_vm9, %v5680_v33, %v2115_v12  ;;  %v2613_v33 = vld [vmem:[%s6080_s2 + $0x158] sm:$0xff]  ;;  %v1932_v52 = vsel %vm1888_vm8, %v6456_v43, %v1501_v27 }
 0x248   : > { %v2215_v34 = vrot.slane %v2213_v42, 3  ;;  %v2218_v22 = vrot.slane %v2216_v11, 4  ;;  %v1503_v38 = vpop.permute.xlu1 %1502  ;;  %3344 = vmatprep.mubr.msk.bf16.mxu0 %vm2268_vm10, %v2116_v41  ;;  %v2212_v25 = vsel %vm2053_vm9, %v5686_v14, %v2211_v57  ;;  %2825 = vperm.xlu0 %3422, %v2611_v23  }
 0x249   : > { %v2123_v59 = vor.u32 %v2122_v24, %v2119_v30  ;;  %3368 = vmatprep.mubr.msk.bf16.mxu1 %vm2268_vm10, %v2212_v25  ;;  %v1934_v55 = vsel %vm1888_vm8, %v6459_v20, %v1503_v38 }
 0x24a   : > { %v2219_v9 = vor.u32 %v2218_v22, %v2215_v34  ;;  %v1546_v49 = vpop.permute.xlu0 %1545  ;;  %2820 = vperm.xlu1 %3423, %v2610_v29  }
 0x24b   : > { %v2124_v40 = vsel %vm2053_vm9, %v2115_v12, %v2123_v59  ;;  %v1959_v2 = vsel %vm1939_vm5, %v1908_v35, %v1546_v49  ;;  %v6460_v49 = vld [vmem:[#allocation35_spill] sm:$0xff] }
 0x24c   : > { %v1570_v17 = vpop.permute.xlu1 %1569  ;;  %3345 = vmatmul.mubr.msk.bf16.gmra.mxu0 %vm2268_vm10, %v2124_v40  ;;  %v2220_v14 = vsel %vm2053_vm9, %v2211_v57, %v2219_v9  ;;  %2835 = vperm.xlu0 %3422, %v2613_v33   ;;  %v6461_v40 = vld [vmem:[#allocation43_spill] sm:$0xff] }
 0x24d   : > { %3369 = vmatmul.mubr.msk.bf16.gmra.mxu1 %vm2268_vm10, %v2220_v14  ;;  %v1983_v16 = vsel %vm1939_vm5, %v1932_v52, %v1570_v17  ;;  %v6462_v14 = vld [vmem:[#allocation33_spill] sm:$0xff] }
 0x24e   : > { %v1548_v7 = vpop.permute.xlu0 %1547  ;;  %2830 = vperm.xlu1 %3423, %v2612_v15   ;;  %v1912_v15 = vsel %vm1888_vm8, %v6461_v40, %v6460_v49 }
 0x24f   : > { %v1961_v10 = vsel %vm1939_vm5, %v1910_v50, %v1548_v7 }
 0x250   : > { %v1572_v45 = vpop.permute.xlu1 %1571  ;;  %2845 = vperm.xlu0 %3422, %v2615_v1  }
 0x251   : > { %v1985_v32 = vsel %vm1939_vm5, %v1934_v55, %v1572_v45 }
 0x252   : > { %v1602_v5 = vpop.permute.xlu0 %1601  ;;  %2840 = vperm.xlu1 %3423, %v2614_v37   ;;  %v6463_v37 = vld [vmem:[#allocation46_spill] sm:$0xff] }
 0x253   : > { %v2010_v0 = vsel %vm1990_vm7, %v1959_v2, %v1602_v5 }
 0x254   : > { %v1626_v63 = vpop.permute.xlu1 %1625  ;;  %v2125_v31 = vshrl.u32 %v2010_v0, 16  ;;  %v2128_v44 = vshll.u32 %v2010_v0, 16  ;;  %2855 = vperm.xlu0 %3422, %v2617_v36  }
 0x255   : > { %v2034_v58 = vsel %vm1990_vm7, %v1983_v16, %v1626_v63 }
 0x256   : > { %v2221_v61 = vshrl.u32 %v2034_v58, 16  ;;  %v2224_v21 = vshll.u32 %v2034_v58, 16  ;;  %v2127_v62 = vrot.slane %v2125_v31, 3  ;;  %v2130_v60 = vrot.slane %v2128_v44, 4  ;;  %v1604_v19 = vpop.permute.xlu0 %1603  ;;  %2850 = vperm.xlu1 %3423, %v2616_v39  }
 0x257   : > { %v2012_v8 = vsel %vm1990_vm7, %v1961_v10, %v1604_v19 }
 0x258   : > { %v2223_v26 = vrot.slane %v2221_v61, 3  ;;  %v2226_v18 = vrot.slane %v2224_v21, 4  ;;  %v2131_v56 = vor.u32 %v2130_v60, %v2127_v62  ;;  %v1628_v47 = vpop.permute.xlu1 %1627  ;;  %v2133_v4 = vshrl.u32 %v2012_v8, 16 }
 0x259   : > { %v2036_v12 = vsel %vm1990_vm7, %v1985_v32, %v1628_v47  ;;  %v2136_v48 = vshll.u32 %v2012_v8, 16 }
 0x25a   : > { %v2227_v46 = vor.u32 %v2226_v18, %v2223_v26  ;;  %v2229_v51 = vshrl.u32 %v2036_v12, 16  ;;  %v2232_v28 = vshll.u32 %v2036_v12, 16  ;;  %v2135_v23 = vrot.slane %v2133_v4, 3  ;;  %v1505_v57 = vpop.permute.xlu0 %1504 }
 0x25b   : > { %v2138_v42 = vrot.slane %v2136_v48, 4  ;;  %v2132_v11 = vsel %vm2053_vm9, %v2123_v59, %v2131_v56  ;;  %v1936_v1 = vsel %vm1888_vm8, %v6462_v14, %v1505_v57 }
 0x25c   : > { %v2231_v30 = vrot.slane %v2229_v51, 3  ;;  %v2234_v27 = vrot.slane %v2232_v28, 4  ;;  %v1507_v24 = vpop.permute.xlu1 %1506  ;;  %3348 = vmatprep.mubr.msk.bf16.mxu0 %vm2268_vm10, %v2132_v11  ;;  %v2228_v41 = vsel %vm2053_vm9, %v2219_v9, %v2227_v46 }
 0x25d   : > { %v2139_v29 = vor.u32 %v2138_v42, %v2135_v23  ;;  %3372 = vmatprep.mubr.msk.bf16.mxu1 %vm2268_vm10, %v2228_v41  ;;  %v1938_v45 = vsel %vm1888_vm8, %v6463_v37, %v1507_v24 }
 0x25e   : > { %v2235_v34 = vor.u32 %v2234_v27, %v2231_v30  ;;  %v1550_v22 = vpop.permute.xlu0 %1549  ;;  %v3572_v27 = vmov 0.0  }
 0x25f   : > { %v2140_v38 = vsel %vm2053_vm9, %v2131_v56, %v2139_v29  ;;  %v1963_v9 = vsel %vm1939_vm5, %v1912_v15, %v1550_v22  ;;  %2907 = vst.msk [vmem:[%s5869_s27] sm:$0xff] %vm2906_vm11, %v3572_v27  ;;  %2908 = vst.msk [vmem:[%s5869_s27 + $0x8] sm:$0xff] %vm2906_vm11, %v3572_v27 }
 0x260   : > { %v1574_v25 = vpop.permute.xlu1 %1573  ;;  %3349 = vmatmul.mubr.msk.bf16.gmra.mxu0 %vm2268_vm10, %v2140_v38  ;;  %v2236_v33 = vsel %vm2053_vm9, %v2227_v46, %v2235_v34  ;;  %2909 = vst.msk [vmem:[%s5869_s27 + $0x10] sm:$0xff] %vm2906_vm11, %v3572_v27  ;;  %2910 = vst.msk [vmem:[%s5869_s27 + $0x18] sm:$0xff] %vm2906_vm11, %v3572_v27 }
 0x261   : > { %3373 = vmatmul.mubr.msk.bf16.gmra.mxu1 %vm2268_vm10, %v2236_v33  ;;  %v1987_v3 = vsel %vm1939_vm5, %v1936_v1, %v1574_v25  ;;  %2911 = vst.msk [vmem:[%s5869_s27 + $0x1a0] sm:$0xff] %vm2906_vm11, %v3572_v27  ;;  %2912 = vst.msk [vmem:[%s5869_s27 + $0x1a8] sm:$0xff] %vm2906_vm11, %v3572_v27  ;;  %v5902_v25 = vld [vmem:[%s6081_s3] ss:$0 sm:$0xff] }
 0x262   : > { %v1576_v59 = vpop.permute.xlu0 %1575  ;;  %2913 = vst.msk [vmem:[%s5869_s27 + $0x1b0] sm:$0xff] %vm2906_vm11, %v3572_v27  ;;  %2914 = vst.msk [vmem:[%s5869_s27 + $0x1b8] sm:$0xff] %vm2906_vm11, %v3572_v27 }
 0x263   : > { %v1989_v2 = vsel %vm1939_vm5, %v1938_v45, %v1576_v59 }
 0x264   : > { %v1606_v17 = vpop.permute.xlu1 %1605 }
 0x265   : > { %v2014_v7 = vsel %vm1990_vm7, %v1963_v9, %v1606_v17 }
 0x266   : > { %v2141_v54 = vshrl.u32 %v2014_v7, 16  ;;  %v2144_v35 = vshll.u32 %v2014_v7, 16  ;;  %v1630_v36 = vpop.permute.xlu0 %1629 }
 0x267   : > { %v2038_v5 = vsel %vm1990_vm7, %v1987_v3, %v1630_v36 }
 0x268   : > { %v2143_v43 = vrot.slane %v2141_v54, 3  ;;  %v2146_v52 = vrot.slane %v2144_v35, 4  ;;  %v1632_v0 = vpop.permute.xlu1 %1631  ;;  %v2237_v39 = vshrl.u32 %v2038_v5, 16  ;;  %v2240_v6 = vshll.u32 %v2038_v5, 16 }
 0x269   : > { %v2040_v13 = vsel %vm1990_vm7, %v1989_v2, %v1632_v0 }
 0x26a   : > { %v2147_v50 = vor.u32 %v2146_v52, %v2143_v43  ;;  %v2245_v16 = vshrl.u32 %v2040_v13, 16  ;;  %v2248_v63 = vshll.u32 %v2040_v13, 16  ;;  %v2239_v31 = vrot.slane %v2237_v39, 3 }
 0x26b   : > { %v2242_v44 = vrot.slane %v2240_v6, 4 }
 0x26c   : > { %v2247_v20 = vrot.slane %v2245_v16, 3  ;;  %v2250_v55 = vrot.slane %v2248_v63, 4  ;;  %v2148_v10 = vsel %vm2053_vm9, %v2139_v29, %v2147_v50  ;;  %v2156_v58 = vsel %vm2053_vm9, %v2147_v50, %v5466_v53 }
 0x26d   : > { %v2243_v61 = vor.u32 %v2242_v44, %v2239_v31  ;;  %3352 = vmatprep.mubr.msk.bf16.mxu0 %vm2268_vm10, %v2148_v10 }
 0x26e   : > { %v2251_v21 = vor.u32 %v2250_v55, %v2247_v20  ;;  %3353 = vmatmul.mubr.msk.bf16.gmra.mxu0 %vm2268_vm10, %v2156_v58 }
 0x26f   : > { %v2244_v62 = vsel %vm2053_vm9, %v2235_v34, %v2243_v61 }
 0x270   : > { %3376 = vmatprep.mubr.msk.bf16.mxu1 %vm2268_vm10, %v2244_v62  ;;  %v2252_v60 = vsel %vm2053_vm9, %v2243_v61, %v2251_v21 }
 0x271   : > { %3377 = vmatmul.mubr.msk.bf16.gmra.mxu1 %vm2268_vm10, %v2252_v60 }
 0x273   : > { %v2621_v32 = vpop.permute.xlu0 %2620 }
 0x275   : > { %v5835_v19 = vpop.permute.xlu1 %2625 }
 0x277   : > { %v2636_v53 = vpop.permute.xlu0 %2635 }
 0x279   : > { %v2631_v8 = vpop.permute.xlu1 %2630 }
 0x27b   : > { %v5839_v18 = vpop.permute.xlu0 %2645 }
 0x27d   : > { %v5837_v26 = vpop.permute.xlu1 %2640 }
 0x27f   : > { %v5843_v47 = vpop.permute.xlu0 %2655 }
 0x281   : > { %v5841_v56 = vpop.permute.xlu1 %2650 }
 0x283   : > { %v5847_v12 = vpop.permute.xlu0 %2665 }
 0x285   : > { %v5845_v4 = vpop.permute.xlu1 %2660 }
 0x287   : > { %v5851_v46 = vpop.permute.xlu0 %2675 }
 0x289   : > { %v5849_v48 = vpop.permute.xlu1 %2670 }
 0x28b   : > { %v5855_v28 = vpop.permute.xlu0 %2685 }
 0x28d   : > { %v5853_v51 = vpop.permute.xlu1 %2680 }
 0x28f   : > { %v5859_v57 = vpop.permute.xlu0 %2695 }
 0x291   : > { %v5857_v23 = vpop.permute.xlu1 %2690 }
 0x293   : > { %v5864_v11 = vpop.permute.xlu0 %2705 }
 0x295   : > { %v5861_v42 = vpop.permute.xlu1 %2700 }
 0x297   : > { %v5889_v24 = vpop.permute.xlu0 %2715 }
 0x299   : > { %v5871_v30 = vpop.permute.xlu1 %2710 }
 0x29b   : > { %v5893_v29 = vpop.permute.xlu0 %2725 }
 0x29d   : > { %v5891_v41 = vpop.permute.xlu1 %2720 }
 0x29f   : > { %v5897_v22 = vpop.permute.xlu0 %2735 }
 0x2a1   : > { %v5895_v34 = vpop.permute.xlu1 %2730 }
 0x2a3   : > { %v2746_v59 = vpop.permute.xlu0 %2745 }
 0x2a5   : > { %v2741_v38 = vpop.permute.xlu1 %2740 }
 0x2a7   : > { %v2756_v39 = vpop.permute.xlu0 %2755 }
 0x2a9   : > { %v2751_v9 = vpop.permute.xlu1 %2750 }
 0x2ab   : > { %v2766_v20 = vpop.permute.xlu0 %2765 }
 0x2ad   : > { %v2761_v31 = vpop.permute.xlu1 %2760 }
 0x2b1   : > { %v2771_v21 = vpop.permute.xlu1 %2770 }
 0x2d1   : > { %v3334_v33 = vpop.f32.mrf.mxu0 }
 0x2d2   : > { %v2388_v49 = vadd.f32 %v3334_v33, %v5902_v25 }
 0x2d3   : > { %v2379_v40 = vpop.f32.mrf.mxu0  ;;  %v3358_v15 = vpop.f32.mrf.mxu1 }
 0x2d4   : > { %v2860_v17 = vmul.f32 %v2631_v8, %v2388_v49  ;;  %v2380_v14 = vadd.f32 %v5902_v25, %v2379_v40  ;;  %v2484_v1 = vadd.f32 %v3358_v15, %v5902_v25  ;;  %v2776_v40 = vpop.permute.xlu0 %2775 }
 0x2d5   : > { %v3335_v7 = vpop.f32.mrf.mxu0  ;;  %v2475_v37 = vpop.f32.mrf.mxu1 }
 0x2d6   : > { %2917 = vst.msk [vmem:[%s5869_s27 + $0x30] sm:$0xff] %vm2906_vm11, %v2860_v17  ;;  %v2858_v45 = vmul.f32 %v2621_v32, %v2380_v14  ;;  %v2391_v3 = vadd.f32 %v3335_v7, %v5902_v25  ;;  %v2884_v54 = vmul.f32 %v2751_v9, %v2484_v1  ;;  %v2476_v35 = vadd.f32 %v5902_v25, %v2475_v37 }
 0x2d7   : > { %v2382_v36 = vpop.f32.mrf.mxu0  ;;  %v3359_v2 = vpop.f32.mrf.mxu1 }
 0x2d8   : > { %2915 = vst.msk [vmem:[%s5869_s27 + $0x20] sm:$0xff] %vm2906_vm11, %v2858_v45  ;;  %v2861_v5 = vmul.f32 %v2636_v53, %v2391_v3  ;;  %2941 = vst.msk [vmem:[%s5869_s27 + $0xf0] sm:$0xff] %vm2906_vm11, %v2884_v54  ;;  %v2383_v43 = vadd.f32 %v5902_v25, %v2382_v36  ;;  %v2882_v52 = vmul.f32 %v2741_v38, %v2476_v35  ;;  %v2786_v45 = vpop.permute.xlu0 %2785 }
 0x2d9   : > { %v2487_v0 = vadd.f32 %v3359_v2, %v5902_v25  ;;  %v2478_v6 = vpop.f32.mrf.mxu1 }
 0x2da   : > { %2918 = vst.msk [vmem:[%s5869_s27 + $0x38] sm:$0xff] %vm2906_vm11, %v2861_v5  ;;  %v2859_v13 = vmul.f32 %v5835_v19, %v2383_v43  ;;  %2939 = vst.msk [vmem:[%s5869_s27 + $0xe0] sm:$0xff] %vm2906_vm11, %v2882_v52  ;;  %v2479_v16 = vadd.f32 %v5902_v25, %v2478_v6 }
 0x2db   : > { %v2885_v50 = vmul.f32 %v2756_v39, %v2487_v0 }
 0x2dc   : > { %2916 = vst.msk [vmem:[%s5869_s27 + $0x28] sm:$0xff] %vm2906_vm11, %v2859_v13  ;;  %v2883_v63 = vmul.f32 %v2746_v59, %v2479_v16 }
 0x2dd   : > { %2942 = vst.msk [vmem:[%s5869_s27 + $0xf8] sm:$0xff] %vm2906_vm11, %v2885_v50 }
 0x2de   : > { %2940 = vst.msk [vmem:[%s5869_s27 + $0xe8] sm:$0xff] %vm2906_vm11, %v2883_v63 }
 0x2e4   : > { %v3338_v44 = vpop.f32.mrf.mxu0 }
 0x2e5   : > { %v2404_v55 = vadd.f32 %v3338_v44, %v5902_v25  ;;  %v3362_v10 = vpop.f32.mrf.mxu1 }
 0x2e6   : > { %v2500_v58 = vadd.f32 %v3362_v10, %v5902_v25  ;;  %v2395_v61 = vpop.f32.mrf.mxu0 }
 0x2e7   : > { %v2864_v62 = vmul.f32 %v5841_v56, %v2404_v55  ;;  %v2396_v60 = vadd.f32 %v5902_v25, %v2395_v61  ;;  %v2491_v19 = vpop.f32.mrf.mxu1 }
 0x2e8   : > { %v2888_v32 = vmul.f32 %v2771_v21, %v2500_v58  ;;  %v2492_v8 = vadd.f32 %v5902_v25, %v2491_v19  ;;  %v3339_v53 = vpop.f32.mrf.mxu0 }
 0x2e9   : > { %2921 = vst.msk [vmem:[%s5869_s27 + $0x50] sm:$0xff] %vm2906_vm11, %v2864_v62  ;;  %v2862_v27 = vmul.f32 %v5837_v26, %v2396_v60  ;;  %v2407_v38 = vadd.f32 %v3339_v53, %v5902_v25  ;;  %v3363_v33 = vpop.f32.mrf.mxu1 }
 0x2ea   : > { %2945 = vst.msk [vmem:[%s5869_s27 + $0x110] sm:$0xff] %vm2906_vm11, %v2888_v32  ;;  %v2886_v56 = vmul.f32 %v2761_v31, %v2492_v8  ;;  %v2503_v59 = vadd.f32 %v3363_v33, %v5902_v25  ;;  %v2398_v49 = vpop.f32.mrf.mxu0  ;;  %v2796_v31 = vpop.permute.xlu0 %2795 }
 0x2eb   : > { %2919 = vst.msk [vmem:[%s5869_s27 + $0x40] sm:$0xff] %vm2906_vm11, %v2862_v27  ;;  %v2865_v15 = vmul.f32 %v5843_v47, %v2407_v38  ;;  %v2399_v9 = vadd.f32 %v5902_v25, %v2398_v49  ;;  %v2494_v26 = vpop.f32.mrf.mxu1  ;;  %v2781_v47 = vpop.permute.xlu1 %2780 }
 0x2ec   : > { %2943 = vst.msk [vmem:[%s5869_s27 + $0x100] sm:$0xff] %vm2906_vm11, %v2886_v56  ;;  %v2889_v17 = vmul.f32 %v2776_v40, %v2503_v59  ;;  %v2495_v14 = vadd.f32 %v5902_v25, %v2494_v26 }
 0x2ed   : > { %2922 = vst.msk [vmem:[%s5869_s27 + $0x58] sm:$0xff] %vm2906_vm11, %v2865_v15  ;;  %v2863_v1 = vmul.f32 %v5839_v18, %v2399_v9 }
 0x2ee   : > { %2946 = vst.msk [vmem:[%s5869_s27 + $0x118] sm:$0xff] %vm2906_vm11, %v2889_v17  ;;  %v2887_v7 = vmul.f32 %v2766_v20, %v2495_v14  ;;  %v2806_v62 = vpop.permute.xlu0 %2805 }
 0x2ef   : > { %2920 = vst.msk [vmem:[%s5869_s27 + $0x48] sm:$0xff] %vm2906_vm11, %v2863_v1  ;;  %v2791_v2 = vpop.permute.xlu1 %2790 }
 0x2f0   : > { %2944 = vst.msk [vmem:[%s5869_s27 + $0x108] sm:$0xff] %vm2906_vm11, %v2887_v7 }
 0x2f2   : > { %v2816_v17 = vpop.permute.xlu0 %2815 }
 0x2f8   : > { %v3342_v37 = vpop.f32.mrf.mxu0 }
 0x2f9   : > { %v2420_v3 = vadd.f32 %v3342_v37, %v5902_v25  ;;  %v3366_v54 = vpop.f32.mrf.mxu1 }
 0x2fa   : > { %v2516_v35 = vadd.f32 %v3366_v54, %v5902_v25  ;;  %v2411_v36 = vpop.f32.mrf.mxu0  ;;  %v2826_v54 = vpop.permute.xlu0 %2825 }
 0x2fb   : > { %v2868_v18 = vmul.f32 %v5849_v48, %v2420_v3  ;;  %v2412_v5 = vadd.f32 %v5902_v25, %v2411_v36  ;;  %v2507_v43 = vpop.f32.mrf.mxu1 }
 0x2fc   : > { %v2892_v52 = vmul.f32 %v2791_v2, %v2516_v35  ;;  %v2508_v0 = vadd.f32 %v5902_v25, %v2507_v43  ;;  %v3343_v39 = vpop.f32.mrf.mxu0 }
 0x2fd   : > { %2925 = vst.msk [vmem:[%s5869_s27 + $0x70] sm:$0xff] %vm2906_vm11, %v2868_v18  ;;  %v2866_v6 = vmul.f32 %v5845_v4, %v2412_v5  ;;  %v2423_v13 = vadd.f32 %v3343_v39, %v5902_v25  ;;  %v3367_v50 = vpop.f32.mrf.mxu1 }
 0x2fe   : > { %2949 = vst.msk [vmem:[%s5869_s27 + $0x130] sm:$0xff] %vm2906_vm11, %v2892_v52  ;;  %v2890_v48 = vmul.f32 %v2781_v47, %v2508_v0  ;;  %v2519_v16 = vadd.f32 %v3367_v50, %v5902_v25  ;;  %v2414_v63 = vpop.f32.mrf.mxu0 }
 0x2ff   : > { %2923 = vst.msk [vmem:[%s5869_s27 + $0x60] sm:$0xff] %vm2906_vm11, %v2866_v6  ;;  %v2869_v44 = vmul.f32 %v5851_v46, %v2423_v13  ;;  %v2415_v20 = vadd.f32 %v5902_v25, %v2414_v63  ;;  %v2510_v4 = vpop.f32.mrf.mxu1  ;;  %v2801_v46 = vpop.permute.xlu1 %2800 }
 0x300   : > { %2947 = vst.msk [vmem:[%s5869_s27 + $0x120] sm:$0xff] %vm2906_vm11, %v2890_v48  ;;  %v2893_v55 = vmul.f32 %v2796_v31, %v2519_v16  ;;  %v2511_v10 = vadd.f32 %v5902_v25, %v2510_v4  ;;  %v2836_v31 = vpop.permute.xlu0 %2835 }
 0x301   : > { %2926 = vst.msk [vmem:[%s5869_s27 + $0x78] sm:$0xff] %vm2906_vm11, %v2869_v44  ;;  %v2867_v58 = vmul.f32 %v5847_v12, %v2415_v20 }
 0x302   : > { %2950 = vst.msk [vmem:[%s5869_s27 + $0x138] sm:$0xff] %vm2906_vm11, %v2893_v55  ;;  %v2891_v61 = vmul.f32 %v2786_v45, %v2511_v10 }
 0x303   : > { %2924 = vst.msk [vmem:[%s5869_s27 + $0x68] sm:$0xff] %vm2906_vm11, %v2867_v58  ;;  %v2811_v53 = vpop.permute.xlu1 %2810 }
 0x304   : > { %2948 = vst.msk [vmem:[%s5869_s27 + $0x128] sm:$0xff] %vm2906_vm11, %v2891_v61 }
 0x30c   : > { %v3346_v21 = vpop.f32.mrf.mxu0 }
 0x30d   : > { %v2436_v60 = vadd.f32 %v3346_v21, %v5902_v25  ;;  %v3370_v19 = vpop.f32.mrf.mxu1 }
 0x30e   : > { %v2532_v32 = vadd.f32 %v3370_v19, %v5902_v25  ;;  %v2427_v8 = vpop.f32.mrf.mxu0 }
 0x30f   : > { %v2872_v12 = vmul.f32 %v5857_v23, %v2436_v60  ;;  %v2428_v27 = vadd.f32 %v5902_v25, %v2427_v8  ;;  %v2523_v38 = vpop.f32.mrf.mxu1 }
 0x310   : > { %v2896_v33 = vmul.f32 %v2811_v53, %v2532_v32  ;;  %v2524_v56 = vadd.f32 %v5902_v25, %v2523_v38  ;;  %v3347_v59 = vpop.f32.mrf.mxu0 }
 0x311   : > { %2929 = vst.msk [vmem:[%s5869_s27 + $0x90] sm:$0xff] %vm2906_vm11, %v2872_v12  ;;  %v2870_v49 = vmul.f32 %v5853_v51, %v2428_v27  ;;  %v2439_v40 = vadd.f32 %v3347_v59, %v5902_v25  ;;  %v3371_v15 = vpop.f32.mrf.mxu1 }
 0x312   : > { %2953 = vst.msk [vmem:[%s5869_s27 + $0x150] sm:$0xff] %vm2906_vm11, %v2896_v33  ;;  %v2894_v23 = vmul.f32 %v2801_v46, %v2524_v56  ;;  %v2535_v9 = vadd.f32 %v3371_v15, %v5902_v25  ;;  %v2430_v26 = vpop.f32.mrf.mxu0 }
 0x313   : > { %2927 = vst.msk [vmem:[%s5869_s27 + $0x80] sm:$0xff] %vm2906_vm11, %v2870_v49  ;;  %v2873_v14 = vmul.f32 %v5859_v57, %v2439_v40  ;;  %v2431_v1 = vadd.f32 %v5902_v25, %v2430_v26  ;;  %v2526_v51 = vpop.f32.mrf.mxu1  ;;  %v2821_v57 = vpop.permute.xlu1 %2820 }
 0x314   : > { %2951 = vst.msk [vmem:[%s5869_s27 + $0x140] sm:$0xff] %vm2906_vm11, %v2894_v23  ;;  %v2897_v7 = vmul.f32 %v2816_v17, %v2535_v9  ;;  %v2527_v47 = vadd.f32 %v5902_v25, %v2526_v51 }
 0x315   : > { %2930 = vst.msk [vmem:[%s5869_s27 + $0x98] sm:$0xff] %vm2906_vm11, %v2873_v14  ;;  %v2871_v37 = vmul.f32 %v5855_v28, %v2431_v1 }
 0x316   : > { %2954 = vst.msk [vmem:[%s5869_s27 + $0x158] sm:$0xff] %vm2906_vm11, %v2897_v7  ;;  %v2895_v45 = vmul.f32 %v2806_v62, %v2527_v47  ;;  %v2846_v62 = vpop.permute.xlu0 %2845 }
 0x317   : > { %2928 = vst.msk [vmem:[%s5869_s27 + $0x88] sm:$0xff] %vm2906_vm11, %v2871_v37  ;;  %v2831_v5 = vpop.permute.xlu1 %2830 }
 0x318   : > { %2952 = vst.msk [vmem:[%s5869_s27 + $0x148] sm:$0xff] %vm2906_vm11, %v2895_v45 }
 0x31a   : > { %v2856_v23 = vpop.permute.xlu0 %2855 }
 0x320   : > { %v3350_v3 = vpop.f32.mrf.mxu0 }
 0x321   : > { %v2452_v35 = vadd.f32 %v3350_v3, %v5902_v25  ;;  %v3374_v36 = vpop.f32.mrf.mxu1 }
 0x322   : > { %v2548_v2 = vadd.f32 %v3374_v36, %v5902_v25  ;;  %v2443_v18 = vpop.f32.mrf.mxu0 }
 0x323   : > { %v2876_v28 = vmul.f32 %v5871_v30, %v2452_v35  ;;  %v2444_v43 = vadd.f32 %v5902_v25, %v2443_v18  ;;  %v2539_v52 = vpop.f32.mrf.mxu1 }
 0x324   : > { %v2900_v0 = vmul.f32 %v2831_v5, %v2548_v2  ;;  %v2540_v39 = vadd.f32 %v5902_v25, %v2539_v52  ;;  %v3351_v6 = vpop.f32.mrf.mxu0 }
 0x325   : > { %2933 = vst.msk [vmem:[%s5869_s27 + $0xb0] sm:$0xff] %vm2906_vm11, %v2876_v28  ;;  %v2874_v13 = vmul.f32 %v5861_v42, %v2444_v43  ;;  %v2455_v50 = vadd.f32 %v3351_v6, %v5902_v25  ;;  %v3375_v48 = vpop.f32.mrf.mxu1 }
 0x326   : > { %2957 = vst.msk [vmem:[%s5869_s27 + $0x170] sm:$0xff] %vm2906_vm11, %v2900_v0  ;;  %v2898_v30 = vmul.f32 %v2821_v57, %v2540_v39  ;;  %v2551_v16 = vadd.f32 %v3375_v48, %v5902_v25  ;;  %v2446_v63 = vpop.f32.mrf.mxu0 }
 0x327   : > { %2931 = vst.msk [vmem:[%s5869_s27 + $0xa0] sm:$0xff] %vm2906_vm11, %v2874_v13  ;;  %v2877_v44 = vmul.f32 %v5889_v24, %v2455_v50  ;;  %v2447_v20 = vadd.f32 %v5902_v25, %v2446_v63  ;;  %v2542_v42 = vpop.f32.mrf.mxu1  ;;  %v2841_v24 = vpop.permute.xlu1 %2840 }
 0x328   : > { %2955 = vst.msk [vmem:[%s5869_s27 + $0x160] sm:$0xff] %vm2906_vm11, %v2898_v30  ;;  %v2901_v4 = vmul.f32 %v2836_v31, %v2551_v16  ;;  %v2543_v55 = vadd.f32 %v5902_v25, %v2542_v42 }
 0x329   : > { %2934 = vst.msk [vmem:[%s5869_s27 + $0xb8] sm:$0xff] %vm2906_vm11, %v2877_v44  ;;  %v2875_v10 = vmul.f32 %v5864_v11, %v2447_v20 }
 0x32a   : > { %2958 = vst.msk [vmem:[%s5869_s27 + $0x178] sm:$0xff] %vm2906_vm11, %v2901_v4  ;;  %v2899_v58 = vmul.f32 %v2826_v54, %v2543_v55 }
 0x32b   : > { %2932 = vst.msk [vmem:[%s5869_s27 + $0xa8] sm:$0xff] %vm2906_vm11, %v2875_v10  ;;  %v2851_v53 = vpop.permute.xlu1 %2850 }
 0x32c   : > { %2956 = vst.msk [vmem:[%s5869_s27 + $0x168] sm:$0xff] %vm2906_vm11, %v2899_v58 }
 0x32e   : > { %v3354_v61 = vpop.f32.mrf.mxu0 }
 0x32f   : > { %v2468_v46 = vadd.f32 %v3354_v61, %v5902_v25 }
 0x330   : > { %v2459_v21 = vpop.f32.mrf.mxu0 }
 0x331   : > { %v2880_v60 = vmul.f32 %v5895_v34, %v2468_v46  ;;  %v2460_v19 = vadd.f32 %v5902_v25, %v2459_v21  ;;  %v3378_v11 = vpop.f32.mrf.mxu1 }
 0x332   : > { %v3355_v32 = vpop.f32.mrf.mxu0  ;;  %v2564_v8 = vadd.f32 %v3378_v11, %v5902_v25 }
 0x333   : > { %2937 = vst.msk [vmem:[%s5869_s27 + $0xd0] sm:$0xff] %vm2906_vm11, %v2880_v60  ;;  %v2878_v12 = vmul.f32 %v5891_v41, %v2460_v19  ;;  %v2471_v27 = vadd.f32 %v3355_v32, %v5902_v25  ;;  %v2555_v38 = vpop.f32.mrf.mxu1 }
 0x334   : > { %v2904_v33 = vmul.f32 %v2851_v53, %v2564_v8  ;;  %v2462_v56 = vpop.f32.mrf.mxu0  ;;  %v2556_v34 = vadd.f32 %v5902_v25, %v2555_v38 }
 0x335   : > { %2935 = vst.msk [vmem:[%s5869_s27 + $0xc0] sm:$0xff] %vm2906_vm11, %v2878_v12  ;;  %v2881_v59 = vmul.f32 %v5897_v22, %v2471_v27  ;;  %v2463_v49 = vadd.f32 %v5902_v25, %v2462_v56  ;;  %v3379_v40 = vpop.f32.mrf.mxu1 }
 0x336   : > { %2961 = vst.msk [vmem:[%s5869_s27 + $0x190] sm:$0xff] %vm2906_vm11, %v2904_v33  ;;  %v2902_v41 = vmul.f32 %v2841_v24, %v2556_v34  ;;  %v2567_v15 = vadd.f32 %v3379_v40, %v5902_v25 }
 0x337   : > { %2938 = vst.msk [vmem:[%s5869_s27 + $0xd8] sm:$0xff] %vm2906_vm11, %v2881_v59  ;;  %v2879_v9 = vmul.f32 %v5893_v29, %v2463_v49  ;;  %v2558_v26 = vpop.f32.mrf.mxu1 }
 0x338   : > { %2959 = vst.msk [vmem:[%s5869_s27 + $0x180] sm:$0xff] %vm2906_vm11, %v2902_v41  ;;  %v2905_v17 = vmul.f32 %v2856_v23, %v2567_v15  ;;  %v2559_v22 = vadd.f32 %v5902_v25, %v2558_v26 }
 0x339   : > { %2936 = vst.msk [vmem:[%s5869_s27 + $0xc8] sm:$0xff] %vm2906_vm11, %v2879_v9 }
 0x33a   : > { %2962 = vst.msk [vmem:[%s5869_s27 + $0x198] sm:$0xff] %vm2906_vm11, %v2905_v17  ;;  %v2903_v14 = vmul.f32 %v2846_v62, %v2559_v22 }
 0x33c   : > { %2960 = vst.msk [vmem:[%s5869_s27 + $0x188] sm:$0xff] %vm2906_vm11, %v2903_v14 }
 0x33d PF: > { %s14_s17 = sadd.s32 1, %s3561_s17   ;;  %s6464_s15 = smov %s3557_s16 }
 0x33e   : > { %p11_p5 = scmp.ge.s32.totalorder %s14_s17, 4   ;;  %s6465_s16 = smov %s6467_s18 }
 0x340   :  { %13 = sbr.rel (!%p11_p5) target bundleno = 2 (0x2), region = 72 }

</bundles_post_ra>
